<compile_context>
chip_gen: v5e
topology: v5e:2x2
jax: 0.10.0
libtpu: 0.0.40
codegen_flags: <defaults>
</compile_context>

<pallas_src>
import jax
import jax.numpy as jnp
from jax.experimental import pallas as pl
from jax.experimental.pallas import tpu as pltpu

_HID = 64        # LSTM hidden size (fixed by the module)
_C1, _C2 = 32, 64  # conv1 / conv2 output channels (fixed by the module)


# -----------------------------------------------------------------------------
# The fused kernel: conv1+pool1 -> conv2+pool2 -> LSTM -> head, all in VMEM.
# -----------------------------------------------------------------------------
def _cnn_lstm_kernel(patches_ref, w1_ref, b1_ref, w2_ref, b2_ref,
                     wih_ref, whh_ref, bl_ref,
                     wf1_ref, bf1_ref, wf2_ref, bf2_ref,
                     out_ref, p1pad_ref):
    B = p1pad_ref.shape[0]
    H2 = p1pad_ref.shape[1] - 2          # height after pool1
    W2 = p1pad_ref.shape[2] - 2          # width  after pool1
    H4, W4 = H2 // 2, W2 // 2            # after pool2 (H4 = LSTM sequence length)
    R = B * H2 * W2                      # rows of the flattened pool1 output

    # ---- conv1 (3x3, Cin=1) + ReLU + 2x2 max-pool --------------------------------
    # patches_ref[tap] is the 3x3 im2col patch matrix evaluated at the *pooled*
    # output positions for pool tap (i,j); conv1+pool1 = 4x(9 VPU FMAs) + 3 maxes.
    w1 = w1_ref[...]                     # (9, 32)
    b1 = b1_ref[...]                     # (1, 32)
    p1 = None
    for tap in range(4):
        pat = patches_ref[tap]           # (R, 9)
        acc = jnp.zeros((R, _C1), jnp.float32)
        for k in range(9):
            acc = acc + pat[:, k:k + 1] * w1[k:k + 1, :]
        acc = jnp.maximum(acc + b1, 0.0)
        p1 = acc if p1 is None else jnp.maximum(p1, acc)
    # p1: (R, 32) with rows ordered (b, h', w')

    # ---- zero-pad pool1 output into VMEM scratch (conv2's 3x3 "same" window) -----
    p1pad_ref[...] = jnp.zeros_like(p1pad_ref)
    p1pad_ref[:, 1:1 + H2, 1:1 + W2, :] = p1.reshape(B, H2, W2, _C1)

    # ---- conv2 (3x3, 32 -> 64) + bias + ReLU: 9 accumulated MXU matmuls ----------
    acc2 = jnp.zeros((R, _C2), jnp.float32)
    for dh in range(3):
        for dw in range(3):
            lhs = p1pad_ref[:, dh:dh + H2, dw:dw + W2, :].reshape(R, _C1)
            acc2 = acc2 + jnp.dot(lhs, w2_ref[dh * 3 + dw],
                                  preferred_element_type=jnp.float32)
    c2 = jnp.maximum(acc2 + b2_ref[...], 0.0).reshape(B, H2, W2, _C2)

    # ---- pool2 fused into the LSTM input projection (hoisted out of the loop) ----
    # Feature order (channel-major, width-minor) from permute(0,2,1,3).view(...) is
    # absorbed into wih_ref's layout (W4, 64, 256), so no in-kernel lane interleave.
    bl = jnp.broadcast_to(bl_ref[...], (B, 4 * _HID))   # bias_ih + bias_hh, [i,f,o,g]
    xproj = []
    for t in range(H4):
        ym = jnp.maximum(c2[:, 2 * t], c2[:, 2 * t + 1])        # (B, W2, 64): pool H
        xp = bl
        for w in range(W4):
            fw = jnp.max(ym[:, 2 * w:2 * w + 2, :], axis=1)     # (B, 64):     pool W
            xp = xp + jnp.dot(fw, wih_ref[w], preferred_element_type=jnp.float32)
        xproj.append(xp)                                        # (B, 256)

    # ---- LSTM recurrence: one (B,64)x(64,256) matmul per step, fused gates -------
    whh = whh_ref[...]                    # (64, 256), columns ordered [i,f,o,g]
    h = jnp.zeros((B, _HID), jnp.float32)
    c = jnp.zeros((B, _HID), jnp.float32)
    for t in range(H4):
        gates = xproj[t] + jnp.dot(h, whh, preferred_element_type=jnp.float32)
        sfo = jax.nn.sigmoid(gates[:, 0:3 * _HID])              # contiguous i|f|o
        i_g = sfo[:, 0:_HID]
        f_g = sfo[:, _HID:2 * _HID]
        o_g = sfo[:, 2 * _HID:3 * _HID]
        g_g = jnp.tanh(gates[:, 3 * _HID:4 * _HID])
        c = f_g * c + i_g * g_g
        h = o_g * jnp.tanh(c)

    # ---- head: fc1 + ReLU + (dropout = identity in eval) + fc2 + sigmoid ---------
    z = jnp.maximum(
        jnp.dot(h, wf1_ref[...], preferred_element_type=jnp.float32) + bf1_ref[...],
        0.0)
    y = jnp.sum(z * wf2_ref[...], axis=1, keepdims=True) + bf2_ref[...]
    out_ref[...] = jax.nn.sigmoid(y)


# -----------------------------------------------------------------------------
# Wrapper-side prep (tiny XLA, done once per call / once per weight set).
# -----------------------------------------------------------------------------
def _conv1_pool_patches(x_nchw):
    """(4, B*H2*W2, 9): 3x3 im2col of the zero-padded input, evaluated at the
    pool1-tap output positions (2h'+i, 2w'+j) for each tap (i, j) in {0,1}^2."""
    B, _, H, W = x_nchw.shape
    H2, W2 = H // 2, W // 2
    xp = jnp.pad(x_nchw[:, 0], ((0, 0), (1, 1), (1, 1)))        # (B, H+2, W+2)
    taps = []
    for i in (0, 1):
        for j in (0, 1):
            cols = []
            for dh in range(3):
                for dw in range(3):
                    r0, c0 = i + dh, j + dw
                    v = xp[:, r0:r0 + 2 * H2:2, c0:c0 + 2 * W2:2]   # (B, H2, W2)
                    cols.append(v.reshape(B * H2 * W2))
            taps.append(jnp.stack(cols, axis=-1))                   # (R, 9)
    return jnp.stack(taps, axis=0)                                  # (4, R, 9)


def prepare_kernel_params(tp):
    """Repack PyTorch-layout weights into the fused-kernel layout.
    NOTE: PyTorch nn.LSTM carries two biases; they are summed here (bias_ih+bias_hh)."""
    def regate(a):   # reorder last-dim gate blocks from torch [i,f,g,o] -> [i,f,o,g]
        return jnp.concatenate(
            [a[..., :2 * _HID], a[..., 3 * _HID:], a[..., 2 * _HID:3 * _HID]], axis=-1)

    w1 = jnp.transpose(tp["conv1.weight"][:, 0], (1, 2, 0)).reshape(9, _C1)
    b1 = tp["conv1.bias"].reshape(1, _C1)
    w2 = jnp.transpose(tp["conv2.weight"], (2, 3, 1, 0)).reshape(9, _C1, _C2)
    b2 = tp["conv2.bias"].reshape(1, _C2)

    F = tp["lstm.weight_ih_l0"].shape[1]
    W4 = F // _C2
    wih = regate(tp["lstm.weight_ih_l0"].T)                     # (F, 256)
    # torch feature index f = c*W4 + w  ->  (w, c, gate) layout for the kernel.
    wih = wih.reshape(_C2, W4, 4 * _HID).transpose(1, 0, 2)     # (W4, 64, 256)
    whh = regate(tp["lstm.weight_hh_l0"].T)                     # (64, 256)
    bl = regate(tp["lstm.bias_ih_l0"] + tp["lstm.bias_hh_l0"]).reshape(1, 4 * _HID)

    return dict(
        w1=w1, b1=b1, w2=w2, b2=b2, wih=wih, whh=whh, bl=bl,
        wf1=tp["fc1.weight"].T, bf1=tp["fc1.bias"].reshape(1, _HID),
        wf2=tp["fc2.weight"].reshape(1, _HID), bf2=tp["fc2.bias"].reshape(1, 1),
    )


@jax.jit
def _forward(x_nchw, kp):
    B, _, H, W = x_nchw.shape
    H2, W2 = H // 2, W // 2
    patches = _conv1_pool_patches(x_nchw)
    return pl.pallas_call(
        _cnn_lstm_kernel,
        out_shape=jax.ShapeDtypeStruct((B, 1), jnp.float32),
        # no grid: single invocation, whole arrays resident in VMEM.
        scratch_shapes=[pltpu.VMEM((B, H2 + 2, W2 + 2, _C1), jnp.float32)],
    )(patches, kp["w1"], kp["b1"], kp["w2"], kp["b2"],
      kp["wih"], kp["whh"], kp["bl"],
      kp["wf1"], kp["bf1"], kp["wf2"], kp["bf2"])


def cnn_lstm_forward(x_nchw, torch_params):
    return _forward(x_nchw, prepare_kernel_params(torch_params))


# -----------------------------------------------------------------------------
# Pure-JAX reference (mirrors the PyTorch forward exactly) for self-validation.
# -----------------------------------------------------------------------------
def reference_forward(x_nchw, tp):
    dn = ("NCHW", "OIHW", "NCHW")
    y = jax.lax.conv_general_dilated(x_nchw, tp["conv1.weight"], (1, 1),
                                     ((1, 1), (1, 1)), dimension_numbers=dn)
    y = jax.nn.relu(y + tp["conv1.bias"][None, :, None, None])
    y = jax.lax.reduce_window(y, -jnp.inf, jax.lax.max,
                              (1, 1, 2, 2), (1, 1, 2, 2), "VALID")
    y = jax.lax.conv_general_dilated(y, tp["conv2.weight"], (1, 1),
                                     ((1, 1), (1, 1)), dimension_numbers=dn)
    y = jax.nn.relu(y + tp["conv2.bias"][None, :, None, None])
    y = jax.lax.reduce_window(y, -jnp.inf, jax.lax.max,
                              (1, 1, 2, 2), (1, 1, 2, 2), "VALID")
    B, C, H4, W4 = y.shape
    seq = jnp.transpose(y, (0, 2, 1, 3)).reshape(B, H4, C * W4)
    wih, whh = tp["lstm.weight_ih_l0"], tp["lstm.weight_hh_l0"]
    bias = tp["lstm.bias_ih_l0"] + tp["lstm.bias_hh_l0"]
    h = jnp.zeros((B, _HID), jnp.float32)
    c = jnp.zeros((B, _HID), jnp.float32)
    for t in range(H4):
        g = seq[:, t] @ wih.T + h @ whh.T + bias
        i = jax.nn.sigmoid(g[:, 0:_HID])
        f = jax.nn.sigmoid(g[:, _HID:2 * _HID])
        gg = jnp.tanh(g[:, 2 * _HID:3 * _HID])
        o = jax.nn.sigmoid(g[:, 3 * _HID:4 * _HID])
        c = f * c + i * gg
        h = o * jnp.tanh(c)
    z = jax.nn.relu(h @ tp["fc1.weight"].T + tp["fc1.bias"])
    return jax.nn.sigmoid(z @ tp["fc2.weight"].T + tp["fc2.bias"])


# -----------------------------------------------------------------------------
if __name__ == "__main__":
    key = jax.random.PRNGKey(0)
    ks = jax.random.split(key, 13)

    B, H, W = 2, 16, 16                  # CNN_LSTM(input_height=16, input_width=16)
    F = (W // 4) * _C2                   # lstm_input_size = width//4 * 64 = 256

    # Parameters in PyTorch state_dict layout (weights random but deterministic).
    torch_params = {
        "conv1.weight": jax.random.normal(ks[0], (_C1, 1, 3, 3), jnp.float32) * 0.10,
        "conv1.bias":   jax.random.normal(ks[1], (_C1,), jnp.float32) * 0.10,
        "conv2.weight": jax.random.normal(ks[2], (_C2, _C1, 3, 3), jnp.float32) * 0.05,
        "conv2.bias":   jax.random.normal(ks[3], (_C2,), jnp.float32) * 0.10,
        "lstm.weight_ih_l0": jax.random.normal(ks[4], (4 * _HID, F), jnp.float32) * 0.05,
        "lstm.weight_hh_l0": jax.random.normal(ks[5], (4 * _HID, _HID), jnp.float32) * 0.05,
        "lstm.bias_ih_l0":   jax.random.normal(ks[6], (4 * _HID,), jnp.float32) * 0.05,
        "lstm.bias_hh_l0":   jax.random.normal(ks[7], (4 * _HID,), jnp.float32) * 0.05,
        "fc1.weight": jax.random.normal(ks[8], (_HID, _HID), jnp.float32) * 0.10,
        "fc1.bias":   jax.random.normal(ks[9], (_HID,), jnp.float32) * 0.10,
        "fc2.weight": jax.random.normal(ks[10], (1, _HID), jnp.float32) * 0.10,
        "fc2.bias":   jax.random.normal(ks[11], (1,), jnp.float32) * 0.10,
    }
    x = jax.random.normal(ks[12], (B, 1, H, W), jnp.float32)     # NCHW like PyTorch

    out = jax.block_until_ready(cnn_lstm_forward(x, torch_params))
    ref = jax.block_until_ready(jax.jit(reference_forward)(x, torch_params))

    assert out.shape == (B, 1), out.shape
    assert bool(jnp.all((out >= 0.0) & (out <= 1.0)))
    assert bool(jnp.allclose(out, ref, atol=1e-2)), (out, ref)
    print("KERNEL_OK")
</pallas_src>

<mosaic_0001>
module attributes {stable_mosaic.version = 11 : i64} {
  func.func @_cnn_lstm_kernel(%arg0: memref<4x128x9xf32, #tpu.memory_space<vmem>>, %arg1: memref<9x32xf32, #tpu.memory_space<vmem>>, %arg2: memref<1x32xf32, #tpu.memory_space<vmem>>, %arg3: memref<9x32x64xf32, #tpu.memory_space<vmem>>, %arg4: memref<1x64xf32, #tpu.memory_space<vmem>>, %arg5: memref<4x64x256xf32, #tpu.memory_space<vmem>>, %arg6: memref<64x256xf32, #tpu.memory_space<vmem>>, %arg7: memref<1x256xf32, #tpu.memory_space<vmem>>, %arg8: memref<64x64xf32, #tpu.memory_space<vmem>>, %arg9: memref<1x64xf32, #tpu.memory_space<vmem>>, %arg10: memref<1x64xf32, #tpu.memory_space<vmem>>, %arg11: memref<1x1xf32, #tpu.memory_space<vmem>>, %arg12: memref<2x1xf32, #tpu.memory_space<vmem>>, %arg13: memref<2x10x10x32xf32, #tpu.memory_space<vmem>>) attributes {dimension_semantics = [], scalar_prefetch = 0 : i64, scratch_operands = 1 : i64, tpu.core_type = #tpu.core_type<tc>} {
    %c0 = arith.constant 0 : index
    %c0_0 = arith.constant 0 : index
    %0 = vector.load %arg1[%c0, %c0_0] : memref<9x32xf32, #tpu.memory_space<vmem>>, vector<9x32xf32>
    %c0_1 = arith.constant 0 : index
    %c0_2 = arith.constant 0 : index
    %1 = vector.load %arg2[%c0_1, %c0_2] : memref<1x32xf32, #tpu.memory_space<vmem>>, vector<1x32xf32>
    %c0_3 = arith.constant 0 : index
    %c0_4 = arith.constant 0 : index
    %c0_5 = arith.constant 0 : index
    %2 = vector.load %arg0[%c0_3, %c0_4, %c0_5] : memref<4x128x9xf32, #tpu.memory_space<vmem>>, vector<1x128x9xf32>
    %3 = vector.shape_cast %2 : vector<1x128x9xf32> to vector<128x9xf32>
    %cst = arith.constant 0.000000e+00 : f32
    %4 = vector.broadcast %cst : f32 to vector<128x32xf32>
    %5 = vector.extract_strided_slice %3 {offsets = [0, 0], sizes = [128, 1], strides = [1, 1]} : vector<128x9xf32> to vector<128x1xf32>
    %6 = vector.extract_strided_slice %0 {offsets = [0, 0], sizes = [1, 32], strides = [1, 1]} : vector<9x32xf32> to vector<1x32xf32>
    %7 = vector.broadcast %5 : vector<128x1xf32> to vector<128x32xf32>
    %8 = vector.broadcast %6 : vector<1x32xf32> to vector<128x32xf32>
    %9 = arith.mulf %7, %8 : vector<128x32xf32>
    %10 = arith.addf %4, %9 : vector<128x32xf32>
    %11 = vector.extract_strided_slice %3 {offsets = [0, 1], sizes = [128, 1], strides = [1, 1]} : vector<128x9xf32> to vector<128x1xf32>
    %12 = vector.extract_strided_slice %0 {offsets = [1, 0], sizes = [1, 32], strides = [1, 1]} : vector<9x32xf32> to vector<1x32xf32>
    %13 = vector.broadcast %11 : vector<128x1xf32> to vector<128x32xf32>
    %14 = vector.broadcast %12 : vector<1x32xf32> to vector<128x32xf32>
    %15 = arith.mulf %13, %14 : vector<128x32xf32>
    %16 = arith.addf %10, %15 : vector<128x32xf32>
    %17 = vector.extract_strided_slice %3 {offsets = [0, 2], sizes = [128, 1], strides = [1, 1]} : vector<128x9xf32> to vector<128x1xf32>
    %18 = vector.extract_strided_slice %0 {offsets = [2, 0], sizes = [1, 32], strides = [1, 1]} : vector<9x32xf32> to vector<1x32xf32>
    %19 = vector.broadcast %17 : vector<128x1xf32> to vector<128x32xf32>
    %20 = vector.broadcast %18 : vector<1x32xf32> to vector<128x32xf32>
    %21 = arith.mulf %19, %20 : vector<128x32xf32>
    %22 = arith.addf %16, %21 : vector<128x32xf32>
    %23 = vector.extract_strided_slice %3 {offsets = [0, 3], sizes = [128, 1], strides = [1, 1]} : vector<128x9xf32> to vector<128x1xf32>
    %24 = vector.extract_strided_slice %0 {offsets = [3, 0], sizes = [1, 32], strides = [1, 1]} : vector<9x32xf32> to vector<1x32xf32>
    %25 = vector.broadcast %23 : vector<128x1xf32> to vector<128x32xf32>
    %26 = vector.broadcast %24 : vector<1x32xf32> to vector<128x32xf32>
    %27 = arith.mulf %25, %26 : vector<128x32xf32>
    %28 = arith.addf %22, %27 : vector<128x32xf32>
    %29 = vector.extract_strided_slice %3 {offsets = [0, 4], sizes = [128, 1], strides = [1, 1]} : vector<128x9xf32> to vector<128x1xf32>
    %30 = vector.extract_strided_slice %0 {offsets = [4, 0], sizes = [1, 32], strides = [1, 1]} : vector<9x32xf32> to vector<1x32xf32>
    %31 = vector.broadcast %29 : vector<128x1xf32> to vector<128x32xf32>
    %32 = vector.broadcast %30 : vector<1x32xf32> to vector<128x32xf32>
    %33 = arith.mulf %31, %32 : vector<128x32xf32>
    %34 = arith.addf %28, %33 : vector<128x32xf32>
    %35 = vector.extract_strided_slice %3 {offsets = [0, 5], sizes = [128, 1], strides = [1, 1]} : vector<128x9xf32> to vector<128x1xf32>
    %36 = vector.extract_strided_slice %0 {offsets = [5, 0], sizes = [1, 32], strides = [1, 1]} : vector<9x32xf32> to vector<1x32xf32>
    %37 = vector.broadcast %35 : vector<128x1xf32> to vector<128x32xf32>
    %38 = vector.broadcast %36 : vector<1x32xf32> to vector<128x32xf32>
    %39 = arith.mulf %37, %38 : vector<128x32xf32>
    %40 = arith.addf %34, %39 : vector<128x32xf32>
    %41 = vector.extract_strided_slice %3 {offsets = [0, 6], sizes = [128, 1], strides = [1, 1]} : vector<128x9xf32> to vector<128x1xf32>
    %42 = vector.extract_strided_slice %0 {offsets = [6, 0], sizes = [1, 32], strides = [1, 1]} : vector<9x32xf32> to vector<1x32xf32>
    %43 = vector.broadcast %41 : vector<128x1xf32> to vector<128x32xf32>
    %44 = vector.broadcast %42 : vector<1x32xf32> to vector<128x32xf32>
    %45 = arith.mulf %43, %44 : vector<128x32xf32>
    %46 = arith.addf %40, %45 : vector<128x32xf32>
    %47 = vector.extract_strided_slice %3 {offsets = [0, 7], sizes = [128, 1], strides = [1, 1]} : vector<128x9xf32> to vector<128x1xf32>
    %48 = vector.extract_strided_slice %0 {offsets = [7, 0], sizes = [1, 32], strides = [1, 1]} : vector<9x32xf32> to vector<1x32xf32>
    %49 = vector.broadcast %47 : vector<128x1xf32> to vector<128x32xf32>
    %50 = vector.broadcast %48 : vector<1x32xf32> to vector<128x32xf32>
    %51 = arith.mulf %49, %50 : vector<128x32xf32>
    %52 = arith.addf %46, %51 : vector<128x32xf32>
    %53 = vector.extract_strided_slice %3 {offsets = [0, 8], sizes = [128, 1], strides = [1, 1]} : vector<128x9xf32> to vector<128x1xf32>
    %54 = vector.extract_strided_slice %0 {offsets = [8, 0], sizes = [1, 32], strides = [1, 1]} : vector<9x32xf32> to vector<1x32xf32>
    %55 = vector.broadcast %53 : vector<128x1xf32> to vector<128x32xf32>
    %56 = vector.broadcast %54 : vector<1x32xf32> to vector<128x32xf32>
    %57 = arith.mulf %55, %56 : vector<128x32xf32>
    %58 = arith.addf %52, %57 : vector<128x32xf32>
    %59 = vector.broadcast %1 : vector<1x32xf32> to vector<128x32xf32>
    %60 = arith.addf %58, %59 : vector<128x32xf32>
    %cst_6 = arith.constant 0.000000e+00 : f32
    %61 = vector.broadcast %cst_6 : f32 to vector<128x32xf32>
    %62 = arith.maximumf %60, %61 : vector<128x32xf32>
    %c1 = arith.constant 1 : index
    %c0_7 = arith.constant 0 : index
    %c0_8 = arith.constant 0 : index
    %63 = vector.load %arg0[%c1, %c0_7, %c0_8] : memref<4x128x9xf32, #tpu.memory_space<vmem>>, vector<1x128x9xf32>
    %64 = vector.shape_cast %63 : vector<1x128x9xf32> to vector<128x9xf32>
    %cst_9 = arith.constant 0.000000e+00 : f32
    %65 = vector.broadcast %cst_9 : f32 to vector<128x32xf32>
    %66 = vector.extract_strided_slice %64 {offsets = [0, 0], sizes = [128, 1], strides = [1, 1]} : vector<128x9xf32> to vector<128x1xf32>
    %67 = vector.extract_strided_slice %0 {offsets = [0, 0], sizes = [1, 32], strides = [1, 1]} : vector<9x32xf32> to vector<1x32xf32>
    %68 = vector.broadcast %66 : vector<128x1xf32> to vector<128x32xf32>
    %69 = vector.broadcast %67 : vector<1x32xf32> to vector<128x32xf32>
    %70 = arith.mulf %68, %69 : vector<128x32xf32>
    %71 = arith.addf %65, %70 : vector<128x32xf32>
    %72 = vector.extract_strided_slice %64 {offsets = [0, 1], sizes = [128, 1], strides = [1, 1]} : vector<128x9xf32> to vector<128x1xf32>
    %73 = vector.extract_strided_slice %0 {offsets = [1, 0], sizes = [1, 32], strides = [1, 1]} : vector<9x32xf32> to vector<1x32xf32>
    %74 = vector.broadcast %72 : vector<128x1xf32> to vector<128x32xf32>
    %75 = vector.broadcast %73 : vector<1x32xf32> to vector<128x32xf32>
    %76 = arith.mulf %74, %75 : vector<128x32xf32>
    %77 = arith.addf %71, %76 : vector<128x32xf32>
    %78 = vector.extract_strided_slice %64 {offsets = [0, 2], sizes = [128, 1], strides = [1, 1]} : vector<128x9xf32> to vector<128x1xf32>
    %79 = vector.extract_strided_slice %0 {offsets = [2, 0], sizes = [1, 32], strides = [1, 1]} : vector<9x32xf32> to vector<1x32xf32>
    %80 = vector.broadcast %78 : vector<128x1xf32> to vector<128x32xf32>
    %81 = vector.broadcast %79 : vector<1x32xf32> to vector<128x32xf32>
    %82 = arith.mulf %80, %81 : vector<128x32xf32>
    %83 = arith.addf %77, %82 : vector<128x32xf32>
    %84 = vector.extract_strided_slice %64 {offsets = [0, 3], sizes = [128, 1], strides = [1, 1]} : vector<128x9xf32> to vector<128x1xf32>
    %85 = vector.extract_strided_slice %0 {offsets = [3, 0], sizes = [1, 32], strides = [1, 1]} : vector<9x32xf32> to vector<1x32xf32>
    %86 = vector.broadcast %84 : vector<128x1xf32> to vector<128x32xf32>
    %87 = vector.broadcast %85 : vector<1x32xf32> to vector<128x32xf32>
    %88 = arith.mulf %86, %87 : vector<128x32xf32>
    %89 = arith.addf %83, %88 : vector<128x32xf32>
    %90 = vector.extract_strided_slice %64 {offsets = [0, 4], sizes = [128, 1], strides = [1, 1]} : vector<128x9xf32> to vector<128x1xf32>
    %91 = vector.extract_strided_slice %0 {offsets = [4, 0], sizes = [1, 32], strides = [1, 1]} : vector<9x32xf32> to vector<1x32xf32>
    %92 = vector.broadcast %90 : vector<128x1xf32> to vector<128x32xf32>
    %93 = vector.broadcast %91 : vector<1x32xf32> to vector<128x32xf32>
    %94 = arith.mulf %92, %93 : vector<128x32xf32>
    %95 = arith.addf %89, %94 : vector<128x32xf32>
    %96 = vector.extract_strided_slice %64 {offsets = [0, 5], sizes = [128, 1], strides = [1, 1]} : vector<128x9xf32> to vector<128x1xf32>
    %97 = vector.extract_strided_slice %0 {offsets = [5, 0], sizes = [1, 32], strides = [1, 1]} : vector<9x32xf32> to vector<1x32xf32>
    %98 = vector.broadcast %96 : vector<128x1xf32> to vector<128x32xf32>
    %99 = vector.broadcast %97 : vector<1x32xf32> to vector<128x32xf32>
    %100 = arith.mulf %98, %99 : vector<128x32xf32>
    %101 = arith.addf %95, %100 : vector<128x32xf32>
    %102 = vector.extract_strided_slice %64 {offsets = [0, 6], sizes = [128, 1], strides = [1, 1]} : vector<128x9xf32> to vector<128x1xf32>
    %103 = vector.extract_strided_slice %0 {offsets = [6, 0], sizes = [1, 32], strides = [1, 1]} : vector<9x32xf32> to vector<1x32xf32>
    %104 = vector.broadcast %102 : vector<128x1xf32> to vector<128x32xf32>
    %105 = vector.broadcast %103 : vector<1x32xf32> to vector<128x32xf32>
    %106 = arith.mulf %104, %105 : vector<128x32xf32>
    %107 = arith.addf %101, %106 : vector<128x32xf32>
    %108 = vector.extract_strided_slice %64 {offsets = [0, 7], sizes = [128, 1], strides = [1, 1]} : vector<128x9xf32> to vector<128x1xf32>
    %109 = vector.extract_strided_slice %0 {offsets = [7, 0], sizes = [1, 32], strides = [1, 1]} : vector<9x32xf32> to vector<1x32xf32>
    %110 = vector.broadcast %108 : vector<128x1xf32> to vector<128x32xf32>
    %111 = vector.broadcast %109 : vector<1x32xf32> to vector<128x32xf32>
    %112 = arith.mulf %110, %111 : vector<128x32xf32>
    %113 = arith.addf %107, %112 : vector<128x32xf32>
    %114 = vector.extract_strided_slice %64 {offsets = [0, 8], sizes = [128, 1], strides = [1, 1]} : vector<128x9xf32> to vector<128x1xf32>
    %115 = vector.extract_strided_slice %0 {offsets = [8, 0], sizes = [1, 32], strides = [1, 1]} : vector<9x32xf32> to vector<1x32xf32>
    %116 = vector.broadcast %114 : vector<128x1xf32> to vector<128x32xf32>
    %117 = vector.broadcast %115 : vector<1x32xf32> to vector<128x32xf32>
    %118 = arith.mulf %116, %117 : vector<128x32xf32>
    %119 = arith.addf %113, %118 : vector<128x32xf32>
    %120 = vector.broadcast %1 : vector<1x32xf32> to vector<128x32xf32>
    %121 = arith.addf %119, %120 : vector<128x32xf32>
    %cst_10 = arith.constant 0.000000e+00 : f32
    %122 = vector.broadcast %cst_10 : f32 to vector<128x32xf32>
    %123 = arith.maximumf %121, %122 : vector<128x32xf32>
    %124 = arith.maximumf %62, %123 : vector<128x32xf32>
    %c2 = arith.constant 2 : index
    %c0_11 = arith.constant 0 : index
    %c0_12 = arith.constant 0 : index
    %125 = vector.load %arg0[%c2, %c0_11, %c0_12] : memref<4x128x9xf32, #tpu.memory_space<vmem>>, vector<1x128x9xf32>
    %126 = vector.shape_cast %125 : vector<1x128x9xf32> to vector<128x9xf32>
    %cst_13 = arith.constant 0.000000e+00 : f32
    %127 = vector.broadcast %cst_13 : f32 to vector<128x32xf32>
    %128 = vector.extract_strided_slice %126 {offsets = [0, 0], sizes = [128, 1], strides = [1, 1]} : vector<128x9xf32> to vector<128x1xf32>
    %129 = vector.extract_strided_slice %0 {offsets = [0, 0], sizes = [1, 32], strides = [1, 1]} : vector<9x32xf32> to vector<1x32xf32>
    %130 = vector.broadcast %128 : vector<128x1xf32> to vector<128x32xf32>
    %131 = vector.broadcast %129 : vector<1x32xf32> to vector<128x32xf32>
    %132 = arith.mulf %130, %131 : vector<128x32xf32>
    %133 = arith.addf %127, %132 : vector<128x32xf32>
    %134 = vector.extract_strided_slice %126 {offsets = [0, 1], sizes = [128, 1], strides = [1, 1]} : vector<128x9xf32> to vector<128x1xf32>
    %135 = vector.extract_strided_slice %0 {offsets = [1, 0], sizes = [1, 32], strides = [1, 1]} : vector<9x32xf32> to vector<1x32xf32>
    %136 = vector.broadcast %134 : vector<128x1xf32> to vector<128x32xf32>
    %137 = vector.broadcast %135 : vector<1x32xf32> to vector<128x32xf32>
    %138 = arith.mulf %136, %137 : vector<128x32xf32>
    %139 = arith.addf %133, %138 : vector<128x32xf32>
    %140 = vector.extract_strided_slice %126 {offsets = [0, 2], sizes = [128, 1], strides = [1, 1]} : vector<128x9xf32> to vector<128x1xf32>
    %141 = vector.extract_strided_slice %0 {offsets = [2, 0], sizes = [1, 32], strides = [1, 1]} : vector<9x32xf32> to vector<1x32xf32>
    %142 = vector.broadcast %140 : vector<128x1xf32> to vector<128x32xf32>
    %143 = vector.broadcast %141 : vector<1x32xf32> to vector<128x32xf32>
    %144 = arith.mulf %142, %143 : vector<128x32xf32>
    %145 = arith.addf %139, %144 : vector<128x32xf32>
    %146 = vector.extract_strided_slice %126 {offsets = [0, 3], sizes = [128, 1], strides = [1, 1]} : vector<128x9xf32> to vector<128x1xf32>
    %147 = vector.extract_strided_slice %0 {offsets = [3, 0], sizes = [1, 32], strides = [1, 1]} : vector<9x32xf32> to vector<1x32xf32>
    %148 = vector.broadcast %146 : vector<128x1xf32> to vector<128x32xf32>
    %149 = vector.broadcast %147 : vector<1x32xf32> to vector<128x32xf32>
    %150 = arith.mulf %148, %149 : vector<128x32xf32>
    %151 = arith.addf %145, %150 : vector<128x32xf32>
    %152 = vector.extract_strided_slice %126 {offsets = [0, 4], sizes = [128, 1], strides = [1, 1]} : vector<128x9xf32> to vector<128x1xf32>
    %153 = vector.extract_strided_slice %0 {offsets = [4, 0], sizes = [1, 32], strides = [1, 1]} : vector<9x32xf32> to vector<1x32xf32>
    %154 = vector.broadcast %152 : vector<128x1xf32> to vector<128x32xf32>
    %155 = vector.broadcast %153 : vector<1x32xf32> to vector<128x32xf32>
    %156 = arith.mulf %154, %155 : vector<128x32xf32>
    %157 = arith.addf %151, %156 : vector<128x32xf32>
    %158 = vector.extract_strided_slice %126 {offsets = [0, 5], sizes = [128, 1], strides = [1, 1]} : vector<128x9xf32> to vector<128x1xf32>
    %159 = vector.extract_strided_slice %0 {offsets = [5, 0], sizes = [1, 32], strides = [1, 1]} : vector<9x32xf32> to vector<1x32xf32>
    %160 = vector.broadcast %158 : vector<128x1xf32> to vector<128x32xf32>
    %161 = vector.broadcast %159 : vector<1x32xf32> to vector<128x32xf32>
    %162 = arith.mulf %160, %161 : vector<128x32xf32>
    %163 = arith.addf %157, %162 : vector<128x32xf32>
    %164 = vector.extract_strided_slice %126 {offsets = [0, 6], sizes = [128, 1], strides = [1, 1]} : vector<128x9xf32> to vector<128x1xf32>
    %165 = vector.extract_strided_slice %0 {offsets = [6, 0], sizes = [1, 32], strides = [1, 1]} : vector<9x32xf32> to vector<1x32xf32>
    %166 = vector.broadcast %164 : vector<128x1xf32> to vector<128x32xf32>
    %167 = vector.broadcast %165 : vector<1x32xf32> to vector<128x32xf32>
    %168 = arith.mulf %166, %167 : vector<128x32xf32>
    %169 = arith.addf %163, %168 : vector<128x32xf32>
    %170 = vector.extract_strided_slice %126 {offsets = [0, 7], sizes = [128, 1], strides = [1, 1]} : vector<128x9xf32> to vector<128x1xf32>
    %171 = vector.extract_strided_slice %0 {offsets = [7, 0], sizes = [1, 32], strides = [1, 1]} : vector<9x32xf32> to vector<1x32xf32>
    %172 = vector.broadcast %170 : vector<128x1xf32> to vector<128x32xf32>
    %173 = vector.broadcast %171 : vector<1x32xf32> to vector<128x32xf32>
    %174 = arith.mulf %172, %173 : vector<128x32xf32>
    %175 = arith.addf %169, %174 : vector<128x32xf32>
    %176 = vector.extract_strided_slice %126 {offsets = [0, 8], sizes = [128, 1], strides = [1, 1]} : vector<128x9xf32> to vector<128x1xf32>
    %177 = vector.extract_strided_slice %0 {offsets = [8, 0], sizes = [1, 32], strides = [1, 1]} : vector<9x32xf32> to vector<1x32xf32>
    %178 = vector.broadcast %176 : vector<128x1xf32> to vector<128x32xf32>
    %179 = vector.broadcast %177 : vector<1x32xf32> to vector<128x32xf32>
    %180 = arith.mulf %178, %179 : vector<128x32xf32>
    %181 = arith.addf %175, %180 : vector<128x32xf32>
    %182 = vector.broadcast %1 : vector<1x32xf32> to vector<128x32xf32>
    %183 = arith.addf %181, %182 : vector<128x32xf32>
    %cst_14 = arith.constant 0.000000e+00 : f32
    %184 = vector.broadcast %cst_14 : f32 to vector<128x32xf32>
    %185 = arith.maximumf %183, %184 : vector<128x32xf32>
    %186 = arith.maximumf %124, %185 : vector<128x32xf32>
    %c3 = arith.constant 3 : index
    %c0_15 = arith.constant 0 : index
    %c0_16 = arith.constant 0 : index
    %187 = vector.load %arg0[%c3, %c0_15, %c0_16] : memref<4x128x9xf32, #tpu.memory_space<vmem>>, vector<1x128x9xf32>
    %188 = vector.shape_cast %187 : vector<1x128x9xf32> to vector<128x9xf32>
    %cst_17 = arith.constant 0.000000e+00 : f32
    %189 = vector.broadcast %cst_17 : f32 to vector<128x32xf32>
    %190 = vector.extract_strided_slice %188 {offsets = [0, 0], sizes = [128, 1], strides = [1, 1]} : vector<128x9xf32> to vector<128x1xf32>
    %191 = vector.extract_strided_slice %0 {offsets = [0, 0], sizes = [1, 32], strides = [1, 1]} : vector<9x32xf32> to vector<1x32xf32>
    %192 = vector.broadcast %190 : vector<128x1xf32> to vector<128x32xf32>
    %193 = vector.broadcast %191 : vector<1x32xf32> to vector<128x32xf32>
    %194 = arith.mulf %192, %193 : vector<128x32xf32>
    %195 = arith.addf %189, %194 : vector<128x32xf32>
    %196 = vector.extract_strided_slice %188 {offsets = [0, 1], sizes = [128, 1], strides = [1, 1]} : vector<128x9xf32> to vector<128x1xf32>
    %197 = vector.extract_strided_slice %0 {offsets = [1, 0], sizes = [1, 32], strides = [1, 1]} : vector<9x32xf32> to vector<1x32xf32>
    %198 = vector.broadcast %196 : vector<128x1xf32> to vector<128x32xf32>
    %199 = vector.broadcast %197 : vector<1x32xf32> to vector<128x32xf32>
    %200 = arith.mulf %198, %199 : vector<128x32xf32>
    %201 = arith.addf %195, %200 : vector<128x32xf32>
    %202 = vector.extract_strided_slice %188 {offsets = [0, 2], sizes = [128, 1], strides = [1, 1]} : vector<128x9xf32> to vector<128x1xf32>
    %203 = vector.extract_strided_slice %0 {offsets = [2, 0], sizes = [1, 32], strides = [1, 1]} : vector<9x32xf32> to vector<1x32xf32>
    %204 = vector.broadcast %202 : vector<128x1xf32> to vector<128x32xf32>
    %205 = vector.broadcast %203 : vector<1x32xf32> to vector<128x32xf32>
    %206 = arith.mulf %204, %205 : vector<128x32xf32>
    %207 = arith.addf %201, %206 : vector<128x32xf32>
    %208 = vector.extract_strided_slice %188 {offsets = [0, 3], sizes = [128, 1], strides = [1, 1]} : vector<128x9xf32> to vector<128x1xf32>
    %209 = vector.extract_strided_slice %0 {offsets = [3, 0], sizes = [1, 32], strides = [1, 1]} : vector<9x32xf32> to vector<1x32xf32>
    %210 = vector.broadcast %208 : vector<128x1xf32> to vector<128x32xf32>
    %211 = vector.broadcast %209 : vector<1x32xf32> to vector<128x32xf32>
    %212 = arith.mulf %210, %211 : vector<128x32xf32>
    %213 = arith.addf %207, %212 : vector<128x32xf32>
    %214 = vector.extract_strided_slice %188 {offsets = [0, 4], sizes = [128, 1], strides = [1, 1]} : vector<128x9xf32> to vector<128x1xf32>
    %215 = vector.extract_strided_slice %0 {offsets = [4, 0], sizes = [1, 32], strides = [1, 1]} : vector<9x32xf32> to vector<1x32xf32>
    %216 = vector.broadcast %214 : vector<128x1xf32> to vector<128x32xf32>
    %217 = vector.broadcast %215 : vector<1x32xf32> to vector<128x32xf32>
    %218 = arith.mulf %216, %217 : vector<128x32xf32>
    %219 = arith.addf %213, %218 : vector<128x32xf32>
    %220 = vector.extract_strided_slice %188 {offsets = [0, 5], sizes = [128, 1], strides = [1, 1]} : vector<128x9xf32> to vector<128x1xf32>
    %221 = vector.extract_strided_slice %0 {offsets = [5, 0], sizes = [1, 32], strides = [1, 1]} : vector<9x32xf32> to vector<1x32xf32>
    %222 = vector.broadcast %220 : vector<128x1xf32> to vector<128x32xf32>
    %223 = vector.broadcast %221 : vector<1x32xf32> to vector<128x32xf32>
    %224 = arith.mulf %222, %223 : vector<128x32xf32>
    %225 = arith.addf %219, %224 : vector<128x32xf32>
    %226 = vector.extract_strided_slice %188 {offsets = [0, 6], sizes = [128, 1], strides = [1, 1]} : vector<128x9xf32> to vector<128x1xf32>
    %227 = vector.extract_strided_slice %0 {offsets = [6, 0], sizes = [1, 32], strides = [1, 1]} : vector<9x32xf32> to vector<1x32xf32>
    %228 = vector.broadcast %226 : vector<128x1xf32> to vector<128x32xf32>
    %229 = vector.broadcast %227 : vector<1x32xf32> to vector<128x32xf32>
    %230 = arith.mulf %228, %229 : vector<128x32xf32>
    %231 = arith.addf %225, %230 : vector<128x32xf32>
    %232 = vector.extract_strided_slice %188 {offsets = [0, 7], sizes = [128, 1], strides = [1, 1]} : vector<128x9xf32> to vector<128x1xf32>
    %233 = vector.extract_strided_slice %0 {offsets = [7, 0], sizes = [1, 32], strides = [1, 1]} : vector<9x32xf32> to vector<1x32xf32>
    %234 = vector.broadcast %232 : vector<128x1xf32> to vector<128x32xf32>
    %235 = vector.broadcast %233 : vector<1x32xf32> to vector<128x32xf32>
    %236 = arith.mulf %234, %235 : vector<128x32xf32>
    %237 = arith.addf %231, %236 : vector<128x32xf32>
    %238 = vector.extract_strided_slice %188 {offsets = [0, 8], sizes = [128, 1], strides = [1, 1]} : vector<128x9xf32> to vector<128x1xf32>
    %239 = vector.extract_strided_slice %0 {offsets = [8, 0], sizes = [1, 32], strides = [1, 1]} : vector<9x32xf32> to vector<1x32xf32>
    %240 = vector.broadcast %238 : vector<128x1xf32> to vector<128x32xf32>
    %241 = vector.broadcast %239 : vector<1x32xf32> to vector<128x32xf32>
    %242 = arith.mulf %240, %241 : vector<128x32xf32>
    %243 = arith.addf %237, %242 : vector<128x32xf32>
    %244 = vector.broadcast %1 : vector<1x32xf32> to vector<128x32xf32>
    %245 = arith.addf %243, %244 : vector<128x32xf32>
    %cst_18 = arith.constant 0.000000e+00 : f32
    %246 = vector.broadcast %cst_18 : f32 to vector<128x32xf32>
    %247 = arith.maximumf %245, %246 : vector<128x32xf32>
    %248 = arith.maximumf %186, %247 : vector<128x32xf32>
    %cst_19 = arith.constant 0.000000e+00 : f32
    %249 = vector.broadcast %cst_19 : f32 to vector<2x10x10x32xf32>
    %c0_20 = arith.constant 0 : index
    %c0_21 = arith.constant 0 : index
    %c0_22 = arith.constant 0 : index
    %c0_23 = arith.constant 0 : index
    %250 = vector.load %arg13[%c0_20, %c0_21, %c0_22, %c0_23] : memref<2x10x10x32xf32, #tpu.memory_space<vmem>>, vector<2x10x10x32xf32>
    tpu.vector_store %arg13[%c0_20, %c0_21, %c0_22, %c0_23], %249 {strides = array<i32>} : memref<2x10x10x32xf32, #tpu.memory_space<vmem>>, vector<2x10x10x32xf32>,
    %251 = vector.shape_cast %248 : vector<128x32xf32> to vector<2x8x8x32xf32>
    %c0_24 = arith.constant 0 : index
    %c1_25 = arith.constant 1 : index
    %c1_26 = arith.constant 1 : index
    %c0_27 = arith.constant 0 : index
    %252 = vector.load %arg13[%c0_24, %c1_25, %c1_26, %c0_27] : memref<2x10x10x32xf32, #tpu.memory_space<vmem>>, vector<2x8x8x32xf32>
    tpu.vector_store %arg13[%c0_24, %c1_25, %c1_26, %c0_27], %251 {strides = array<i32>} : memref<2x10x10x32xf32, #tpu.memory_space<vmem>>, vector<2x8x8x32xf32>,
    %cst_28 = arith.constant 0.000000e+00 : f32
    %253 = vector.broadcast %cst_28 : f32 to vector<128x64xf32>
    %c0_29 = arith.constant 0 : index
    %c0_30 = arith.constant 0 : index
    %c0_31 = arith.constant 0 : index
    %c0_32 = arith.constant 0 : index
    %254 = vector.load %arg13[%c0_29, %c0_30, %c0_31, %c0_32] : memref<2x10x10x32xf32, #tpu.memory_space<vmem>>, vector<2x8x8x32xf32>
    %255 = vector.shape_cast %254 : vector<2x8x8x32xf32> to vector<128x32xf32>
    %c0_33 = arith.constant 0 : index
    %c0_34 = arith.constant 0 : index
    %c0_35 = arith.constant 0 : index
    %256 = vector.load %arg3[%c0_33, %c0_34, %c0_35] : memref<9x32x64xf32, #tpu.memory_space<vmem>>, vector<1x32x64xf32>
    %257 = vector.shape_cast %256 : vector<1x32x64xf32> to vector<32x64xf32>
    %cst_36 = arith.constant dense<0.000000e+00> : vector<128x64xf32>
    %258 = tpu.matmul %255, %257, %cst_36 {dimension_numbers = #tpu.dot_dimension_numbers<[1], [0], [0], [1], [0, 0, 1, 1], [], []>} : vector<128x32xf32>, vector<32x64xf32>, vector<128x64xf32> -> vector<128x64xf32>
    %259 = arith.addf %253, %258 : vector<128x64xf32>
    %c0_37 = arith.constant 0 : index
    %c0_38 = arith.constant 0 : index
    %c1_39 = arith.constant 1 : index
    %c0_40 = arith.constant 0 : index
    %260 = vector.load %arg13[%c0_37, %c0_38, %c1_39, %c0_40] : memref<2x10x10x32xf32, #tpu.memory_space<vmem>>, vector<2x8x8x32xf32>
    %261 = vector.shape_cast %260 : vector<2x8x8x32xf32> to vector<128x32xf32>
    %c1_41 = arith.constant 1 : index
    %c0_42 = arith.constant 0 : index
    %c0_43 = arith.constant 0 : index
    %262 = vector.load %arg3[%c1_41, %c0_42, %c0_43] : memref<9x32x64xf32, #tpu.memory_space<vmem>>, vector<1x32x64xf32>
    %263 = vector.shape_cast %262 : vector<1x32x64xf32> to vector<32x64xf32>
    %cst_44 = arith.constant dense<0.000000e+00> : vector<128x64xf32>
    %264 = tpu.matmul %261, %263, %cst_44 {dimension_numbers = #tpu.dot_dimension_numbers<[1], [0], [0], [1], [0, 0, 1, 1], [], []>} : vector<128x32xf32>, vector<32x64xf32>, vector<128x64xf32> -> vector<128x64xf32>
    %265 = arith.addf %259, %264 : vector<128x64xf32>
    %c0_45 = arith.constant 0 : index
    %c0_46 = arith.constant 0 : index
    %c2_47 = arith.constant 2 : index
    %c0_48 = arith.constant 0 : index
    %266 = vector.load %arg13[%c0_45, %c0_46, %c2_47, %c0_48] : memref<2x10x10x32xf32, #tpu.memory_space<vmem>>, vector<2x8x8x32xf32>
    %267 = vector.shape_cast %266 : vector<2x8x8x32xf32> to vector<128x32xf32>
    %c2_49 = arith.constant 2 : index
    %c0_50 = arith.constant 0 : index
    %c0_51 = arith.constant 0 : index
    %268 = vector.load %arg3[%c2_49, %c0_50, %c0_51] : memref<9x32x64xf32, #tpu.memory_space<vmem>>, vector<1x32x64xf32>
    %269 = vector.shape_cast %268 : vector<1x32x64xf32> to vector<32x64xf32>
    %cst_52 = arith.constant dense<0.000000e+00> : vector<128x64xf32>
    %270 = tpu.matmul %267, %269, %cst_52 {dimension_numbers = #tpu.dot_dimension_numbers<[1], [0], [0], [1], [0, 0, 1, 1], [], []>} : vector<128x32xf32>, vector<32x64xf32>, vector<128x64xf32> -> vector<128x64xf32>
    %271 = arith.addf %265, %270 : vector<128x64xf32>
    %c0_53 = arith.constant 0 : index
    %c1_54 = arith.constant 1 : index
    %c0_55 = arith.constant 0 : index
    %c0_56 = arith.constant 0 : index
    %272 = vector.load %arg13[%c0_53, %c1_54, %c0_55, %c0_56] : memref<2x10x10x32xf32, #tpu.memory_space<vmem>>, vector<2x8x8x32xf32>
    %273 = vector.shape_cast %272 : vector<2x8x8x32xf32> to vector<128x32xf32>
    %c3_57 = arith.constant 3 : index
    %c0_58 = arith.constant 0 : index
    %c0_59 = arith.constant 0 : index
    %274 = vector.load %arg3[%c3_57, %c0_58, %c0_59] : memref<9x32x64xf32, #tpu.memory_space<vmem>>, vector<1x32x64xf32>
    %275 = vector.shape_cast %274 : vector<1x32x64xf32> to vector<32x64xf32>
    %cst_60 = arith.constant dense<0.000000e+00> : vector<128x64xf32>
    %276 = tpu.matmul %273, %275, %cst_60 {dimension_numbers = #tpu.dot_dimension_numbers<[1], [0], [0], [1], [0, 0, 1, 1], [], []>} : vector<128x32xf32>, vector<32x64xf32>, vector<128x64xf32> -> vector<128x64xf32>
    %277 = arith.addf %271, %276 : vector<128x64xf32>
    %c0_61 = arith.constant 0 : index
    %c1_62 = arith.constant 1 : index
    %c1_63 = arith.constant 1 : index
    %c0_64 = arith.constant 0 : index
    %278 = vector.load %arg13[%c0_61, %c1_62, %c1_63, %c0_64] : memref<2x10x10x32xf32, #tpu.memory_space<vmem>>, vector<2x8x8x32xf32>
    %279 = vector.shape_cast %278 : vector<2x8x8x32xf32> to vector<128x32xf32>
    %c4 = arith.constant 4 : index
    %c0_65 = arith.constant 0 : index
    %c0_66 = arith.constant 0 : index
    %280 = vector.load %arg3[%c4, %c0_65, %c0_66] : memref<9x32x64xf32, #tpu.memory_space<vmem>>, vector<1x32x64xf32>
    %281 = vector.shape_cast %280 : vector<1x32x64xf32> to vector<32x64xf32>
    %cst_67 = arith.constant dense<0.000000e+00> : vector<128x64xf32>
    %282 = tpu.matmul %279, %281, %cst_67 {dimension_numbers = #tpu.dot_dimension_numbers<[1], [0], [0], [1], [0, 0, 1, 1], [], []>} : vector<128x32xf32>, vector<32x64xf32>, vector<128x64xf32> -> vector<128x64xf32>
    %283 = arith.addf %277, %282 : vector<128x64xf32>
    %c0_68 = arith.constant 0 : index
    %c1_69 = arith.constant 1 : index
    %c2_70 = arith.constant 2 : index
    %c0_71 = arith.constant 0 : index
    %284 = vector.load %arg13[%c0_68, %c1_69, %c2_70, %c0_71] : memref<2x10x10x32xf32, #tpu.memory_space<vmem>>, vector<2x8x8x32xf32>
    %285 = vector.shape_cast %284 : vector<2x8x8x32xf32> to vector<128x32xf32>
    %c5 = arith.constant 5 : index
    %c0_72 = arith.constant 0 : index
    %c0_73 = arith.constant 0 : index
    %286 = vector.load %arg3[%c5, %c0_72, %c0_73] : memref<9x32x64xf32, #tpu.memory_space<vmem>>, vector<1x32x64xf32>
    %287 = vector.shape_cast %286 : vector<1x32x64xf32> to vector<32x64xf32>
    %cst_74 = arith.constant dense<0.000000e+00> : vector<128x64xf32>
    %288 = tpu.matmul %285, %287, %cst_74 {dimension_numbers = #tpu.dot_dimension_numbers<[1], [0], [0], [1], [0, 0, 1, 1], [], []>} : vector<128x32xf32>, vector<32x64xf32>, vector<128x64xf32> -> vector<128x64xf32>
    %289 = arith.addf %283, %288 : vector<128x64xf32>
    %c0_75 = arith.constant 0 : index
    %c2_76 = arith.constant 2 : index
    %c0_77 = arith.constant 0 : index
    %c0_78 = arith.constant 0 : index
    %290 = vector.load %arg13[%c0_75, %c2_76, %c0_77, %c0_78] : memref<2x10x10x32xf32, #tpu.memory_space<vmem>>, vector<2x8x8x32xf32>
    %291 = vector.shape_cast %290 : vector<2x8x8x32xf32> to vector<128x32xf32>
    %c6 = arith.constant 6 : index
    %c0_79 = arith.constant 0 : index
    %c0_80 = arith.constant 0 : index
    %292 = vector.load %arg3[%c6, %c0_79, %c0_80] : memref<9x32x64xf32, #tpu.memory_space<vmem>>, vector<1x32x64xf32>
    %293 = vector.shape_cast %292 : vector<1x32x64xf32> to vector<32x64xf32>
    %cst_81 = arith.constant dense<0.000000e+00> : vector<128x64xf32>
    %294 = tpu.matmul %291, %293, %cst_81 {dimension_numbers = #tpu.dot_dimension_numbers<[1], [0], [0], [1], [0, 0, 1, 1], [], []>} : vector<128x32xf32>, vector<32x64xf32>, vector<128x64xf32> -> vector<128x64xf32>
    %295 = arith.addf %289, %294 : vector<128x64xf32>
    %c0_82 = arith.constant 0 : index
    %c2_83 = arith.constant 2 : index
    %c1_84 = arith.constant 1 : index
    %c0_85 = arith.constant 0 : index
    %296 = vector.load %arg13[%c0_82, %c2_83, %c1_84, %c0_85] : memref<2x10x10x32xf32, #tpu.memory_space<vmem>>, vector<2x8x8x32xf32>
    %297 = vector.shape_cast %296 : vector<2x8x8x32xf32> to vector<128x32xf32>
    %c7 = arith.constant 7 : index
    %c0_86 = arith.constant 0 : index
    %c0_87 = arith.constant 0 : index
    %298 = vector.load %arg3[%c7, %c0_86, %c0_87] : memref<9x32x64xf32, #tpu.memory_space<vmem>>, vector<1x32x64xf32>
    %299 = vector.shape_cast %298 : vector<1x32x64xf32> to vector<32x64xf32>
    %cst_88 = arith.constant dense<0.000000e+00> : vector<128x64xf32>
    %300 = tpu.matmul %297, %299, %cst_88 {dimension_numbers = #tpu.dot_dimension_numbers<[1], [0], [0], [1], [0, 0, 1, 1], [], []>} : vector<128x32xf32>, vector<32x64xf32>, vector<128x64xf32> -> vector<128x64xf32>
    %301 = arith.addf %295, %300 : vector<128x64xf32>
    %c0_89 = arith.constant 0 : index
    %c2_90 = arith.constant 2 : index
    %c2_91 = arith.constant 2 : index
    %c0_92 = arith.constant 0 : index
    %302 = vector.load %arg13[%c0_89, %c2_90, %c2_91, %c0_92] : memref<2x10x10x32xf32, #tpu.memory_space<vmem>>, vector<2x8x8x32xf32>
    %303 = vector.shape_cast %302 : vector<2x8x8x32xf32> to vector<128x32xf32>
    %c8 = arith.constant 8 : index
    %c0_93 = arith.constant 0 : index
    %c0_94 = arith.constant 0 : index
    %304 = vector.load %arg3[%c8, %c0_93, %c0_94] : memref<9x32x64xf32, #tpu.memory_space<vmem>>, vector<1x32x64xf32>
    %305 = vector.shape_cast %304 : vector<1x32x64xf32> to vector<32x64xf32>
    %cst_95 = arith.constant dense<0.000000e+00> : vector<128x64xf32>
    %306 = tpu.matmul %303, %305, %cst_95 {dimension_numbers = #tpu.dot_dimension_numbers<[1], [0], [0], [1], [0, 0, 1, 1], [], []>} : vector<128x32xf32>, vector<32x64xf32>, vector<128x64xf32> -> vector<128x64xf32>
    %307 = arith.addf %301, %306 : vector<128x64xf32>
    %c0_96 = arith.constant 0 : index
    %c0_97 = arith.constant 0 : index
    %308 = vector.load %arg4[%c0_96, %c0_97] : memref<1x64xf32, #tpu.memory_space<vmem>>, vector<1x64xf32>
    %309 = vector.broadcast %308 : vector<1x64xf32> to vector<128x64xf32>
    %310 = arith.addf %307, %309 : vector<128x64xf32>
    %cst_98 = arith.constant 0.000000e+00 : f32
    %311 = vector.broadcast %cst_98 : f32 to vector<128x64xf32>
    %312 = arith.maximumf %310, %311 : vector<128x64xf32>
    %313 = vector.shape_cast %312 : vector<128x64xf32> to vector<2x8x8x64xf32>
    %c0_99 = arith.constant 0 : index
    %c0_100 = arith.constant 0 : index
    %314 = vector.load %arg7[%c0_99, %c0_100] : memref<1x256xf32, #tpu.memory_space<vmem>>, vector<1x256xf32>
    %315 = vector.shape_cast %314 : vector<1x256xf32> to vector<1x256xf32>
    %316 = vector.broadcast %315 : vector<1x256xf32> to vector<2x256xf32>
    %317 = vector.extract_strided_slice %313 {offsets = [0, 0, 0, 0], sizes = [2, 1, 8, 64], strides = [1, 1, 1, 1]} : vector<2x8x8x64xf32> to vector<2x1x8x64xf32>
    %318 = vector.shape_cast %317 : vector<2x1x8x64xf32> to vector<2x8x64xf32>
    %319 = vector.extract_strided_slice %313 {offsets = [0, 1, 0, 0], sizes = [2, 1, 8, 64], strides = [1, 1, 1, 1]} : vector<2x8x8x64xf32> to vector<2x1x8x64xf32>
    %320 = vector.shape_cast %319 : vector<2x1x8x64xf32> to vector<2x8x64xf32>
    %321 = arith.maximumf %318, %320 : vector<2x8x64xf32>
    %322 = vector.extract_strided_slice %321 {offsets = [0, 0, 0], sizes = [2, 2, 64], strides = [1, 1, 1]} : vector<2x8x64xf32> to vector<2x2x64xf32>
    %cst_101 = arith.constant dense<0xFF800000> : vector<2x64xf32>
    %323 = vector.multi_reduction <maximumf>, %322, %cst_101 [1] : vector<2x2x64xf32> to vector<2x64xf32>
    %c0_102 = arith.constant 0 : index
    %c0_103 = arith.constant 0 : index
    %c0_104 = arith.constant 0 : index
    %324 = vector.load %arg5[%c0_102, %c0_103, %c0_104] : memref<4x64x256xf32, #tpu.memory_space<vmem>>, vector<1x64x256xf32>
    %325 = vector.shape_cast %324 : vector<1x64x256xf32> to vector<64x256xf32>
    %cst_105 = arith.constant dense<0.000000e+00> : vector<2x256xf32>
    %326 = tpu.matmul %323, %325, %cst_105 {dimension_numbers = #tpu.dot_dimension_numbers<[1], [0], [0], [1], [0, 0, 1, 1], [], []>} : vector<2x64xf32>, vector<64x256xf32>, vector<2x256xf32> -> vector<2x256xf32>
    %327 = arith.addf %316, %326 : vector<2x256xf32>
    %328 = vector.extract_strided_slice %321 {offsets = [0, 2, 0], sizes = [2, 2, 64], strides = [1, 1, 1]} : vector<2x8x64xf32> to vector<2x2x64xf32>
    %cst_106 = arith.constant dense<0xFF800000> : vector<2x64xf32>
    %329 = vector.multi_reduction <maximumf>, %328, %cst_106 [1] : vector<2x2x64xf32> to vector<2x64xf32>
    %c1_107 = arith.constant 1 : index
    %c0_108 = arith.constant 0 : index
    %c0_109 = arith.constant 0 : index
    %330 = vector.load %arg5[%c1_107, %c0_108, %c0_109] : memref<4x64x256xf32, #tpu.memory_space<vmem>>, vector<1x64x256xf32>
    %331 = vector.shape_cast %330 : vector<1x64x256xf32> to vector<64x256xf32>
    %cst_110 = arith.constant dense<0.000000e+00> : vector<2x256xf32>
    %332 = tpu.matmul %329, %331, %cst_110 {dimension_numbers = #tpu.dot_dimension_numbers<[1], [0], [0], [1], [0, 0, 1, 1], [], []>} : vector<2x64xf32>, vector<64x256xf32>, vector<2x256xf32> -> vector<2x256xf32>
    %333 = arith.addf %327, %332 : vector<2x256xf32>
    %334 = vector.extract_strided_slice %321 {offsets = [0, 4, 0], sizes = [2, 2, 64], strides = [1, 1, 1]} : vector<2x8x64xf32> to vector<2x2x64xf32>
    %cst_111 = arith.constant dense<0xFF800000> : vector<2x64xf32>
    %335 = vector.multi_reduction <maximumf>, %334, %cst_111 [1] : vector<2x2x64xf32> to vector<2x64xf32>
    %c2_112 = arith.constant 2 : index
    %c0_113 = arith.constant 0 : index
    %c0_114 = arith.constant 0 : index
    %336 = vector.load %arg5[%c2_112, %c0_113, %c0_114] : memref<4x64x256xf32, #tpu.memory_space<vmem>>, vector<1x64x256xf32>
    %337 = vector.shape_cast %336 : vector<1x64x256xf32> to vector<64x256xf32>
    %cst_115 = arith.constant dense<0.000000e+00> : vector<2x256xf32>
    %338 = tpu.matmul %335, %337, %cst_115 {dimension_numbers = #tpu.dot_dimension_numbers<[1], [0], [0], [1], [0, 0, 1, 1], [], []>} : vector<2x64xf32>, vector<64x256xf32>, vector<2x256xf32> -> vector<2x256xf32>
    %339 = arith.addf %333, %338 : vector<2x256xf32>
    %340 = vector.extract_strided_slice %321 {offsets = [0, 6, 0], sizes = [2, 2, 64], strides = [1, 1, 1]} : vector<2x8x64xf32> to vector<2x2x64xf32>
    %cst_116 = arith.constant dense<0xFF800000> : vector<2x64xf32>
    %341 = vector.multi_reduction <maximumf>, %340, %cst_116 [1] : vector<2x2x64xf32> to vector<2x64xf32>
    %c3_117 = arith.constant 3 : index
    %c0_118 = arith.constant 0 : index
    %c0_119 = arith.constant 0 : index
    %342 = vector.load %arg5[%c3_117, %c0_118, %c0_119] : memref<4x64x256xf32, #tpu.memory_space<vmem>>, vector<1x64x256xf32>
    %343 = vector.shape_cast %342 : vector<1x64x256xf32> to vector<64x256xf32>
    %cst_120 = arith.constant dense<0.000000e+00> : vector<2x256xf32>
    %344 = tpu.matmul %341, %343, %cst_120 {dimension_numbers = #tpu.dot_dimension_numbers<[1], [0], [0], [1], [0, 0, 1, 1], [], []>} : vector<2x64xf32>, vector<64x256xf32>, vector<2x256xf32> -> vector<2x256xf32>
    %345 = arith.addf %339, %344 : vector<2x256xf32>
    %346 = vector.extract_strided_slice %313 {offsets = [0, 2, 0, 0], sizes = [2, 1, 8, 64], strides = [1, 1, 1, 1]} : vector<2x8x8x64xf32> to vector<2x1x8x64xf32>
    %347 = vector.shape_cast %346 : vector<2x1x8x64xf32> to vector<2x8x64xf32>
    %348 = vector.extract_strided_slice %313 {offsets = [0, 3, 0, 0], sizes = [2, 1, 8, 64], strides = [1, 1, 1, 1]} : vector<2x8x8x64xf32> to vector<2x1x8x64xf32>
    %349 = vector.shape_cast %348 : vector<2x1x8x64xf32> to vector<2x8x64xf32>
    %350 = arith.maximumf %347, %349 : vector<2x8x64xf32>
    %351 = vector.extract_strided_slice %350 {offsets = [0, 0, 0], sizes = [2, 2, 64], strides = [1, 1, 1]} : vector<2x8x64xf32> to vector<2x2x64xf32>
    %cst_121 = arith.constant dense<0xFF800000> : vector<2x64xf32>
    %352 = vector.multi_reduction <maximumf>, %351, %cst_121 [1] : vector<2x2x64xf32> to vector<2x64xf32>
    %c0_122 = arith.constant 0 : index
    %c0_123 = arith.constant 0 : index
    %c0_124 = arith.constant 0 : index
    %353 = vector.load %arg5[%c0_122, %c0_123, %c0_124] : memref<4x64x256xf32, #tpu.memory_space<vmem>>, vector<1x64x256xf32>
    %354 = vector.shape_cast %353 : vector<1x64x256xf32> to vector<64x256xf32>
    %cst_125 = arith.constant dense<0.000000e+00> : vector<2x256xf32>
    %355 = tpu.matmul %352, %354, %cst_125 {dimension_numbers = #tpu.dot_dimension_numbers<[1], [0], [0], [1], [0, 0, 1, 1], [], []>} : vector<2x64xf32>, vector<64x256xf32>, vector<2x256xf32> -> vector<2x256xf32>
    %356 = arith.addf %316, %355 : vector<2x256xf32>
    %357 = vector.extract_strided_slice %350 {offsets = [0, 2, 0], sizes = [2, 2, 64], strides = [1, 1, 1]} : vector<2x8x64xf32> to vector<2x2x64xf32>
    %cst_126 = arith.constant dense<0xFF800000> : vector<2x64xf32>
    %358 = vector.multi_reduction <maximumf>, %357, %cst_126 [1] : vector<2x2x64xf32> to vector<2x64xf32>
    %c1_127 = arith.constant 1 : index
    %c0_128 = arith.constant 0 : index
    %c0_129 = arith.constant 0 : index
    %359 = vector.load %arg5[%c1_127, %c0_128, %c0_129] : memref<4x64x256xf32, #tpu.memory_space<vmem>>, vector<1x64x256xf32>
    %360 = vector.shape_cast %359 : vector<1x64x256xf32> to vector<64x256xf32>
    %cst_130 = arith.constant dense<0.000000e+00> : vector<2x256xf32>
    %361 = tpu.matmul %358, %360, %cst_130 {dimension_numbers = #tpu.dot_dimension_numbers<[1], [0], [0], [1], [0, 0, 1, 1], [], []>} : vector<2x64xf32>, vector<64x256xf32>, vector<2x256xf32> -> vector<2x256xf32>
    %362 = arith.addf %356, %361 : vector<2x256xf32>
    %363 = vector.extract_strided_slice %350 {offsets = [0, 4, 0], sizes = [2, 2, 64], strides = [1, 1, 1]} : vector<2x8x64xf32> to vector<2x2x64xf32>
    %cst_131 = arith.constant dense<0xFF800000> : vector<2x64xf32>
    %364 = vector.multi_reduction <maximumf>, %363, %cst_131 [1] : vector<2x2x64xf32> to vector<2x64xf32>
    %c2_132 = arith.constant 2 : index
    %c0_133 = arith.constant 0 : index
    %c0_134 = arith.constant 0 : index
    %365 = vector.load %arg5[%c2_132, %c0_133, %c0_134] : memref<4x64x256xf32, #tpu.memory_space<vmem>>, vector<1x64x256xf32>
    %366 = vector.shape_cast %365 : vector<1x64x256xf32> to vector<64x256xf32>
    %cst_135 = arith.constant dense<0.000000e+00> : vector<2x256xf32>
    %367 = tpu.matmul %364, %366, %cst_135 {dimension_numbers = #tpu.dot_dimension_numbers<[1], [0], [0], [1], [0, 0, 1, 1], [], []>} : vector<2x64xf32>, vector<64x256xf32>, vector<2x256xf32> -> vector<2x256xf32>
    %368 = arith.addf %362, %367 : vector<2x256xf32>
    %369 = vector.extract_strided_slice %350 {offsets = [0, 6, 0], sizes = [2, 2, 64], strides = [1, 1, 1]} : vector<2x8x64xf32> to vector<2x2x64xf32>
    %cst_136 = arith.constant dense<0xFF800000> : vector<2x64xf32>
    %370 = vector.multi_reduction <maximumf>, %369, %cst_136 [1] : vector<2x2x64xf32> to vector<2x64xf32>
    %c3_137 = arith.constant 3 : index
    %c0_138 = arith.constant 0 : index
    %c0_139 = arith.constant 0 : index
    %371 = vector.load %arg5[%c3_137, %c0_138, %c0_139] : memref<4x64x256xf32, #tpu.memory_space<vmem>>, vector<1x64x256xf32>
    %372 = vector.shape_cast %371 : vector<1x64x256xf32> to vector<64x256xf32>
    %cst_140 = arith.constant dense<0.000000e+00> : vector<2x256xf32>
    %373 = tpu.matmul %370, %372, %cst_140 {dimension_numbers = #tpu.dot_dimension_numbers<[1], [0], [0], [1], [0, 0, 1, 1], [], []>} : vector<2x64xf32>, vector<64x256xf32>, vector<2x256xf32> -> vector<2x256xf32>
    %374 = arith.addf %368, %373 : vector<2x256xf32>
    %375 = vector.extract_strided_slice %313 {offsets = [0, 4, 0, 0], sizes = [2, 1, 8, 64], strides = [1, 1, 1, 1]} : vector<2x8x8x64xf32> to vector<2x1x8x64xf32>
    %376 = vector.shape_cast %375 : vector<2x1x8x64xf32> to vector<2x8x64xf32>
    %377 = vector.extract_strided_slice %313 {offsets = [0, 5, 0, 0], sizes = [2, 1, 8, 64], strides = [1, 1, 1, 1]} : vector<2x8x8x64xf32> to vector<2x1x8x64xf32>
    %378 = vector.shape_cast %377 : vector<2x1x8x64xf32> to vector<2x8x64xf32>
    %379 = arith.maximumf %376, %378 : vector<2x8x64xf32>
    %380 = vector.extract_strided_slice %379 {offsets = [0, 0, 0], sizes = [2, 2, 64], strides = [1, 1, 1]} : vector<2x8x64xf32> to vector<2x2x64xf32>
    %cst_141 = arith.constant dense<0xFF800000> : vector<2x64xf32>
    %381 = vector.multi_reduction <maximumf>, %380, %cst_141 [1] : vector<2x2x64xf32> to vector<2x64xf32>
    %c0_142 = arith.constant 0 : index
    %c0_143 = arith.constant 0 : index
    %c0_144 = arith.constant 0 : index
    %382 = vector.load %arg5[%c0_142, %c0_143, %c0_144] : memref<4x64x256xf32, #tpu.memory_space<vmem>>, vector<1x64x256xf32>
    %383 = vector.shape_cast %382 : vector<1x64x256xf32> to vector<64x256xf32>
    %cst_145 = arith.constant dense<0.000000e+00> : vector<2x256xf32>
    %384 = tpu.matmul %381, %383, %cst_145 {dimension_numbers = #tpu.dot_dimension_numbers<[1], [0], [0], [1], [0, 0, 1, 1], [], []>} : vector<2x64xf32>, vector<64x256xf32>, vector<2x256xf32> -> vector<2x256xf32>
    %385 = arith.addf %316, %384 : vector<2x256xf32>
    %386 = vector.extract_strided_slice %379 {offsets = [0, 2, 0], sizes = [2, 2, 64], strides = [1, 1, 1]} : vector<2x8x64xf32> to vector<2x2x64xf32>
    %cst_146 = arith.constant dense<0xFF800000> : vector<2x64xf32>
    %387 = vector.multi_reduction <maximumf>, %386, %cst_146 [1] : vector<2x2x64xf32> to vector<2x64xf32>
    %c1_147 = arith.constant 1 : index
    %c0_148 = arith.constant 0 : index
    %c0_149 = arith.constant 0 : index
    %388 = vector.load %arg5[%c1_147, %c0_148, %c0_149] : memref<4x64x256xf32, #tpu.memory_space<vmem>>, vector<1x64x256xf32>
    %389 = vector.shape_cast %388 : vector<1x64x256xf32> to vector<64x256xf32>
    %cst_150 = arith.constant dense<0.000000e+00> : vector<2x256xf32>
    %390 = tpu.matmul %387, %389, %cst_150 {dimension_numbers = #tpu.dot_dimension_numbers<[1], [0], [0], [1], [0, 0, 1, 1], [], []>} : vector<2x64xf32>, vector<64x256xf32>, vector<2x256xf32> -> vector<2x256xf32>
    %391 = arith.addf %385, %390 : vector<2x256xf32>
    %392 = vector.extract_strided_slice %379 {offsets = [0, 4, 0], sizes = [2, 2, 64], strides = [1, 1, 1]} : vector<2x8x64xf32> to vector<2x2x64xf32>
    %cst_151 = arith.constant dense<0xFF800000> : vector<2x64xf32>
    %393 = vector.multi_reduction <maximumf>, %392, %cst_151 [1] : vector<2x2x64xf32> to vector<2x64xf32>
    %c2_152 = arith.constant 2 : index
    %c0_153 = arith.constant 0 : index
    %c0_154 = arith.constant 0 : index
    %394 = vector.load %arg5[%c2_152, %c0_153, %c0_154] : memref<4x64x256xf32, #tpu.memory_space<vmem>>, vector<1x64x256xf32>
    %395 = vector.shape_cast %394 : vector<1x64x256xf32> to vector<64x256xf32>
    %cst_155 = arith.constant dense<0.000000e+00> : vector<2x256xf32>
    %396 = tpu.matmul %393, %395, %cst_155 {dimension_numbers = #tpu.dot_dimension_numbers<[1], [0], [0], [1], [0, 0, 1, 1], [], []>} : vector<2x64xf32>, vector<64x256xf32>, vector<2x256xf32> -> vector<2x256xf32>
    %397 = arith.addf %391, %396 : vector<2x256xf32>
    %398 = vector.extract_strided_slice %379 {offsets = [0, 6, 0], sizes = [2, 2, 64], strides = [1, 1, 1]} : vector<2x8x64xf32> to vector<2x2x64xf32>
    %cst_156 = arith.constant dense<0xFF800000> : vector<2x64xf32>
    %399 = vector.multi_reduction <maximumf>, %398, %cst_156 [1] : vector<2x2x64xf32> to vector<2x64xf32>
    %c3_157 = arith.constant 3 : index
    %c0_158 = arith.constant 0 : index
    %c0_159 = arith.constant 0 : index
    %400 = vector.load %arg5[%c3_157, %c0_158, %c0_159] : memref<4x64x256xf32, #tpu.memory_space<vmem>>, vector<1x64x256xf32>
    %401 = vector.shape_cast %400 : vector<1x64x256xf32> to vector<64x256xf32>
    %cst_160 = arith.constant dense<0.000000e+00> : vector<2x256xf32>
    %402 = tpu.matmul %399, %401, %cst_160 {dimension_numbers = #tpu.dot_dimension_numbers<[1], [0], [0], [1], [0, 0, 1, 1], [], []>} : vector<2x64xf32>, vector<64x256xf32>, vector<2x256xf32> -> vector<2x256xf32>
    %403 = arith.addf %397, %402 : vector<2x256xf32>
    %404 = vector.extract_strided_slice %313 {offsets = [0, 6, 0, 0], sizes = [2, 1, 8, 64], strides = [1, 1, 1, 1]} : vector<2x8x8x64xf32> to vector<2x1x8x64xf32>
    %405 = vector.shape_cast %404 : vector<2x1x8x64xf32> to vector<2x8x64xf32>
    %406 = vector.extract_strided_slice %313 {offsets = [0, 7, 0, 0], sizes = [2, 1, 8, 64], strides = [1, 1, 1, 1]} : vector<2x8x8x64xf32> to vector<2x1x8x64xf32>
    %407 = vector.shape_cast %406 : vector<2x1x8x64xf32> to vector<2x8x64xf32>
    %408 = arith.maximumf %405, %407 : vector<2x8x64xf32>
    %409 = vector.extract_strided_slice %408 {offsets = [0, 0, 0], sizes = [2, 2, 64], strides = [1, 1, 1]} : vector<2x8x64xf32> to vector<2x2x64xf32>
    %cst_161 = arith.constant dense<0xFF800000> : vector<2x64xf32>
    %410 = vector.multi_reduction <maximumf>, %409, %cst_161 [1] : vector<2x2x64xf32> to vector<2x64xf32>
    %c0_162 = arith.constant 0 : index
    %c0_163 = arith.constant 0 : index
    %c0_164 = arith.constant 0 : index
    %411 = vector.load %arg5[%c0_162, %c0_163, %c0_164] : memref<4x64x256xf32, #tpu.memory_space<vmem>>, vector<1x64x256xf32>
    %412 = vector.shape_cast %411 : vector<1x64x256xf32> to vector<64x256xf32>
    %cst_165 = arith.constant dense<0.000000e+00> : vector<2x256xf32>
    %413 = tpu.matmul %410, %412, %cst_165 {dimension_numbers = #tpu.dot_dimension_numbers<[1], [0], [0], [1], [0, 0, 1, 1], [], []>} : vector<2x64xf32>, vector<64x256xf32>, vector<2x256xf32> -> vector<2x256xf32>
    %414 = arith.addf %316, %413 : vector<2x256xf32>
    %415 = vector.extract_strided_slice %408 {offsets = [0, 2, 0], sizes = [2, 2, 64], strides = [1, 1, 1]} : vector<2x8x64xf32> to vector<2x2x64xf32>
    %cst_166 = arith.constant dense<0xFF800000> : vector<2x64xf32>
    %416 = vector.multi_reduction <maximumf>, %415, %cst_166 [1] : vector<2x2x64xf32> to vector<2x64xf32>
    %c1_167 = arith.constant 1 : index
    %c0_168 = arith.constant 0 : index
    %c0_169 = arith.constant 0 : index
    %417 = vector.load %arg5[%c1_167, %c0_168, %c0_169] : memref<4x64x256xf32, #tpu.memory_space<vmem>>, vector<1x64x256xf32>
    %418 = vector.shape_cast %417 : vector<1x64x256xf32> to vector<64x256xf32>
    %cst_170 = arith.constant dense<0.000000e+00> : vector<2x256xf32>
    %419 = tpu.matmul %416, %418, %cst_170 {dimension_numbers = #tpu.dot_dimension_numbers<[1], [0], [0], [1], [0, 0, 1, 1], [], []>} : vector<2x64xf32>, vector<64x256xf32>, vector<2x256xf32> -> vector<2x256xf32>
    %420 = arith.addf %414, %419 : vector<2x256xf32>
    %421 = vector.extract_strided_slice %408 {offsets = [0, 4, 0], sizes = [2, 2, 64], strides = [1, 1, 1]} : vector<2x8x64xf32> to vector<2x2x64xf32>
    %cst_171 = arith.constant dense<0xFF800000> : vector<2x64xf32>
    %422 = vector.multi_reduction <maximumf>, %421, %cst_171 [1] : vector<2x2x64xf32> to vector<2x64xf32>
    %c2_172 = arith.constant 2 : index
    %c0_173 = arith.constant 0 : index
    %c0_174 = arith.constant 0 : index
    %423 = vector.load %arg5[%c2_172, %c0_173, %c0_174] : memref<4x64x256xf32, #tpu.memory_space<vmem>>, vector<1x64x256xf32>
    %424 = vector.shape_cast %423 : vector<1x64x256xf32> to vector<64x256xf32>
    %cst_175 = arith.constant dense<0.000000e+00> : vector<2x256xf32>
    %425 = tpu.matmul %422, %424, %cst_175 {dimension_numbers = #tpu.dot_dimension_numbers<[1], [0], [0], [1], [0, 0, 1, 1], [], []>} : vector<2x64xf32>, vector<64x256xf32>, vector<2x256xf32> -> vector<2x256xf32>
    %426 = arith.addf %420, %425 : vector<2x256xf32>
    %427 = vector.extract_strided_slice %408 {offsets = [0, 6, 0], sizes = [2, 2, 64], strides = [1, 1, 1]} : vector<2x8x64xf32> to vector<2x2x64xf32>
    %cst_176 = arith.constant dense<0xFF800000> : vector<2x64xf32>
    %428 = vector.multi_reduction <maximumf>, %427, %cst_176 [1] : vector<2x2x64xf32> to vector<2x64xf32>
    %c3_177 = arith.constant 3 : index
    %c0_178 = arith.constant 0 : index
    %c0_179 = arith.constant 0 : index
    %429 = vector.load %arg5[%c3_177, %c0_178, %c0_179] : memref<4x64x256xf32, #tpu.memory_space<vmem>>, vector<1x64x256xf32>
    %430 = vector.shape_cast %429 : vector<1x64x256xf32> to vector<64x256xf32>
    %cst_180 = arith.constant dense<0.000000e+00> : vector<2x256xf32>
    %431 = tpu.matmul %428, %430, %cst_180 {dimension_numbers = #tpu.dot_dimension_numbers<[1], [0], [0], [1], [0, 0, 1, 1], [], []>} : vector<2x64xf32>, vector<64x256xf32>, vector<2x256xf32> -> vector<2x256xf32>
    %432 = arith.addf %426, %431 : vector<2x256xf32>
    %c0_181 = arith.constant 0 : index
    %c0_182 = arith.constant 0 : index
    %433 = vector.load %arg6[%c0_181, %c0_182] : memref<64x256xf32, #tpu.memory_space<vmem>>, vector<64x256xf32>
    %cst_183 = arith.constant 0.000000e+00 : f32
    %434 = vector.broadcast %cst_183 : f32 to vector<2x64xf32>
    %cst_184 = arith.constant 0.000000e+00 : f32
    %435 = vector.broadcast %cst_184 : f32 to vector<2x64xf32>
    %cst_185 = arith.constant dense<0.000000e+00> : vector<2x256xf32>
    %436 = tpu.matmul %434, %433, %cst_185 {dimension_numbers = #tpu.dot_dimension_numbers<[1], [0], [0], [1], [0, 0, 1, 1], [], []>} : vector<2x64xf32>, vector<64x256xf32>, vector<2x256xf32> -> vector<2x256xf32>
    %437 = arith.addf %345, %436 : vector<2x256xf32>
    %438 = vector.extract_strided_slice %437 {offsets = [0, 0], sizes = [2, 192], strides = [1, 1]} : vector<2x256xf32> to vector<2x192xf32>
    %439 = arith.negf %438 : vector<2x192xf32>
    %440 = math.exp %439 : vector<2x192xf32>
    %cst_186 = arith.constant 1.000000e+00 : f32
    %441 = vector.broadcast %cst_186 : f32 to vector<2x192xf32>
    %442 = arith.addf %441, %440 : vector<2x192xf32>
    %443 = arith.divf %441, %442 : vector<2x192xf32>
    %444 = vector.extract_strided_slice %443 {offsets = [0, 0], sizes = [2, 64], strides = [1, 1]} : vector<2x192xf32> to vector<2x64xf32>
    %445 = vector.extract_strided_slice %443 {offsets = [0, 64], sizes = [2, 64], strides = [1, 1]} : vector<2x192xf32> to vector<2x64xf32>
    %446 = vector.extract_strided_slice %443 {offsets = [0, 128], sizes = [2, 64], strides = [1, 1]} : vector<2x192xf32> to vector<2x64xf32>
    %447 = vector.extract_strided_slice %437 {offsets = [0, 192], sizes = [2, 64], strides = [1, 1]} : vector<2x256xf32> to vector<2x64xf32>
    %448 = math.tanh %447 : vector<2x64xf32>
    %449 = arith.mulf %445, %435 : vector<2x64xf32>
    %450 = arith.mulf %444, %448 : vector<2x64xf32>
    %451 = arith.addf %449, %450 : vector<2x64xf32>
    %452 = math.tanh %451 : vector<2x64xf32>
    %453 = arith.mulf %446, %452 : vector<2x64xf32>
    %cst_187 = arith.constant dense<0.000000e+00> : vector<2x256xf32>
    %454 = tpu.matmul %453, %433, %cst_187 {dimension_numbers = #tpu.dot_dimension_numbers<[1], [0], [0], [1], [0, 0, 1, 1], [], []>} : vector<2x64xf32>, vector<64x256xf32>, vector<2x256xf32> -> vector<2x256xf32>
    %455 = arith.addf %374, %454 : vector<2x256xf32>
    %456 = vector.extract_strided_slice %455 {offsets = [0, 0], sizes = [2, 192], strides = [1, 1]} : vector<2x256xf32> to vector<2x192xf32>
    %457 = arith.negf %456 : vector<2x192xf32>
    %458 = math.exp %457 : vector<2x192xf32>
    %cst_188 = arith.constant 1.000000e+00 : f32
    %459 = vector.broadcast %cst_188 : f32 to vector<2x192xf32>
    %460 = arith.addf %459, %458 : vector<2x192xf32>
    %461 = arith.divf %459, %460 : vector<2x192xf32>
    %462 = vector.extract_strided_slice %461 {offsets = [0, 0], sizes = [2, 64], strides = [1, 1]} : vector<2x192xf32> to vector<2x64xf32>
    %463 = vector.extract_strided_slice %461 {offsets = [0, 64], sizes = [2, 64], strides = [1, 1]} : vector<2x192xf32> to vector<2x64xf32>
    %464 = vector.extract_strided_slice %461 {offsets = [0, 128], sizes = [2, 64], strides = [1, 1]} : vector<2x192xf32> to vector<2x64xf32>
    %465 = vector.extract_strided_slice %455 {offsets = [0, 192], sizes = [2, 64], strides = [1, 1]} : vector<2x256xf32> to vector<2x64xf32>
    %466 = math.tanh %465 : vector<2x64xf32>
    %467 = arith.mulf %463, %451 : vector<2x64xf32>
    %468 = arith.mulf %462, %466 : vector<2x64xf32>
    %469 = arith.addf %467, %468 : vector<2x64xf32>
    %470 = math.tanh %469 : vector<2x64xf32>
    %471 = arith.mulf %464, %470 : vector<2x64xf32>
    %cst_189 = arith.constant dense<0.000000e+00> : vector<2x256xf32>
    %472 = tpu.matmul %471, %433, %cst_189 {dimension_numbers = #tpu.dot_dimension_numbers<[1], [0], [0], [1], [0, 0, 1, 1], [], []>} : vector<2x64xf32>, vector<64x256xf32>, vector<2x256xf32> -> vector<2x256xf32>
    %473 = arith.addf %403, %472 : vector<2x256xf32>
    %474 = vector.extract_strided_slice %473 {offsets = [0, 0], sizes = [2, 192], strides = [1, 1]} : vector<2x256xf32> to vector<2x192xf32>
    %475 = arith.negf %474 : vector<2x192xf32>
    %476 = math.exp %475 : vector<2x192xf32>
    %cst_190 = arith.constant 1.000000e+00 : f32
    %477 = vector.broadcast %cst_190 : f32 to vector<2x192xf32>
    %478 = arith.addf %477, %476 : vector<2x192xf32>
    %479 = arith.divf %477, %478 : vector<2x192xf32>
    %480 = vector.extract_strided_slice %479 {offsets = [0, 0], sizes = [2, 64], strides = [1, 1]} : vector<2x192xf32> to vector<2x64xf32>
    %481 = vector.extract_strided_slice %479 {offsets = [0, 64], sizes = [2, 64], strides = [1, 1]} : vector<2x192xf32> to vector<2x64xf32>
    %482 = vector.extract_strided_slice %479 {offsets = [0, 128], sizes = [2, 64], strides = [1, 1]} : vector<2x192xf32> to vector<2x64xf32>
    %483 = vector.extract_strided_slice %473 {offsets = [0, 192], sizes = [2, 64], strides = [1, 1]} : vector<2x256xf32> to vector<2x64xf32>
    %484 = math.tanh %483 : vector<2x64xf32>
    %485 = arith.mulf %481, %469 : vector<2x64xf32>
    %486 = arith.mulf %480, %484 : vector<2x64xf32>
    %487 = arith.addf %485, %486 : vector<2x64xf32>
    %488 = math.tanh %487 : vector<2x64xf32>
    %489 = arith.mulf %482, %488 : vector<2x64xf32>
    %cst_191 = arith.constant dense<0.000000e+00> : vector<2x256xf32>
    %490 = tpu.matmul %489, %433, %cst_191 {dimension_numbers = #tpu.dot_dimension_numbers<[1], [0], [0], [1], [0, 0, 1, 1], [], []>} : vector<2x64xf32>, vector<64x256xf32>, vector<2x256xf32> -> vector<2x256xf32>
    %491 = arith.addf %432, %490 : vector<2x256xf32>
    %492 = vector.extract_strided_slice %491 {offsets = [0, 0], sizes = [2, 192], strides = [1, 1]} : vector<2x256xf32> to vector<2x192xf32>
    %493 = arith.negf %492 : vector<2x192xf32>
    %494 = math.exp %493 : vector<2x192xf32>
    %cst_192 = arith.constant 1.000000e+00 : f32
    %495 = vector.broadcast %cst_192 : f32 to vector<2x192xf32>
    %496 = arith.addf %495, %494 : vector<2x192xf32>
    %497 = arith.divf %495, %496 : vector<2x192xf32>
    %498 = vector.extract_strided_slice %497 {offsets = [0, 0], sizes = [2, 64], strides = [1, 1]} : vector<2x192xf32> to vector<2x64xf32>
    %499 = vector.extract_strided_slice %497 {offsets = [0, 64], sizes = [2, 64], strides = [1, 1]} : vector<2x192xf32> to vector<2x64xf32>
    %500 = vector.extract_strided_slice %497 {offsets = [0, 128], sizes = [2, 64], strides = [1, 1]} : vector<2x192xf32> to vector<2x64xf32>
    %501 = vector.extract_strided_slice %491 {offsets = [0, 192], sizes = [2, 64], strides = [1, 1]} : vector<2x256xf32> to vector<2x64xf32>
    %502 = math.tanh %501 : vector<2x64xf32>
    %503 = arith.mulf %499, %487 : vector<2x64xf32>
    %504 = arith.mulf %498, %502 : vector<2x64xf32>
    %505 = arith.addf %503, %504 : vector<2x64xf32>
    %506 = math.tanh %505 : vector<2x64xf32>
    %507 = arith.mulf %500, %506 : vector<2x64xf32>
    %c0_193 = arith.constant 0 : index
    %c0_194 = arith.constant 0 : index
    %508 = vector.load %arg8[%c0_193, %c0_194] : memref<64x64xf32, #tpu.memory_space<vmem>>, vector<64x64xf32>
    %cst_195 = arith.constant dense<0.000000e+00> : vector<2x64xf32>
    %509 = tpu.matmul %507, %508, %cst_195 {dimension_numbers = #tpu.dot_dimension_numbers<[1], [0], [0], [1], [0, 0, 1, 1], [], []>} : vector<2x64xf32>, vector<64x64xf32>, vector<2x64xf32> -> vector<2x64xf32>
    %c0_196 = arith.constant 0 : index
    %c0_197 = arith.constant 0 : index
    %510 = vector.load %arg9[%c0_196, %c0_197] : memref<1x64xf32, #tpu.memory_space<vmem>>, vector<1x64xf32>
    %511 = vector.broadcast %510 : vector<1x64xf32> to vector<2x64xf32>
    %512 = arith.addf %509, %511 : vector<2x64xf32>
    %cst_198 = arith.constant 0.000000e+00 : f32
    %513 = vector.broadcast %cst_198 : f32 to vector<2x64xf32>
    %514 = arith.maximumf %512, %513 : vector<2x64xf32>
    %c0_199 = arith.constant 0 : index
    %c0_200 = arith.constant 0 : index
    %515 = vector.load %arg10[%c0_199, %c0_200] : memref<1x64xf32, #tpu.memory_space<vmem>>, vector<1x64xf32>
    %516 = vector.broadcast %515 : vector<1x64xf32> to vector<2x64xf32>
    %517 = arith.mulf %514, %516 : vector<2x64xf32>
    %cst_201 = arith.constant dense<0.000000e+00> : vector<2xf32>
    %518 = vector.multi_reduction <add>, %517, %cst_201 [1] : vector<2x64xf32> to vector<2xf32>
    %519 = vector.shape_cast %518 : vector<2xf32> to vector<2x1xf32>
    %c0_202 = arith.constant 0 : index
    %c0_203 = arith.constant 0 : index
    %520 = vector.load %arg11[%c0_202, %c0_203] : memref<1x1xf32, #tpu.memory_space<vmem>>, vector<1x1xf32>
    %521 = vector.broadcast %520 : vector<1x1xf32> to vector<2x1xf32>
    %522 = arith.addf %519, %521 : vector<2x1xf32>
    %523 = arith.negf %522 : vector<2x1xf32>
    %524 = math.exp %523 : vector<2x1xf32>
    %cst_204 = arith.constant 1.000000e+00 : f32
    %525 = vector.broadcast %cst_204 : f32 to vector<2x1xf32>
    %526 = arith.addf %525, %524 : vector<2x1xf32>
    %527 = arith.divf %525, %526 : vector<2x1xf32>
    %c0_205 = arith.constant 0 : index
    %c0_206 = arith.constant 0 : index
    %528 = vector.load %arg12[%c0_205, %c0_206] : memref<2x1xf32, #tpu.memory_space<vmem>>, vector<2x1xf32>
    tpu.vector_store %arg12[%c0_205, %c0_206], %527 {strides = array<i32>} : memref<2x1xf32, #tpu.memory_space<vmem>>, vector<2x1xf32>,
    return
  }
}

</mosaic_0001>

<bundles_post_ra>
// kernel: _forward.1
= control target key start
LH: loop header
LB: loop body
LE: loop exit
PB: predicated region body
PF: predicated region fallthrough
CT: control target
= control target key end

     0   :  { %v13297_v0 = vmov 3   ;;  %v13305_v1 = vmov 0   ;;  %v13299_v19 = vmov 1   ;;  %v13301_v26 = vmov 2   ;;  %s13284_s0 = inlined_call_operand.vmem [shape: f32[4,128,9], index: 0, kind: input, shape index: {}]   ;;  %s13285_s1 = inlined_call_operand.vmem [shape: f32[9,32], index: 1, kind: input, shape index: {}]   ;;  %s13286_s2 = inlined_call_operand.vmem [shape: f32[1,32], index: 2, kind: input, shape index: {}]   ;;  %s13287_s3 = inlined_call_operand.vmem [shape: f32[9,32,64], index: 3, kind: input, shape index: {}]   ;;  %s13288_s4 = inlined_call_operand.vmem [shape: f32[1,64], index: 4, kind: input, shape index: {}]   ;;  %s13289_s5 = inlined_call_operand.vmem [shape: f32[4,64,256], index: 5, kind: input, shape index: {}]   ;;  %s13290_s6 = inlined_call_operand.vmem [shape: f32[64,256], index: 6, kind: input, shape index: {}]   ;;  %s13291_s7 = inlined_call_operand.vmem [shape: f32[1,256], index: 7, kind: input, shape index: {}]   ;;  %s13292_s8 = inlined_call_operand.vmem [shape: f32[64,64], index: 8, kind: input, shape index: {}]   ;;  %s13293_s9 = inlined_call_operand.vmem [shape: f32[1,64], index: 9, kind: input, shape index: {}]   ;;  %s13294_s10 = inlined_call_operand.vmem [shape: f32[1,64], index: 10, kind: input, shape index: {}]   ;;  %s13295_s11 = inlined_call_operand.<no memory space> [shape: f32[1,1], index: 11, kind: input, shape index: {}]   ;;  %s13296_s12 = inlined_call_operand.vmem [shape: f32[2,1], index: 12, kind: output, shape index: {}]  }
   0x1   :  { %7133 = vset.pattern.permute.xlu0 %v13297_v0  ;;  %7127 = vset.pattern.permute.xlu2 %v13305_v1  ;;  %v7651_v2 = vld [vmem:[%s13284_s0 + $0x20] sm:$0xff]  ;;  %v7656_v3 = vld [vmem:[%s13284_s0 + $0x10] sm:$0xff]  ;;  %v7661_v4 = vld [vmem:[%s13284_s0 + $0x8] sm:$0xff]  ;;  %v13303_v62 = vmov 4   ;;  %vm3821_vm0 = vcmask 261120   ;;  %vm3823_vm1 = vcmask 254976  }
   0x2   :  { %7126 = vset.pattern.permute.xlu1 %v13305_v1  ;;  %84 = vperm.xlu2 %7127, %v7651_v2   ;;  %v7670_v5 = vld [vmem:[%s13284_s0 + $0x28] sm:$0xff]  ;;  %v7675_v6 = vld [vmem:[%s13284_s0 + $0x18] sm:$0xff]  ;;  %v7680_v7 = vld [vmem:[%s13284_s0 + $0x30] sm:$0xff]  ;;  %vm5242_vm2 = vcmask 517120   ;;  %vm5322_vm3 = vcmask 519170   ;;  %vm5401_vm4 = vcmask 521220  }
   0x3   :  { %74 = vperm.xlu1 %7126, %v7656_v3   ;;  %374 = vperm.xlu0 %7133, %v7661_v4   ;;  %v7688_v8 = vld [vmem:[%s13284_s0 + $0x40] sm:$0xff]  ;;  %v7693_v9 = vld [vmem:[%s13284_s0 + $0x38] sm:$0xff]  ;;  %v7698_v10 = vld [vmem:[%s13284_s0 + $0x48] sm:$0xff]  ;;  %vm5480_vm5 = vcmask 523270   ;;  %vm5275_vm6 = vcmask 1041409   ;;  %vm5277_vm7 = vcmask 523264  }
   0x4   :  { %v7706_v11 = vld [vmem:[%s13284_s0 + $0x58] sm:$0xff]  ;;  %v7711_v12 = vld [vmem:[%s13284_s0 + $0x50] sm:$0xff]  ;;  %v7716_v13 = vld [vmem:[%s13284_s0 + $0x60] sm:$0xff] }
   0x5   :  { %v7724_v14 = vld [vmem:[%s13284_s0 + $0x70] sm:$0xff]  ;;  %v7729_v15 = vld [vmem:[%s13284_s0 + $0x68] sm:$0xff]  ;;  %v7734_v16 = vld [vmem:[%s13284_s0 + $0x78] sm:$0xff] }
   0x6   :  { %v7742_v17 = vld [vmem:[%s13284_s0 + $0x88] sm:$0xff]  ;;  %v7747_v18 = vld [vmem:[%s13284_s0] sm:$0xff]  ;;  %v7757_v20 = vld [vmem:[%s13284_s0 + $0xb0] sm:$0xff] }
   0x7   :  { %v7765_v21 = vld [vmem:[%s13284_s0 + $0xc8] sm:$0xff]  ;;  %v7773_v22 = vld [vmem:[%s13284_s0 + $0xe0] sm:$0xff]  ;;  %v7781_v23 = vld [vmem:[%s13284_s0 + $0xf8] sm:$0xff] }
   0x8   :  { %v7789_v24 = vld [vmem:[%s13284_s0 + $0x188] sm:$0xff]  ;;  %v6829_v28 = vld [vmem:[%s13284_s0 + $0x1b0] sm:$0xff]  ;;  %v7879_v48 = vld [vmem:[%s13284_s0 + $0xb8] sm:$0xff] }
   0x9   :  { %v7797_v25 = vld [vmem:[%s13284_s0 + $0x128] sm:$0xff]  ;;  %v7865_v44 = vld [vmem:[%s13284_s0 + $0x90] sm:$0xff] }
   0xa   :  { %89 = vperm.xlu2 %7127, %v7670_v5   ;;  %v7816_v30 = vld [vmem:[%s13284_s0 + $0x1c8] sm:$0xff]  ;;  %v7893_v52 = vld [vmem:[%s13284_s0 + $0xd0] sm:$0xff] }
   0xb   :  { %79 = vperm.xlu1 %7126, %v7675_v6   ;;  %394 = vperm.xlu0 %7133, %v7680_v7   ;;  %v7907_v56 = vld [vmem:[%s13284_s0 + $0xe8] sm:$0xff]  ;;  %v7921_v60 = vld [vmem:[%s13284_s0 + $0x190] sm:$0xff] }
  0x12   :  { %104 = vperm.xlu2 %7127, %v7688_v8  }
  0x13   :  { %99 = vperm.xlu1 %7126, %v7693_v9   ;;  %406 = vperm.xlu0 %7133, %v7698_v10  }
  0x1a   :  { %119 = vperm.xlu2 %7127, %v7706_v11  }
  0x1b   :  { %114 = vperm.xlu1 %7126, %v7711_v12   ;;  %418 = vperm.xlu0 %7133, %v7716_v13  }
  0x22   :  { %134 = vperm.xlu2 %7127, %v7724_v14  }
  0x23   :  { %129 = vperm.xlu1 %7126, %v7729_v15   ;;  %430 = vperm.xlu0 %7133, %v7734_v16  }
  0x2a   :  { %7129 = vset.pattern.permute.xlu2 %v13299_v19 }
  0x2b   :  { %7128 = vset.pattern.permute.xlu1 %v13299_v19  ;;  %1312 = vperm.xlu0 %7133, %v7742_v17  }
  0x2c   :  { %180 = vperm.xlu2 %7129, %v7661_v4   ;;  %176 = vperm.xlu1 %7128, %v7747_v18  }
  0x33   :  { %1332 = vperm.xlu0 %7133, %v7757_v20  }
  0x34   :  { %192 = vperm.xlu2 %7129, %v7651_v2   ;;  %188 = vperm.xlu1 %7128, %v7675_v6  }
  0x3b   :  { %1344 = vperm.xlu0 %7133, %v7765_v21  }
  0x3c   :  { %200 = vperm.xlu2 %7129, %v7680_v7   ;;  %196 = vperm.xlu1 %7128, %v7670_v5  }
  0x43   :  { %1356 = vperm.xlu0 %7133, %v7773_v22  }
  0x44   :  { %212 = vperm.xlu2 %7129, %v7698_v10   ;;  %208 = vperm.xlu1 %7128, %v7688_v8  }
  0x4b   :  { %1368 = vperm.xlu0 %7133, %v7781_v23  }
  0x4c   :  { %224 = vperm.xlu2 %7129, %v7716_v13   ;;  %220 = vperm.xlu1 %7128, %v7706_v11  }
  0x53   :  { %3202 = vperm.xlu0 %7133, %v7789_v24  }
  0x54   :  { %236 = vperm.xlu2 %7129, %v7734_v16   ;;  %232 = vperm.xlu1 %7128, %v7724_v14  }
  0x5b   :  { %2273 = vperm.xlu0 %7133, %v7797_v25  }
  0x5c   :  { %7131 = vset.pattern.permute.xlu2 %v13301_v26  ;;  %7130 = vset.pattern.permute.xlu1 %v13301_v26  ;;  %v7802_v27 = vpop.permute.xlu2 %84 }
  0x5d   :  { %13362 = vst [vmem:[#allocation4_spill] sm:$0xff] %v7802_v27  ;;  %281 = vperm.xlu2 %7131, %v7656_v3   ;;  %277 = vperm.xlu1 %7130, %v7661_v4  }
  0x63   :  { %3222 = vperm.xlu0 %7133, %v6829_v28  }
  0x64   :  { %v7809_v29 = vpop.permute.xlu2 %89 }
  0x65   :  { %289 = vperm.xlu2 %7131, %v7651_v2   ;;  %285 = vperm.xlu1 %7130, %v7675_v6  }
  0x6b   :  { %3234 = vperm.xlu0 %7133, %v7816_v30  }
  0x6c   :  { %v7819_v31 = vpop.permute.xlu2 %104 }
  0x6d   :  { %301 = vperm.xlu2 %7131, %v7693_v9   ;;  %297 = vperm.xlu1 %7130, %v7680_v7  }
  0x73   :  { %7281 = vset.pattern.permute.xlu0 %v13299_v19 }
  0x74   :  { %184 = vperm.xlu0 %7281, %v7656_v3   ;;  %v7825_v32 = vpop.permute.xlu2 %119 }
  0x75   :  { %v7827_v33 = vpop.permute.xlu1 %74  ;;  %313 = vperm.xlu2 %7131, %v7711_v12   ;;  %309 = vperm.xlu1 %7130, %v7698_v10   ;;  %v7831_v34 = vpop.permute.xlu0 %374 }
  0x7c   :  { %204 = vperm.xlu0 %7281, %v7693_v9   ;;  %v7834_v35 = vpop.permute.xlu2 %134 }
  0x7d   :  { %v7836_v36 = vpop.permute.xlu1 %79  ;;  %325 = vperm.xlu2 %7131, %v7729_v15   ;;  %321 = vperm.xlu1 %7130, %v7716_v13   ;;  %v7840_v37 = vpop.permute.xlu0 %394 }
  0x7e   :  { %13363 = vst [vmem:[#allocation5_spill] sm:$0xff] %v7836_v36 }
  0x7f   :  { %13364 = vst [vmem:[#allocation6_spill] sm:$0xff] %v7840_v37 }
  0x84   :  { %216 = vperm.xlu0 %7281, %v7711_v12  }
  0x85   :  { %v7843_v38 = vpop.permute.xlu1 %99  ;;  %7132 = vset.pattern.permute.xlu2 %v13297_v0  ;;  %333 = vperm.xlu1 %7130, %v7734_v16   ;;  %v7847_v39 = vpop.permute.xlu0 %406 }
  0x86   :  { %13365 = vst [vmem:[#allocation7_spill] sm:$0xff] %v7843_v38  ;;  %v7849_v40 = vpop.permute.xlu2 %180  ;;  %370 = vperm.xlu2 %7132, %v7747_v18  }
  0x87   :  { %13366 = vst [vmem:[#allocation8_spill] sm:$0xff] %v7847_v39 }
  0x8c   :  { %228 = vperm.xlu0 %7281, %v7729_v15  }
  0x8d   :  { %v7853_v41 = vpop.permute.xlu1 %114  ;;  %7134 = vset.pattern.permute.xlu1 %v13297_v0  ;;  %v7856_v42 = vpop.permute.xlu0 %418 }
  0x8e   :  { %13367 = vst [vmem:[#allocation9_spill] sm:$0xff] %v7853_v41  ;;  %v7858_v43 = vpop.permute.xlu2 %192  ;;  %382 = vperm.xlu2 %7132, %v7675_v6   ;;  %378 = vperm.xlu1 %7134, %v7656_v3  }
  0x8f   :  { %13368 = vst [vmem:[#allocation10_spill] sm:$0xff] %v7856_v42 }
  0x90   :  { %13369 = vst [vmem:[#allocation11_spill] sm:$0xff] %v7858_v43 }
  0x94   :  { %1124 = vperm.xlu0 %7281, %v7865_v44  }
  0x95   :  { %v7868_v45 = vpop.permute.xlu1 %129  ;;  %v7870_v46 = vpop.permute.xlu0 %430 }
  0x96   :  { %13370 = vst [vmem:[#allocation12_spill] sm:$0xff] %v7868_v45  ;;  %v7872_v47 = vpop.permute.xlu2 %200  ;;  %390 = vperm.xlu2 %7132, %v7670_v5   ;;  %386 = vperm.xlu1 %7134, %v7651_v2  }
  0x97   :  { %13371 = vst [vmem:[#allocation13_spill] sm:$0xff] %v7870_v46 }
  0x98   :  { %13372 = vst [vmem:[#allocation14_spill] sm:$0xff] %v7872_v47 }
  0x9c   :  { %1144 = vperm.xlu0 %7281, %v7879_v48  }
  0x9d   :  { %v7882_v49 = vpop.permute.xlu0 %1312 }
  0x9e   :  { %v7884_v50 = vpop.permute.xlu2 %212  ;;  %402 = vperm.xlu2 %7132, %v7688_v8   ;;  %398 = vperm.xlu1 %7134, %v7693_v9   ;;  %v7888_v51 = vpop.permute.xlu1 %176 }
  0x9f   :  { %13373 = vst [vmem:[#allocation15_spill] sm:$0xff] %v7884_v50 }
  0xa4   :  { %1156 = vperm.xlu0 %7281, %v7893_v52  }
  0xa5   :  { %v7896_v53 = vpop.permute.xlu0 %1332 }
  0xa6   :  { %13374 = vst [vmem:[#allocation16_spill] sm:$0xff] %v7896_v53  ;;  %v7898_v54 = vpop.permute.xlu2 %224  ;;  %414 = vperm.xlu2 %7132, %v7706_v11   ;;  %410 = vperm.xlu1 %7134, %v7711_v12   ;;  %v7902_v55 = vpop.permute.xlu1 %188 }
  0xa7   :  { %13375 = vst [vmem:[#allocation17_spill] sm:$0xff] %v7898_v54 }
  0xa8   :  { %13376 = vst [vmem:[#allocation18_spill] sm:$0xff] %v7902_v55 }
  0xac   :  { %1168 = vperm.xlu0 %7281, %v7907_v56  }
  0xad   :  { %v7910_v57 = vpop.permute.xlu0 %1344 }
  0xae   :  { %13377 = vst [vmem:[#allocation19_spill] sm:$0xff] %v7910_v57  ;;  %v7912_v58 = vpop.permute.xlu2 %236  ;;  %426 = vperm.xlu2 %7132, %v7724_v14   ;;  %422 = vperm.xlu1 %7134, %v7729_v15   ;;  %v7916_v59 = vpop.permute.xlu1 %196  ;;  %v13309_v57 = vmov 5  }
  0xaf   :  { %13378 = vst [vmem:[#allocation20_spill] sm:$0xff] %v7912_v58  ;;  %v13307_v58 = vmov 7  }
  0xb4   :  { %3014 = vperm.xlu0 %7281, %v7921_v60  }
  0xb5   :  { %v7924_v61 = vpop.permute.xlu0 %1356 }
  0xb6   :  { %13379 = vst [vmem:[#allocation21_spill] sm:$0xff] %v7924_v61  ;;  %7136 = vset.pattern.permute.xlu2 %v13303_v62  ;;  %7135 = vset.pattern.permute.xlu1 %v13303_v62  ;;  %v7928_v63 = vpop.permute.xlu1 %208  ;;  %v7946_v62 = vld [vmem:[%s13284_s0 + $0x1d0] sm:$0xff] }
  0xb7   :  { %v7930_v28 = vpop.permute.xlu2 %281  ;;  %471 = vperm.xlu2 %7136, %v7661_v4   ;;  %467 = vperm.xlu1 %7135, %v7747_v18  }
  0xbc   :  { %2081 = vperm.xlu0 %7281, %v7797_v25  }
  0xbd   :  { %v7935_v0 = vpop.permute.xlu0 %1368 }
  0xbe   :  { %13380 = vst [vmem:[#allocation22_spill] sm:$0xff] %v7935_v0  ;;  %v7937_v19 = vpop.permute.xlu1 %220 }
  0xbf   :  { %v7939_v26 = vpop.permute.xlu2 %289  ;;  %483 = vperm.xlu2 %7136, %v7651_v2   ;;  %479 = vperm.xlu1 %7135, %v7675_v6  }
  0xc0   :  { %13381 = vst [vmem:[#allocation23_spill] sm:$0xff] %v7939_v26  ;;  %v13311_v26 = vmov 6  }
  0xc4   :  { %3046 = vperm.xlu0 %7281, %v7946_v62  }
  0xc5   :  { %v7949_v1 = vpop.permute.xlu0 %3202 }
  0xc6   :  { %v7951_v46 = vpop.permute.xlu1 %232 }
  0xc7   :  { %v7953_v0 = vpop.permute.xlu2 %301  ;;  %491 = vperm.xlu2 %7136, %v7680_v7   ;;  %487 = vperm.xlu1 %7135, %v7670_v5  }
  0xc8   :  { %13382 = vst [vmem:[#allocation24_spill] sm:$0xff] %v7953_v0 }
  0xcc   :  { %7290 = vset.pattern.permute.xlu0 %v13307_v58 }
  0xcd   :  { %766 = vperm.xlu0 %7290, %v7656_v3   ;;  %v7959_v38 = vpop.permute.xlu0 %2273 }
  0xce   :  { %13383 = vst [vmem:[#allocation25_spill] sm:$0xff] %v7959_v38 }
  0xcf   :  { %v7961_v45 = vpop.permute.xlu2 %313  ;;  %503 = vperm.xlu2 %7136, %v7698_v10   ;;  %499 = vperm.xlu1 %7135, %v7688_v8   ;;  %v7965_v61 = vpop.permute.xlu1 %277 }
  0xd0   :  { %13384 = vst [vmem:[#allocation26_spill] sm:$0xff] %v7961_v45 }
  0xd5   :  { %786 = vperm.xlu0 %7290, %v7693_v9   ;;  %v7968_v0 = vpop.permute.xlu0 %3222 }
  0xd6   :  { %13385 = vst [vmem:[#allocation27_spill] sm:$0xff] %v7968_v0 }
  0xd7   :  { %v7970_v42 = vpop.permute.xlu2 %325  ;;  %515 = vperm.xlu2 %7136, %v7716_v13   ;;  %511 = vperm.xlu1 %7135, %v7706_v11   ;;  %v7974_v58 = vpop.permute.xlu1 %285 }
  0xd8   :  { %13386 = vst [vmem:[#allocation28_spill] sm:$0xff] %v7970_v42 }
  0xd9   :  { %13387 = vst [vmem:[#allocation29_spill] sm:$0xff] %v7974_v58 }
  0xdd   :  { %798 = vperm.xlu0 %7290, %v7711_v12   ;;  %v7977_v54 = vpop.permute.xlu0 %3234 }
  0xde   :  { %13388 = vst [vmem:[#allocation30_spill] sm:$0xff] %v7977_v54 }
  0xdf   :  { %527 = vperm.xlu2 %7136, %v7734_v16   ;;  %523 = vperm.xlu1 %7135, %v7724_v14   ;;  %v7981_v45 = vpop.permute.xlu1 %297 }
  0xe0   :  { %13389 = vst [vmem:[#allocation31_spill] sm:$0xff] %v7981_v45  ;;  %v7983_v41 = vpop.permute.xlu2 %370 }
  0xe5   :  { %810 = vperm.xlu0 %7290, %v7729_v15  }
  0xe6   :  { %v7986_v42 = vpop.permute.xlu0 %184 }
  0xe7   :  { %7138 = vset.pattern.permute.xlu2 %v13309_v57  ;;  %7137 = vset.pattern.permute.xlu1 %v13309_v57  ;;  %v7990_v39 = vpop.permute.xlu1 %309 }
  0xe8   :  { %13390 = vst [vmem:[#allocation32_spill] sm:$0xff] %v7990_v39  ;;  %572 = vperm.xlu2 %7138, %v7656_v3   ;;  %v7993_v54 = vpop.permute.xlu2 %382  ;;  %568 = vperm.xlu1 %7137, %v7661_v4  }
  0xe9   :  { %13391 = vst [vmem:[#allocation33_spill] sm:$0xff] %v7993_v54 }
  0xed   :  { %1700 = vperm.xlu0 %7290, %v7865_v44  }
  0xee   :  { %v7997_v50 = vpop.permute.xlu0 %204 }
  0xef   :  { %13392 = vst [vmem:[#allocation34_spill] sm:$0xff] %v7997_v50  ;;  %v7999_v0 = vpop.permute.xlu1 %321 }
  0xf0   :  { %13393 = vst [vmem:[#allocation35_spill] sm:$0xff] %v7999_v0  ;;  %580 = vperm.xlu2 %7138, %v7651_v2   ;;  %v8002_v53 = vpop.permute.xlu2 %390  ;;  %576 = vperm.xlu1 %7137, %v7675_v6  }
  0xf5   :  { %1720 = vperm.xlu0 %7290, %v7879_v48  }
  0xf6   :  { %v8006_v57 = vpop.permute.xlu0 %216 }
  0xf7   :  { %13394 = vst [vmem:[#allocation36_spill] sm:$0xff] %v8006_v57  ;;  %v8008_v39 = vpop.permute.xlu1 %333 }
  0xf8   :  { %13395 = vst [vmem:[#allocation37_spill] sm:$0xff] %v8008_v39  ;;  %592 = vperm.xlu2 %7138, %v7693_v9   ;;  %v8011_v37 = vpop.permute.xlu2 %402  ;;  %588 = vperm.xlu1 %7137, %v7680_v7  }
  0xfd   :  { %1732 = vperm.xlu0 %7290, %v7893_v52  }
  0xfe   :  { %v8015_v50 = vpop.permute.xlu0 %228 }
  0xff   :  { %13396 = vst [vmem:[#allocation38_spill] sm:$0xff] %v8015_v50  ;;  %v8035_v50 = vld [vmem:[%s13284_s0 + $0x100] sm:$0xff] }
 0x100   :  { %604 = vperm.xlu2 %7138, %v7711_v12   ;;  %v8018_v0 = vpop.permute.xlu2 %414  ;;  %600 = vperm.xlu1 %7137, %v7698_v10   ;;  %v8021_v45 = vpop.permute.xlu1 %378 }
 0x105   :  { %1744 = vperm.xlu0 %7290, %v7907_v56  }
 0x106   :  { %v8024_v39 = vpop.permute.xlu0 %1124 }
 0x108   :  { %616 = vperm.xlu2 %7138, %v7729_v15   ;;  %v8027_v57 = vpop.permute.xlu2 %426  ;;  %612 = vperm.xlu1 %7137, %v7716_v13   ;;  %v8030_v47 = vpop.permute.xlu1 %386 }
 0x109   :  { %13397 = vst [vmem:[#allocation39_spill] sm:$0xff] %v8030_v47 }
 0x10d   :  { %2637 = vperm.xlu0 %7290, %v8035_v50  }
 0x10e   :  { %v8038_v38 = vpop.permute.xlu0 %1144 }
 0x10f   :  { %13398 = vst [vmem:[#allocation40_spill] sm:$0xff] %v8038_v38 }
 0x110   :  { %7139 = vset.pattern.permute.xlu2 %v13311_v26  ;;  %624 = vperm.xlu1 %7137, %v7734_v16   ;;  %v8042_v27 = vpop.permute.xlu1 %398 }
 0x111   :  { %13399 = vst [vmem:[#allocation41_spill] sm:$0xff] %v8042_v27  ;;  %661 = vperm.xlu2 %7139, %v7747_v18   ;;  %v8045_v43 = vpop.permute.xlu2 %471 }
 0x112   :  { %13400 = vst [vmem:[#allocation42_spill] sm:$0xff] %v8045_v43 }
 0x115   :  { %3586 = vperm.xlu0 %7290, %v7789_v24  }
 0x116   :  { %v8048_v47 = vpop.permute.xlu0 %1156 }
 0x117   :  { %13401 = vst [vmem:[#allocation43_spill] sm:$0xff] %v8048_v47 }
 0x118   :  { %7140 = vset.pattern.permute.xlu1 %v13311_v26  ;;  %v8051_v54 = vpop.permute.xlu1 %410  ;;  %v8069_v26 = vld [vmem:[%s13284_s0 + $0x140] sm:$0xff] }
 0x119   :  { %13402 = vst [vmem:[#allocation44_spill] sm:$0xff] %v8051_v54  ;;  %673 = vperm.xlu2 %7139, %v7675_v6   ;;  %v8054_v38 = vpop.permute.xlu2 %483  ;;  %669 = vperm.xlu1 %7140, %v7656_v3  }
 0x11a   :  { %13403 = vst [vmem:[#allocation45_spill] sm:$0xff] %v8054_v38  ;;  %v13413_v38 = vmov 6  }
 0x11d   :  { %2657 = vperm.xlu0 %7290, %v7797_v25  }
 0x11e   :  { %v8058_v27 = vpop.permute.xlu0 %1168 }
 0x11f   :  { %13404 = vst [vmem:[#allocation46_spill] sm:$0xff] %v8058_v27 }
 0x120   :  { %v8060_v58 = vpop.permute.xlu1 %422 }
 0x121   :  { %13405 = vst [vmem:[#allocation47_spill] sm:$0xff] %v8060_v58  ;;  %681 = vperm.xlu2 %7139, %v7670_v5   ;;  %v8063_v36 = vpop.permute.xlu2 %491  ;;  %677 = vperm.xlu1 %7140, %v7651_v2  }
 0x122   :  { %13406 = vst [vmem:[#allocation48_spill] sm:$0xff] %v8063_v36 }
 0x125   :  { %2669 = vperm.xlu0 %7290, %v8069_v26  }
 0x126   :  { %v8072_v47 = vpop.permute.xlu0 %3014 }
 0x127   :  { %13407 = vst [vmem:[#allocation49_spill] sm:$0xff] %v8072_v47 }
 0x129   :  { %693 = vperm.xlu2 %7139, %v7688_v8   ;;  %v8075_v25 = vpop.permute.xlu2 %503  ;;  %689 = vperm.xlu1 %7140, %v7693_v9   ;;  %v8078_v27 = vpop.permute.xlu1 %467 }
 0x12a   :  { %13408 = vst [vmem:[#allocation50_spill] sm:$0xff] %v8075_v25 }
 0x12b   :  { %13409 = vst [vmem:[#allocation51_spill] sm:$0xff] %v8078_v27  ;;  %v13418_v27 = vmov 7  }
 0x12d   :  { %3618 = vperm.xlu0 %7290, %v7816_v30  }
 0x12e   :  { %v8081_v58 = vpop.permute.xlu0 %2081 }
 0x12f   :  { %13410 = vst [vmem:[#allocation52_spill] sm:$0xff] %v8081_v58 }
 0x131   :  { %705 = vperm.xlu2 %7139, %v7706_v11   ;;  %v8084_v54 = vpop.permute.xlu2 %515  ;;  %701 = vperm.xlu1 %7140, %v7711_v12   ;;  %v8087_v36 = vpop.permute.xlu1 %479 }
 0x132   :  { %13411 = vst [vmem:[#allocation53_spill] sm:$0xff] %v8084_v54 }
 0x133   :  { %13412 = vst [vmem:[#allocation54_spill] sm:$0xff] %v8087_v36 }
 0x135   :  { %7299 = vset.pattern.permute.xlu0 %v13413_v38 }
 0x136   :  { %665 = vperm.xlu0 %7299, %v7661_v4   ;;  %v8091_v25 = vpop.permute.xlu0 %3046 }
 0x137   :  { %13414 = vst [vmem:[#allocation55_spill] sm:$0xff] %v8091_v25 }
 0x139   :  { %717 = vperm.xlu2 %7139, %v7724_v14   ;;  %v8094_v55 = vpop.permute.xlu2 %527  ;;  %713 = vperm.xlu1 %7140, %v7729_v15   ;;  %v8097_v58 = vpop.permute.xlu1 %487 }
 0x13a   :  { %13415 = vst [vmem:[#allocation56_spill] sm:$0xff] %v8094_v55 }
 0x13b   :  { %13416 = vst [vmem:[#allocation57_spill] sm:$0xff] %v8097_v58 }
 0x13e   :  { %685 = vperm.xlu0 %7299, %v7680_v7  }
 0x13f   :  { %v8100_v54 = vpop.permute.xlu0 %766 }
 0x140   :  { %13417 = vst [vmem:[#allocation58_spill] sm:$0xff] %v8100_v54 }
 0x141   :  { %7142 = vset.pattern.permute.xlu2 %v13418_v27  ;;  %7141 = vset.pattern.permute.xlu1 %v13418_v27  ;;  %v8104_v36 = vpop.permute.xlu1 %499 }
 0x142   :  { %13419 = vst [vmem:[#allocation59_spill] sm:$0xff] %v8104_v36  ;;  %762 = vperm.xlu2 %7142, %v7661_v4   ;;  %v8107_v25 = vpop.permute.xlu2 %572  ;;  %758 = vperm.xlu1 %7141, %v7747_v18  }
 0x143   :  { %13420 = vst [vmem:[#allocation60_spill] sm:$0xff] %v8107_v25 }
 0x146   :  { %697 = vperm.xlu0 %7299, %v7698_v10  }
 0x147   :  { %v8111_v55 = vpop.permute.xlu0 %786 }
 0x148   :  { %13421 = vst [vmem:[#allocation61_spill] sm:$0xff] %v8111_v55 }
 0x149   :  { %v8113_v58 = vpop.permute.xlu1 %511 }
 0x14a   :  { %13422 = vst [vmem:[#allocation62_spill] sm:$0xff] %v8113_v58  ;;  %774 = vperm.xlu2 %7142, %v7651_v2   ;;  %v8116_v54 = vpop.permute.xlu2 %580  ;;  %770 = vperm.xlu1 %7141, %v7675_v6  }
 0x14b   :  { %13423 = vst [vmem:[#allocation63_spill] sm:$0xff] %v8116_v54 }
 0x14e   :  { %709 = vperm.xlu0 %7299, %v7716_v13  }
 0x14f   :  { %v8120_v36 = vpop.permute.xlu0 %798 }
 0x150   :  { %13424 = vst [vmem:[#allocation64_spill] sm:$0xff] %v8120_v36 }
 0x151   :  { %v8122_v47 = vpop.permute.xlu1 %523 }
 0x152   :  { %13425 = vst [vmem:[#allocation65_spill] sm:$0xff] %v8122_v47  ;;  %782 = vperm.xlu2 %7142, %v7680_v7   ;;  %v8125_v25 = vpop.permute.xlu2 %592  ;;  %778 = vperm.xlu1 %7141, %v7670_v5  }
 0x153   :  { %13426 = vst [vmem:[#allocation66_spill] sm:$0xff] %v8125_v25 }
 0x156   :  { %721 = vperm.xlu0 %7299, %v7734_v16  }
 0x157   :  { %v8129_v55 = vpop.permute.xlu0 %810 }
 0x158   :  { %13427 = vst [vmem:[#allocation67_spill] sm:$0xff] %v8129_v55 }
 0x15a   :  { %794 = vperm.xlu2 %7142, %v7698_v10   ;;  %v8132_v54 = vpop.permute.xlu2 %604  ;;  %790 = vperm.xlu1 %7141, %v7688_v8   ;;  %v8135_v58 = vpop.permute.xlu1 %568 }
 0x15b   :  { %13428 = vst [vmem:[#allocation68_spill] sm:$0xff] %v8132_v54 }
 0x15c   :  { %13429 = vst [vmem:[#allocation69_spill] sm:$0xff] %v8135_v58 }
 0x15e   :  { %1600 = vperm.xlu0 %7299, %v7742_v17  }
 0x15f   :  { %v8138_v36 = vpop.permute.xlu0 %1700 }
 0x160   :  { %13430 = vst [vmem:[#allocation70_spill] sm:$0xff] %v8138_v36 }
 0x162   :  { %806 = vperm.xlu2 %7142, %v7716_v13   ;;  %v8141_v25 = vpop.permute.xlu2 %616  ;;  %802 = vperm.xlu1 %7141, %v7706_v11   ;;  %v8144_v47 = vpop.permute.xlu1 %576 }
 0x163   :  { %13431 = vst [vmem:[#allocation71_spill] sm:$0xff] %v8141_v25  ;;  %v13313_v25 = vmov 8  }
 0x164   :  { %13432 = vst [vmem:[#allocation72_spill] sm:$0xff] %v8144_v47 }
 0x166   :  { %1620 = vperm.xlu0 %7299, %v7757_v20  }
 0x167   :  { %v8147_v55 = vpop.permute.xlu0 %1720 }
 0x168   :  { %13433 = vst [vmem:[#allocation73_spill] sm:$0xff] %v8147_v55 }
 0x16a   :  { %818 = vperm.xlu2 %7142, %v7734_v16   ;;  %814 = vperm.xlu1 %7141, %v7724_v14   ;;  %v8151_v54 = vpop.permute.xlu1 %588 }
 0x16b   :  { %13434 = vst [vmem:[#allocation74_spill] sm:$0xff] %v8151_v54  ;;  %v8153_v58 = vpop.permute.xlu2 %661 }
 0x16c   :  { %13435 = vst [vmem:[#allocation75_spill] sm:$0xff] %v8153_v58 }
 0x16e   :  { %1632 = vperm.xlu0 %7299, %v7765_v21  }
 0x16f   :  { %v8156_v36 = vpop.permute.xlu0 %1732 }
 0x170   :  { %13436 = vst [vmem:[#allocation76_spill] sm:$0xff] %v8156_v36 }
 0x172   :  { %7144 = vset.pattern.permute.xlu2 %v13313_v25  ;;  %7143 = vset.pattern.permute.xlu1 %v13313_v25  ;;  %v8160_v47 = vpop.permute.xlu1 %600 }
 0x173   :  { %13437 = vst [vmem:[#allocation77_spill] sm:$0xff] %v8160_v47  ;;  %863 = vperm.xlu2 %7144, %v7656_v3   ;;  %v8163_v55 = vpop.permute.xlu2 %673  ;;  %859 = vperm.xlu1 %7143, %v7661_v4  }
 0x174   :  { %13438 = vst [vmem:[#allocation78_spill] sm:$0xff] %v8163_v55 }
 0x176   :  { %1644 = vperm.xlu0 %7299, %v7773_v22  }
 0x177   :  { %v8167_v54 = vpop.permute.xlu0 %1744 }
 0x178   :  { %13439 = vst [vmem:[#allocation79_spill] sm:$0xff] %v8167_v54 }
 0x17a   :  { %v8169_v58 = vpop.permute.xlu1 %612 }
 0x17b   :  { %13440 = vst [vmem:[#allocation80_spill] sm:$0xff] %v8169_v58  ;;  %871 = vperm.xlu2 %7144, %v7651_v2   ;;  %v8172_v36 = vpop.permute.xlu2 %681  ;;  %867 = vperm.xlu1 %7143, %v7675_v6  }
 0x17c   :  { %13441 = vst [vmem:[#allocation81_spill] sm:$0xff] %v8172_v36 }
 0x17e   :  { %1656 = vperm.xlu0 %7299, %v7781_v23  }
 0x17f   :  { %v8176_v25 = vpop.permute.xlu0 %2637 }
 0x180   :  { %13442 = vst [vmem:[#allocation82_spill] sm:$0xff] %v8176_v25 }
 0x182   :  { %v8178_v47 = vpop.permute.xlu1 %624 }
 0x183   :  { %13443 = vst [vmem:[#allocation83_spill] sm:$0xff] %v8178_v47  ;;  %883 = vperm.xlu2 %7144, %v7693_v9   ;;  %v8181_v4 = vpop.permute.xlu2 %693  ;;  %879 = vperm.xlu1 %7143, %v7680_v7   ;;  %v8196_v47 = vld [vmem:[%s13284_s0 + $0x120] sm:$0xff] }
 0x184   :  { %13444 = vst [vmem:[#allocation84_spill] sm:$0xff] %v8181_v4  ;;  %v8267_v4 = vld [vmem:[%s13284_s0 + $0xc0] sm:$0xff] }
 0x186   :  { %3494 = vperm.xlu0 %7299, %v7921_v60  }
 0x187   :  { %v8185_v54 = vpop.permute.xlu0 %3586 }
 0x188   :  { %13445 = vst [vmem:[#allocation85_spill] sm:$0xff] %v8185_v54 }
 0x18b   :  { %895 = vperm.xlu2 %7144, %v7711_v12   ;;  %v8188_v2 = vpop.permute.xlu2 %705  ;;  %891 = vperm.xlu1 %7143, %v7698_v10   ;;  %v8191_v6 = vpop.permute.xlu1 %669  ;;  %v6813_v10 = vld [vmem:[%s13284_s0 + $0x130] sm:$0xff] }
 0x18c   :  { %13446 = vst [vmem:[#allocation86_spill] sm:$0xff] %v8188_v2 }
 0x18d   :  { %13447 = vst [vmem:[#allocation87_spill] sm:$0xff] %v8191_v6  ;;  %v8215_v6 = vld [vmem:[%s13284_s0 + $0x80] sm:$0xff] }
 0x18e   :  { %2557 = vperm.xlu0 %7299, %v8196_v47  }
 0x18f   :  { %v8199_v7 = vpop.permute.xlu0 %2657 }
 0x190   :  { %13448 = vst [vmem:[#allocation88_spill] sm:$0xff] %v8199_v7  ;;  %v13452_v7 = vmov 0  }
 0x193   :  { %907 = vperm.xlu2 %7144, %v7729_v15   ;;  %v8202_v58 = vpop.permute.xlu2 %717  ;;  %903 = vperm.xlu1 %7143, %v7716_v13   ;;  %v8205_v55 = vpop.permute.xlu1 %677 }
 0x194   :  { %13449 = vst [vmem:[#allocation89_spill] sm:$0xff] %v8202_v58 }
 0x195   :  { %13450 = vst [vmem:[#allocation90_spill] sm:$0xff] %v8205_v55 }
 0x196   :  { %2565 = vperm.xlu0 %7299, %v6813_v10  }
 0x197   :  { %v8210_v54 = vpop.permute.xlu0 %2669 }
 0x198   :  { %13451 = vst [vmem:[#allocation91_spill] sm:$0xff] %v8210_v54  ;;  %v8230_v54 = vld [vmem:[%s13284_s0 + $0x98] sm:$0xff] }
 0x19b   :  { %7145 = vset.pattern.permute.xlu2 %v13452_v7  ;;  %915 = vperm.xlu1 %7143, %v7734_v16   ;;  %v8219_v58 = vpop.permute.xlu1 %689  ;;  %v6818_v16 = vld [vmem:[%s13284_s0 + $0x158] sm:$0xff] }
 0x19c   :  { %13453 = vst [vmem:[#allocation92_spill] sm:$0xff] %v8219_v58  ;;  %1005 = vperm.xlu2 %7145, %v8215_v6   ;;  %v8222_v13 = vpop.permute.xlu2 %762 }
 0x19d   :  { %13454 = vst [vmem:[#allocation93_spill] sm:$0xff] %v8222_v13  ;;  %v8247_v13 = vld [vmem:[%s13284_s0 + $0xa8] sm:$0xff] }
 0x19e   :  { %3526 = vperm.xlu0 %7299, %v7946_v62  }
 0x19f   :  { %v8225_v10 = vpop.permute.xlu0 %3618 }
 0x1a0   :  { %13455 = vst [vmem:[#allocation94_spill] sm:$0xff] %v8225_v10 }
 0x1a3   :  { %7146 = vset.pattern.permute.xlu1 %v13452_v7  ;;  %v8233_v55 = vpop.permute.xlu1 %701 }
 0x1a4   :  { %13456 = vst [vmem:[#allocation95_spill] sm:$0xff] %v8233_v55  ;;  %1020 = vperm.xlu2 %7145, %v8230_v54   ;;  %v8239_v58 = vpop.permute.xlu2 %774  ;;  %1015 = vperm.xlu1 %7146, %v7865_v44   ;;  %v8252_v55 = vld [vmem:[%s13284_s0 + $0xa0] sm:$0xff] }
 0x1a5   :  { %13457 = vst [vmem:[#allocation96_spill] sm:$0xff] %v8239_v58 }
 0x1a6   :  { %2585 = vperm.xlu0 %7299, %v6818_v16   ;;  %v13461_v16 = vmov 2  }
 0x1a8   :  { %v8242_v10 = vpop.permute.xlu0 %665 }
 0x1a9   :  { %13458 = vst [vmem:[#allocation97_spill] sm:$0xff] %v8242_v10 }
 0x1ab   :  { %v8254_v2 = vpop.permute.xlu1 %713 }
 0x1ac   :  { %13459 = vst [vmem:[#allocation98_spill] sm:$0xff] %v8254_v2  ;;  %1030 = vperm.xlu2 %7145, %v8247_v13   ;;  %v8257_v58 = vpop.permute.xlu2 %782  ;;  %1025 = vperm.xlu1 %7146, %v8252_v55  }
 0x1ad   :  { %13460 = vst [vmem:[#allocation99_spill] sm:$0xff] %v8257_v58 }
 0x1ae   :  { %7322 = vset.pattern.permute.xlu0 %v13461_v16 }
 0x1af   :  { %273 = vperm.xlu0 %7322, %v7747_v18   ;;  %v8281_v18 = vld [vmem:[%s13284_s0 + $0xd8] sm:$0xff] }
 0x1b0   :  { %v8262_v10 = vpop.permute.xlu0 %685 }
 0x1b1   :  { %13462 = vst [vmem:[#allocation100_spill] sm:$0xff] %v8262_v10 }
 0x1b4   :  { %1045 = vperm.xlu2 %7145, %v8267_v4   ;;  %v8270_v2 = vpop.permute.xlu2 %794  ;;  %1040 = vperm.xlu1 %7146, %v7879_v48   ;;  %v8273_v58 = vpop.permute.xlu1 %758 }
 0x1b5   :  { %13463 = vst [vmem:[#allocation101_spill] sm:$0xff] %v8270_v2 }
 0x1b6   :  { %13464 = vst [vmem:[#allocation102_spill] sm:$0xff] %v8273_v58 }
 0x1b7   :  { %293 = vperm.xlu0 %7322, %v7670_v5   ;;  %v8295_v5 = vld [vmem:[%s13284_s0 + $0xf0] sm:$0xff] }
 0x1b8   :  { %v8276_v25 = vpop.permute.xlu0 %697 }
 0x1b9   :  { %13465 = vst [vmem:[#allocation103_spill] sm:$0xff] %v8276_v25 }
 0x1bc   :  { %1060 = vperm.xlu2 %7145, %v8281_v18   ;;  %v8284_v10 = vpop.permute.xlu2 %806  ;;  %1055 = vperm.xlu1 %7146, %v7893_v52   ;;  %v8287_v2 = vpop.permute.xlu1 %770 }
 0x1bd   :  { %13466 = vst [vmem:[#allocation104_spill] sm:$0xff] %v8284_v10 }
 0x1be   :  { %13467 = vst [vmem:[#allocation105_spill] sm:$0xff] %v8287_v2 }
 0x1bf   :  { %305 = vperm.xlu0 %7322, %v7688_v8   ;;  %v13472_v8 = vmov 1  }
 0x1c0   :  { %v8290_v58 = vpop.permute.xlu0 %709 }
 0x1c1   :  { %13468 = vst [vmem:[#allocation106_spill] sm:$0xff] %v8290_v58 }
 0x1c4   :  { %1075 = vperm.xlu2 %7145, %v8295_v5   ;;  %v8298_v25 = vpop.permute.xlu2 %818  ;;  %1070 = vperm.xlu1 %7146, %v7907_v56   ;;  %v8301_v10 = vpop.permute.xlu1 %778 }
 0x1c5   :  { %13469 = vst [vmem:[#allocation107_spill] sm:$0xff] %v8298_v25 }
 0x1c6   :  { %13470 = vst [vmem:[#allocation108_spill] sm:$0xff] %v8301_v10 }
 0x1c7   :  { %317 = vperm.xlu0 %7322, %v7706_v11  }
 0x1c8   :  { %v8304_v2 = vpop.permute.xlu0 %721 }
 0x1c9   :  { %13471 = vst [vmem:[#allocation109_spill] sm:$0xff] %v8304_v2 }
 0x1cc   :  { %7148 = vset.pattern.permute.xlu2 %v13472_v8  ;;  %7147 = vset.pattern.permute.xlu1 %v13472_v8  ;;  %v8308_v58 = vpop.permute.xlu1 %790 }
 0x1cd   :  { %13473 = vst [vmem:[#allocation110_spill] sm:$0xff] %v8308_v58  ;;  %1120 = vperm.xlu2 %7148, %v7742_v17   ;;  %v8311_v36 = vpop.permute.xlu2 %863  ;;  %1116 = vperm.xlu1 %7147, %v8215_v6  }
 0x1ce   :  { %13474 = vst [vmem:[#allocation111_spill] sm:$0xff] %v8311_v36 }
 0x1cf   :  { %329 = vperm.xlu0 %7322, %v7724_v14  }
 0x1d0   :  { %v8315_v25 = vpop.permute.xlu0 %1600 }
 0x1d1   :  { %13475 = vst [vmem:[#allocation112_spill] sm:$0xff] %v8315_v25  ;;  %v13514_v25 = vmov 4  }
 0x1d4   :  { %v8317_v10 = vpop.permute.xlu1 %802 }
 0x1d5   :  { %13476 = vst [vmem:[#allocation113_spill] sm:$0xff] %v8317_v10  ;;  %1132 = vperm.xlu2 %7148, %v8252_v55   ;;  %v8320_v11 = vpop.permute.xlu2 %871  ;;  %1128 = vperm.xlu1 %7147, %v8230_v54  }
 0x1d6   :  { %13477 = vst [vmem:[#allocation114_spill] sm:$0xff] %v8320_v11 }
 0x1d7   :  { %1212 = vperm.xlu0 %7322, %v8215_v6  }
 0x1d8   :  { %v8324_v2 = vpop.permute.xlu0 %1620 }
 0x1d9   :  { %13478 = vst [vmem:[#allocation115_spill] sm:$0xff] %v8324_v2 }
 0x1dc   :  { %v8326_v58 = vpop.permute.xlu1 %814 }
 0x1dd   :  { %13479 = vst [vmem:[#allocation116_spill] sm:$0xff] %v8326_v58  ;;  %1140 = vperm.xlu2 %7148, %v7757_v20   ;;  %v8329_v36 = vpop.permute.xlu2 %883  ;;  %1136 = vperm.xlu1 %7147, %v8247_v13  }
 0x1de   :  { %13480 = vst [vmem:[#allocation117_spill] sm:$0xff] %v8329_v36 }
 0x1df   :  { %1232 = vperm.xlu0 %7322, %v8247_v13  }
 0x1e0   :  { %v8333_v14 = vpop.permute.xlu0 %1632 }
 0x1e1   :  { %13481 = vst [vmem:[#allocation118_spill] sm:$0xff] %v8333_v14 }
 0x1e5   :  { %1152 = vperm.xlu2 %7148, %v7765_v21   ;;  %v8336_v11 = vpop.permute.xlu2 %895  ;;  %1148 = vperm.xlu1 %7147, %v8267_v4   ;;  %v8339_v10 = vpop.permute.xlu1 %859 }
 0x1e6   :  { %13482 = vst [vmem:[#allocation119_spill] sm:$0xff] %v8336_v11 }
 0x1e7   :  { %13483 = vst [vmem:[#allocation120_spill] sm:$0xff] %v8339_v10  ;;  %1244 = vperm.xlu0 %7322, %v8267_v4  }
 0x1e8   :  { %v8342_v2 = vpop.permute.xlu0 %1644 }
 0x1e9   :  { %13484 = vst [vmem:[#allocation121_spill] sm:$0xff] %v8342_v2 }
 0x1ed   :  { %1164 = vperm.xlu2 %7148, %v7773_v22   ;;  %v8345_v36 = vpop.permute.xlu2 %907  ;;  %1160 = vperm.xlu1 %7147, %v8281_v18   ;;  %v8348_v58 = vpop.permute.xlu1 %867 }
 0x1ee   :  { %13485 = vst [vmem:[#allocation122_spill] sm:$0xff] %v8345_v36 }
 0x1ef   :  { %13486 = vst [vmem:[#allocation123_spill] sm:$0xff] %v8348_v58  ;;  %1256 = vperm.xlu0 %7322, %v8281_v18  }
 0x1f0   :  { %v8351_v14 = vpop.permute.xlu0 %1656 }
 0x1f1   :  { %13487 = vst [vmem:[#allocation124_spill] sm:$0xff] %v8351_v14 }
 0x1f5   :  { %1176 = vperm.xlu2 %7148, %v7781_v23   ;;  %1172 = vperm.xlu1 %7147, %v8295_v5   ;;  %v8355_v11 = vpop.permute.xlu1 %879 }
 0x1f6   :  { %13488 = vst [vmem:[#allocation125_spill] sm:$0xff] %v8355_v11  ;;  %v8357_v10 = vpop.permute.xlu2 %1005 }
 0x1f7   :  { %13489 = vst [vmem:[#allocation126_spill] sm:$0xff] %v8357_v10  ;;  %1268 = vperm.xlu0 %7322, %v8295_v5  }
 0x1f8   :  { %v8360_v2 = vpop.permute.xlu0 %3494 }
 0x1f9   :  { %13490 = vst [vmem:[#allocation127_spill] sm:$0xff] %v8360_v2 }
 0x1fd   :  { %7150 = vset.pattern.permute.xlu2 %v13461_v16  ;;  %7149 = vset.pattern.permute.xlu1 %v13461_v16  ;;  %v8364_v36 = vpop.permute.xlu1 %891 }
 0x1fe   :  { %13491 = vst [vmem:[#allocation128_spill] sm:$0xff] %v8364_v36  ;;  %1220 = vperm.xlu2 %7150, %v7865_v44   ;;  %v8367_v14 = vpop.permute.xlu2 %1020  ;;  %1216 = vperm.xlu1 %7149, %v7742_v17  }
 0x1ff   :  { %13492 = vst [vmem:[#allocation129_spill] sm:$0xff] %v8367_v14  ;;  %2157 = vperm.xlu0 %7322, %v8035_v50  }
 0x200   :  { %v8371_v11 = vpop.permute.xlu0 %2557 }
 0x201   :  { %13493 = vst [vmem:[#allocation130_spill] sm:$0xff] %v8371_v11  ;;  %v13506_v11 = vmov 3  }
 0x205   :  { %v8373_v58 = vpop.permute.xlu1 %903 }
 0x206   :  { %13494 = vst [vmem:[#allocation131_spill] sm:$0xff] %v8373_v58  ;;  %1228 = vperm.xlu2 %7150, %v8252_v55   ;;  %v8376_v2 = vpop.permute.xlu2 %1030  ;;  %1224 = vperm.xlu1 %7149, %v8230_v54  }
 0x207   :  { %13495 = vst [vmem:[#allocation132_spill] sm:$0xff] %v8376_v2  ;;  %3110 = vperm.xlu0 %7322, %v7921_v60  }
 0x208   :  { %v8380_v36 = vpop.permute.xlu0 %2565 }
 0x209   :  { %13496 = vst [vmem:[#allocation133_spill] sm:$0xff] %v8380_v36 }
 0x20d   :  { %v8382_v10 = vpop.permute.xlu1 %915 }
 0x20e   :  { %13497 = vst [vmem:[#allocation134_spill] sm:$0xff] %v8382_v10  ;;  %1240 = vperm.xlu2 %7150, %v7879_v48   ;;  %v8385_v14 = vpop.permute.xlu2 %1045  ;;  %1236 = vperm.xlu1 %7149, %v7757_v20  }
 0x20f   :  { %13498 = vst [vmem:[#allocation135_spill] sm:$0xff] %v8385_v14  ;;  %2173 = vperm.xlu0 %7322, %v8196_v47  }
 0x210   :  { %v8389_v58 = vpop.permute.xlu0 %3526 }
 0x211   :  { %13499 = vst [vmem:[#allocation136_spill] sm:$0xff] %v8389_v58 }
 0x216   :  { %1252 = vperm.xlu2 %7150, %v7893_v52   ;;  %v8392_v2 = vpop.permute.xlu2 %1060  ;;  %1248 = vperm.xlu1 %7149, %v7765_v21   ;;  %v8395_v60 = vpop.permute.xlu1 %1015 }
 0x217   :  { %13500 = vst [vmem:[#allocation137_spill] sm:$0xff] %v8392_v2  ;;  %2189 = vperm.xlu0 %7322, %v8069_v26   ;;  %v8412_v2 = vld [vmem:[%s13284_s0 + $0x170] sm:$0xff] }
 0x218   :  { %13501 = vst [vmem:[#allocation138_spill] sm:$0xff] %v8395_v60  ;;  %v8398_v10 = vpop.permute.xlu0 %2585 }
 0x219   :  { %13502 = vst [vmem:[#allocation139_spill] sm:$0xff] %v8398_v10 }
 0x21e   :  { %1264 = vperm.xlu2 %7150, %v7907_v56   ;;  %v8401_v14 = vpop.permute.xlu2 %1075  ;;  %1260 = vperm.xlu1 %7149, %v7773_v22   ;;  %v8404_v36 = vpop.permute.xlu1 %1025 }
 0x21f   :  { %13503 = vst [vmem:[#allocation140_spill] sm:$0xff] %v8401_v14  ;;  %3142 = vperm.xlu0 %7322, %v7946_v62  }
 0x220   :  { %13504 = vst [vmem:[#allocation141_spill] sm:$0xff] %v8404_v36  ;;  %v8427_v36 = vld [vmem:[%s13284_s0 + $0x1e0] sm:$0xff] }
 0x221   :  { %v8407_v58 = vpop.permute.xlu0 %273 }
 0x222   :  { %13505 = vst [vmem:[#allocation142_spill] sm:$0xff] %v8407_v58 }
 0x226   :  { %7151 = vset.pattern.permute.xlu2 %v13506_v11  ;;  %1272 = vperm.xlu1 %7149, %v7781_v23   ;;  %v8416_v10 = vpop.permute.xlu1 %1040 }
 0x227   :  { %13507 = vst [vmem:[#allocation143_spill] sm:$0xff] %v8416_v10  ;;  %2213 = vperm.xlu0 %7322, %v8412_v2   ;;  %1308 = vperm.xlu2 %7151, %v8215_v6   ;;  %v8420_v14 = vpop.permute.xlu2 %1120 }
 0x228   :  { %13508 = vst [vmem:[#allocation144_spill] sm:$0xff] %v8420_v14 }
 0x229   :  { %v8422_v62 = vpop.permute.xlu0 %293 }
 0x22a   :  { %13509 = vst [vmem:[#allocation145_spill] sm:$0xff] %v8422_v62 }
 0x22e   :  { %7152 = vset.pattern.permute.xlu1 %v13506_v11  ;;  %v8430_v58 = vpop.permute.xlu1 %1055 }
 0x22f   :  { %13510 = vst [vmem:[#allocation146_spill] sm:$0xff] %v8430_v58  ;;  %3150 = vperm.xlu0 %7322, %v8427_v36   ;;  %1320 = vperm.xlu2 %7151, %v8230_v54   ;;  %v8434_v10 = vpop.permute.xlu2 %1132 }
 0x230   :  { %13511 = vst [vmem:[#allocation147_spill] sm:$0xff] %v8434_v10  ;;  %1316 = vperm.xlu1 %7152, %v7865_v44  }
 0x231   :  { %v8437_v14 = vpop.permute.xlu0 %305 }
 0x232   :  { %13512 = vst [vmem:[#allocation148_spill] sm:$0xff] %v8437_v14 }
 0x236   :  { %v8439_v60 = vpop.permute.xlu1 %1070 }
 0x237   :  { %13513 = vst [vmem:[#allocation149_spill] sm:$0xff] %v8439_v60  ;;  %7331 = vset.pattern.permute.xlu0 %v13514_v25  ;;  %1328 = vperm.xlu2 %7151, %v8247_v13   ;;  %v8443_v62 = vpop.permute.xlu2 %1140 }
 0x238   :  { %13515 = vst [vmem:[#allocation150_spill] sm:$0xff] %v8443_v62  ;;  %1324 = vperm.xlu1 %7152, %v8252_v55   ;;  %475 = vperm.xlu0 %7331, %v7656_v3  }
 0x239   :  { %v8447_v58 = vpop.permute.xlu0 %317 }
 0x23f   :  { %1340 = vperm.xlu2 %7151, %v8267_v4   ;;  %v8450_v10 = vpop.permute.xlu2 %1152  ;;  %v8452_v43 = vpop.permute.xlu1 %1116 }
 0x240   :  { %13516 = vst [vmem:[#allocation151_spill] sm:$0xff] %v8450_v10  ;;  %1336 = vperm.xlu1 %7152, %v7879_v48   ;;  %495 = vperm.xlu0 %7331, %v7693_v9  }
 0x241   :  { %13517 = vst [vmem:[#allocation152_spill] sm:$0xff] %v8452_v43  ;;  %v8456_v60 = vpop.permute.xlu0 %329 }
 0x242   :  { %13518 = vst [vmem:[#allocation153_spill] sm:$0xff] %v8456_v60 }
 0x247   :  { %1352 = vperm.xlu2 %7151, %v8281_v18   ;;  %v8459_v62 = vpop.permute.xlu2 %1164  ;;  %v8461_v14 = vpop.permute.xlu1 %1128 }
 0x248   :  { %13519 = vst [vmem:[#allocation154_spill] sm:$0xff] %v8459_v62  ;;  %1348 = vperm.xlu1 %7152, %v7893_v52   ;;  %507 = vperm.xlu0 %7331, %v7711_v12  }
 0x249   :  { %13520 = vst [vmem:[#allocation155_spill] sm:$0xff] %v8461_v14  ;;  %v8465_v3 = vpop.permute.xlu0 %1212 }
 0x24a   :  { %13521 = vst [vmem:[#allocation156_spill] sm:$0xff] %v8465_v3 }
 0x24f   :  { %1364 = vperm.xlu2 %7151, %v8295_v5   ;;  %v8468_v10 = vpop.permute.xlu2 %1176  ;;  %v8470_v43 = vpop.permute.xlu1 %1136 }
 0x250   :  { %13522 = vst [vmem:[#allocation157_spill] sm:$0xff] %v8468_v10  ;;  %1360 = vperm.xlu1 %7152, %v7907_v56   ;;  %519 = vperm.xlu0 %7331, %v7729_v15  }
 0x251   :  { %13523 = vst [vmem:[#allocation158_spill] sm:$0xff] %v8470_v43  ;;  %v8474_v9 = vpop.permute.xlu0 %1232 }
 0x252   :  { %13524 = vst [vmem:[#allocation159_spill] sm:$0xff] %v8474_v9 }
 0x257   :  { %7154 = vset.pattern.permute.xlu2 %v13514_v25  ;;  %v8477_v62 = vpop.permute.xlu1 %1148 }
 0x258   :  { %13525 = vst [vmem:[#allocation160_spill] sm:$0xff] %v8477_v62  ;;  %7153 = vset.pattern.permute.xlu1 %v13514_v25  ;;  %1412 = vperm.xlu0 %7331, %v7865_v44   ;;  %v8481_v12 = vpop.permute.xlu2 %1220 }
 0x259   :  { %13526 = vst [vmem:[#allocation161_spill] sm:$0xff] %v8481_v12  ;;  %1408 = vperm.xlu2 %7154, %v7742_v17   ;;  %1404 = vperm.xlu1 %7153, %v8215_v6   ;;  %v8485_v10 = vpop.permute.xlu0 %1244  ;;  %v13542_v12 = vmov 5  }
 0x25a   :  { %13527 = vst [vmem:[#allocation162_spill] sm:$0xff] %v8485_v10 }
 0x25f   :  { %v8487_v43 = vpop.permute.xlu1 %1160 }
 0x260   :  { %13528 = vst [vmem:[#allocation163_spill] sm:$0xff] %v8487_v43  ;;  %1432 = vperm.xlu0 %7331, %v7879_v48   ;;  %v8490_v15 = vpop.permute.xlu2 %1228 }
 0x261   :  { %13529 = vst [vmem:[#allocation164_spill] sm:$0xff] %v8490_v15  ;;  %1420 = vperm.xlu2 %7154, %v8252_v55   ;;  %1416 = vperm.xlu1 %7153, %v8230_v54   ;;  %v8494_v62 = vpop.permute.xlu0 %1256 }
 0x262   :  { %13530 = vst [vmem:[#allocation165_spill] sm:$0xff] %v8494_v62 }
 0x267   :  { %v8496_v9 = vpop.permute.xlu1 %1172 }
 0x268   :  { %13531 = vst [vmem:[#allocation166_spill] sm:$0xff] %v8496_v9  ;;  %1444 = vperm.xlu0 %7331, %v7893_v52   ;;  %v8499_v14 = vpop.permute.xlu2 %1240 }
 0x269   :  { %13532 = vst [vmem:[#allocation167_spill] sm:$0xff] %v8499_v14  ;;  %1428 = vperm.xlu2 %7154, %v7757_v20   ;;  %1424 = vperm.xlu1 %7153, %v8247_v13   ;;  %v8503_v43 = vpop.permute.xlu0 %1268 }
 0x26a   :  { %13533 = vst [vmem:[#allocation168_spill] sm:$0xff] %v8503_v43 }
 0x270   :  { %1456 = vperm.xlu0 %7331, %v7907_v56   ;;  %v8506_v10 = vpop.permute.xlu2 %1252  ;;  %v8508_v15 = vpop.permute.xlu1 %1216 }
 0x271   :  { %13534 = vst [vmem:[#allocation169_spill] sm:$0xff] %v8506_v10  ;;  %1440 = vperm.xlu2 %7154, %v7765_v21   ;;  %1436 = vperm.xlu1 %7153, %v8267_v4   ;;  %v8512_v9 = vpop.permute.xlu0 %2157  ;;  %v8526_v10 = vld [vmem:[%s13284_s0 + $0x180] sm:$0xff] }
 0x272   :  { %13535 = vst [vmem:[#allocation170_spill] sm:$0xff] %v8508_v15 }
 0x278   :  { %2349 = vperm.xlu0 %7331, %v8035_v50   ;;  %v8515_v14 = vpop.permute.xlu2 %1264  ;;  %v8517_v62 = vpop.permute.xlu1 %1224 }
 0x279   :  { %13536 = vst [vmem:[#allocation171_spill] sm:$0xff] %v8515_v14  ;;  %1452 = vperm.xlu2 %7154, %v7773_v22   ;;  %1448 = vperm.xlu1 %7153, %v8281_v18   ;;  %v8521_v43 = vpop.permute.xlu0 %3110 }
 0x27a   :  { %13537 = vst [vmem:[#allocation172_spill] sm:$0xff] %v8517_v62 }
 0x27b   :  { %13538 = vst [vmem:[#allocation173_spill] sm:$0xff] %v8521_v43 }
 0x280   :  { %3294 = vperm.xlu0 %7331, %v8526_v10   ;;  %v8529_v15 = vpop.permute.xlu1 %1236 }
 0x281   :  { %13539 = vst [vmem:[#allocation174_spill] sm:$0xff] %v8529_v15  ;;  %1464 = vperm.xlu2 %7154, %v7781_v23   ;;  %1460 = vperm.xlu1 %7153, %v8295_v5   ;;  %v8533_v14 = vpop.permute.xlu2 %1308  ;;  %v8535_v62 = vpop.permute.xlu0 %2173 }
 0x282   :  { %13540 = vst [vmem:[#allocation175_spill] sm:$0xff] %v8535_v62 }
 0x288   :  { %3298 = vperm.xlu0 %7331, %v7789_v24   ;;  %v8538_v43 = vpop.permute.xlu1 %1248 }
 0x289   :  { %13541 = vst [vmem:[#allocation176_spill] sm:$0xff] %v8538_v43  ;;  %7156 = vset.pattern.permute.xlu2 %v13542_v12  ;;  %7155 = vset.pattern.permute.xlu1 %v13542_v12  ;;  %v8542_v60 = vpop.permute.xlu2 %1320  ;;  %v8544_v3 = vpop.permute.xlu0 %2189 }
 0x28a   :  { %13543 = vst [vmem:[#allocation177_spill] sm:$0xff] %v8542_v60  ;;  %1508 = vperm.xlu2 %7156, %v7865_v44   ;;  %1504 = vperm.xlu1 %7155, %v7742_v17   ;;  %v6831_v17 = vld [vmem:[%s13284_s0 + $0x1c0] sm:$0xff] }
 0x28b   :  { %13544 = vst [vmem:[#allocation178_spill] sm:$0xff] %v8544_v3 }
 0x290   :  { %2365 = vperm.xlu0 %7331, %v8196_v47   ;;  %v8549_v15 = vpop.permute.xlu1 %1260 }
 0x291   :  { %13545 = vst [vmem:[#allocation179_spill] sm:$0xff] %v8549_v15  ;;  %v8551_v62 = vpop.permute.xlu2 %1328  ;;  %v8553_v24 = vpop.permute.xlu0 %3142 }
 0x292   :  { %13546 = vst [vmem:[#allocation180_spill] sm:$0xff] %v8551_v62  ;;  %1516 = vperm.xlu2 %7156, %v8252_v55   ;;  %1512 = vperm.xlu1 %7155, %v8230_v54  }
 0x293   :  { %13547 = vst [vmem:[#allocation181_spill] sm:$0xff] %v8553_v24 }
 0x298   :  { %2381 = vperm.xlu0 %7331, %v8069_v26   ;;  %v8558_v43 = vpop.permute.xlu1 %1272 }
 0x299   :  { %13548 = vst [vmem:[#allocation182_spill] sm:$0xff] %v8558_v43  ;;  %v8560_v3 = vpop.permute.xlu2 %1340  ;;  %v8562_v60 = vpop.permute.xlu0 %2213 }
 0x29a   :  { %13549 = vst [vmem:[#allocation183_spill] sm:$0xff] %v8560_v3  ;;  %1528 = vperm.xlu2 %7156, %v7879_v48   ;;  %1524 = vperm.xlu1 %7155, %v7757_v20  }
 0x29b   :  { %13550 = vst [vmem:[#allocation184_spill] sm:$0xff] %v8562_v60 }
 0x2a0   :  { %3326 = vperm.xlu0 %7331, %v6831_v17  }
 0x2a1   :  { %v8569_v15 = vpop.permute.xlu2 %1352  ;;  %v8571_v24 = vpop.permute.xlu0 %3150 }
 0x2a2   :  { %13551 = vst [vmem:[#allocation185_spill] sm:$0xff] %v8569_v15  ;;  %1540 = vperm.xlu2 %7156, %v7893_v52   ;;  %1536 = vperm.xlu1 %7155, %v7765_v21   ;;  %v8575_v26 = vpop.permute.xlu1 %1316 }
 0x2a3   :  { %13552 = vst [vmem:[#allocation186_spill] sm:$0xff] %v8571_v24  ;;  %v8589_v24 = vld [vmem:[%s13284_s0 + $0x160] sm:$0xff] }
 0x2a4   :  { %13553 = vst [vmem:[#allocation187_spill] sm:$0xff] %v8575_v26 }
 0x2a8   :  { %3330 = vperm.xlu0 %7331, %v7816_v30  }
 0x2a9   :  { %v8578_v43 = vpop.permute.xlu2 %1364 }
 0x2aa   :  { %13554 = vst [vmem:[#allocation188_spill] sm:$0xff] %v8578_v43  ;;  %1552 = vperm.xlu2 %7156, %v7907_v56   ;;  %1548 = vperm.xlu1 %7155, %v7773_v22   ;;  %v8582_v20 = vpop.permute.xlu1 %1324  ;;  %v8584_v17 = vpop.permute.xlu0 %475 }
 0x2ab   :  { %13555 = vst [vmem:[#allocation189_spill] sm:$0xff] %v8582_v20 }
 0x2ac   :  { %13556 = vst [vmem:[#allocation190_spill] sm:$0xff] %v8584_v17 }
 0x2b0   :  { %2397 = vperm.xlu0 %7331, %v8589_v24  }
 0x2b2   :  { %7157 = vset.pattern.permute.xlu2 %v13413_v38  ;;  %1560 = vperm.xlu1 %7155, %v7781_v23   ;;  %v8594_v21 = vpop.permute.xlu1 %1336  ;;  %v8596_v30 = vpop.permute.xlu0 %495  ;;  %v8615_v23 = vld [vmem:[%s13284_s0] sm:$0xff] }
 0x2b3   :  { %13557 = vst [vmem:[#allocation191_spill] sm:$0xff] %v8594_v21  ;;  %1596 = vperm.xlu2 %7157, %v8215_v6   ;;  %v8599_v22 = vpop.permute.xlu2 %1408 }
 0x2b4   :  { %13558 = vst [vmem:[#allocation192_spill] sm:$0xff] %v8596_v30 }
 0x2b5   :  { %13559 = vst [vmem:[#allocation193_spill] sm:$0xff] %v8599_v22 }
 0x2b8   :  { %3342 = vperm.xlu0 %7331, %v8427_v36  }
 0x2ba   :  { %7158 = vset.pattern.permute.xlu1 %v13413_v38  ;;  %v8603_v43 = vpop.permute.xlu1 %1348  ;;  %v8605_v60 = vpop.permute.xlu0 %507 }
 0x2bb   :  { %13560 = vst [vmem:[#allocation194_spill] sm:$0xff] %v8603_v43  ;;  %1608 = vperm.xlu2 %7157, %v8230_v54   ;;  %v8608_v15 = vpop.permute.xlu2 %1420  ;;  %1604 = vperm.xlu1 %7158, %v7865_v44   ;;  %v7462_v44 = vld [vmem:[%s13284_s0 + $0x8] sm:$0xff] }
 0x2bc   :  { %13561 = vst [vmem:[#allocation195_spill] sm:$0xff] %v8605_v60 }
 0x2bd   :  { %13562 = vst [vmem:[#allocation196_spill] sm:$0xff] %v8608_v15 }
 0x2c0   :  { %7342 = vset.pattern.permute.xlu0 %v13452_v7 }
 0x2c1   :  { %64 = vperm.xlu0 %7342, %v8615_v23  }
 0x2c2   :  { %v8618_v36 = vpop.permute.xlu1 %1360  ;;  %v8620_v21 = vpop.permute.xlu0 %519 }
 0x2c3   :  { %13563 = vst [vmem:[#allocation197_spill] sm:$0xff] %v8618_v36  ;;  %1616 = vperm.xlu2 %7157, %v8247_v13   ;;  %v8623_v30 = vpop.permute.xlu2 %1428  ;;  %1612 = vperm.xlu1 %7158, %v8252_v55  }
 0x2c4   :  { %13564 = vst [vmem:[#allocation198_spill] sm:$0xff] %v8620_v21  ;;  %v7463_v21 = vld [vmem:[%s13284_s0 + $0x30] sm:$0xff] }
 0x2c5   :  { %13565 = vst [vmem:[#allocation199_spill] sm:$0xff] %v8623_v30 }
 0x2c9   :  { %69 = vperm.xlu0 %7342, %v7462_v44  }
 0x2ca   :  { %v8629_v43 = vpop.permute.xlu0 %1412 }
 0x2cb   :  { %13566 = vst [vmem:[#allocation200_spill] sm:$0xff] %v8629_v43  ;;  %1628 = vperm.xlu2 %7157, %v8267_v4   ;;  %v8632_v60 = vpop.permute.xlu2 %1440  ;;  %1624 = vperm.xlu1 %7158, %v7879_v48   ;;  %v8635_v36 = vpop.permute.xlu1 %1404  ;;  %v7464_v48 = vld [vmem:[%s13284_s0 + $0x48] sm:$0xff]  ;;  %v8900_v43 = vld [vmem:[%s13284_s0 + $0x58] sm:$0xff] }
 0x2cc   :  { %13567 = vst [vmem:[#allocation201_spill] sm:$0xff] %v8632_v60 }
 0x2d1   :  { %94 = vperm.xlu0 %7342, %v7463_v21  }
 0x2d2   :  { %v8640_v3 = vpop.permute.xlu0 %1432 }
 0x2d3   :  { %13568 = vst [vmem:[#allocation202_spill] sm:$0xff] %v8640_v3  ;;  %1640 = vperm.xlu2 %7157, %v8281_v18   ;;  %v8643_v44 = vpop.permute.xlu2 %1452  ;;  %1636 = vperm.xlu1 %7158, %v7893_v52   ;;  %v8646_v30 = vpop.permute.xlu1 %1416  ;;  %v7465_v52 = vld [vmem:[%s13284_s0 + $0x60] sm:$0xff] }
 0x2d4   :  { %13569 = vst [vmem:[#allocation203_spill] sm:$0xff] %v8643_v44 }
 0x2d5   :  { %13570 = vst [vmem:[#allocation204_spill] sm:$0xff] %v8646_v30 }
 0x2d9   :  { %109 = vperm.xlu0 %7342, %v7464_v48  }
 0x2da   :  { %v8651_v60 = vpop.permute.xlu0 %1444 }
 0x2db   :  { %13571 = vst [vmem:[#allocation205_spill] sm:$0xff] %v8651_v60  ;;  %1652 = vperm.xlu2 %7157, %v8295_v5   ;;  %v8654_v21 = vpop.permute.xlu2 %1464  ;;  %1648 = vperm.xlu1 %7158, %v7907_v56   ;;  %v8657_v3 = vpop.permute.xlu1 %1424 }
 0x2dc   :  { %13572 = vst [vmem:[#allocation206_spill] sm:$0xff] %v8654_v21  ;;  %v8671_v21 = vld [vmem:[%s13284_s0 + $0x88] sm:$0xff] }
 0x2dd   :  { %13573 = vst [vmem:[#allocation207_spill] sm:$0xff] %v8657_v3 }
 0x2e1   :  { %124 = vperm.xlu0 %7342, %v7465_v52   ;;  %v7467_v52 = vld [vmem:[%s13284_s0 + $0x78] sm:$0xff] }
 0x2e2   :  { %v8662_v44 = vpop.permute.xlu0 %1456 }
 0x2e3   :  { %13574 = vst [vmem:[#allocation208_spill] sm:$0xff] %v8662_v44  ;;  %7160 = vset.pattern.permute.xlu2 %v13418_v27  ;;  %7159 = vset.pattern.permute.xlu1 %v13418_v27  ;;  %v8666_v48 = vpop.permute.xlu1 %1436 }
 0x2e4   :  { %13575 = vst [vmem:[#allocation209_spill] sm:$0xff] %v8666_v48  ;;  %1696 = vperm.xlu2 %7160, %v8671_v21   ;;  %v8674_v56 = vpop.permute.xlu2 %1508  ;;  %1692 = vperm.xlu1 %7159, %v8215_v6  }
 0x2e5   :  { %13576 = vst [vmem:[#allocation210_spill] sm:$0xff] %v8674_v56 }
 0x2e9   :  { %139 = vperm.xlu0 %7342, %v7467_v52   ;;  %v7468_v52 = vld [vmem:[%s13284_s0 + $0xb0] sm:$0xff] }
 0x2ea   :  { %v8680_v44 = vpop.permute.xlu0 %2349 }
 0x2eb   :  { %13577 = vst [vmem:[#allocation211_spill] sm:$0xff] %v8680_v44  ;;  %v8682_v60 = vpop.permute.xlu1 %1448 }
 0x2ec   :  { %13578 = vst [vmem:[#allocation212_spill] sm:$0xff] %v8682_v60  ;;  %1708 = vperm.xlu2 %7160, %v8252_v55   ;;  %v8685_v48 = vpop.permute.xlu2 %1516  ;;  %1704 = vperm.xlu1 %7159, %v8230_v54   ;;  %v7469_v54 = vld [vmem:[%s13284_s0 + $0xc8] sm:$0xff] }
 0x2ed   :  { %13579 = vst [vmem:[#allocation213_spill] sm:$0xff] %v8685_v48 }
 0x2f1   :  { %1010 = vperm.xlu0 %7342, %v8671_v21  }
 0x2f2   :  { %v8689_v3 = vpop.permute.xlu0 %3294 }
 0x2f3   :  { %13580 = vst [vmem:[#allocation214_spill] sm:$0xff] %v8689_v3  ;;  %v8691_v62 = vpop.permute.xlu1 %1460  ;;  %v8916_v3 = vld [vmem:[%s13284_s0 + $0x70] sm:$0xff] }
 0x2f4   :  { %13581 = vst [vmem:[#allocation215_spill] sm:$0xff] %v8691_v62  ;;  %1716 = vperm.xlu2 %7160, %v7468_v52   ;;  %v8696_v15 = vpop.permute.xlu2 %1528  ;;  %1712 = vperm.xlu1 %7159, %v8247_v13  }
 0x2f5   :  { %13582 = vst [vmem:[#allocation216_spill] sm:$0xff] %v8696_v15 }
 0x2f9   :  { %1035 = vperm.xlu0 %7342, %v7468_v52   ;;  %v8714_v52 = vld [vmem:[%s13284_s0 + $0xe0] sm:$0xff] }
 0x2fa   :  { %v8699_v55 = vpop.permute.xlu0 %3298 }
 0x2fb   :  { %13583 = vst [vmem:[#allocation217_spill] sm:$0xff] %v8699_v55 }
 0x2fc   :  { %1728 = vperm.xlu2 %7160, %v7469_v54   ;;  %v8704_v60 = vpop.permute.xlu2 %1540  ;;  %1724 = vperm.xlu1 %7159, %v8267_v4   ;;  %v8707_v62 = vpop.permute.xlu1 %1504 }
 0x2fd   :  { %13584 = vst [vmem:[#allocation218_spill] sm:$0xff] %v8704_v60 }
 0x2fe   :  { %13585 = vst [vmem:[#allocation219_spill] sm:$0xff] %v8707_v62 }
 0x301   :  { %1050 = vperm.xlu0 %7342, %v7469_v54  }
 0x302   :  { %v8709_v48 = vpop.permute.xlu0 %2365 }
 0x303   :  { %13586 = vst [vmem:[#allocation220_spill] sm:$0xff] %v8709_v48 }
 0x304   :  { %1740 = vperm.xlu2 %7160, %v8714_v52   ;;  %v8717_v15 = vpop.permute.xlu2 %1552  ;;  %1736 = vperm.xlu1 %7159, %v8281_v18   ;;  %v8720_v20 = vpop.permute.xlu1 %1512 }
 0x305   :  { %13587 = vst [vmem:[#allocation221_spill] sm:$0xff] %v8717_v15  ;;  %v7471_v15 = vld [vmem:[%s13284_s0 + $0xf8] sm:$0xff] }
 0x306   :  { %13588 = vst [vmem:[#allocation222_spill] sm:$0xff] %v8720_v20 }
 0x309   :  { %1065 = vperm.xlu0 %7342, %v8714_v52  }
 0x30a   :  { %v8723_v60 = vpop.permute.xlu0 %2381 }
 0x30b   :  { %13589 = vst [vmem:[#allocation223_spill] sm:$0xff] %v8723_v60 }
 0x30c   :  { %7162 = vset.pattern.permute.xlu2 %v13472_v8  ;;  %7161 = vset.pattern.permute.xlu1 %v13452_v7  ;;  %v8727_v54 = vpop.permute.xlu1 %1524 }
 0x30d   :  { %13590 = vst [vmem:[#allocation224_spill] sm:$0xff] %v8727_v54  ;;  %2061 = vperm.xlu2 %7162, %v8035_v50   ;;  %v8730_v48 = vpop.permute.xlu2 %1596  ;;  %1950 = vperm.xlu1 %7161, %v8035_v50   ;;  %v8747_v54 = vld [vmem:[%s13284_s0 + $0x188] sm:$0xff] }
 0x30e   :  { %13591 = vst [vmem:[#allocation225_spill] sm:$0xff] %v8730_v48 }
 0x311   :  { %1080 = vperm.xlu0 %7342, %v7471_v15  }
 0x312   :  { %v8736_v20 = vpop.permute.xlu0 %3326 }
 0x313   :  { %13592 = vst [vmem:[#allocation226_spill] sm:$0xff] %v8736_v20 }
 0x314   :  { %v8738_v60 = vpop.permute.xlu1 %1536 }
 0x315   :  { %13593 = vst [vmem:[#allocation227_spill] sm:$0xff] %v8738_v60  ;;  %3006 = vperm.xlu2 %7162, %v8526_v10   ;;  %v8741_v30 = vpop.permute.xlu2 %1608  ;;  %2895 = vperm.xlu1 %7161, %v8526_v10  }
 0x316   :  { %13594 = vst [vmem:[#allocation228_spill] sm:$0xff] %v8741_v30 }
 0x319   :  { %2900 = vperm.xlu0 %7342, %v8747_v54  }
 0x31a   :  { %v8750_v55 = vpop.permute.xlu0 %3330 }
 0x31b   :  { %13595 = vst [vmem:[#allocation229_spill] sm:$0xff] %v8750_v55 }
 0x31c   :  { %v8752_v15 = vpop.permute.xlu1 %1548 }
 0x31d   :  { %13596 = vst [vmem:[#allocation230_spill] sm:$0xff] %v8752_v15  ;;  %7164 = vset.pattern.permute.xlu2 %v13461_v16  ;;  %v8755_v60 = vpop.permute.xlu2 %1616  ;;  %7163 = vset.pattern.permute.xlu1 %v13506_v11  ;;  %v8768_v15 = vld [vmem:[%s13284_s0 + $0x108] sm:$0xff] }
 0x31e   :  { %13597 = vst [vmem:[#allocation231_spill] sm:$0xff] %v8755_v60  ;;  %3102 = vperm.xlu2 %7164, %v8526_v10   ;;  %2253 = vperm.xlu1 %7163, %v8035_v50  }
 0x321   :  { %1970 = vperm.xlu0 %7342, %v8196_v47   ;;  %v7473_v47 = vld [vmem:[%s13284_s0 + $0x1b0] sm:$0xff] }
 0x322   :  { %v8761_v20 = vpop.permute.xlu0 %2397 }
 0x323   :  { %13598 = vst [vmem:[#allocation232_spill] sm:$0xff] %v8761_v20 }
 0x324   :  { %v8763_v30 = vpop.permute.xlu1 %1560 }
 0x325   :  { %13599 = vst [vmem:[#allocation233_spill] sm:$0xff] %v8763_v30  ;;  %v8770_v55 = vpop.permute.xlu2 %1628 }
 0x326   :  { %13600 = vst [vmem:[#allocation234_spill] sm:$0xff] %v8770_v55  ;;  %7165 = vset.pattern.permute.xlu2 %v13452_v7  ;;  %3198 = vperm.xlu1 %7163, %v8526_v10   ;;  %v8791_v55 = vld [vmem:[%s13284_s0 + $0x1c8] sm:$0xff] }
 0x327   :  { %1955 = vperm.xlu2 %7165, %v8768_v15  }
 0x329   :  { %2925 = vperm.xlu0 %7342, %v7473_v47  }
 0x32a   :  { %v8778_v20 = vpop.permute.xlu0 %3342 }
 0x32b   :  { %13601 = vst [vmem:[#allocation235_spill] sm:$0xff] %v8778_v20 }
 0x32d   :  { %v8780_v30 = vpop.permute.xlu2 %1640  ;;  %v8782_v60 = vpop.permute.xlu1 %1604 }
 0x32e   :  { %13602 = vst [vmem:[#allocation236_spill] sm:$0xff] %v8780_v30  ;;  %7166 = vset.pattern.permute.xlu1 %v13472_v8 }
 0x32f   :  { %13603 = vst [vmem:[#allocation237_spill] sm:$0xff] %v8782_v60  ;;  %7167 = vset.pattern.permute.xlu2 %v13542_v12  ;;  %2065 = vperm.xlu1 %7166, %v8768_v15  }
 0x330   :  { %2445 = vperm.xlu2 %7167, %v8035_v50  }
 0x331   :  { %2940 = vperm.xlu0 %7342, %v8791_v55  }
 0x333   :  { %v8794_v47 = vpop.permute.xlu0 %64 }
 0x335   :  { %v8796_v20 = vpop.permute.xlu2 %1652  ;;  %v8798_v30 = vpop.permute.xlu1 %1612 }
 0x336   :  { %13604 = vst [vmem:[#allocation238_spill] sm:$0xff] %v8796_v20 }
 0x337   :  { %13605 = vst [vmem:[#allocation239_spill] sm:$0xff] %v8798_v30  ;;  %7168 = vset.pattern.permute.xlu1 %v13461_v16 }
 0x338   :  { %7169 = vset.pattern.permute.xlu2 %v13413_v38  ;;  %2161 = vperm.xlu1 %7168, %v8768_v15  }
 0x339   :  { %2541 = vperm.xlu2 %7169, %v8035_v50   ;;  %2010 = vperm.xlu0 %7342, %v8589_v24  }
 0x33b   :  { %v8805_v62 = vpop.permute.xlu0 %69 }
 0x33c   :  { %13606 = vst [vmem:[#allocation240_spill] sm:$0xff] %v8805_v62  ;;  %v8871_v62 = vld [vmem:[%s13284_s0 + $0x110] sm:$0xff] }
 0x33d   :  { %v8807_v22 = vpop.permute.xlu1 %1624 }
 0x33e   :  { %13607 = vst [vmem:[#allocation241_spill] sm:$0xff] %v8807_v22  ;;  %v8809_v60 = vpop.permute.xlu2 %1696  ;;  %v6820_v22 = vld [vmem:[%s13284_s0 + $0x168] sm:$0xff] }
 0x33f   :  { %13608 = vst [vmem:[#allocation242_spill] sm:$0xff] %v8809_v60  ;;  %v13612_v60 = vmov 8  }
 0x340   :  { %7170 = vset.pattern.permute.xlu1 %v13472_v8 }
 0x341   :  { %7171 = vset.pattern.permute.xlu2 %v13542_v12  ;;  %3010 = vperm.xlu1 %7170, %v8747_v54  }
 0x342   :  { %2020 = vperm.xlu0 %7342, %v8412_v2   ;;  %3390 = vperm.xlu2 %7171, %v8526_v10  }
 0x343   :  { %v8816_v20 = vpop.permute.xlu0 %94 }
 0x344   :  { %13609 = vst [vmem:[#allocation243_spill] sm:$0xff] %v8816_v20 }
 0x345   :  { %v8818_v30 = vpop.permute.xlu1 %1636 }
 0x346   :  { %13610 = vst [vmem:[#allocation244_spill] sm:$0xff] %v8818_v30  ;;  %v8820_v56 = vpop.permute.xlu2 %1708 }
 0x347   :  { %13611 = vst [vmem:[#allocation245_spill] sm:$0xff] %v8820_v56  ;;  %v6836_v56 = vld [vmem:[%s13284_s0 + $0x1e8] sm:$0xff] }
 0x349   :  { %7172 = vset.pattern.permute.xlu1 %v13612_v60 }
 0x34a   :  { %2015 = vperm.xlu0 %7342, %v6820_v22   ;;  %7173 = vset.pattern.permute.xlu2 %v13506_v11 }
 0x34b   :  { %1788 = vperm.xlu1 %7172, %v8215_v6   ;;  %2257 = vperm.xlu2 %7173, %v8768_v15   ;;  %v8829_v2 = vpop.permute.xlu0 %109 }
 0x34c   :  { %13613 = vst [vmem:[#allocation246_spill] sm:$0xff] %v8829_v2 }
 0x34d   :  { %v8831_v20 = vpop.permute.xlu1 %1648 }
 0x34e   :  { %13614 = vst [vmem:[#allocation247_spill] sm:$0xff] %v8831_v20  ;;  %v8833_v30 = vpop.permute.xlu2 %1716 }
 0x34f   :  { %13615 = vst [vmem:[#allocation248_spill] sm:$0xff] %v8833_v30 }
 0x352   :  { %2960 = vperm.xlu0 %7342, %v6836_v56  }
 0x353   :  { %7174 = vset.pattern.permute.xlu1 %v13461_v16  ;;  %7175 = vset.pattern.permute.xlu2 %v13413_v38  ;;  %v8840_v22 = vpop.permute.xlu0 %124 }
 0x354   :  { %13616 = vst [vmem:[#allocation249_spill] sm:$0xff] %v8840_v22  ;;  %3106 = vperm.xlu1 %7174, %v8747_v54   ;;  %3486 = vperm.xlu2 %7175, %v8526_v10  }
 0x356   :  { %v8844_v2 = vpop.permute.xlu2 %1728  ;;  %v8846_v20 = vpop.permute.xlu1 %1692 }
 0x357   :  { %13617 = vst [vmem:[#allocation250_spill] sm:$0xff] %v8844_v2  ;;  %v8863_v2 = vld [vmem:[%s13284_s0 + $0x28] sm:$0xff] }
 0x358   :  { %13618 = vst [vmem:[#allocation251_spill] sm:$0xff] %v8846_v20 }
 0x35a   :  { %7347 = vset.pattern.permute.xlu0 %v13542_v12 }
 0x35b   :  { %564 = vperm.xlu0 %7347, %v8615_v23   ;;  %v8850_v30 = vpop.permute.xlu0 %139 }
 0x35c   :  { %13619 = vst [vmem:[#allocation252_spill] sm:$0xff] %v8850_v30  ;;  %7176 = vset.pattern.permute.xlu1 %v13514_v25  ;;  %7177 = vset.pattern.permute.xlu2 %v13612_v60 }
 0x35d   :  { %2353 = vperm.xlu1 %7176, %v8768_v15   ;;  %2733 = vperm.xlu2 %7177, %v8035_v50  }
 0x35e   :  { %v8856_v56 = vpop.permute.xlu1 %1704  ;;  %v8858_v22 = vpop.permute.xlu2 %1740 }
 0x35f   :  { %13620 = vst [vmem:[#allocation253_spill] sm:$0xff] %v8856_v56  ;;  %v8884_v56 = vld [vmem:[%s13284_s0 + $0x40] sm:$0xff] }
 0x360   :  { %13621 = vst [vmem:[#allocation254_spill] sm:$0xff] %v8858_v22 }
 0x363   :  { %584 = vperm.xlu0 %7347, %v8863_v2   ;;  %v8866_v30 = vpop.permute.xlu0 %1010 }
 0x364   :  { %13622 = vst [vmem:[#allocation255_spill] sm:$0xff] %v8866_v30 }
 0x365   :  { %7178 = vset.pattern.permute.xlu1 %v13418_v27  ;;  %7179 = vset.pattern.permute.xlu2 %v13452_v7 }
 0x366   :  { %3582 = vperm.xlu1 %7178, %v8526_v10   ;;  %1960 = vperm.xlu2 %7179, %v8871_v62   ;;  %v8877_v50 = vpop.permute.xlu1 %1712 }
 0x367   :  { %13623 = vst [vmem:[#allocation256_spill] sm:$0xff] %v8877_v50  ;;  %v8879_v22 = vpop.permute.xlu2 %2061 }
 0x36b   :  { %596 = vperm.xlu0 %7347, %v8884_v56   ;;  %v8887_v30 = vpop.permute.xlu0 %1035 }
 0x36c   :  { %13624 = vst [vmem:[#allocation257_spill] sm:$0xff] %v8887_v30 }
 0x36e   :  { %7180 = vset.pattern.permute.xlu1 %v13472_v8  ;;  %7181 = vset.pattern.permute.xlu2 %v13542_v12  ;;  %v8891_v20 = vpop.permute.xlu1 %1724 }
 0x36f   :  { %13625 = vst [vmem:[#allocation258_spill] sm:$0xff] %v8891_v20  ;;  %2069 = vperm.xlu1 %7180, %v8871_v62   ;;  %2449 = vperm.xlu2 %7181, %v8768_v15   ;;  %v8895_v50 = vpop.permute.xlu2 %3006 }
 0x373   :  { %608 = vperm.xlu0 %7347, %v8900_v43   ;;  %v8903_v30 = vpop.permute.xlu0 %1050 }
 0x374   :  { %13626 = vst [vmem:[#allocation259_spill] sm:$0xff] %v8903_v30 }
 0x376   :  { %v8905_v48 = vpop.permute.xlu1 %1736 }
 0x377   :  { %13627 = vst [vmem:[#allocation260_spill] sm:$0xff] %v8905_v48  ;;  %7182 = vset.pattern.permute.xlu1 %v13612_v60  ;;  %7183 = vset.pattern.permute.xlu2 %v13461_v16 }
 0x378   :  { %3678 = vperm.xlu1 %7182, %v8526_v10   ;;  %2165 = vperm.xlu2 %7183, %v8871_v62   ;;  %v8911_v20 = vpop.permute.xlu2 %3102  ;;  %v8929_v10 = vld [vmem:[%s13284_s0 + $0x190] sm:$0xff] }
 0x379   :  { %13628 = vst [vmem:[#allocation261_spill] sm:$0xff] %v8911_v20 }
 0x37b   :  { %620 = vperm.xlu0 %7347, %v8916_v3   ;;  %v8919_v30 = vpop.permute.xlu0 %1065 }
 0x37c   :  { %13629 = vst [vmem:[#allocation262_spill] sm:$0xff] %v8919_v30 }
 0x37f   :  { %v8921_v48 = vpop.permute.xlu1 %1950 }
 0x380   :  { %7184 = vset.pattern.permute.xlu1 %v13413_v38  ;;  %7185 = vset.pattern.permute.xlu2 %v13452_v7 }
 0x381   :  { %2545 = vperm.xlu1 %7184, %v8768_v15   ;;  %2905 = vperm.xlu2 %7185, %v8929_v10   ;;  %v8932_v26 = vpop.permute.xlu2 %1955 }
 0x382   :  { %13630 = vst [vmem:[#allocation263_spill] sm:$0xff] %v8932_v26 }
 0x383   :  { %1500 = vperm.xlu0 %7347, %v8215_v6   ;;  %v8935_v30 = vpop.permute.xlu0 %1080 }
 0x384   :  { %13631 = vst [vmem:[#allocation264_spill] sm:$0xff] %v8935_v30 }
 0x387   :  { %v8937_v20 = vpop.permute.xlu1 %2895 }
 0x389   :  { %7186 = vset.pattern.permute.xlu1 %v13542_v12  ;;  %7187 = vset.pattern.permute.xlu2 %v13612_v60 }
 0x38a   :  { %3394 = vperm.xlu1 %7186, %v8747_v54   ;;  %1792 = vperm.xlu2 %7187, %v8671_v21   ;;  %v8943_v17 = vpop.permute.xlu2 %2445 }
 0x38b   :  { %1520 = vperm.xlu0 %7347, %v8247_v13   ;;  %v8946_v44 = vpop.permute.xlu0 %2900 }
 0x38c   :  { %13632 = vst [vmem:[#allocation265_spill] sm:$0xff] %v8946_v44 }
 0x390   :  { %v8948_v26 = vpop.permute.xlu1 %2253 }
 0x392   :  { %7188 = vset.pattern.permute.xlu1 %v13506_v11  ;;  %7189 = vset.pattern.permute.xlu2 %v13418_v27 }
 0x393   :  { %2261 = vperm.xlu1 %7188, %v8871_v62   ;;  %1532 = vperm.xlu0 %7347, %v8267_v4   ;;  %v8954_v6 = vpop.permute.xlu2 %2541  ;;  %v8956_v30 = vpop.permute.xlu0 %1970 }
 0x394   :  { %13633 = vst [vmem:[#allocation266_spill] sm:$0xff] %v8956_v30  ;;  %2641 = vperm.xlu2 %7189, %v8768_v15  }
 0x398   :  { %v8959_v21 = vpop.permute.xlu1 %3198 }
 0x39b   :  { %7190 = vset.pattern.permute.xlu1 %v13413_v38  ;;  %1544 = vperm.xlu0 %7347, %v8281_v18   ;;  %v8963_v13 = vpop.permute.xlu0 %2925 }
 0x39c   :  { %13634 = vst [vmem:[#allocation267_spill] sm:$0xff] %v8963_v13  ;;  %7191 = vset.pattern.permute.xlu2 %v13514_v25  ;;  %3490 = vperm.xlu1 %7190, %v8747_v54   ;;  %v8968_v4 = vpop.permute.xlu2 %3390 }
 0x39d   :  { %2357 = vperm.xlu2 %7191, %v8871_v62   ;;  %13635 = vst [vmem:[#allocation268_spill] sm:$0xff] %v8968_v4 }
 0x3a1   :  { %v8970_v44 = vpop.permute.xlu1 %2065 }
 0x3a2   :  { %13636 = vst [vmem:[#allocation269_spill] sm:$0xff] %v8970_v44  ;;  %v7481_v44 = vld [vmem:[%s13284_s0 + $0x1d0] sm:$0xff] }
 0x3a3   :  { %1556 = vperm.xlu0 %7347, %v8295_v5   ;;  %v8973_v30 = vpop.permute.xlu0 %2940  ;;  %v8989_v5 = vld [vmem:[%s13284_s0 + $0x118] sm:$0xff] }
 0x3a4   :  { %13637 = vst [vmem:[#allocation270_spill] sm:$0xff] %v8973_v30  ;;  %7192 = vset.pattern.permute.xlu1 %v13612_v60  ;;  %v9000_v30 = vld [vmem:[%s13284_s0 + $0x128] sm:$0xff] }
 0x3a5   :  { %7193 = vset.pattern.permute.xlu2 %v13506_v11  ;;  %2737 = vperm.xlu1 %7192, %v8768_v15   ;;  %v8978_v18 = vpop.permute.xlu2 %2257  ;;  %13642 = vst [vmem:[#allocation275_spill] sm:$0xff] %v9000_v30 }
 0x3a6   :  { %13638 = vst [vmem:[#allocation271_spill] sm:$0xff] %v8978_v18  ;;  %3206 = vperm.xlu2 %7193, %v8929_v10  }
 0x3aa   :  { %v8981_v13 = vpop.permute.xlu1 %2161 }
 0x3ab   :  { %13639 = vst [vmem:[#allocation272_spill] sm:$0xff] %v8981_v13  ;;  %3398 = vperm.xlu0 %7347, %v8929_v10   ;;  %v8984_v4 = vpop.permute.xlu0 %2010 }
 0x3ac   :  { %13640 = vst [vmem:[#allocation273_spill] sm:$0xff] %v8984_v4 }
 0x3ad   :  { %7194 = vset.pattern.permute.xlu1 %v13452_v7 }
 0x3ae   :  { %7195 = vset.pattern.permute.xlu2 %v13472_v8  ;;  %1965 = vperm.xlu1 %7194, %v8989_v5   ;;  %v8994_v15 = vpop.permute.xlu2 %3486 }
 0x3af   :  { %13641 = vst [vmem:[#allocation274_spill] sm:$0xff] %v8994_v15  ;;  %2073 = vperm.xlu2 %7195, %v8989_v5  }
 0x3b3   :  { %2465 = vperm.xlu0 %7347, %v9000_v30   ;;  %v9003_v4 = vpop.permute.xlu1 %3010 }
 0x3b4   :  { %13643 = vst [vmem:[#allocation276_spill] sm:$0xff] %v9003_v4  ;;  %v9005_v18 = vpop.permute.xlu0 %2020 }
 0x3b5   :  { %13644 = vst [vmem:[#allocation277_spill] sm:$0xff] %v9005_v18  ;;  %v9026_v18 = vld [vmem:[%s13284_s0 + $0x1f0] sm:$0xff] }
 0x3b6   :  { %7196 = vset.pattern.permute.xlu1 %v13542_v12  ;;  %13648 = vst [vmem:[#allocation281_spill] sm:$0xff] %v9026_v18 }
 0x3b7   :  { %7197 = vset.pattern.permute.xlu2 %v13514_v25  ;;  %2453 = vperm.xlu1 %7196, %v8871_v62   ;;  %v9011_v13 = vpop.permute.xlu2 %2733 }
 0x3b8   :  { %3302 = vperm.xlu2 %7197, %v8929_v10   ;;  %13645 = vst [vmem:[#allocation278_spill] sm:$0xff] %v9011_v13 }
 0x3bb   :  { %3430 = vperm.xlu0 %7347, %v7481_v44  }
 0x3bc   :  { %v9016_v15 = vpop.permute.xlu0 %2015 }
 0x3bd   :  { %13646 = vst [vmem:[#allocation279_spill] sm:$0xff] %v9016_v15  ;;  %v9018_v4 = vpop.permute.xlu1 %1788 }
 0x3be   :  { %13647 = vst [vmem:[#allocation280_spill] sm:$0xff] %v9018_v4  ;;  %v9039_v4 = vld [vmem:[%s13284_s0 + $0x198] sm:$0xff] }
 0x3bf   :  { %7198 = vset.pattern.permute.xlu1 %v13461_v16 }
 0x3c0   :  { %7199 = vset.pattern.permute.xlu2 %v13413_v38  ;;  %2169 = vperm.xlu1 %7198, %v8989_v5   ;;  %v9028_v13 = vpop.permute.xlu2 %1960 }
 0x3c1   :  { %13649 = vst [vmem:[#allocation282_spill] sm:$0xff] %v9028_v13  ;;  %2549 = vperm.xlu2 %7199, %v8871_v62  }
 0x3c3   :  { %3446 = vperm.xlu0 %7347, %v9026_v18   ;;  %v7482_v18 = vld [vmem:[%s13284_s0 + $0x90] sm:$0xff] }
 0x3c4   :  { %v9032_v44 = vpop.permute.xlu0 %2960 }
 0x3c5   :  { %13650 = vst [vmem:[#allocation283_spill] sm:$0xff] %v9032_v44 }
 0x3c6   :  { %v9034_v15 = vpop.permute.xlu1 %3106 }
 0x3c7   :  { %13651 = vst [vmem:[#allocation284_spill] sm:$0xff] %v9034_v15 }
 0x3c8   :  { %7200 = vset.pattern.permute.xlu1 %v13452_v7 }
 0x3c9   :  { %7201 = vset.pattern.permute.xlu2 %v13472_v8  ;;  %2910 = vperm.xlu1 %7200, %v9039_v4   ;;  %v9044_v13 = vpop.permute.xlu2 %2449 }
 0x3ca   :  { %13652 = vst [vmem:[#allocation285_spill] sm:$0xff] %v9044_v13  ;;  %3018 = vperm.xlu2 %7201, %v9039_v4  }
 0x3cb   :  { %7356 = vset.pattern.permute.xlu0 %v13612_v60 }
 0x3cc   :  { %855 = vperm.xlu0 %7356, %v8615_v23  }
 0x3cd   :  { %v9049_v44 = vpop.permute.xlu0 %564 }
 0x3cf   :  { %v9051_v15 = vpop.permute.xlu1 %2353 }
 0x3d0   :  { %13653 = vst [vmem:[#allocation286_spill] sm:$0xff] %v9051_v15 }
 0x3d1   :  { %7202 = vset.pattern.permute.xlu1 %v13612_v60 }
 0x3d2   :  { %7203 = vset.pattern.permute.xlu2 %v13506_v11  ;;  %1796 = vperm.xlu1 %7202, %v7482_v18   ;;  %v9058_v13 = vpop.permute.xlu2 %2165 }
 0x3d3   :  { %13654 = vst [vmem:[#allocation287_spill] sm:$0xff] %v9058_v13  ;;  %2265 = vperm.xlu2 %7203, %v8989_v5  }
 0x3d4   :  { %875 = vperm.xlu0 %7356, %v8863_v2  }
 0x3d5   :  { %v9062_v23 = vpop.permute.xlu0 %584 }
 0x3d6   :  { %13655 = vst [vmem:[#allocation288_spill] sm:$0xff] %v9062_v23 }
 0x3d8   :  { %v9064_v30 = vpop.permute.xlu1 %3582 }
 0x3d9   :  { %13656 = vst [vmem:[#allocation289_spill] sm:$0xff] %v9064_v30 }
 0x3da   :  { %7204 = vset.pattern.permute.xlu1 %v13418_v27 }
 0x3db   :  { %7205 = vset.pattern.permute.xlu2 %v13461_v16  ;;  %2645 = vperm.xlu1 %7204, %v8871_v62   ;;  %v9070_v15 = vpop.permute.xlu2 %2905 }
 0x3dc   :  { %3114 = vperm.xlu2 %7205, %v9039_v4   ;;  %13657 = vst [vmem:[#allocation290_spill] sm:$0xff] %v9070_v15  ;;  %887 = vperm.xlu0 %7356, %v8884_v56  }
 0x3dd   :  { %v9073_v18 = vpop.permute.xlu0 %596 }
 0x3de   :  { %13658 = vst [vmem:[#allocation291_spill] sm:$0xff] %v9073_v18 }
 0x3e1   :  { %v9075_v13 = vpop.permute.xlu1 %2069 }
 0x3e2   :  { %13659 = vst [vmem:[#allocation292_spill] sm:$0xff] %v9075_v13 }
 0x3e3   :  { %7206 = vset.pattern.permute.xlu1 %v13514_v25 }
 0x3e4   :  { %7207 = vset.pattern.permute.xlu2 %v13612_v60  ;;  %2361 = vperm.xlu1 %7206, %v8989_v5   ;;  %v9084_v30 = vpop.permute.xlu2 %1792 }
 0x3e5   :  { %899 = vperm.xlu0 %7356, %v8900_v43   ;;  %2741 = vperm.xlu2 %7207, %v8871_v62   ;;  %v9082_v2 = vpop.permute.xlu0 %608  ;;  %13661 = vst [vmem:[#allocation294_spill] sm:$0xff] %v9084_v30 }
 0x3e6   :  { %13660 = vst [vmem:[#allocation293_spill] sm:$0xff] %v9082_v2 }
 0x3ea   :  { %v9086_v15 = vpop.permute.xlu1 %3678 }
 0x3eb   :  { %13662 = vst [vmem:[#allocation295_spill] sm:$0xff] %v9086_v15 }
 0x3ec   :  { %7208 = vset.pattern.permute.xlu1 %v13506_v11 }
 0x3ed   :  { %911 = vperm.xlu0 %7356, %v8916_v3   ;;  %7209 = vset.pattern.permute.xlu2 %v13418_v27  ;;  %v9091_v56 = vpop.permute.xlu0 %620  ;;  %v9107_v3 = vld [vmem:[%s13284_s0 + $0x120] sm:$0xff] }
 0x3ee   :  { %13663 = vst [vmem:[#allocation296_spill] sm:$0xff] %v9091_v56  ;;  %3210 = vperm.xlu1 %7208, %v9039_v4   ;;  %3590 = vperm.xlu2 %7209, %v8929_v10   ;;  %v9095_v43 = vpop.permute.xlu2 %2641 }
 0x3ef   :  { %13664 = vst [vmem:[#allocation297_spill] sm:$0xff] %v9095_v43 }
 0x3f0   :  { %13666 = vst [vmem:[#allocation299_spill] sm:$0xff] %v9107_v3 }
 0x3f3   :  { %v9097_v62 = vpop.permute.xlu1 %2545 }
 0x3f4   :  { %13665 = vst [vmem:[#allocation298_spill] sm:$0xff] %v9097_v62 }
 0x3f5   :  { %3682 = vperm.xlu0 %7356, %v8747_v54   ;;  %v9100_v30 = vpop.permute.xlu0 %1500  ;;  %v7484_v54 = vld [vmem:[%s13284_s0 + $0x98] sm:$0xff] }
 0x3f6   :  { %7210 = vset.pattern.permute.xlu1 %v13472_v8  ;;  %7211 = vset.pattern.permute.xlu2 %v13542_v12 }
 0x3f7   :  { %2077 = vperm.xlu1 %7210, %v9107_v3   ;;  %2457 = vperm.xlu2 %7211, %v8989_v5   ;;  %v9111_v43 = vpop.permute.xlu2 %2357 }
 0x3f8   :  { %13667 = vst [vmem:[#allocation300_spill] sm:$0xff] %v9111_v43 }
 0x3fc   :  { %v9113_v62 = vpop.permute.xlu1 %3394 }
 0x3fd   :  { %13668 = vst [vmem:[#allocation301_spill] sm:$0xff] %v9113_v62  ;;  %1800 = vperm.xlu0 %7356, %v7484_v54   ;;  %v9118_v56 = vpop.permute.xlu0 %1520  ;;  %v9134_v54 = vld [vmem:[%s13284_s0 + $0x1a0] sm:$0xff] }
 0x3fe   :  { %13669 = vst [vmem:[#allocation302_spill] sm:$0xff] %v9118_v56  ;;  %v43_v56 = vld [vmem:[%s13285_s1] sm:$0xff] }
 0x3ff   :  { %7212 = vset.pattern.permute.xlu1 %v13514_v25  ;;  %7213 = vset.pattern.permute.xlu2 %v13612_v60  ;;  %v9163_v13 = vperm.slane %v43_v56, 3 }
 0x400   :  { %3306 = vperm.xlu1 %7212, %v9039_v4   ;;  %3686 = vperm.xlu2 %7213, %v8929_v10   ;;  %v9124_v2 = vpop.permute.xlu2 %3206 }
 0x401   :  { %13670 = vst [vmem:[#allocation303_spill] sm:$0xff] %v9124_v2  ;;  %v9150_v2 = vld [vmem:[%s13284_s0 + $0x130] sm:$0xff] }
 0x402   :  { %13674 = vst [vmem:[#allocation307_spill] sm:$0xff] %v9150_v2 }
 0x405   :  { %2749 = vperm.xlu0 %7356, %v9107_v3   ;;  %v9127_v62 = vpop.permute.xlu1 %2261  ;;  %v9129_v43 = vpop.permute.xlu0 %1532 }
 0x406   :  { %13671 = vst [vmem:[#allocation304_spill] sm:$0xff] %v9127_v62  ;;  %v9155_v62 = vperm.slane %v43_v56, 0 }
 0x407   :  { %13672 = vst [vmem:[#allocation305_spill] sm:$0xff] %v9129_v43  ;;  %v9145_v43 = vperm.slane %v43_v56, 1 }
 0x408   :  { %7214 = vset.pattern.permute.xlu1 %v13413_v38  ;;  %7215 = vset.pattern.permute.xlu2 %v13452_v7  ;;  %v145_v15 = vmul.f32 %v9155_v62, %v7827_v33  ;;  %v148_v33 = vmul.f32 %v9155_v62, %v7809_v29 }
 0x409   :  { %2553 = vperm.xlu1 %7214, %v8989_v5   ;;  %2915 = vperm.xlu2 %7215, %v9134_v54   ;;  %v9140_v10 = vpop.permute.xlu2 %2073  ;;  %v245_v23 = vmul.f32 %v9145_v43, %v7916_v59  ;;  %v151_v59 = vmul.f32 %v9155_v62, %v7819_v31  ;;  %v436_v31 = vmul.f32 %v9163_v13, %v8021_v45 }
 0x40a   :  { %13673 = vst [vmem:[#allocation306_spill] sm:$0xff] %v9140_v10  ;;  %v242_v10 = vmul.f32 %v9145_v43, %v7986_v42  ;;  %v251_v42 = vmul.f32 %v9145_v43, %v7937_v19  ;;  %v9189_v19 = vmul.f32 %v9163_v13, %v7831_v34  ;;  %v9207_v34 = vmul.f32 %v9145_v43, %v7888_v51 }
 0x40c   :  { %13678 = vst [vmem:[#allocation311_spill] sm:$0xff] %v9189_v19  ;;  %v13702_v19 = vld [vmem:[#allocation70_spill] sm:$0xff] }
 0x40d   :  { %2757 = vperm.xlu0 %7356, %v9150_v2   ;;  %v9153_v18 = vpop.permute.xlu0 %1544  ;;  %v9171_v2 = vperm.slane %v43_v56, 2 }
 0x40e   :  { %13675 = vst [vmem:[#allocation308_spill] sm:$0xff] %v9153_v18  ;;  %v9159_v25 = vpop.permute.xlu1 %3490  ;;  %v248_v18 = vmul.f32 %v9145_v43, %v7928_v63  ;;  %v254_v63 = vmul.f32 %v9145_v43, %v7951_v46  ;;  %v9203_v46 = vmul.f32 %v7882_v49, %v9163_v13 }
 0x40f   :  { %13676 = vst [vmem:[#allocation309_spill] sm:$0xff] %v9159_v25  ;;  %v258_v25 = vadd.f32 %v242_v10, %v145_v15  ;;  %v157_v15 = vmul.f32 %v9155_v62, %v7834_v35  ;;  %v339_v29 = vmul.f32 %v9171_v2, %v7930_v28  ;;  %v261_v10 = vadd.f32 %v245_v23, %v148_v33  ;;  %v13685_v33 = vld [vmem:[#allocation42_spill] sm:$0xff] }
 0x410   :  { %13680 = vst [vmem:[#allocation313_spill] sm:$0xff] %v9203_v46  ;;  %v9212_v28 = vadd.f32 %v248_v18, %v151_v59  ;;  %v9224_v51 = vmul.f32 %v9171_v2, %v7965_v61  ;;  %v9230_v23 = vperm.slane %v43_v56, 4  ;;  %v13687_v59 = vld [vmem:[#allocation49_spill] sm:$0xff] }
 0x411   :  { %7216 = vset.pattern.permute.xlu1 %v13472_v8  ;;  %7217 = vset.pattern.permute.xlu2 %v13542_v12  ;;  %v154_v8 = vmul.f32 %v9155_v62, %v7825_v32  ;;  %v9199_v32 = vmul.f32 %v9145_v43, %v7849_v40  ;;  %v9218_v40 = vmul.f32 %v7949_v1, %v9163_v13  ;;  %v13700_v46 = vld [vmem:[#allocation69_spill] sm:$0xff] }
 0x412   :  { %3022 = vperm.xlu1 %7216, %v9134_v54   ;;  %3402 = vperm.xlu2 %7217, %v9039_v4   ;;  %v9185_v12 = vpop.permute.xlu2 %3302  ;;  %v9220_v49 = vadd.f32 %v254_v63, %v157_v15  ;;  %13683 = vst [vmem:[#allocation316_spill] sm:$0xff] %v9224_v51  ;;  %v9238_v1 = vmul.f32 %v9163_v13, %v8011_v37  ;;  %v9258_v37 = vperm.slane %v43_v56, 7  ;;  %v13706_v51 = vld [vmem:[#allocation81_spill] sm:$0xff] }
 0x413   :  { %13677 = vst [vmem:[#allocation310_spill] sm:$0xff] %v9185_v12  ;;  %v9214_v45 = vadd.f32 %v251_v42, %v154_v8  ;;  %v355_v12 = vadd.f32 %v339_v29, %v258_v25  ;;  %v439_v8 = vmul.f32 %v9163_v13, %v8002_v53  ;;  %v9242_v25 = vmul.f32 %v9163_v13, %v8018_v0  ;;  %v13691_v29 = vld [vmem:[#allocation58_spill] sm:$0xff] }
 0x414   :  { %13679 = vst [vmem:[#allocation312_spill] sm:$0xff] %v9199_v32  ;;  %v9252_v42 = vmul.f32 %v8024_v39, %v9145_v43  ;;  %v9256_v53 = vmul.f32 %v9230_v23, %v13685_v33  ;;  %v9262_v0 = vmul.f32 %v13687_v59, %v9145_v43  ;;  %v9272_v39 = vperm.slane %v43_v56, 5  ;;  %v13693_v33 = vld [vmem:[#allocation59_spill] sm:$0xff] }
 0x415   :  { %3714 = vperm.xlu0 %7356, %v8791_v55   ;;  %v9210_v35 = vpop.permute.xlu0 %1556  ;;  %13682 = vst [vmem:[#allocation315_spill] sm:$0xff] %v9218_v40  ;;  %v9228_v55 = vmul.f32 %v9163_v13, %v7983_v41  ;;  %v9244_v61 = vadd.f32 %v436_v31, %v355_v12  ;;  %v9248_v41 = vmul.f32 %v9163_v13, %v8027_v57  ;;  %v13689_v12 = vld [vmem:[#allocation51_spill] sm:$0xff]  ;;  %v13690_v57 = vld [vmem:[#allocation57_spill] sm:$0xff]  ;;  %v13696_v40 = vld [vmem:[#allocation60_spill] sm:$0xff] }
 0x416   :  { %13681 = vst [vmem:[#allocation314_spill] sm:$0xff] %v9210_v35  ;;  %v9266_v63 = vmul.f32 %v9230_v23, %v13689_v12  ;;  %v9270_v15 = vmul.f32 %v9230_v23, %v13690_v57  ;;  %v9278_v31 = vmul.f32 %v9258_v37, %v13691_v29  ;;  %v9282_v59 = vmul.f32 %v9230_v23, %v13693_v33  ;;  %v13694_v35 = vld [vmem:[#allocation145_spill] sm:$0xff]  ;;  %v13697_v29 = vld [vmem:[#allocation62_spill] sm:$0xff] }
 0x417   :  { %v9232_v18 = vpop.permute.xlu1 %2737  ;;  %13686 = vst [vmem:[#allocation42_spill] sm:$0xff] %v9256_v53  ;;  %v9284_v12 = vperm.slane %v43_v56, 6  ;;  %v342_v57 = vmul.f32 %v9171_v2, %v13694_v35  ;;  %v9294_v53 = vmul.f32 %v9272_v39, %v13696_v40  ;;  %v13698_v33 = vld [vmem:[#allocation65_spill] sm:$0xff]  ;;  %v9306_v35 = vmul.f32 %v9272_v39, %v13700_v46 }
 0x418   :  { %13684 = vst [vmem:[#allocation317_spill] sm:$0xff] %v9232_v18  ;;  %v9302_v56 = vmul.f32 %v9230_v23, %v13698_v33 }
 0x419   :  { %13688 = vst [vmem:[#allocation49_spill] sm:$0xff] %v9262_v0  ;;  %v9298_v0 = vmul.f32 %v9230_v23, %v13697_v29  ;;  %v9318_v29 = vmul.f32 %v9284_v12, %v13706_v51  ;;  %v358_v32 = vadd.f32 %v342_v57, %v261_v10  ;;  %v348_v10 = vmul.f32 %v9171_v2, %v8447_v58 }
 0x41a   :  { %7218 = vset.pattern.permute.xlu1 %v13506_v11  ;;  %7219 = vset.pattern.permute.xlu2 %v13418_v27  ;;  %13692 = vst [vmem:[#allocation51_spill] sm:$0xff] %v9278_v31  ;;  %v9310_v31 = vmul.f32 %v13702_v19, %v9258_v37  ;;  %v2028_v58 = vmul.f32 %v8921_v48, %v9155_v62 }
 0x41b   :  { %2269 = vperm.xlu1 %7218, %v9107_v3   ;;  %2649 = vperm.xlu2 %7219, %v8989_v5   ;;  %v9290_v18 = vpop.permute.xlu2 %2549  ;;  %13699 = vst [vmem:[#allocation58_spill] sm:$0xff] %v9302_v56  ;;  %v13708_v3 = vld [vmem:[#allocation82_spill] sm:$0xff]  ;;  %v455_v48 = vadd.f32 %v439_v8, %v358_v32  ;;  %v143_v8 = vmul.f32 %v9155_v62, %v8794_v47  ;;  %v13741_v47 = vld [vmem:[#allocation156_spill] sm:$0xff] }
 0x41c   :  { %13695 = vst [vmem:[#allocation57_spill] sm:$0xff] %v9290_v18  ;;  %v13704_v18 = vld [vmem:[#allocation75_spill] sm:$0xff]  ;;  %v9322_v33 = vmul.f32 %v13708_v3, %v9258_v37  ;;  %v13713_v56 = vld [vmem:[#allocation86_spill] sm:$0xff] }
 0x41d   :  { %13701 = vst [vmem:[#allocation59_spill] sm:$0xff] %v9306_v35  ;;  %v9314_v40 = vmul.f32 %v9284_v12, %v13704_v18  ;;  %1836 = vperm.xlu0 %7356, %v8714_v52   ;;  %v9325_v46 = vpop.permute.xlu0 %3398  ;;  %v13711_v35 = vld [vmem:[#allocation84_spill] sm:$0xff]  ;;  %v9333_v18 = vmul.f32 %v9284_v12, %v13713_v56 }
 0x41e   :  { %13703 = vst [vmem:[#allocation145_spill] sm:$0xff] %v9310_v31  ;;  %v9329_v19 = vmul.f32 %v9284_v12, %v13711_v35  ;;  %v13715_v31 = vld [vmem:[#allocation87_spill] sm:$0xff]  ;;  %v13718_v52 = vld [vmem:[#allocation148_spill] sm:$0xff] }
 0x41f   :  { %13705 = vst [vmem:[#allocation60_spill] sm:$0xff] %v9314_v40  ;;  %v9337_v51 = vmul.f32 %v9284_v12, %v13715_v31  ;;  %v13719_v40 = vld [vmem:[#allocation93_spill] sm:$0xff]  ;;  %v9356_v31 = vld [vmem:[%s13285_s1 + $0x8] ss:$0 sm:$0xff] }
 0x420   :  { %13707 = vst [vmem:[#allocation62_spill] sm:$0xff] %v9318_v29  ;;  %v13716_v29 = vld [vmem:[#allocation89_spill] sm:$0xff]  ;;  %v9347_v35 = vmul.f32 %v9258_v37, %v13719_v40  ;;  %v9360_v57 = vpop.permute.xlu1 %1965  ;;  %v13724_v40 = vld [vmem:[#allocation102_spill] sm:$0xff] }
 0x421   :  { %13709 = vst [vmem:[#allocation65_spill] sm:$0xff] %v9322_v33  ;;  %v9341_v3 = vmul.f32 %v9284_v12, %v13716_v29  ;;  %v13325_v29 = vmov 0.0  }
 0x422   :  { %13710 = vst [vmem:[#allocation69_spill] sm:$0xff] %v9325_v46  ;;  %v345_v46 = vmul.f32 %v9171_v2, %v13718_v52  ;;  %v9366_v52 = vmul.f32 %v9258_v37, %v13724_v40  ;;  %v13731_v40 = vld [vmem:[#allocation112_spill] sm:$0xff] }
 0x423   :  { %13712 = vst [vmem:[#allocation70_spill] sm:$0xff] %v9329_v19  ;;  %v13721_v19 = vld [vmem:[#allocation97_spill] sm:$0xff]  ;;  %7220 = vset.pattern.permute.xlu1 %v13461_v16  ;;  %7221 = vset.pattern.permute.xlu2 %v13413_v38 }
 0x424   :  { %13714 = vst [vmem:[#allocation75_spill] sm:$0xff] %v9333_v18  ;;  %v9351_v56 = vmul.f32 %v9284_v12, %v13721_v19  ;;  %v13726_v19 = vld [vmem:[#allocation108_spill] sm:$0xff]  ;;  %v361_v33 = vadd.f32 %v345_v46, %v9212_v28  ;;  %3118 = vperm.xlu1 %7220, %v9134_v54   ;;  %3498 = vperm.xlu2 %7221, %v9039_v4  }
 0x425   :  { %13717 = vst [vmem:[#allocation81_spill] sm:$0xff] %v9341_v3  ;;  %v13728_v3 = vld [vmem:[#allocation110_spill] sm:$0xff]  ;;  %v2220_v28 = vmul.f32 %v8512_v9, %v9171_v2  ;;  %2781 = vperm.xlu0 %7356, %v8589_v24  }
 0x426   :  { %13720 = vst [vmem:[#allocation82_spill] sm:$0xff] %v9347_v35  ;;  %v9370_v35 = vmul.f32 %v9258_v37, %v13726_v19  ;;  %v13733_v19 = vld [vmem:[#allocation113_spill] sm:$0xff]  ;;  %v458_v24 = vadd.f32 %v9238_v1, %v361_v33  ;;  %v256_v33 = vadd.f32 %v9207_v34, %v143_v8  ;;  %v3069_v34 = vmul.f32 %v8895_v50, %v9145_v43 }
 0x427   :  { %13722 = vst [vmem:[#allocation84_spill] sm:$0xff] %v9351_v56  ;;  %v9374_v56 = vmul.f32 %v9258_v37, %v13728_v3  ;;  %v13734_v3 = vld [vmem:[#allocation138_spill] sm:$0xff]  ;;  %v6876_v50 = vld [vmem:[%s13287_s3 + $0x48] sm:$0xff] }
 0x428   :  { %13723 = vst [vmem:[#allocation86_spill] sm:$0xff] %v9360_v57  ;;  %v13730_v57 = vld [vmem:[#allocation111_spill] sm:$0xff] }
 0x429   :  { %3825 = vst.msk [vmem:[#allocation2 + $0x10] sm:$0xff] %vm3821_vm0, %v13325_v29  ;;  %v9382_v18 = vmul.f32 %v9356_v31, %v13730_v57  ;;  %v2124_v57 = vmul.f32 %v8879_v22, %v9145_v43  ;;  %v9410_v22 = vpop.permute.xlu2 %3018 }
 0x42a   :  { %13725 = vst [vmem:[#allocation87_spill] sm:$0xff] %v9366_v52  ;;  %v9386_v52 = vmul.f32 %v13731_v40, %v9284_v12  ;;  %v13735_v40 = vld [vmem:[#allocation126_spill] sm:$0xff] }
 0x42b   :  { %13727 = vst [vmem:[#allocation89_spill] sm:$0xff] %v9370_v35  ;;  %v9390_v35 = vmul.f32 %v9258_v37, %v13733_v19  ;;  %v1083_v19 = vmul.f32 %v13735_v40, %v9155_v62  ;;  %v2140_v46 = vadd.f32 %v2124_v57, %v2028_v58  ;;  %v1275_v58 = vmul.f32 %v13741_v47, %v9171_v2  ;;  %v13742_v57 = vld [vmem:[#allocation144_spill] sm:$0xff] }
 0x42c   :  { %13729 = vst [vmem:[#allocation148_spill] sm:$0xff] %v9374_v56  ;;  %v1085_v56 = vmul.f32 %v13734_v3, %v9155_v62  ;;  %v364_v3 = vadd.f32 %v348_v10, %v9214_v45  ;;  %v9418_v45 = vpop.permute.xlu0 %2465  ;;  %v13739_v10 = vld [vmem:[#allocation127_spill] sm:$0xff]  ;;  %7222 = vset.pattern.permute.xlu1 %v13612_v60  ;;  %7223 = vset.pattern.permute.xlu2 %v13506_v11 }
 0x42d   :  { %3826 = vst.msk [vmem:[#allocation2 + $0x18] sm:$0x3] %vm3823_vm1, %v13325_v29  ;;  %2745 = vperm.xlu1 %7222, %v8989_v5   ;;  %3214 = vperm.xlu2 %7223, %v9134_v54   ;;  %v3261_v5 = vmul.f32 %v8959_v21, %v9163_v13  ;;  %v6898_v21 = vld [vmem:[%s13287_s3 + $0x78] sm:$0xff] }
 0x42e   :  { %13732 = vst [vmem:[#allocation93_spill] sm:$0xff] %v9386_v52  ;;  %v13736_v52 = vld [vmem:[#allocation152_spill] sm:$0xff]  ;;  %v9428_v40 = vadd.f32 %v9252_v42, %v1085_v56  ;;  %v9444_v42 = vadd.f32 %v9270_v15, %v455_v48  ;;  %v6842_v56 = vld [vmem:[%s13287_s3 + $0x38] sm:$0xff]  ;;  %v9455_v47 = vadd.f32 %v9242_v25, %v364_v3  ;;  %v1371_v15 = vmul.f32 %v8533_v14, %v9163_v13  ;;  %v6877_v25 = vld [vmem:[%s13287_s3 + $0x50] sm:$0xff] }
 0x42f   :  { %3822 = vst.msk [vmem:[#allocation2] sm:$0xff] %vm3821_vm0, %v13325_v29  ;;  %v1179_v32 = vmul.f32 %v13736_v52, %v9145_v43  ;;  %v9425_v52 = vmul.f32 %v13739_v10, %v9284_v12  ;;  %v2316_v10 = vmul.f32 %v8948_v26, %v9163_v13  ;;  %v2973_v26 = vmul.f32 %v8937_v20, %v9155_v62  ;;  %v6841_v20 = vld [vmem:[%s13287_s3 + $0x30] sm:$0xff] }
 0x430   :  { %3824 = vst.msk [vmem:[#allocation2 + $0x8] sm:$0x3] %vm3823_vm1, %v13325_v29  ;;  %3981 = vmatpush.msra.mxu0 %v6842_v56  ;;  %v2236_v48 = vadd.f32 %v2220_v28, %v2140_v46  ;;  %7111 = vmatpush.msra.mxu1 %v6842_v56  ;;  %v13744_v28 = vld [vmem:[#allocation211_spill] sm:$0xff]  ;;  %v13745_v56 = vld [vmem:[#allocation190_spill] sm:$0xff] }
 0x431   :  { %13737 = vst [vmem:[#allocation97_spill] sm:$0xff] %v9410_v22  ;;  %v13740_v22 = vld [vmem:[#allocation142_spill] sm:$0xff]  ;;  %v1195_v1 = vadd.f32 %v1179_v32, %v1083_v19  ;;  %v13743_v19 = vld [vmem:[#allocation153_spill] sm:$0xff]  ;;  %v1467_v32 = vmul.f32 %v8635_v36, %v9230_v23  ;;  %v2412_v8 = vmul.f32 %v13744_v28, %v9230_v23  ;;  %v9506_v28 = vpop.permute.xlu2 %2265  ;;  %4378 = vmatpush.msra.mxu3 %v6898_v21  ;;  %v6895_v21 = vld [vmem:[%s13287_s3 + $0x60] sm:$0xff] }
 0x432   :  { %3827 = vst.msk [vmem:[#allocation2 + $0x20] sm:$0xff] %vm3821_vm0, %v13325_v29  ;;  %v337_v9 = vmul.f32 %v9171_v2, %v13740_v22  ;;  %v6878_v22 = vld [vmem:[%s13287_s3 + $0x58] sm:$0xff]  ;;  %v351_v14 = vmul.f32 %v9171_v2, %v13743_v19  ;;  %3982 = vmatpush.msra.mxu0 %v6841_v20  ;;  %v2332_v46 = vadd.f32 %v2316_v10, %v2236_v48  ;;  %v13746_v36 = vld [vmem:[#allocation261_spill] sm:$0xff] }
 0x433   :  { %13738 = vst [vmem:[#allocation102_spill] sm:$0xff] %v9418_v45  ;;  %v9438_v45 = vmul.f32 %v13742_v57, %v9145_v43  ;;  %4228 = vmatpush.msra.mxu2 %v6878_v22  ;;  %v9464_v57 = vpop.permute.xlu1 %2453  ;;  %v1291_v3 = vadd.f32 %v1275_v58, %v1195_v1  ;;  %v6840_v58 = vld [vmem:[%s13287_s3 + $0x28] sm:$0xff]  ;;  %7112 = vmatpush.msra.mxu1 %v6841_v20 }
 0x434   :  { %3828 = vst.msk [vmem:[#allocation2 + $0x28] sm:$0x3] %vm3823_vm1, %v13325_v29  ;;  %v533_v22 = vmul.f32 %v9230_v23, %v13745_v56  ;;  %v3165_v1 = vmul.f32 %v13746_v36, %v9171_v2  ;;  %v353_v48 = vadd.f32 %v337_v9, %v256_v33  ;;  %v1563_v19 = vmul.f32 %v9100_v30, %v9272_v39  ;;  %v9504_v20 = vpop.permute.xlu0 %3430  ;;  %v6875_v9 = vld [vmem:[%s13287_s3 + $0x40] sm:$0xff] }
 0x435   :  { %3829 = vst.msk [vmem:[#allocation2 + $0x30] sm:$0xff] %vm3821_vm0, %v13325_v29  ;;  %4229 = vmatpush.msra.mxu2 %v6877_v25  ;;  %v3085_v25 = vadd.f32 %v3069_v34, %v2973_v26  ;;  %v1387_v10 = vadd.f32 %v1371_v15, %v1291_v3  ;;  %v6839_v26 = vld [vmem:[%s13287_s3 + $0x20] sm:$0xff]  ;;  %v367_v30 = vadd.f32 %v351_v14, %v9220_v49  ;;  %v7486_v49 = vld [vmem:[%s13284_s0 + $0x170] sm:$0xff] }
 0x436   :  { %3830 = vst.msk [vmem:[#allocation2 + $0x38] sm:$0x3] %vm3823_vm1, %v13325_v29  ;;  %v9520_v15 = vadd.f32 %v9282_v59, %v458_v24  ;;  %3983 = vmatpush.msra.mxu0 %v6840_v58  ;;  %v2508_v56 = vmul.f32 %v8943_v17, %v9272_v39  ;;  %v2428_v36 = vadd.f32 %v2412_v8, %v2332_v46  ;;  %v13748_v59 = vld [vmem:[#allocation161_spill] sm:$0xff] }
 0x437   :  { %3831 = vst.msk [vmem:[#allocation2 + $0x40] sm:$0xff] %vm3821_vm0, %v13325_v29  ;;  %4230 = vmatpush.msra.mxu2 %v6876_v50  ;;  %v3900_v33 = vld [vmem:[#allocation2 + $0x1] sm:$0xff]  ;;  %v1483_v34 = vadd.f32 %v1467_v32, %v1387_v10  ;;  %2789 = vperm.xlu0 %7356, %v7486_v49   ;;  %v1277_v24 = vmul.f32 %v13748_v59, %v9171_v2  ;;  %v13757_v49 = vld [vmem:[#allocation251_spill] sm:$0xff] }
 0x438   :  { %3832 = vst.msk [vmem:[#allocation2 + $0x48] sm:$0x3] %vm3823_vm1, %v13325_v29  ;;  %v4147_v3 = vld [vmem:[#allocation2 + $0x2] sm:$0xff]  ;;  %7113 = vmatpush.msra.mxu1 %v6840_v58  ;;  %v549_v14 = vadd.f32 %v533_v22, %v9244_v61  ;;  %v3181_v17 = vadd.f32 %v3165_v1, %v3085_v25  ;;  %3984 = vmatpush.msra.mxu0 %v6839_v26  ;;  %v6897_v61 = vld [vmem:[%s13287_s3 + $0x70] sm:$0xff]  ;;  %v13749_v58 = vld [vmem:[#allocation187_spill] sm:$0xff] }
 0x439   :  { %3833 = vst.msk [vmem:[#allocation2 + $0x50] sm:$0xff] %vm3821_vm0, %v13325_v29  ;;  %4231 = vmatpush.msra.mxu2 %v6875_v9  ;;  %v450_v32 = vadd.f32 %v9228_v55, %v353_v48  ;;  %v9542_v8 = vadd.f32 %v9298_v0, %v9455_v47  ;;  %v1579_v46 = vadd.f32 %v1563_v19, %v1483_v34  ;;  %v13750_v55 = vld [vmem:[#allocation214_spill] sm:$0xff]  ;;  %v13751_v1 = vld [vmem:[#allocation225_spill] sm:$0xff] }
 0x43a   :  { %3834 = vst.msk [vmem:[#allocation2 + $0x58] sm:$0x3] %vm3823_vm1, %v13325_v29  ;;  %6843 = vmatmul.msk.f32.vlgmr.msra.gmra.mxu0 %vm3821_vm0, %v3900_v33  ;;  %6879 = vmatmul.msk.f32.vlgmr.msra.gmra.mxu2 %vm3821_vm0, %v4147_v3  ;;  %v1373_v50 = vmul.f32 %v13749_v58, %v9163_v13  ;;  %v3357_v22 = vmul.f32 %v13750_v55, %v9230_v23  ;;  %v13759_v58 = vld [vmem:[#allocation240_spill] sm:$0xff]  ;;  %v13760_v55 = vld [vmem:[#allocation274_spill] sm:$0xff] }
 0x43b   :  { %3835 = vst.msk [vmem:[#allocation2 + $0x60] sm:$0xff] %vm3821_vm0, %v13325_v29  ;;  %v3277_v0 = vadd.f32 %v3261_v5, %v3181_v17  ;;  %v9555_v47 = vpop.permute.xlu1 %2169  ;;  %7114 = vmatpush.msra.mxu1 %v6839_v26  ;;  %v1659_v25 = vmul.f32 %v13751_v1, %v9284_v12  ;;  %v2524_v10 = vadd.f32 %v2508_v56, %v2428_v36  ;;  %v13755_v36 = vld [vmem:[#allocation275_spill] sm:$0xff]  ;;  %v13761_v1 = vld [vmem:[#allocation278_spill] sm:$0xff] }
 0x43c   :  { %13747 = vst [vmem:[#allocation108_spill] sm:$0xff] %v9504_v20  ;;  %v2604_v48 = vmul.f32 %v8954_v6, %v9284_v12  ;;  %v628_v19 = vmul.f32 %v9272_v39, %v9049_v44  ;;  %v9568_v9 = vadd.f32 %v9248_v41, %v367_v30  ;;  %v1293_v5 = vadd.f32 %v1277_v24, %v9428_v40  ;;  %v6896_v6 = vld [vmem:[%s13287_s3 + $0x68] sm:$0xff]  ;;  %v9582_v41 = vpop.permute.xlu0 %3446  ;;  %v7487_v17 = vld [vmem:[%s13284_s0 + $0x1e0] sm:$0xff] }
 0x43d   :  { %3836 = vst.msk [vmem:[#allocation2 + $0x68] sm:$0x3] %vm3823_vm1, %v13325_v29  ;;  %v646_v26 = vadd.f32 %v9294_v53, %v549_v14  ;;  %4379 = vmatpush.msra.mxu3 %v6897_v61  ;;  %v13752_v44 = vld [vmem:[#allocation200_spill] sm:$0xff]  ;;  %v547_v3 = vadd.f32 %v9266_v63, %v450_v32  ;;  %v1675_v34 = vadd.f32 %v1659_v25, %v1579_v46  ;;  %v9590_v63 = vpop.permute.xlu2 %3114  ;;  %v13758_v32 = vld [vmem:[#allocation170_spill] sm:$0xff] }
 0x43e   :  { %3837 = vst.msk [vmem:[#allocation2 + $0x70] sm:$0xff] %vm3821_vm0, %v13325_v29  ;;  %v1469_v33 = vmul.f32 %v13752_v44, %v9230_v23  ;;  %7224 = vset.pattern.permute.xlu1 %v13418_v27  ;;  %7225 = vset.pattern.permute.xlu2 %v13452_v7  ;;  %v1389_v53 = vadd.f32 %v1373_v50, %v1293_v5  ;;  %v13754_v30 = vld [vmem:[#allocation268_spill] sm:$0xff] }
 0x43f   :  { %3838 = vst.msk [vmem:[#allocation2 + $0x78] sm:$0x3] %vm3823_vm1, %v13325_v29  ;;  %v3373_v40 = vadd.f32 %v3357_v22, %v3277_v0  ;;  %v3453_v56 = vmul.f32 %v13754_v30, %v9272_v39  ;;  %3594 = vperm.xlu1 %7224, %v9039_v4   ;;  %1975 = vperm.xlu2 %7225, %v13755_v36   ;;  %v13763_v5 = vld [vmem:[#allocation288_spill] sm:$0xff] }
 0x440   :  { %3839 = vst.msk [vmem:[#allocation2 + $0x80] sm:$0xff] %vm3821_vm0, %v13325_v29  ;;  %v1755_v59 = vmul.f32 %v13757_v49, %v9258_v37  ;;  %v2620_v24 = vadd.f32 %v2604_v48, %v2524_v10  ;;  %v644_v14 = vadd.f32 %v628_v19, %v547_v3  ;;  %4380 = vmatpush.msra.mxu3 %v6896_v6  ;;  %v13764_v6 = vld [vmem:[#allocation289_spill] sm:$0xff]  ;;  %v13767_v30 = vld [vmem:[#allocation60_spill] sm:$0xff] }
 0x441   :  { %3840 = vst.msk [vmem:[#allocation2 + $0x88] sm:$0x3] %vm3823_vm1, %v13325_v29  ;;  %3726 = vperm.xlu0 %7356, %v7487_v17   ;;  %v9606_v46 = vmul.f32 %v13758_v32, %v9171_v2  ;;  %v743_v61 = vadd.f32 %v9337_v51, %v646_v26  ;;  %v144_v50 = vmul.f32 %v9155_v62, %v13759_v58  ;;  %v13762_v51 = vld [vmem:[#allocation210_spill] sm:$0xff]  ;;  %v13768_v49 = vld [vmem:[#allocation292_spill] sm:$0xff]  ;;  %v13770_v32 = vld [vmem:[#allocation255_spill] sm:$0xff] }
 0x442   :  { %3841 = vst.msk [vmem:[#allocation2 + $0x90] sm:$0xff] %vm3821_vm0, %v13325_v29  ;;  %v3549_v22 = vmul.f32 %v13760_v55, %v9284_v12  ;;  %v1485_v0 = vadd.f32 %v1469_v33, %v1389_v53  ;;  %v2796_v25 = vmul.f32 %v9356_v31, %v13761_v1  ;;  %v1771_v10 = vadd.f32 %v1755_v59, %v1675_v34  ;;  %v13765_v33 = vld [vmem:[#allocation65_spill] sm:$0xff]  ;;  %v13766_v34 = vld [vmem:[#allocation280_spill] sm:$0xff] }
 0x443   :  { %3842 = vst.msk [vmem:[#allocation2 + $0x98] sm:$0x3] %vm3823_vm1, %v13325_v29  ;;  %4381 = vmatpush.msra.mxu3 %v6895_v21  ;;  %v1565_v48 = vmul.f32 %v13762_v51, %v9272_v39  ;;  %v3469_v19 = vadd.f32 %v3453_v56, %v3373_v40  ;;  %v633_v26 = vmul.f32 %v9272_v39, %v13763_v5  ;;  %v9633_v40 = vpop.permute.xlu1 %2910  ;;  %v13769_v56 = vld [vmem:[#allocation312_spill] sm:$0xff] }
 0x444   :  { %3843 = vst.msk [vmem:[#allocation2 + $0xa0] sm:$0xff] %vm3821_vm0, %v13325_v29  ;;  %v3645_v44 = vmul.f32 %v13764_v6, %v9258_v37  ;;  %v2716_v3 = vadd.f32 %v13765_v33, %v2620_v24  ;;  %v1851_v53 = vmul.f32 %v9356_v31, %v13766_v34  ;;  %v741_v21 = vadd.f32 %v13767_v30, %v644_v14  ;;  %v13771_v24 = vld [vmem:[#allocation295_spill] sm:$0xff]  ;;  %v13772_v14 = vld [vmem:[#allocation237_spill] sm:$0xff]  ;;  %v13773_v6 = vld [vmem:[#allocation282_spill] sm:$0xff] }
 0x445   :  { %13753 = vst [vmem:[#allocation110_spill] sm:$0xff] %v9582_v41  ;;  %v2126_v59 = vmul.f32 %v13768_v49, %v9145_v43  ;;  %v257_v17 = vadd.f32 %v13769_v56, %v144_v50  ;;  %v1084_v58 = vmul.f32 %v13770_v32, %v9155_v62  ;;  %v3565_v55 = vadd.f32 %v3549_v22, %v3469_v19  ;;  %v13774_v50 = vld [vmem:[#allocation287_spill] sm:$0xff]  ;;  %v856_v32 = vpop.permute.xlu0 %855  ;;  %v13803_v41 = vld [vmem:[#allocation265_spill] sm:$0xff] }
 0x446   :  { %3844 = vst.msk [vmem:[#allocation2 + $0xa8] sm:$0x3] %vm3823_vm1, %v13325_v29  ;;  %v3741_v1 = vmul.f32 %v9356_v31, %v13771_v24  ;;  %v1661_v51 = vmul.f32 %v13772_v14, %v9284_v12  ;;  %v2812_v5 = vadd.f32 %v2796_v25, %v2716_v3  ;;  %v2030_v33 = vmul.f32 %v13773_v6, %v9155_v62  ;;  %v9660_v25 = vld [vmem:[%s13286_s2] ss:$0 sm:$0xff] }
 0x447   :  { %13756 = vst [vmem:[#allocation111_spill] sm:$0xff] %v9590_v63  ;;  %v1867_v34 = vadd.f32 %v1851_v53, %v1771_v10  ;;  %v2222_v22 = vmul.f32 %v13774_v50, %v9171_v2  ;;  %v649_v19 = vadd.f32 %v633_v26, %v9444_v42  ;;  %v3661_v30 = vadd.f32 %v3645_v44, %v3565_v55  ;;  %v13777_v3 = vld [vmem:[#allocation299_spill] sm:$0xff]  ;;  %v9668_v26 = vpop.permute.xlu2 %2741  ;;  %v13779_v44 = vld [vmem:[#allocation316_spill] sm:$0xff] }
 0x448   :  { %3845 = vst.msk [vmem:[#allocation2 + $0xb0] sm:$0xff] %vm3821_vm0, %v13325_v29  ;;  %v13775_v49 = vmov 5   ;;  %v13776_v56 = vmov 4   ;;  %v2142_v10 = vadd.f32 %v2126_v59, %v2030_v33  ;;  %v13778_v53 = vld [vmem:[#allocation87_spill] sm:$0xff]  ;;  %v919_v42 = vmul.f32 %v9356_v31, %v856_v32  ;;  %v13780_v59 = vld [vmem:[#allocation281_spill] sm:$0xff]  ;;  %v13781_v33 = vld [vmem:[#allocation304_spill] sm:$0xff] }
 0x449   :  { %3846 = vst.msk [vmem:[#allocation2 + $0xb8] sm:$0x3] %vm3823_vm1, %v13325_v29  ;;  %7226 = vset.pattern.permute.xlu1 %v13775_v49  ;;  %7227 = vset.pattern.permute.xlu2 %v13776_v56  ;;  %v838_v24 = vadd.f32 %v13778_v53, %v741_v21  ;;  %v354_v55 = vadd.f32 %v13779_v44, %v257_v17  ;;  %v13782_v17 = vld [vmem:[#allocation173_spill] sm:$0xff] }
 0x44a   :  { %3847 = vst.msk [vmem:[#allocation2 + $0xc0] sm:$0xff] %vm3821_vm0, %v13325_v29  ;;  %2461 = vperm.xlu1 %7226, %v13777_v3   ;;  %3310 = vperm.xlu2 %7227, %v9134_v54   ;;  %v1196_v14 = vadd.f32 %v9438_v45, %v1084_v58  ;;  %v3757_v6 = vadd.f32 %v3741_v1, %v3661_v30  ;;  %v13783_v58 = vld [vmem:[#allocation62_spill] sm:$0xff]  ;;  %v13784_v30 = vld [vmem:[#allocation291_spill] sm:$0xff] }
 0x44b   :  { %3848 = vst.msk [vmem:[#allocation2 + $0xc8] sm:$0x3] %vm3823_vm1, %v13325_v29  ;;  %3734 = vperm.xlu0 %7356, %v13780_v59   ;;  %v1581_v21 = vadd.f32 %v1565_v48, %v1485_v0  ;;  %v2318_v50 = vmul.f32 %v13781_v33, %v9163_v13  ;;  %v935_v32 = vadd.f32 %v919_v42, %v838_v24  ;;  %v13785_v48 = vld [vmem:[#allocation51_spill] sm:$0xff] }
 0x44c   :  { %3849 = vst.msk [vmem:[#allocation2 + $0xd0] sm:$0xff] %vm3821_vm0, %v13325_v29  ;;  %v1883_v53 = vadd.f32 %v9660_v25, %v1867_v34  ;;  %v9682_v44 = vmul.f32 %v13782_v17, %v9171_v2  ;;  %v2828_v45 = vadd.f32 %v9660_v25, %v2812_v5  ;;  %v746_v1 = vadd.f32 %v13783_v58, %v649_v19  ;;  %v13786_v33 = vld [vmem:[#allocation311_spill] sm:$0xff]  ;;  %v13787_v19 = vld [vmem:[#allocation269_spill] sm:$0xff] }
 0x44d   :  { %3850 = vst.msk [vmem:[#allocation2 + $0xd8] sm:$0x3] %vm3823_vm1, %v13325_v29  ;;  %v636_v0 = vmul.f32 %v9272_v39, %v13784_v30  ;;  %v840_v24 = vadd.f32 %v13785_v48, %v743_v61  ;;  %v1677_v34 = vadd.f32 %v1661_v51, %v1581_v21  ;;  %v2238_v42 = vadd.f32 %v2222_v22, %v2142_v10  ;;  %v1797_v61 = vpop.permute.xlu1 %1796  ;;  %v13788_v51 = vld [vmem:[#allocation300_spill] sm:$0xff] }
 0x44e   :  { %3851 = vst.msk [vmem:[#allocation2 + $0xe0] sm:$0xff] %vm3821_vm0, %v13325_v29  ;;  %v954_v59 = vadd.f32 %v9660_v25, %v935_v32  ;;  %v451_v17 = vadd.f32 %v13786_v33, %v354_v55  ;;  %v1292_v5 = vadd.f32 %v9606_v46, %v1196_v14  ;;  %v2125_v58 = vmul.f32 %v13787_v19, %v9145_v43  ;;  %v13789_v46 = vld [vmem:[#allocation290_spill] sm:$0xff]  ;;  %v13790_v33 = vld [vmem:[#allocation89_spill] sm:$0xff] }
 0x44f   :  { %3852 = vst.msk [vmem:[#allocation2 + $0xe8] sm:$0x3] %vm3823_vm1, %v13325_v29  ;;  %v3773_v30 = vadd.f32 %v9660_v25, %v3757_v6  ;;  %v2414_v22 = vmul.f32 %v13788_v51, %v9230_v23  ;;  %v2334_v10 = vadd.f32 %v2318_v50, %v2238_v42  ;;  %v1899_v32 = vmax.f32 %v1883_v53, 0.0  ;;  %v876_v6 = vpop.permute.xlu0 %875 }
 0x450   :  { %3853 = vst.msk [vmem:[#allocation2 + $0xf0] sm:$0xff] %vm3821_vm0, %v13325_v29  ;;  %v970_v21 = vmax.f32 %v954_v59, 0.0  ;;  %v2844_v55 = vmax.f32 %v2828_v45, 0.0  ;;  %v2975_v14 = vmul.f32 %v13789_v46, %v9155_v62  ;;  %v652_v48 = vadd.f32 %v636_v0, %v9520_v15  ;;  %v13791_v15 = vld [vmem:[#allocation313_spill] sm:$0xff]  ;;  %v13792_v0 = vld [vmem:[#allocation263_spill] sm:$0xff] }
 0x451   :  { %3854 = vst.msk [vmem:[#allocation2 + $0xf8] sm:$0x3] %vm3823_vm1, %v13325_v29  ;;  %v843_v19 = vadd.f32 %v13790_v33, %v746_v1  ;;  %v2510_v50 = vmul.f32 %v9464_v57, %v9272_v39  ;;  %v924_v53 = vmul.f32 %v9356_v31, %v876_v6  ;;  %v1388_v45 = vadd.f32 %v13791_v15, %v1292_v5  ;;  %v13793_v1 = vld [vmem:[#allocation272_spill] sm:$0xff]  ;;  %v9727_v6 = vpop.permute.xlu2 %3590  ;;  %v13795_v33 = vld [vmem:[#allocation193_spill] sm:$0xff] }
 0x452   :  { %3855 = vst.msk [vmem:[#allocation2 + $0x100] sm:$0xff] %vm3821_vm0, %v13325_v29  ;;  %v1915_v42 = vmax.f32 %v970_v21, %v1899_v32  ;;  %7228 = vset.pattern.permute.xlu1 %v13612_v60  ;;  %7229 = vset.pattern.permute.xlu2 %v13461_v16  ;;  %v2029_v59 = vmul.f32 %v13792_v0, %v9155_v62  ;;  %v3789_v57 = vmax.f32 %v3773_v30, 0.0  ;;  %v13796_v0 = vld [vmem:[#allocation49_spill] sm:$0xff] }
 0x453   :  { %3856 = vst.msk [vmem:[#allocation2 + $0x108] sm:$0x3] %vm3823_vm1, %v13325_v29  ;;  %v2221_v51 = vmul.f32 %v13793_v1, %v9171_v2  ;;  %3690 = vperm.xlu1 %7228, %v9039_v4   ;;  %2177 = vperm.xlu2 %7229, %v13755_v36   ;;  %v2430_v21 = vadd.f32 %v2414_v22, %v2334_v10  ;;  %v7488_v36 = vld [vmem:[%s13284_s0 + $0x1e8] sm:$0xff] }
 0x454   :  { %3857 = vst.msk [vmem:[#allocation2 + $0x110] sm:$0xff] %vm3821_vm0, %v13325_v29  ;;  %v2860_v32 = vmax.f32 %v1915_v42, %v2844_v55  ;;  %v9725_v46 = vadd.f32 %v924_v53, %v843_v19  ;;  %7371 = vset.pattern.permute.xlu0 %v13413_v38  ;;  %v937_v5 = vadd.f32 %v9382_v18, %v840_v24  ;;  %v13798_v22 = vld [vmem:[#allocation57_spill] sm:$0xff]  ;;  %v13799_v42 = vld [vmem:[#allocation42_spill] sm:$0xff] }
 0x455   :  { %3858 = vst.msk [vmem:[#allocation2 + $0x118] sm:$0x3] %vm3823_vm1, %v13325_v29  ;;  %v1468_v15 = vmul.f32 %v13795_v33, %v9230_v23  ;;  %v3087_v1 = vadd.f32 %v13796_v0, %v2975_v14  ;;  %3538 = vperm.xlu0 %7371, %v7488_v36   ;;  %v2141_v30 = vadd.f32 %v2125_v58, %v2029_v59  ;;  %v13800_v24 = vld [vmem:[#allocation293_spill] sm:$0xff]  ;;  %v13801_v14 = vld [vmem:[#allocation303_spill] sm:$0xff] }
 0x456   :  { %3859 = vst.msk [vmem:[#allocation2 + $0x120] sm:$0xff] %vm3821_vm0, %v13325_v29  ;;  %v2606_v10 = vmul.f32 %v13798_v22, %v9284_v12  ;;  %v2526_v55 = vadd.f32 %v2510_v50, %v2430_v21  ;;  %v3805_v19 = vmax.f32 %v2860_v32, %v3789_v57  ;;  %v548_v18 = vadd.f32 %v13799_v42, %v451_v17  ;;  %v13804_v58 = vld [vmem:[#allocation271_spill] sm:$0xff]  ;;  %v2646_v50 = vpop.permute.xlu1 %2645  ;;  %v13805_v17 = vld [vmem:[#allocation276_spill] sm:$0xff] }
 0x457   :  { %3860 = vst.msk [vmem:[#allocation2 + $0x128] sm:$0x3] %vm3823_vm1, %v13325_v29  ;;  %v639_v53 = vmul.f32 %v9272_v39, %v13800_v24  ;;  %v3263_v33 = vmul.f32 %v13801_v14, %v9163_v13  ;;  %v1484_v0 = vadd.f32 %v1468_v15, %v1388_v45  ;;  %v2974_v36 = vmul.f32 %v13803_v41, %v9155_v62  ;;  %v888_v42 = vpop.permute.xlu0 %887  ;;  %v9759_v41 = vld [vmem:[%s13284_s0 + $0x1a8] sm:$0xff] }
 0x458   :  { %3861 = vst.msk [vmem:[#allocation2 + $0x130] sm:$0xff] %vm3821_vm0, %v13325_v29  ;;  %v2317_v59 = vmul.f32 %v13804_v58, %v9163_v13  ;;  %v2237_v22 = vadd.f32 %v2221_v51, %v2141_v30  ;;  %v3070_v57 = vmul.f32 %v13805_v17, %v9145_v43  ;;  %v3183_v21 = vadd.f32 %v9682_v44, %v3087_v1  ;;  %v13807_v51 = vld [vmem:[#allocation310_spill] sm:$0xff]  ;;  %v13808_v14 = vld [vmem:[#allocation69_spill] sm:$0xff] }
 0x459   :  { %3862 = vst.msk [vmem:[#allocation2 + $0x138] sm:$0x3] %vm3823_vm1, %v13325_v29  ;;  %v13797_v29 = vld [vmem:[#allocation70_spill] sm:$0xff]  ;;  %v2702_v32 = vmul.f32 %v2646_v50, %v9258_v37  ;;  %v3359_v15 = vmul.f32 %v13807_v51, %v9230_v23  ;;  %v1853_v30 = vmul.f32 %v9356_v31, %v1797_v61  ;;  %v927_v24 = vmul.f32 %v9356_v31, %v888_v42  ;;  %v9776_v61 = vpop.permute.xlu2 %2457 }
 0x45a   :  { %13794 = vst [vmem:[#allocation112_spill] sm:$0xff] %v9725_v46  ;;  %v749_v4 = vadd.f32 %v13797_v29, %v652_v48  ;;  %v13802_v29 = vld [vmem:[#allocation145_spill] sm:$0xff]  ;;  %v655_v44 = vadd.f32 %v639_v53, %v9542_v8  ;;  %v3279_v1 = vadd.f32 %v3263_v33, %v3183_v21  ;;  %v2798_v58 = vmul.f32 %v9356_v31, %v9668_v26  ;;  %v13812_v8 = vld [vmem:[#allocation284_spill] sm:$0xff]  ;;  %v13814_v33 = vld [vmem:[#allocation58_spill] sm:$0xff] }
 0x45b   :  { %v1773_v48 = vadd.f32 %v13802_v29, %v1677_v34  ;;  %3864 = vst.msk [vmem:[#allocation2 + $0x11] sm:$0xff] %vm3821_vm0, %v3805_v19  ;;  %v13806_v34 = vld [vmem:[#allocation148_spill] sm:$0xff]  ;;  %v2622_v19 = vadd.f32 %v2606_v10, %v2526_v55  ;;  %v3455_v29 = vmul.f32 %v13808_v14, %v9272_v39  ;;  %7230 = vset.pattern.permute.xlu1 %v13452_v7  ;;  %v13813_v55 = vld [vmem:[#allocation286_spill] sm:$0xff] }
 0x45c   :  { %v846_v45 = vadd.f32 %v13806_v34, %v749_v4  ;;  %v13809_v4 = vmov 1   ;;  %2920 = vperm.xlu1 %7230, %v9759_v41   ;;  %13811 = vst [vmem:[#allocation138_spill] sm:$0xff] %v9776_v61  ;;  %v3166_v10 = vmul.f32 %v13812_v8, %v9171_v2  ;;  %v2413_v53 = vmul.f32 %v13813_v55, %v9230_v23  ;;  %v13816_v34 = vld [vmem:[#allocation59_spill] sm:$0xff]  ;;  %v13818_v55 = vld [vmem:[#allocation296_spill] sm:$0xff] }
 0x45d   :  { %7231 = vset.pattern.permute.xlu2 %v13809_v4  ;;  %v2718_v50 = vadd.f32 %v2702_v32, %v2622_v19  ;;  %v561_v21 = vadd.f32 %v13814_v33, %v9568_v9  ;;  %v9785_v26 = vadd.f32 %v9660_v25, %v937_v5  ;;  %7373 = vset.pattern.permute.xlu0 %v13809_v4  ;;  %v13815_v32 = vld [vmem:[#allocation219_spill] sm:$0xff] }
 0x45e   :  { %v9772_v17 = vadd.f32 %v927_v24, %v846_v45  ;;  %3026 = vperm.xlu2 %7231, %v9759_v41   ;;  %v1564_v42 = vmul.f32 %v13815_v32, %v9272_v39  ;;  %v645_v45 = vadd.f32 %v13816_v34, %v548_v18  ;;  %v3375_v51 = vadd.f32 %v3359_v15, %v3279_v1  ;;  %v13817_v8 = vld [vmem:[#allocation75_spill] sm:$0xff]  ;;  %v13819_v18 = vld [vmem:[#allocation217_spill] sm:$0xff]  ;;  %v9801_v15 = vpop.permute.xlu1 %2361  ;;  %v13823_v32 = vld [vmem:[#allocation298_spill] sm:$0xff] }
 0x45f   :  { %v1869_v19 = vadd.f32 %v1853_v30, %v1773_v48  ;;  %v3086_v24 = vadd.f32 %v3070_v57, %v2974_v36  ;;  %v2333_v14 = vadd.f32 %v2317_v59, %v2237_v22  ;;  %v752_v20 = vadd.f32 %v13817_v8, %v655_v44  ;;  %v13820_v59 = vld [vmem:[#allocation285_spill] sm:$0xff]  ;;  %v13821_v30 = vld [vmem:[#allocation84_spill] sm:$0xff]  ;;  %v13822_v44 = vld [vmem:[#allocation242_spill] sm:$0xff] }
 0x460   :  { %13810 = vst [vmem:[#allocation113_spill] sm:$0xff] %v9772_v17  ;;  %v642_v17 = vmul.f32 %v9272_v39, %v13818_v55  ;;  %v1580_v46 = vadd.f32 %v1564_v42, %v1484_v0  ;;  %v3471_v63 = vadd.f32 %v3455_v29, %v3375_v51  ;;  %v2814_v61 = vadd.f32 %v2798_v58, %v2718_v50  ;;  %v900_v50 = vpop.permute.xlu0 %899  ;;  %v13824_v51 = vld [vmem:[#allocation93_spill] sm:$0xff] }
 0x461   :  { %v3358_v48 = vmul.f32 %v13819_v18, %v9230_v23  ;;  %v3182_v36 = vadd.f32 %v3166_v10, %v3086_v24  ;;  %v2509_v22 = vmul.f32 %v13820_v59, %v9272_v39  ;;  %v2429_v57 = vadd.f32 %v2413_v53, %v2333_v14  ;;  %v13828_v55 = vld [vmem:[#allocation81_spill] sm:$0xff]  ;;  %v13830_v59 = vld [vmem:[#allocation82_spill] sm:$0xff] }
 0x462   :  { %v3901_v9 = vld [vmem:[#allocation2 + $0x11] sm:$0xff]  ;;  %v742_v0 = vadd.f32 %v13821_v30, %v645_v45  ;;  %v1756_v1 = vmul.f32 %v13822_v44, %v9258_v37  ;;  %v1885_v29 = vadd.f32 %v9660_v25, %v1869_v19  ;;  %v3647_v58 = vmul.f32 %v9727_v6, %v9258_v37  ;;  %v13825_v6 = vld [vmem:[#allocation315_spill] sm:$0xff] }
 0x463   :  { %v4148_v33 = vld [vmem:[#allocation2 + $0x12] sm:$0xff]  ;;  %6844 = vmatmul.msk.f32.gmra.mxu0 %vm3821_vm0, %v3901_v9  ;;  %v658_v10 = vadd.f32 %v642_v17, %v561_v21  ;;  %v2605_v42 = vmul.f32 %v13823_v32, %v9284_v12  ;;  %v849_v53 = vadd.f32 %v9390_v35, %v752_v20  ;;  %v930_v34 = vmul.f32 %v9356_v31, %v900_v50  ;;  %v7489_v35 = vld [vmem:[%s13284_s0 + $0xa0] sm:$0xff]  ;;  %v3687_v20 = vpop.permute.xlu2 %3686 }
 0x464   :  { %v4297_v5 = vld [vmem:[#allocation2 + $0x10] sm:$0xff]  ;;  %6880 = vmatmul.msk.f32.gmra.mxu2 %vm3821_vm0, %v4148_v33  ;;  %v1676_v24 = vadd.f32 %v13824_v51, %v1580_v46  ;;  %v3567_v45 = vadd.f32 %v9425_v52, %v3471_v63  ;;  %v2830_v14 = vadd.f32 %v9660_v25, %v2814_v61  ;;  %7232 = vset.pattern.permute.xlu1 %v13775_v49  ;;  %v1901_v46 = vmax.f32 %v1885_v29, 0.0  ;;  %v13831_v50 = vld [vmem:[#allocation116_spill] sm:$0xff] }
 0x465   :  { %6899 = vmatmul.msk.f32.vlgmr.msra.gmra.mxu3 %vm3821_vm0, %v4297_v5  ;;  %v3278_v19 = vadd.f32 %v13825_v6, %v3182_v36  ;;  %v2525_v17 = vadd.f32 %v2509_v22, %v2429_v57  ;;  %v9819_v21 = vadd.f32 %v930_v34, %v849_v53  ;;  %3406 = vperm.xlu1 %7232, %v9134_v54   ;;  %v13827_v52 = vld [vmem:[#allocation294_spill] sm:$0xff]  ;;  %v13829_v33 = vld [vmem:[#allocation297_spill] sm:$0xff]  ;;  %v972_v36 = vmax.f32 %v9785_v26, 0.0  ;;  %v13832_v29 = vld [vmem:[#allocation120_spill] sm:$0xff] }
 0x466   :  { %7233 = vset.pattern.permute.xlu2 %v13612_v60  ;;  %v1852_v63 = vmul.f32 %v9356_v31, %v13827_v52  ;;  %v3663_v61 = vadd.f32 %v3647_v58, %v3567_v45  ;;  %v3743_v8 = vmul.f32 %v9356_v31, %v3687_v20  ;;  %v755_v9 = vadd.f32 %v13828_v55, %v658_v10  ;;  %v13833_v53 = vld [vmem:[#allocation301_spill] sm:$0xff]  ;;  %v9845_v20 = vpop.permute.xlu1 %3210 }
 0x467   :  { %13826 = vst [vmem:[#allocation126_spill] sm:$0xff] %v9819_v21  ;;  %1804 = vperm.xlu2 %7233, %v7489_v35   ;;  %v2701_v5 = vmul.f32 %v13829_v33, %v9258_v37  ;;  %v2621_v18 = vadd.f32 %v2605_v42, %v2525_v17  ;;  %v839_v22 = vadd.f32 %v13830_v59, %v742_v0  ;;  %v2846_v30 = vmax.f32 %v2830_v14, 0.0  ;;  %v13834_v34 = vld [vmem:[#allocation317_spill] sm:$0xff] }
 0x468   :  { %v1772_v57 = vadd.f32 %v1756_v1, %v1676_v24  ;;  %v3759_v44 = vadd.f32 %v3743_v8, %v3663_v61  ;;  %v836_v32 = vmul.f32 %v9258_v37, %v13831_v50  ;;  %v920_v58 = vmul.f32 %v9356_v31, %v13832_v29  ;;  %v912_v1 = vpop.permute.xlu0 %911  ;;  %v13835_v24 = vld [vmem:[#allocation309_spill] sm:$0xff] }
 0x469   :  { %v3454_v10 = vmul.f32 %v13833_v53, %v9272_v39  ;;  %v2797_v51 = vmul.f32 %v9356_v31, %v13834_v34  ;;  %v3374_v45 = vadd.f32 %v3358_v48, %v3278_v19  ;;  %v1917_v26 = vmax.f32 %v972_v36, %v1901_v46 }
 0x46a   :  { %v1868_v42 = vadd.f32 %v1852_v63, %v1772_v57  ;;  %v3775_v0 = vadd.f32 %v9660_v25, %v3759_v44  ;;  %v3550_v14 = vmul.f32 %v13835_v24, %v9284_v12  ;;  %v2717_v6 = vadd.f32 %v2701_v5, %v2621_v18  ;;  %v13837_v5 = vld [vmem:[#allocation85_spill] sm:$0xff] }
 0x46b   :  { %v852_v17 = vadd.f32 %v836_v32, %v755_v9  ;;  %v933_v35 = vmul.f32 %v9356_v31, %v912_v1  ;;  %v936_v52 = vadd.f32 %v920_v58, %v839_v22  ;;  %v2862_v61 = vmax.f32 %v1917_v26, %v2846_v30  ;;  %v9853_v19 = vpop.permute.xlu2 %2915 }
 0x46c   :  { %v3791_v8 = vmax.f32 %v3775_v0, 0.0  ;;  %v3470_v55 = vadd.f32 %v3454_v10, %v3374_v45  ;;  %v2813_v33 = vadd.f32 %v2797_v51, %v2717_v6  ;;  %v1884_v46 = vadd.f32 %v9660_v25, %v1868_v42  ;;  %v9871_v10 = vld [vmem:[%s13284_s0 + $0x128] sm:$0xff] }
 0x46d   :  { %v9847_v63 = vadd.f32 %v933_v35, %v852_v17  ;;  %7234 = vset.pattern.permute.xlu1 %v13418_v27  ;;  %v3646_v18 = vmul.f32 %v13837_v5, %v9258_v37  ;;  %v955_v36 = vadd.f32 %v9660_v25, %v936_v52  ;;  %v13838_v17 = vld [vmem:[#allocation307_spill] sm:$0xff] }
 0x46e   :  { %v3807_v48 = vmax.f32 %v2862_v61, %v3791_v8  ;;  %2653 = vperm.xlu1 %7234, %v13777_v3   ;;  %v3566_v9 = vadd.f32 %v3550_v14, %v3470_v55  ;;  %v2829_v59 = vadd.f32 %v9660_v25, %v2813_v33  ;;  %v1900_v57 = vmax.f32 %v1884_v46, 0.0  ;;  %v9862_v44 = vpop.permute.xlu1 %2077  ;;  %v7491_v55 = vld [vmem:[%s13284_s0 + $0x1a0] sm:$0xff]  ;;  %v9916_v46 = vld [vmem:[%s13284_s0 + $0x130] sm:$0xff] }
 0x46f   :  { %13836 = vst [vmem:[#allocation152_spill] sm:$0xff] %v9847_v63  ;;  %7235 = vset.pattern.permute.xlu2 %v13461_v16  ;;  %v971_v50 = vmax.f32 %v955_v36, 0.0  ;;  %v13854_v63 = vld [vmem:[#allocation72_spill] sm:$0xff] }
 0x470   :  { %3122 = vperm.xlu2 %7235, %v9759_v41   ;;  %3866 = vst.msk [vmem:[#allocation2 + $0x31] sm:$0xff] %vm3821_vm0, %v3807_v48  ;;  %v3683_v22 = vpop.permute.xlu0 %3682  ;;  %v3662_v30 = vadd.f32 %v3646_v18, %v3566_v9  ;;  %v2845_v32 = vmax.f32 %v2829_v59, 0.0  ;;  %v9929_v18 = vld [vmem:[%s13284_s0 + $0x1b0] sm:$0xff] }
 0x471   :  { %v3742_v3 = vmul.f32 %v9356_v31, %v3683_v22  ;;  %v1916_v58 = vmax.f32 %v971_v50, %v1900_v57  ;;  %v13839_v59 = vld [vmem:[#allocation86_spill] sm:$0xff]  ;;  %v13840_v57 = vld [vmem:[#allocation155_spill] sm:$0xff] }
 0x472   :  { %v2031_v22 = vmul.f32 %v13839_v59, %v9155_v62 }
 0x473   :  { %v3758_v29 = vadd.f32 %v3742_v3, %v3662_v30  ;;  %v9874_v34 = vpop.permute.xlu2 %3402  ;;  %v2861_v51 = vmax.f32 %v1916_v58, %v2845_v32  ;;  %v1182_v30 = vmul.f32 %v13840_v57, %v9145_v43  ;;  %v13841_v3 = vld [vmem:[#allocation306_spill] sm:$0xff]  ;;  %v2223_v32 = vmul.f32 %v9555_v47, %v9171_v2  ;;  %v13846_v47 = vld [vmem:[#allocation29_spill] sm:$0xff] }
 0x474   :  { %v2127_v50 = vmul.f32 %v13841_v3, %v9145_v43  ;;  %v13842_v58 = vld [vmem:[#allocation18_spill] sm:$0xff] }
 0x475   :  { %v3774_v53 = vadd.f32 %v9660_v25, %v3758_v29 }
 0x476   :  { %7236 = vset.pattern.permute.xlu1 %v13413_v38  ;;  %v9877_v26 = vpop.permute.xlu1 %3306 }
 0x477   :  { %3502 = vperm.xlu1 %7236, %v9134_v54   ;;  %v3790_v42 = vmax.f32 %v3774_v53, 0.0  ;;  %v3903_v35 = vld [vmem:[#allocation2 + $0x31] sm:$0xff]  ;;  %v243_v53 = vmul.f32 %v9145_v43, %v13842_v58  ;;  %v13849_v58 = vld [vmem:[#allocation33_spill] sm:$0xff] }
 0x478   :  { %7237 = vset.pattern.permute.xlu2 %v13776_v56  ;;  %v4150_v52 = vld [vmem:[#allocation2 + $0x32] sm:$0xff] }
 0x479   :  { %2369 = vperm.xlu2 %7237, %v9871_v10   ;;  %v3806_v45 = vmax.f32 %v2861_v51, %v3790_v42  ;;  %v4299_v61 = vld [vmem:[#allocation2 + $0x30] sm:$0xff] }
 0x47a   :  { %v13843_v51 = vld [vmem:[#allocation129_spill] sm:$0xff] }
 0x47b   :  { %3865 = vst.msk [vmem:[#allocation2 + $0x21] sm:$0xff] %vm3821_vm0, %v3806_v45  ;;  %v9883_v0 = vpop.permute.xlu2 %2649  ;;  %v1086_v42 = vmul.f32 %v13843_v51, %v9155_v62  ;;  %v13844_v45 = vld [vmem:[#allocation172_spill] sm:$0xff]  ;;  %v437_v51 = vmul.f32 %v9163_v13, %v13849_v58 }
 0x47e   :  { %v9888_v6 = vpop.permute.xlu1 %2553 }
 0x47f   :  { %7238 = vset.pattern.permute.xlu1 %v13506_v11 }
 0x480   :  { %3218 = vperm.xlu1 %7238, %v9759_v41  }
 0x481   :  { %7239 = vset.pattern.permute.xlu2 %v13418_v27 }
 0x482   :  { %3598 = vperm.xlu2 %7239, %v9134_v54   ;;  %v3902_v1 = vld [vmem:[#allocation2 + $0x21] sm:$0xff] }
 0x483   :  { %v4149_v24 = vld [vmem:[#allocation2 + $0x22] sm:$0xff]  ;;  %6845 = vmatmul.msk.f32.gmra.mxu0 %vm3821_vm0, %v3902_v1  ;;  %v9894_v54 = vpop.permute.xlu2 %3498  ;;  %v1278_v1 = vmul.f32 %v13844_v45, %v9171_v2 }
 0x484   :  { %v4298_v14 = vld [vmem:[#allocation2 + $0x20] sm:$0xff]  ;;  %6881 = vmatmul.msk.f32.gmra.mxu2 %vm3821_vm0, %v4149_v24  ;;  %v2143_v24 = vadd.f32 %v2127_v50, %v2031_v22  ;;  %v2319_v22 = vmul.f32 %v9506_v28, %v9163_v13 }
 0x485   :  { %6900 = vmatmul.msk.f32.gmra.mxu3 %vm3821_vm0, %v4298_v14  ;;  %v13845_v14 = vld [vmem:[#allocation5_spill] sm:$0xff] }
 0x486   :  { %v9899_v8 = vpop.permute.xlu1 %3022  ;;  %v2239_v57 = vadd.f32 %v2223_v32, %v2143_v24  ;;  %v13851_v24 = vld [vmem:[#allocation54_spill] sm:$0xff] }
 0x488   :  { %7240 = vset.pattern.permute.xlu1 %v13452_v7  ;;  %v2335_v28 = vadd.f32 %v2319_v22, %v2239_v57  ;;  %v13856_v22 = vld [vmem:[#allocation228_spill] sm:$0xff] }
 0x489   :  { %1980 = vperm.xlu1 %7240, %v13838_v17   ;;  %v1662_v57 = vmul.f32 %v13856_v22, %v9284_v12  ;;  %v13860_v22 = vld [vmem:[#allocation105_spill] sm:$0xff] }
 0x48a   :  { %7241 = vset.pattern.permute.xlu2 %v13809_v4 }
 0x48b   :  { %2085 = vperm.xlu2 %7241, %v13838_v17   ;;  %6846 = vmatmul.msk.f32.gmra.mxu0 %vm3821_vm0, %v3903_v35  ;;  %v9907_v33 = vpop.permute.xlu2 %3214  ;;  %v146_v17 = vmul.f32 %v9155_v62, %v13845_v14  ;;  %v340_v35 = vmul.f32 %v9171_v2, %v13846_v47  ;;  %v13850_v14 = vld [vmem:[#allocation204_spill] sm:$0xff] }
 0x48c   :  { %6882 = vmatmul.msk.f32.gmra.mxu2 %vm3821_vm0, %v4150_v52  ;;  %v7494_v52 = vld [vmem:[%s13284_s0 + $0xa8] sm:$0xff]  ;;  %v1470_v47 = vmul.f32 %v13850_v14, %v9230_v23 }
 0x48d   :  { %6901 = vmatmul.msk.f32.gmra.mxu3 %vm3821_vm0, %v4299_v61  ;;  %v1198_v61 = vadd.f32 %v1182_v30, %v1086_v42  ;;  %v259_v50 = vadd.f32 %v243_v53, %v146_v17  ;;  %v2415_v30 = vmul.f32 %v9801_v15, %v9230_v23  ;;  %v534_v53 = vmul.f32 %v9230_v23, %v13851_v24  ;;  %v13852_v17 = vld [vmem:[#allocation222_spill] sm:$0xff] }
 0x48e   :  { %v9909_v48 = vpop.permute.xlu1 %2269  ;;  %v1566_v58 = vmul.f32 %v13852_v17, %v9272_v39  ;;  %v631_v15 = vmul.f32 %v9272_v39, %v13854_v63  ;;  %v2607_v24 = vmul.f32 %v9888_v6, %v9284_v12  ;;  %v1801_v17 = vpop.permute.xlu0 %1800 }
 0x48f   :  { %v1294_v45 = vadd.f32 %v1278_v1, %v1198_v61  ;;  %v356_v42 = vadd.f32 %v340_v35, %v259_v50  ;;  %v13853_v1 = vld [vmem:[#allocation97_spill] sm:$0xff]  ;;  %v13855_v50 = vld [vmem:[#allocation138_spill] sm:$0xff] }
 0x490   :  { %v3072_v61 = vmul.f32 %v13853_v1, %v9145_v43 }
 0x491   :  { %7242 = vset.pattern.permute.xlu1 %v13776_v56  ;;  %v453_v32 = vadd.f32 %v437_v51, %v356_v42  ;;  %v13857_v51 = vld [vmem:[#allocation111_spill] sm:$0xff] }
 0x492   :  { %3314 = vperm.xlu1 %7242, %v9759_v41  }
 0x493   :  { %7243 = vset.pattern.permute.xlu2 %v13612_v60 }
 0x494   :  { %3694 = vperm.xlu2 %7243, %v7491_v55   ;;  %v13847_v55 = vld [vmem:[#allocation177_spill] sm:$0xff] }
 0x495   :  { %v1374_v59 = vmul.f32 %v13847_v55, %v9163_v13 }
 0x496   :  { %v9922_v5 = vpop.permute.xlu1 %3118 }
 0x497   :  { %v1390_v55 = vadd.f32 %v1374_v59, %v1294_v45  ;;  %v2431_v59 = vadd.f32 %v2415_v30, %v2335_v28  ;;  %v3168_v45 = vmul.f32 %v13857_v51, %v9171_v2  ;;  %v13858_v30 = vld [vmem:[#allocation78_spill] sm:$0xff]  ;;  %v825_v51 = vmul.f32 %v9258_v37, %v13860_v22 }
 0x499   :  { %v9920_v9 = vpop.permute.xlu2 %1975  ;;  %v1486_v35 = vadd.f32 %v1470_v47, %v1390_v55  ;;  %v550_v47 = vadd.f32 %v534_v53, %v453_v32  ;;  %v728_v55 = vmul.f32 %v9284_v12, %v13858_v30  ;;  %v1854_v32 = vmul.f32 %v9356_v31, %v1801_v17 }
 0x49a   :  { %7244 = vset.pattern.permute.xlu1 %v13461_v16  ;;  %v3360_v53 = vmul.f32 %v9877_v26, %v9230_v23 }
 0x49b   :  { %2181 = vperm.xlu1 %7244, %v9916_v46   ;;  %v1582_v28 = vadd.f32 %v1566_v58, %v1486_v35  ;;  %v647_v6 = vadd.f32 %v631_v15, %v550_v47  ;;  %v2703_v58 = vmul.f32 %v9883_v0, %v9258_v37  ;;  %v13861_v15 = vld [vmem:[#allocation123_spill] sm:$0xff]  ;;  %v3456_v0 = vmul.f32 %v9874_v34, %v9272_v39 }
 0x49c   :  { %7245 = vset.pattern.permute.xlu2 %v13413_v38 }
 0x49d   :  { %2561 = vperm.xlu2 %7245, %v9871_v10   ;;  %v1678_v21 = vadd.f32 %v1662_v57, %v1582_v28  ;;  %v744_v30 = vadd.f32 %v728_v55, %v647_v6 }
 0x49f   :  { %v9943_v29 = vpop.permute.xlu1 %2745  ;;  %v841_v26 = vadd.f32 %v825_v51, %v744_v30 }
 0x4a3   :  { %7246 = vset.pattern.permute.xlu1 %v13809_v4 }
 0x4a4   :  { %3030 = vperm.xlu1 %7246, %v9929_v18   ;;  %v9933_v36 = vpop.permute.xlu2 %3310 }
 0x4a5   :  { %7247 = vset.pattern.permute.xlu2 %v13775_v49 }
 0x4a6   :  { %3410 = vperm.xlu2 %7247, %v9759_v41  }
 0x4ac   :  { %7248 = vset.pattern.permute.xlu1 %v13612_v60 }
 0x4ad   :  { %1808 = vperm.xlu1 %7248, %v7494_v52   ;;  %v9965_v3 = vpop.permute.xlu2 %2177  ;;  %v2976_v52 = vmul.f32 %v9633_v40, %v9155_v62  ;;  %v2511_v40 = vmul.f32 %v13855_v50, %v9272_v39 }
 0x4ae   :  { %7249 = vset.pattern.permute.xlu2 %v13506_v11  ;;  %13848 = vst [vmem:[#allocation127_spill] sm:$0xff] %v9965_v3 }
 0x4af   :  { %2277 = vperm.xlu2 %7249, %v9916_v46   ;;  %v3088_v42 = vadd.f32 %v3072_v61, %v2976_v52  ;;  %v13859_v52 = vld [vmem:[#allocation253_spill] sm:$0xff]  ;;  %v3264_v61 = vmul.f32 %v9845_v20, %v9163_v13  ;;  %v2527_v50 = vadd.f32 %v2511_v40, %v2431_v59  ;;  %v10013_v20 = vld [vmem:[%s13285_s1 + $0x8] ss:$0 sm:$0xff] }
 0x4b0   :  { %v1758_v1 = vmul.f32 %v13859_v52, %v9258_v37  ;;  %v922_v40 = vmul.f32 %v10013_v20, %v13861_v15  ;;  %v2799_v31 = vmul.f32 %v10013_v20, %v9943_v29  ;;  %v3552_v29 = vmul.f32 %v9894_v54, %v9284_v12  ;;  %v13862_v15 = vld [vmem:[#allocation266_spill] sm:$0xff] }
 0x4b1   :  { %v3595_v14 = vpop.permute.xlu1 %3594  ;;  %v3184_v3 = vadd.f32 %v3168_v45, %v3088_v42  ;;  %v2623_v35 = vadd.f32 %v2607_v24, %v2527_v50 }
 0x4b2   :  { %v1774_v59 = vadd.f32 %v1758_v1, %v1678_v21  ;;  %v938_v21 = vadd.f32 %v922_v40, %v841_v26  ;;  %v3648_v17 = vmul.f32 %v3595_v14, %v9258_v37  ;;  %v2032_v40 = vmul.f32 %v13862_v15, %v9155_v62  ;;  %v13863_v26 = vld [vmem:[#allocation175_spill] sm:$0xff] }
 0x4b3   :  { %v3280_v57 = vadd.f32 %v3264_v61, %v3184_v3  ;;  %v2719_v47 = vadd.f32 %v2703_v58, %v2623_v35 }
 0x4b4   :  { %v1870_v42 = vadd.f32 %v1854_v32, %v1774_v59  ;;  %v957_v52 = vadd.f32 %v9660_v25, %v938_v21  ;;  %v2128_v59 = vmul.f32 %v9862_v44, %v9145_v43  ;;  %v13864_v44 = vld [vmem:[#allocation147_spill] sm:$0xff] }
 0x4b5   :  { %7250 = vset.pattern.permute.xlu1 %v13461_v16  ;;  %v3376_v24 = vadd.f32 %v3360_v53, %v3280_v57  ;;  %v2815_v3 = vadd.f32 %v2799_v31, %v2719_v47  ;;  %v1183_v47 = vmul.f32 %v13864_v44, %v9145_v43  ;;  %v13865_v21 = vld [vmem:[#allocation11_spill] sm:$0xff] }
 0x4b6   :  { %3126 = vperm.xlu1 %7250, %v9929_v18   ;;  %v1886_v34 = vadd.f32 %v9660_v25, %v1870_v42  ;;  %v973_v54 = vmax.f32 %v957_v52, 0.0  ;;  %v2144_v42 = vadd.f32 %v2128_v59, %v2032_v40  ;;  %v13868_v52 = vld [vmem:[#allocation4_spill] sm:$0xff]  ;;  %v13872_v40 = vld [vmem:[#allocation39_spill] sm:$0xff] }
 0x4b7   :  { %7251 = vset.pattern.permute.xlu2 %v13413_v38  ;;  %v3472_v28 = vadd.f32 %v3456_v0, %v3376_v24  ;;  %v2831_v61 = vadd.f32 %v9660_v25, %v2815_v3  ;;  %v2224_v0 = vmul.f32 %v13863_v26, %v9171_v2  ;;  %v2320_v3 = vmul.f32 %v9909_v48, %v9163_v13  ;;  %v13873_v26 = vld [vmem:[#allocation196_spill] sm:$0xff] }
 0x4b8   :  { %3506 = vperm.xlu2 %7251, %v9759_v41   ;;  %v9995_v63 = vpop.permute.xlu2 %3026  ;;  %v1902_v6 = vmax.f32 %v1886_v34, 0.0  ;;  %v13866_v34 = vld [vmem:[#allocation141_spill] sm:$0xff]  ;;  %v438_v59 = vmul.f32 %v9163_v13, %v13872_v40 }
 0x4b9   :  { %v3568_v1 = vadd.f32 %v3552_v29, %v3472_v28  ;;  %v2847_v51 = vmax.f32 %v2831_v61, 0.0  ;;  %v244_v29 = vmul.f32 %v9145_v43, %v13865_v21  ;;  %v1087_v28 = vmul.f32 %v13866_v34, %v9155_v62 }
 0x4ba   :  { %v1918_v53 = vmax.f32 %v973_v54, %v1902_v6  ;;  %v2240_v61 = vadd.f32 %v2224_v0, %v2144_v42  ;;  %v1471_v0 = vmul.f32 %v13873_v26, %v9230_v23  ;;  %v3073_v42 = vmul.f32 %v9899_v8, %v9145_v43 }
 0x4bb   :  { %v2977_v8 = vmul.f32 %v9853_v19, %v9155_v62  ;;  %v13879_v19 = vld [vmem:[#allocation245_spill] sm:$0xff] }
 0x4bc   :  { %v10019_v45 = vpop.permute.xlu1 %2461  ;;  %v2863_v35 = vmax.f32 %v1918_v53, %v2847_v51  ;;  %v2336_v15 = vadd.f32 %v2320_v3, %v2240_v61  ;;  %v13874_v3 = vld [vmem:[#allocation45_spill] sm:$0xff]  ;;  %v13876_v61 = vld [vmem:[#allocation63_spill] sm:$0xff]  ;;  %v1759_v40 = vmul.f32 %v13879_v19, %v9258_v37 }
 0x4bd   :  { %v2512_v44 = vmul.f32 %v10019_v45, %v9272_v39  ;;  %v535_v34 = vmul.f32 %v9230_v23, %v13874_v3  ;;  %v3169_v45 = vmul.f32 %v9922_v5, %v9171_v2  ;;  %v13880_v5 = vld [vmem:[#allocation130_spill] sm:$0xff]  ;;  %v10139_v19 = vld [vmem:[%s13284_s0 + $0x140] sm:$0xff] }
 0x4be   :  { %7252 = vset.pattern.permute.xlu1 %v13776_v56 }
 0x4bf   :  { %2373 = vperm.xlu1 %7252, %v9916_v46  }
 0x4c0   :  { %7253 = vset.pattern.permute.xlu2 %v13612_v60 }
 0x4c1   :  { %2753 = vperm.xlu2 %7253, %v9871_v10   ;;  %v10029_v55 = vpop.permute.xlu2 %1804  ;;  %v3664_v10 = vadd.f32 %v3648_v17, %v3568_v1  ;;  %v147_v1 = vmul.f32 %v9155_v62, %v13868_v52 }
 0x4c5   :  { %v3691_v50 = vpop.permute.xlu1 %3690 }
 0x4c6   :  { %v3744_v22 = vmul.f32 %v10013_v20, %v3691_v50  ;;  %v13869_v50 = vld [vmem:[#allocation23_spill] sm:$0xff] }
 0x4c7   :  { %7254 = vset.pattern.permute.xlu1 %v13418_v27  ;;  %v341_v6 = vmul.f32 %v9171_v2, %v13869_v50  ;;  %v632_v50 = vmul.f32 %v9272_v39, %v13876_v61 }
 0x4c8   :  { %v3760_v32 = vadd.f32 %v3744_v22, %v3664_v10  ;;  %3602 = vperm.xlu1 %7254, %v9759_v41   ;;  %v1199_v10 = vadd.f32 %v1183_v47, %v1087_v28  ;;  %v13870_v22 = vld [vmem:[#allocation189_spill] sm:$0xff] }
 0x4c9   :  { %7255 = vset.pattern.permute.xlu2 %v13775_v49  ;;  %v1375_v54 = vmul.f32 %v13870_v22, %v9163_v13  ;;  %v7496_v47 = vld [vmem:[%s13284_s0 + $0xb0] sm:$0xff] }
 0x4ca   :  { %2469 = vperm.xlu2 %7255, %v9916_v46   ;;  %v10040_v14 = vpop.permute.xlu2 %3122  ;;  %v3776_v58 = vadd.f32 %v9660_v25, %v3760_v32 }
 0x4cc   :  { %v3792_v30 = vmax.f32 %v3776_v58, 0.0  ;;  %v260_v58 = vadd.f32 %v244_v29, %v147_v1 }
 0x4ce   :  { %v3808_v57 = vmax.f32 %v2863_v35, %v3792_v30  ;;  %v10047_v31 = vpop.permute.xlu1 %2920  ;;  %v13871_v35 = vld [vmem:[#allocation220_spill] sm:$0xff]  ;;  %v357_v29 = vadd.f32 %v341_v6, %v260_v58  ;;  %v13877_v6 = vld [vmem:[#allocation239_spill] sm:$0xff] }
 0x4cf   :  { %v2416_v30 = vmul.f32 %v13871_v35, %v9230_v23  ;;  %v1663_v22 = vmul.f32 %v13877_v6, %v9284_v12 }
 0x4d0   :  { %3867 = vst.msk [vmem:[#allocation2 + $0x41] sm:$0xff] %vm3821_vm0, %v3808_v57  ;;  %7256 = vset.pattern.permute.xlu1 %v13776_v56  ;;  %v454_v1 = vadd.f32 %v438_v59, %v357_v29  ;;  %v1855_v29 = vmul.f32 %v10013_v20, %v10029_v55 }
 0x4d1   :  { %3318 = vperm.xlu1 %7256, %v9929_v18   ;;  %v2432_v52 = vadd.f32 %v2416_v30, %v2336_v15  ;;  %v2608_v30 = vmul.f32 %v13880_v5, %v9284_v12  ;;  %v3265_v15 = vmul.f32 %v9907_v33, %v9163_v13 }
 0x4d2   :  { %7257 = vset.pattern.permute.xlu2 %v13612_v60 }
 0x4d3   :  { %3698 = vperm.xlu2 %7257, %v9759_v41   ;;  %v10056_v24 = vpop.permute.xlu2 %2369  ;;  %v13867_v41 = vld [vmem:[#allocation164_spill] sm:$0xff] }
 0x4d4   :  { %v1279_v17 = vmul.f32 %v13867_v41, %v9171_v2  ;;  %v13875_v41 = vld [vmem:[#allocation213_spill] sm:$0xff] }
 0x4d6   :  { %v1295_v57 = vadd.f32 %v1279_v17, %v1199_v10  ;;  %v1567_v17 = vmul.f32 %v13875_v41, %v9272_v39 }
 0x4d7   :  { %v3407_v51 = vpop.permute.xlu1 %3406  ;;  %v3904_v32 = vld [vmem:[#allocation2 + $0x41] sm:$0xff] }
 0x4d8   :  { %v4151_v48 = vld [vmem:[#allocation2 + $0x42] sm:$0xff]  ;;  %6847 = vmatmul.msk.f32.gmra.mxu0 %vm3821_vm0, %v3904_v32  ;;  %v1391_v28 = vadd.f32 %v1375_v54, %v1295_v57  ;;  %v3089_v32 = vadd.f32 %v3073_v42, %v2977_v8  ;;  %v2528_v54 = vadd.f32 %v2512_v44, %v2432_v52  ;;  %v3361_v52 = vmul.f32 %v9933_v36, %v9230_v23 }
 0x4d9   :  { %v4300_v53 = vld [vmem:[#allocation2 + $0x40] sm:$0xff]  ;;  %6883 = vmatmul.msk.f32.gmra.mxu2 %vm3821_vm0, %v4151_v48  ;;  %7258 = vset.pattern.permute.xlu1 %v13775_v49  ;;  %v551_v48 = vadd.f32 %v535_v34, %v454_v1 }
 0x4da   :  { %6902 = vmatmul.msk.f32.gmra.mxu3 %vm3821_vm0, %v4300_v53  ;;  %3414 = vperm.xlu1 %7258, %v9929_v18   ;;  %v1487_v10 = vadd.f32 %v1471_v0, %v1391_v28  ;;  %v13878_v53 = vld [vmem:[#allocation90_spill] sm:$0xff]  ;;  %v3185_v59 = vadd.f32 %v3169_v45, %v3089_v32  ;;  %v13881_v44 = vld [vmem:[#allocation96_spill] sm:$0xff]  ;;  %v2624_v3 = vadd.f32 %v2608_v30, %v2528_v54 }
 0x4db   :  { %1812 = vperm.xlu2 %7257, %v7496_v47   ;;  %v729_v58 = vmul.f32 %v9284_v12, %v13878_v53  ;;  %v648_v26 = vadd.f32 %v632_v50, %v551_v48  ;;  %v826_v47 = vmul.f32 %v9258_v37, %v13881_v44  ;;  %v13882_v28 = vld [vmem:[#allocation114_spill] sm:$0xff] }
 0x4dc   :  { %v3599_v21 = vpop.permute.xlu2 %3598  ;;  %v1583_v35 = vadd.f32 %v1567_v17, %v1487_v10  ;;  %v923_v33 = vmul.f32 %v10013_v20, %v13882_v28  ;;  %v2750_v17 = vpop.permute.xlu0 %2749  ;;  %v3281_v55 = vadd.f32 %v3265_v15, %v3185_v59  ;;  %v3457_v10 = vmul.f32 %v3407_v51, %v9272_v39 }
 0x4dd   :  { %v745_v34 = vadd.f32 %v729_v58, %v648_v26  ;;  %v2800_v45 = vmul.f32 %v10013_v20, %v2750_v17  ;;  %v3649_v53 = vmul.f32 %v3599_v21, %v9258_v37 }
 0x4de   :  { %v1679_v0 = vadd.f32 %v1663_v22, %v1583_v35  ;;  %v3377_v22 = vadd.f32 %v3361_v52, %v3281_v55  ;;  %v2033_v55 = vmul.f32 %v9920_v9, %v9155_v62  ;;  %v13883_v52 = vld [vmem:[#allocation52_spill] sm:$0xff] }
 0x4df   :  { %v842_v61 = vadd.f32 %v826_v47, %v745_v34 }
 0x4e0   :  { %v2654_v57 = vpop.permute.xlu1 %2653  ;;  %v1775_v41 = vadd.f32 %v1759_v40, %v1679_v0 }
 0x4e1   :  { %v2704_v42 = vmul.f32 %v2654_v57, %v9258_v37  ;;  %v939_v6 = vadd.f32 %v923_v33, %v842_v61  ;;  %v13884_v61 = vld [vmem:[#allocation158_spill] sm:$0xff] }
 0x4e2   :  { %7259 = vset.pattern.permute.xlu1 %v13418_v27  ;;  %v1871_v50 = vadd.f32 %v1855_v29, %v1775_v41 }
 0x4e3   :  { %7260 = vset.pattern.permute.xlu2 %v13413_v38  ;;  %2661 = vperm.xlu1 %7259, %v9916_v46   ;;  %v2720_v1 = vadd.f32 %v2704_v42, %v2624_v3  ;;  %v3473_v46 = vadd.f32 %v3457_v10, %v3377_v22  ;;  %v958_v36 = vadd.f32 %v9660_v25, %v939_v6  ;;  %v13885_v10 = vld [vmem:[#allocation127_spill] sm:$0xff]  ;;  %v13886_v22 = vld [vmem:[#allocation132_spill] sm:$0xff] }
 0x4e4   :  { %3510 = vperm.xlu2 %7260, %v9929_v18   ;;  %v1887_v48 = vadd.f32 %v9660_v25, %v1871_v50  ;;  %v1184_v50 = vmul.f32 %v13884_v61, %v9145_v43  ;;  %v2225_v6 = vmul.f32 %v13885_v10, %v9171_v2 }
 0x4e5   :  { %v10123_v8 = vpop.permute.xlu2 %2085  ;;  %v2816_v32 = vadd.f32 %v2800_v45, %v2720_v1  ;;  %v974_v15 = vmax.f32 %v958_v36, 0.0  ;;  %v2129_v1 = vmul.f32 %v13883_v52, %v9145_v43 }
 0x4e6   :  { %v1903_v5 = vmax.f32 %v1887_v48, 0.0 }
 0x4e7   :  { %v2832_v35 = vadd.f32 %v9660_v25, %v2816_v32  ;;  %v1088_v32 = vmul.f32 %v13886_v22, %v9155_v62  ;;  %v13894_v22 = vld [vmem:[#allocation88_spill] sm:$0xff] }
 0x4e8   :  { %v1919_v26 = vmax.f32 %v974_v15, %v1903_v5  ;;  %v2417_v5 = vmul.f32 %v10056_v24, %v9230_v23 }
 0x4e9   :  { %v3503_v54 = vpop.permute.xlu1 %3502  ;;  %v2848_v59 = vmax.f32 %v2832_v35, 0.0  ;;  %v1200_v9 = vadd.f32 %v1184_v50, %v1088_v32  ;;  %v13888_v35 = vld [vmem:[#allocation25_spill] sm:$0xff]  ;;  %v13893_v50 = vld [vmem:[#allocation231_spill] sm:$0xff] }
 0x4ea   :  { %v3553_v58 = vmul.f32 %v3503_v54, %v9284_v12  ;;  %v2145_v54 = vadd.f32 %v2129_v1, %v2033_v55  ;;  %v1664_v10 = vmul.f32 %v13893_v50, %v9284_v12  ;;  %v3170_v50 = vmul.f32 %v10040_v14, %v9171_v2 }
 0x4eb   :  { %3606 = vperm.xlu1 %7259, %v9929_v18   ;;  %v2864_v44 = vmax.f32 %v1919_v26, %v2848_v59  ;;  %v13890_v59 = vld [vmem:[#allocation207_spill] sm:$0xff] }
 0x4ec   :  { %7261 = vset.pattern.permute.xlu2 %v13452_v7  ;;  %v3569_v51 = vadd.f32 %v3553_v58, %v3473_v46  ;;  %v10190_v46 = vld [vmem:[%s13284_s0 + $0x148] sm:$0xff]  ;;  %v2241_v36 = vadd.f32 %v2225_v6, %v2145_v54 }
 0x4ed   :  { %1990 = vperm.xlu2 %7261, %v10139_v19  }
 0x4ee   :  { %v3695_v40 = vpop.permute.xlu2 %3694  ;;  %v3665_v30 = vadd.f32 %v3649_v53, %v3569_v51  ;;  %v13887_v53 = vld [vmem:[#allocation159_spill] sm:$0xff]  ;;  %v2321_v51 = vmul.f32 %v13888_v35, %v9163_v13 }
 0x4ef   :  { %v3745_v21 = vmul.f32 %v10013_v20, %v3695_v40  ;;  %v1280_v58 = vmul.f32 %v13887_v53, %v9171_v2  ;;  %v13889_v40 = vld [vmem:[#allocation180_spill] sm:$0xff] }
 0x4f0   :  { %v2337_v26 = vadd.f32 %v2321_v51, %v2241_v36 }
 0x4f1   :  { %v3761_v57 = vadd.f32 %v3745_v21, %v3665_v30  ;;  %v1376_v21 = vmul.f32 %v13889_v40, %v9163_v13  ;;  %v1296_v15 = vadd.f32 %v1280_v58, %v1200_v9  ;;  %v13895_v9 = vld [vmem:[#allocation256_spill] sm:$0xff] }
 0x4f2   :  { %v10144_v42 = vpop.permute.xlu1 %3218  ;;  %v1760_v53 = vmul.f32 %v13895_v9, %v9258_v37  ;;  %v13897_v9 = vld [vmem:[#allocation243_spill] sm:$0xff] }
 0x4f3   :  { %v3777_v0 = vadd.f32 %v9660_v25, %v3761_v57  ;;  %7262 = vset.pattern.permute.xlu1 %v13809_v4  ;;  %v10158_v25 = vld [vmem:[%s13284_s0 + $0x1c0] sm:$0xff]  ;;  %v1472_v57 = vmul.f32 %v13890_v59, %v9230_v23 }
 0x4f4   :  { %2093 = vperm.xlu1 %7262, %v10139_v19  }
 0x4f5   :  { %v3793_v47 = vmax.f32 %v3777_v0, 0.0  ;;  %7263 = vset.pattern.permute.xlu2 %v13612_v60  ;;  %v1392_v0 = vadd.f32 %v1376_v21, %v1296_v15  ;;  %v10232_v21 = vld [vmem:[%s13286_s2] ss:$0 sm:$0xff] }
 0x4f6   :  { %3702 = vperm.xlu2 %7263, %v9929_v18  }
 0x4f7   :  { %v3809_v29 = vmax.f32 %v2864_v44, %v3793_v47  ;;  %v2562_v3 = vpop.permute.xlu2 %2561  ;;  %v13891_v44 = vld [vmem:[#allocation302_spill] sm:$0xff] }
 0x4f8   :  { %v1568_v47 = vmul.f32 %v13891_v44, %v9272_v39  ;;  %v2609_v24 = vmul.f32 %v2562_v3, %v9284_v12  ;;  %v2705_v3 = vmul.f32 %v13894_v22, %v9258_v37 }
 0x4f9   :  { %3868 = vst.msk [vmem:[#allocation2 + $0x51] sm:$0xff] %vm3821_vm0, %v3809_v29  ;;  %v13892_v29 = vld [vmem:[#allocation102_spill] sm:$0xff] }
 0x4fb   :  { %v10151_v34 = vpop.permute.xlu1 %1980 }
 0x4fc   :  { %7264 = vset.pattern.permute.xlu1 %v13452_v7 }
 0x4fd   :  { %2935 = vperm.xlu1 %7264, %v10158_v25  }
 0x4fe   :  { %7265 = vset.pattern.permute.xlu2 %v13809_v4 }
 0x4ff   :  { %3038 = vperm.xlu2 %7265, %v10158_v25  }
 0x500   :  { %v10162_v18 = vpop.permute.xlu2 %3410  ;;  %v3905_v28 = vld [vmem:[#allocation2 + $0x51] sm:$0xff] }
 0x501   :  { %v4152_v33 = vld [vmem:[#allocation2 + $0x52] sm:$0xff]  ;;  %6848 = vmatmul.msk.f32.gmra.mxu0 %vm3821_vm0, %v3905_v28  ;;  %v2513_v28 = vmul.f32 %v13892_v29, %v9272_v39  ;;  %v3458_v14 = vmul.f32 %v10162_v18, %v9272_v39 }
 0x502   :  { %v4301_v41 = vld [vmem:[#allocation2 + $0x50] sm:$0xff]  ;;  %6884 = vmatmul.msk.f32.gmra.mxu2 %vm3821_vm0, %v4152_v33  ;;  %v2433_v33 = vadd.f32 %v2417_v5, %v2337_v26  ;;  %v13896_v5 = vld [vmem:[#allocation112_spill] sm:$0xff] }
 0x503   :  { %6903 = vmatmul.msk.f32.gmra.mxu3 %vm3821_vm0, %v4301_v41  ;;  %v1488_v41 = vadd.f32 %v1472_v57, %v1392_v0  ;;  %v959_v15 = vadd.f32 %v10232_v21, %v13896_v5  ;;  %v13900_v18 = vld [vmem:[#allocation150_spill] sm:$0xff] }
 0x504   :  { %v10167_v17 = vpop.permute.xlu1 %3314  ;;  %v2529_v1 = vadd.f32 %v2513_v28, %v2433_v33 }
 0x505   :  { %7266 = vset.pattern.permute.xlu1 %v13506_v11  ;;  %v1584_v52 = vadd.f32 %v1568_v47, %v1488_v41  ;;  %v975_v44 = vmax.f32 %v959_v15, 0.0  ;;  %v2978_v41 = vmul.f32 %v10047_v31, %v9155_v62  ;;  %v3362_v22 = vmul.f32 %v10167_v17, %v9230_v23 }
 0x506   :  { %2285 = vperm.xlu1 %7266, %v10139_v19   ;;  %v2625_v6 = vadd.f32 %v2609_v24, %v2529_v1  ;;  %v10249_v24 = vld [vmem:[%s13284_s0 + $0x1c8] sm:$0xff]  ;;  %v3074_v1 = vmul.f32 %v9995_v63, %v9145_v43  ;;  %v7501_v63 = vld [vmem:[%s13284_s0 + $0xc0] sm:$0xff]  ;;  %v1185_v15 = vmul.f32 %v13900_v18, %v9145_v43 }
 0x507   :  { %7267 = vset.pattern.permute.xlu2 %v13461_v16  ;;  %v1680_v32 = vadd.f32 %v1664_v10, %v1584_v52  ;;  %v3266_v10 = vmul.f32 %v10144_v42, %v9163_v13 }
 0x508   :  { %3134 = vperm.xlu2 %7267, %v10158_v25   ;;  %v2721_v58 = vadd.f32 %v2705_v3, %v2625_v6  ;;  %v3090_v31 = vadd.f32 %v3074_v1, %v2978_v41  ;;  %v13902_v1 = vld [vmem:[#allocation174_spill] sm:$0xff] }
 0x509   :  { %v10173_v45 = vpop.permute.xlu2 %2277  ;;  %v1776_v51 = vadd.f32 %v1760_v53, %v1680_v32  ;;  %v149_v53 = vmul.f32 %v9155_v62, %v13897_v9 }
 0x50a   :  { %v3186_v6 = vadd.f32 %v3170_v50, %v3090_v31  ;;  %v1281_v50 = vmul.f32 %v13902_v1, %v9171_v2 }
 0x50c   :  { %v3282_v32 = vadd.f32 %v3266_v10, %v3186_v6 }
 0x50d   :  { %v10185_v48 = vpop.permute.xlu1 %2181 }
 0x50e   :  { %3230 = vperm.xlu1 %7266, %v10158_v25   ;;  %v3378_v42 = vadd.f32 %v3362_v22, %v3282_v32  ;;  %v2034_v22 = vmul.f32 %v10151_v34, %v9155_v62 }
 0x510   :  { %7268 = vset.pattern.permute.xlu2 %v13452_v7 }
 0x511   :  { %1995 = vperm.xlu2 %7268, %v10190_v46  }
 0x512   :  { %v10203_v30 = vpop.permute.xlu2 %3506 }
 0x513   :  { %v3554_v17 = vmul.f32 %v10203_v30, %v9284_v12 }
 0x516   :  { %7269 = vset.pattern.permute.xlu1 %v13809_v4  ;;  %v10213_v55 = vpop.permute.xlu1 %3030 }
 0x517   :  { %2097 = vperm.xlu1 %7269, %v10190_v46   ;;  %v3075_v1 = vmul.f32 %v10213_v55, %v9145_v43 }
 0x519   :  { %7270 = vset.pattern.permute.xlu2 %v13775_v49 }
 0x51a   :  { %2477 = vperm.xlu2 %7270, %v10139_v19  }
 0x51b   :  { %v2754_v61 = vpop.permute.xlu2 %2753 }
 0x51c   :  { %v2801_v54 = vmul.f32 %v10013_v20, %v2754_v61 }
 0x51e   :  { %v2817_v35 = vadd.f32 %v2801_v54, %v2721_v58  ;;  %v13898_v58 = vld [vmem:[#allocation257_spill] sm:$0xff] }
 0x51f   :  { %7271 = vset.pattern.permute.xlu1 %v13461_v16  ;;  %v1809_v36 = vpop.permute.xlu1 %1808 }
 0x520   :  { %v1856_v40 = vmul.f32 %v10013_v20, %v1809_v36  ;;  %2193 = vperm.xlu1 %7271, %v10190_v46   ;;  %v2833_v26 = vadd.f32 %v10232_v21, %v2817_v35  ;;  %v1089_v36 = vmul.f32 %v13898_v58, %v9155_v62  ;;  %v3474_v35 = vadd.f32 %v3458_v14, %v3378_v42  ;;  %v13904_v14 = vld [vmem:[#allocation16_spill] sm:$0xff] }
 0x521   :  { %v1377_v42 = vmul.f32 %v13904_v14, %v9163_v13  ;;  %v2226_v58 = vmul.f32 %v10185_v48, %v9171_v2  ;;  %v2322_v48 = vmul.f32 %v10173_v45, %v9163_v13 }
 0x522   :  { %7272 = vset.pattern.permute.xlu2 %v13413_v38  ;;  %v1872_v59 = vadd.f32 %v1856_v40, %v1776_v51  ;;  %v2849_v29 = vmax.f32 %v2833_v26, 0.0  ;;  %v13899_v51 = vld [vmem:[#allocation14_spill] sm:$0xff] }
 0x523   :  { %2573 = vperm.xlu2 %7272, %v10139_v19   ;;  %v246_v40 = vmul.f32 %v9145_v43, %v13899_v51 }
 0x524   :  { %v10237_v57 = vpop.permute.xlu2 %2469  ;;  %v1888_v0 = vadd.f32 %v10232_v21, %v1872_v59  ;;  %v3570_v59 = vadd.f32 %v3554_v17, %v3474_v35 }
 0x525   :  { %v2514_v55 = vmul.f32 %v10237_v57, %v9272_v39 }
 0x526   :  { %v1904_v47 = vmax.f32 %v1888_v0, 0.0  ;;  %v262_v0 = vadd.f32 %v246_v40, %v149_v53  ;;  %v2130_v53 = vmul.f32 %v10123_v8, %v9145_v43  ;;  %v13906_v8 = vld [vmem:[#allocation199_spill] sm:$0xff] }
 0x528   :  { %v1920_v28 = vmax.f32 %v975_v44, %v1904_v47  ;;  %7273 = vset.pattern.permute.xlu1 %v13809_v4  ;;  %v10242_v33 = vpop.permute.xlu1 %3126  ;;  %v1201_v44 = vadd.f32 %v1185_v15, %v1089_v36  ;;  %v2146_v51 = vadd.f32 %v2130_v53, %v2034_v22  ;;  %v1473_v15 = vmul.f32 %v13906_v8, %v9230_v23 }
 0x529   :  { %3042 = vperm.xlu1 %7273, %v10249_v24  }
 0x52a   :  { %v2865_v52 = vmax.f32 %v1920_v28, %v2849_v29  ;;  %v13901_v28 = vld [vmem:[#allocation31_spill] sm:$0xff]  ;;  %v1297_v10 = vadd.f32 %v1281_v50, %v1201_v44  ;;  %v13908_v44 = vld [vmem:[#allocation224_spill] sm:$0xff] }
 0x52b   :  { %7274 = vset.pattern.permute.xlu2 %v13775_v49  ;;  %v343_v41 = vmul.f32 %v9171_v2, %v13901_v28  ;;  %v13909_v28 = vld [vmem:[#allocation267_spill] sm:$0xff] }
 0x52c   :  { %3422 = vperm.xlu2 %7274, %v10158_v25   ;;  %v1393_v34 = vadd.f32 %v1377_v42, %v1297_v10  ;;  %v13911_v10 = vld [vmem:[#allocation115_spill] sm:$0xff] }
 0x52d   :  { %v3699_v61 = vpop.permute.xlu2 %3698  ;;  %v359_v31 = vadd.f32 %v343_v41, %v262_v0  ;;  %v13907_v0 = vld [vmem:[#allocation74_spill] sm:$0xff]  ;;  %v2979_v41 = vmul.f32 %v13909_v28, %v9155_v62 }
 0x52e   :  { %v3746_v26 = vmul.f32 %v10013_v20, %v3699_v61 }
 0x531   :  { %7275 = vset.pattern.permute.xlu1 %v13612_v60  ;;  %v2374_v3 = vpop.permute.xlu1 %2373 }
 0x532   :  { %1820 = vperm.xlu1 %7275, %v7501_v63   ;;  %v13903_v63 = vld [vmem:[#allocation6_spill] sm:$0xff] }
 0x533   :  { %v440_v32 = vmul.f32 %v9163_v13, %v13903_v63 }
 0x534   :  { %7276 = vset.pattern.permute.xlu2 %v13506_v11 }
 0x535   :  { %2289 = vperm.xlu2 %7276, %v10190_v46   ;;  %v10270_v54 = vpop.permute.xlu2 %1812  ;;  %v456_v36 = vadd.f32 %v440_v32, %v359_v31  ;;  %v3171_v32 = vmul.f32 %v10242_v33, %v9171_v2 }
 0x53a   :  { %7277 = vset.pattern.permute.xlu1 %v13461_v16  ;;  %v3603_v5 = vpop.permute.xlu1 %3602 }
 0x53b   :  { %v3650_v30 = vmul.f32 %v3603_v5, %v9258_v37  ;;  %3138 = vperm.xlu1 %7277, %v10249_v24   ;;  %v13905_v5 = vld [vmem:[#allocation48_spill] sm:$0xff] }
 0x53c   :  { %v537_v18 = vmul.f32 %v9230_v23, %v13905_v5 }
 0x53d   :  { %7278 = vset.pattern.permute.xlu2 %v13413_v38  ;;  %v3666_v47 = vadd.f32 %v3650_v30, %v3570_v59  ;;  %v2242_v59 = vadd.f32 %v2226_v58, %v2146_v51  ;;  %v2418_v30 = vmul.f32 %v2374_v3, %v9230_v23  ;;  %v10331_v3 = vld [vmem:[%s13284_s0 + $0x150] sm:$0xff]  ;;  %v13912_v51 = vld [vmem:[#allocation99_spill] sm:$0xff] }
 0x53e   :  { %3518 = vperm.xlu2 %7278, %v10158_v25   ;;  %v10288_v29 = vpop.permute.xlu2 %3510  ;;  %v828_v5 = vmul.f32 %v9258_v37, %v13912_v51 }
 0x53f   :  { %v3762_v61 = vadd.f32 %v3746_v26, %v3666_v47  ;;  %v1489_v26 = vadd.f32 %v1473_v15, %v1393_v34  ;;  %v1569_v47 = vmul.f32 %v13908_v44, %v9272_v39  ;;  %v2338_v50 = vadd.f32 %v2322_v48, %v2242_v59  ;;  %v13914_v15 = vld [vmem:[#allocation27_spill] sm:$0xff]  ;;  %v13915_v59 = vld [vmem:[#allocation133_spill] sm:$0xff] }
 0x540   :  { %v3267_v48 = vmul.f32 %v13914_v15, %v9163_v13 }
 0x541   :  { %v3778_v6 = vadd.f32 %v10232_v21, %v3762_v61  ;;  %v13910_v61 = vld [vmem:[#allocation100_spill] sm:$0xff]  ;;  %v1585_v63 = vadd.f32 %v1569_v47, %v1489_v26  ;;  %v2434_v14 = vadd.f32 %v2418_v30, %v2338_v50  ;;  %v2758_v26 = vpop.permute.xlu0 %2757  ;;  %v1857_v30 = vmul.f32 %v10013_v20, %v10270_v54 }
 0x542   :  { %v731_v31 = vmul.f32 %v9284_v12, %v13910_v61 }
 0x543   :  { %v3794_v17 = vmax.f32 %v3778_v6, 0.0  ;;  %7279 = vset.pattern.permute.xlu1 %v13776_v56  ;;  %v3319_v9 = vpop.permute.xlu1 %3318  ;;  %v1665_v6 = vmul.f32 %v13911_v10, %v9284_v12  ;;  %v2530_v33 = vadd.f32 %v2514_v55, %v2434_v14 }
 0x544   :  { %2385 = vperm.xlu1 %7279, %v10190_v46  }
 0x545   :  { %v3810_v35 = vmax.f32 %v2865_v52, %v3794_v17  ;;  %v553_v52 = vadd.f32 %v537_v18, %v456_v36  ;;  %v3091_v36 = vadd.f32 %v3075_v1, %v2979_v41  ;;  %v1681_v34 = vadd.f32 %v1665_v6, %v1585_v63  ;;  %v13913_v18 = vld [vmem:[#allocation248_spill] sm:$0xff] }
 0x546   :  { %7280 = vset.pattern.permute.xlu2 %v13612_v60  ;;  %v1761_v8 = vmul.f32 %v13913_v18, %v9258_v37 }
 0x547   :  { %2765 = vperm.xlu2 %7280, %v10139_v19   ;;  %v10309_v40 = vpop.permute.xlu2 %1990  ;;  %3869 = vst.msk [vmem:[#allocation2 + $0x61] sm:$0xff] %vm3821_vm0, %v3810_v35  ;;  %v634_v19 = vmul.f32 %v9272_v39, %v13907_v0  ;;  %v3187_v35 = vadd.f32 %v3171_v32, %v3091_v36  ;;  %v3363_v0 = vmul.f32 %v3319_v9, %v9230_v23 }
 0x548   :  { %v1777_v47 = vadd.f32 %v1761_v8, %v1681_v34 }
 0x549   :  { %v650_v22 = vadd.f32 %v634_v19, %v553_v52  ;;  %v2610_v52 = vmul.f32 %v13915_v59, %v9284_v12  ;;  %v2802_v19 = vmul.f32 %v10013_v20, %v2758_v26  ;;  %v3283_v41 = vadd.f32 %v3267_v48, %v3187_v35 }
 0x54a   :  { %v1873_v9 = vadd.f32 %v1857_v30, %v1777_v47 }
 0x54b   :  { %v747_v57 = vadd.f32 %v731_v31, %v650_v22  ;;  %v2626_v50 = vadd.f32 %v2610_v52, %v2530_v33  ;;  %v13916_v31 = vld [vmem:[#allocation125_spill] sm:$0xff]  ;;  %v3379_v10 = vadd.f32 %v3363_v0, %v3283_v41 }
 0x54c   :  { %7282 = vset.pattern.permute.xlu1 %v13418_v27  ;;  %v3415_v45 = vpop.permute.xlu1 %3414  ;;  %v925_v54 = vmul.f32 %v10013_v20, %v13916_v31  ;;  %v1889_v14 = vadd.f32 %v10232_v21, %v1873_v9  ;;  %v10392_v52 = vld [vmem:[%s13284_s0 + $0x1d0] sm:$0xff]  ;;  %v13917_v9 = vld [vmem:[#allocation160_spill] sm:$0xff] }
 0x54d   :  { %3614 = vperm.xlu1 %7282, %v10158_v25   ;;  %v844_v44 = vadd.f32 %v828_v5, %v747_v57  ;;  %v3459_v1 = vmul.f32 %v3415_v45, %v9272_v39  ;;  %v3555_v45 = vmul.f32 %v10288_v29, %v9284_v12 }
 0x54e   :  { %v3906_v42 = vld [vmem:[#allocation2 + $0x61] sm:$0xff]  ;;  %v1905_v35 = vmax.f32 %v1889_v14, 0.0 }
 0x54f   :  { %7283 = vset.pattern.permute.xlu2 %v13452_v7  ;;  %v4153_v17 = vld [vmem:[#allocation2 + $0x62] sm:$0xff]  ;;  %6849 = vmatmul.msk.f32.gmra.mxu0 %vm3821_vm0, %v3906_v42  ;;  %v941_v63 = vadd.f32 %v925_v54, %v844_v44  ;;  %v3475_v55 = vadd.f32 %v3459_v1, %v3379_v10  ;;  %v1187_v10 = vmul.f32 %v13917_v9, %v9145_v43 }
 0x550   :  { %v4302_v53 = vld [vmem:[#allocation2 + $0x60] sm:$0xff]  ;;  %2000 = vperm.xlu2 %7283, %v10331_v3   ;;  %v3703_v58 = vpop.permute.xlu2 %3702  ;;  %6885 = vmatmul.msk.f32.gmra.mxu2 %vm3821_vm0, %v4153_v17  ;;  %v13925_v9 = vld [vmem:[#allocation113_spill] sm:$0xff] }
 0x551   :  { %6904 = vmatmul.msk.f32.gmra.mxu3 %vm3821_vm0, %v4302_v53  ;;  %v960_v42 = vadd.f32 %v10232_v21, %v941_v63  ;;  %v3747_v53 = vmul.f32 %v10013_v20, %v3703_v58  ;;  %v3571_v57 = vadd.f32 %v3555_v45, %v3475_v55  ;;  %v13919_v55 = vld [vmem:[#allocation162_spill] sm:$0xff] }
 0x553   :  { %v976_v51 = vmax.f32 %v960_v42, 0.0  ;;  %v10448_v42 = vld [vmem:[%s13284_s0 + $0x158] sm:$0xff] }
 0x555   :  { %7284 = vset.pattern.permute.xlu1 %v13809_v4  ;;  %v2662_v28 = vpop.permute.xlu1 %2661  ;;  %v1921_v18 = vmax.f32 %v976_v51, %v1905_v35  ;;  %v13922_v35 = vld [vmem:[#allocation305_spill] sm:$0xff] }
 0x556   :  { %v2706_v61 = vmul.f32 %v2662_v28, %v9258_v37  ;;  %2101 = vperm.xlu1 %7284, %v10331_v3   ;;  %v7503_v28 = vld [vmem:[%s13284_s0 + $0xc8] sm:$0xff] }
 0x558   :  { %7285 = vset.pattern.permute.xlu2 %v13775_v49  ;;  %v2722_v6 = vadd.f32 %v2706_v61, %v2626_v50 }
 0x559   :  { %2481 = vperm.xlu2 %7285, %v10190_v46   ;;  %v10367_v22 = vpop.permute.xlu2 %3038 }
 0x55a   :  { %v2818_v32 = vadd.f32 %v2802_v19, %v2722_v6 }
 0x55c   :  { %v2834_v36 = vadd.f32 %v10232_v21, %v2818_v32  ;;  %v1283_v32 = vmul.f32 %v13919_v55, %v9171_v2 }
 0x55d   :  { %v3607_v17 = vpop.permute.xlu1 %3606 }
 0x55e   :  { %v3651_v34 = vmul.f32 %v3607_v17, %v9258_v37  ;;  %7286 = vset.pattern.permute.xlu1 %v13612_v60  ;;  %v2850_v5 = vmax.f32 %v2834_v36, 0.0 }
 0x55f   :  { %3710 = vperm.xlu1 %7286, %v10158_v25  }
 0x560   :  { %v3667_v29 = vadd.f32 %v3651_v34, %v3571_v57  ;;  %v2866_v15 = vmax.f32 %v1921_v18, %v2850_v5  ;;  %v13923_v18 = vld [vmem:[#allocation234_spill] sm:$0xff] }
 0x561   :  { %7287 = vset.pattern.permute.xlu2 %v13461_v16 }
 0x562   :  { %2197 = vperm.xlu2 %7287, %v10331_v3   ;;  %v10380_v33 = vpop.permute.xlu2 %3134  ;;  %v3763_v58 = vadd.f32 %v3747_v53, %v3667_v29  ;;  %v13921_v53 = vld [vmem:[#allocation209_spill] sm:$0xff]  ;;  %v1571_v29 = vmul.f32 %v13922_v35, %v9272_v39 }
 0x563   :  { %v1475_v36 = vmul.f32 %v13921_v53, %v9230_v23 }
 0x564   :  { %v3779_v8 = vadd.f32 %v10232_v21, %v3763_v58 }
 0x566   :  { %v3795_v48 = vmax.f32 %v3779_v8, 0.0  ;;  %v10383_v59 = vpop.permute.xlu1 %2093  ;;  %v1667_v8 = vmul.f32 %v13923_v18, %v9284_v12 }
 0x567   :  { %7288 = vset.pattern.permute.xlu1 %v13413_v38  ;;  %v2132_v53 = vmul.f32 %v10383_v59, %v9145_v43  ;;  %v7505_v59 = vld [vmem:[%s13284_s0 + $0xd0] sm:$0xff] }
 0x568   :  { %v3811_v25 = vmax.f32 %v2866_v15, %v3795_v48  ;;  %2577 = vperm.xlu1 %7288, %v10190_v46  }
 0x56a   :  { %7289 = vset.pattern.permute.xlu2 %v13452_v7  ;;  %3870 = vst.msk [vmem:[#allocation2 + $0x71] sm:$0xff] %vm3821_vm0, %v3811_v25  ;;  %v13924_v25 = vld [vmem:[#allocation258_spill] sm:$0xff] }
 0x56b   :  { %2945 = vperm.xlu2 %7289, %v10392_v52   ;;  %v10395_v26 = vpop.permute.xlu2 %1995 }
 0x56f   :  { %v10397_v30 = vpop.permute.xlu1 %2935 }
 0x570   :  { %7291 = vset.pattern.permute.xlu1 %v13775_v49 }
 0x571   :  { %3426 = vperm.xlu1 %7291, %v10249_v24   ;;  %v3907_v0 = vld [vmem:[#allocation2 + $0x71] sm:$0xff] }
 0x572   :  { %v4154_v19 = vld [vmem:[#allocation2 + $0x72] sm:$0xff]  ;;  %6850 = vmatmul.msk.f32.gmra.mxu0 %vm3821_vm0, %v3907_v0  ;;  %v1763_v0 = vmul.f32 %v13924_v25, %v9258_v37 }
 0x573   :  { %v4303_v44 = vld [vmem:[#allocation2 + $0x70] sm:$0xff]  ;;  %7292 = vset.pattern.permute.xlu2 %v13612_v60  ;;  %6886 = vmatmul.msk.f32.gmra.mxu2 %vm3821_vm0, %v4154_v19 }
 0x574   :  { %6905 = vmatmul.msk.f32.gmra.mxu3 %vm3821_vm0, %v4303_v44  ;;  %v10405_v47 = vpop.permute.xlu2 %2477  ;;  %1824 = vperm.xlu2 %7292, %v7503_v28  }
 0x578   :  { %v10410_v41 = vpop.permute.xlu1 %2285 }
 0x579   :  { %7293 = vset.pattern.permute.xlu1 %v13506_v11  ;;  %v2324_v18 = vmul.f32 %v10410_v41, %v9163_v13  ;;  %v4155_v41 = vld [vmem:[#allocation2 + $0xa2] sm:$0xff] }
 0x57a   :  { %2293 = vperm.xlu1 %7293, %v10331_v3  }
 0x57b   :  { %6887 = vmatmul.msk.f32.gmra.mxu2 %vm3821_vm0, %v4155_v41 }
 0x57c   :  { %7294 = vset.pattern.permute.xlu2 %v13418_v27 }
 0x57d   :  { %v10415_v1 = vpop.permute.xlu2 %2573  ;;  %2673 = vperm.xlu2 %7294, %v10190_v46  }
 0x580   :  { %v10418_v50 = vpop.permute.xlu1 %3230 }
 0x582   :  { %7295 = vset.pattern.permute.xlu1 %v13413_v38 }
 0x583   :  { %3522 = vperm.xlu1 %7295, %v10249_v24   ;;  %v13918_v24 = vld [vmem:[#allocation135_spill] sm:$0xff] }
 0x584   :  { %v1091_v6 = vmul.f32 %v13918_v24, %v9155_v62 }
 0x585   :  { %7296 = vset.pattern.permute.xlu2 %v13776_v56 }
 0x586   :  { %2389 = vperm.xlu2 %7296, %v10331_v3   ;;  %v10424_v61 = vpop.permute.xlu2 %3422  ;;  %v1203_v45 = vadd.f32 %v1187_v10, %v1091_v6  ;;  %v962_v10 = vadd.f32 %v10232_v21, %v13925_v9 }
 0x588   :  { %v1299_v17 = vadd.f32 %v1283_v32, %v1203_v45  ;;  %v978_v55 = vmax.f32 %v962_v10, 0.0  ;;  %v3173_v10 = vmul.f32 %v10380_v33, %v9171_v2 }
 0x589   :  { %v10426_v31 = vpop.permute.xlu1 %2097 }
 0x58b   :  { %7297 = vset.pattern.permute.xlu1 %v13612_v60 }
 0x58c   :  { %2769 = vperm.xlu1 %7297, %v10190_v46   ;;  %v13920_v46 = vld [vmem:[#allocation183_spill] sm:$0xff] }
 0x58d   :  { %v1379_v14 = vmul.f32 %v13920_v46, %v9163_v13 }
 0x58e   :  { %7298 = vset.pattern.permute.xlu2 %v13506_v11 }
 0x58f   :  { %v10431_v54 = vpop.permute.xlu2 %2289  ;;  %3238 = vperm.xlu2 %7298, %v10392_v52   ;;  %v1395_v34 = vadd.f32 %v1379_v14, %v1299_v17  ;;  %v10488_v17 = vld [vmem:[%s13284_s0 + $0x1d8] sm:$0xff] }
 0x591   :  { %v1491_v51 = vadd.f32 %v1475_v36, %v1395_v34  ;;  %v2036_v34 = vmul.f32 %v10309_v40, %v9155_v62 }
 0x592   :  { %v10438_v63 = vpop.permute.xlu1 %2193 }
 0x593   :  { %v1587_v58 = vadd.f32 %v1571_v29, %v1491_v51  ;;  %v2148_v35 = vadd.f32 %v2132_v53, %v2036_v34  ;;  %v13926_v51 = vld [vmem:[#allocation178_spill] sm:$0xff] }
 0x594   :  { %7300 = vset.pattern.permute.xlu1 %v13452_v7  ;;  %v13928_v34 = vld [vmem:[#allocation226_spill] sm:$0xff] }
 0x595   :  { %2005 = vperm.xlu1 %7300, %v10448_v42   ;;  %v1683_v15 = vadd.f32 %v1667_v8, %v1587_v58  ;;  %v2228_v58 = vmul.f32 %v13926_v51, %v9171_v2 }
 0x597   :  { %7301 = vset.pattern.permute.xlu2 %v13809_v4  ;;  %v1779_v44 = vadd.f32 %v1763_v0, %v1683_v15  ;;  %v2244_v8 = vadd.f32 %v2228_v58, %v2148_v35  ;;  %v2981_v15 = vmul.f32 %v10397_v30, %v9155_v62  ;;  %v3908_v0 = vld [vmem:[#allocation2 + $0xa1] sm:$0xff]  ;;  %v3365_v35 = vmul.f32 %v13928_v34, %v9230_v23  ;;  %v13931_v34 = vld [vmem:[#allocation259_spill] sm:$0xff] }
 0x598   :  { %v10454_v57 = vpop.permute.xlu2 %3518  ;;  %2105 = vperm.xlu2 %7301, %v10448_v42   ;;  %6851 = vmatmul.msk.f32.gmra.mxu0 %vm3821_vm0, %v3908_v0 }
 0x599   :  { %v2340_v25 = vadd.f32 %v2324_v18, %v2244_v8 }
 0x59b   :  { %v10459_v5 = vpop.permute.xlu1 %3042 }
 0x59d   :  { %7302 = vset.pattern.permute.xlu1 %v13775_v49 }
 0x59e   :  { %2485 = vperm.xlu1 %7302, %v10331_v3  }
 0x5a0   :  { %7303 = vset.pattern.permute.xlu2 %v13776_v56 }
 0x5a1   :  { %3334 = vperm.xlu2 %7303, %v10392_v52   ;;  %v10467_v48 = vpop.permute.xlu2 %2765 }
 0x5a2   :  { %v2804_v8 = vmul.f32 %v10013_v20, %v10467_v48 }
 0x5a4   :  { %v1821_v19 = vpop.permute.xlu1 %1820 }
 0x5a5   :  { %v1859_v28 = vmul.f32 %v10013_v20, %v1821_v19  ;;  %v13927_v19 = vld [vmem:[#allocation223_spill] sm:$0xff] }
 0x5a6   :  { %7304 = vset.pattern.permute.xlu1 %v13461_v16 }
 0x5a7   :  { %v1875_v24 = vadd.f32 %v1859_v28, %v1779_v44  ;;  %2201 = vperm.xlu1 %7304, %v10448_v42   ;;  %v2420_v44 = vmul.f32 %v13927_v19, %v9230_v23  ;;  %v3077_v28 = vmul.f32 %v10367_v22, %v9145_v43  ;;  %v2612_v22 = vmul.f32 %v10415_v1, %v9284_v12 }
 0x5a8   :  { %v3461_v1 = vmul.f32 %v10424_v61, %v9272_v39 }
 0x5a9   :  { %v1891_v6 = vadd.f32 %v10232_v21, %v1875_v24  ;;  %7305 = vset.pattern.permute.xlu2 %v13413_v38  ;;  %v3093_v30 = vadd.f32 %v3077_v28, %v2981_v15  ;;  %v2516_v24 = vmul.f32 %v10405_v47, %v9272_v39  ;;  %v3557_v15 = vmul.f32 %v10454_v57, %v9284_v12  ;;  %v10559_v57 = vld [vmem:[%s13285_s1 + $0x8] ss:$0 sm:$0xff] }
 0x5aa   :  { %v10478_v45 = vpop.permute.xlu2 %2000  ;;  %2581 = vperm.xlu2 %7305, %v10331_v3  }
 0x5ab   :  { %v1907_v32 = vmax.f32 %v1891_v6, 0.0  ;;  %v2436_v6 = vadd.f32 %v2420_v44, %v2340_v25  ;;  %v3189_v53 = vadd.f32 %v3173_v10, %v3093_v30 }
 0x5ad   :  { %v10481_v46 = vmax.f32 %v978_v55, %v1907_v32  ;;  %v10483_v14 = vpop.permute.xlu1 %3138  ;;  %v3269_v55 = vmul.f32 %v10418_v50, %v9163_v13  ;;  %v2532_v32 = vadd.f32 %v2516_v24, %v2436_v6  ;;  %v13929_v50 = vld [vmem:[#allocation91_spill] sm:$0xff] }
 0x5ae   :  { %v2708_v18 = vmul.f32 %v13929_v50, %v9258_v37 }
 0x5af   :  { %7306 = vset.pattern.permute.xlu1 %v13452_v7  ;;  %v3285_v47 = vadd.f32 %v3269_v55, %v3189_v53  ;;  %v2628_v51 = vadd.f32 %v2612_v22, %v2532_v32  ;;  %v13930_v32 = vld [vmem:[#allocation246_spill] sm:$0xff] }
 0x5b0   :  { %2950 = vperm.xlu1 %7306, %v10488_v17   ;;  %v152_v22 = vmul.f32 %v9155_v62, %v13930_v32  ;;  %v13938_v32 = vld [vmem:[#allocation270_spill] sm:$0xff] }
 0x5b1   :  { %v2724_v25 = vadd.f32 %v2708_v18, %v2628_v51  ;;  %v13932_v51 = vld [vmem:[#allocation15_spill] sm:$0xff] }
 0x5b2   :  { %7307 = vset.pattern.permute.xlu2 %v13809_v4  ;;  %v249_v50 = vmul.f32 %v9145_v43, %v13932_v51  ;;  %v13933_v18 = vld [vmem:[#allocation151_spill] sm:$0xff] }
 0x5b3   :  { %v10495_v36 = vpop.permute.xlu2 %2481  ;;  %3050 = vperm.xlu2 %7307, %v10488_v17   ;;  %v2820_v41 = vadd.f32 %v2804_v8, %v2724_v25 }
 0x5b5   :  { %v2836_v48 = vadd.f32 %v10232_v21, %v2820_v41  ;;  %v13935_v41 = vld [vmem:[#allocation176_spill] sm:$0xff] }
 0x5b6   :  { %v10500_v29 = vpop.permute.xlu1 %2385 }
 0x5b8   :  { %7308 = vset.pattern.permute.xlu1 %v13612_v60 }
 0x5b9   :  { %1828 = vperm.xlu1 %7308, %v7505_v59   ;;  %v3381_v59 = vadd.f32 %v3365_v35, %v3285_v47  ;;  %v1092_v35 = vmul.f32 %v13931_v34, %v9155_v62 }
 0x5bb   :  { %7309 = vset.pattern.permute.xlu2 %v13506_v11  ;;  %v3477_v0 = vadd.f32 %v3461_v1, %v3381_v59  ;;  %v10585_v59 = vld [vmem:[%s13284_s0 + $0x160] sm:$0xff]  ;;  %v265_v1 = vadd.f32 %v249_v50, %v152_v22  ;;  %v2982_v22 = vmul.f32 %v13938_v32, %v9155_v62  ;;  %v3174_v50 = vmul.f32 %v10483_v14, %v9171_v2 }
 0x5bc   :  { %v10511_v40 = vpop.permute.xlu2 %2197  ;;  %2297 = vperm.xlu2 %7309, %v10448_v42   ;;  %v2229_v14 = vmul.f32 %v10438_v63, %v9171_v2  ;;  %v13945_v63 = vld [vmem:[#allocation118_spill] sm:$0xff]  ;;  %v2325_v32 = vmul.f32 %v10431_v54, %v9163_v13 }
 0x5bd   :  { %v3573_v44 = vadd.f32 %v3557_v15, %v3477_v0  ;;  %v13934_v15 = vld [vmem:[#allocation32_spill] sm:$0xff] }
 0x5be   :  { %v346_v25 = vmul.f32 %v9171_v2, %v13934_v15 }
 0x5bf   :  { %v3615_v9 = vpop.permute.xlu1 %3614 }
 0x5c0   :  { %v3653_v19 = vmul.f32 %v3615_v9, %v9258_v37 }
 0x5c1   :  { %7310 = vset.pattern.permute.xlu1 %v13418_v27 }
 0x5c2   :  { %2677 = vperm.xlu1 %7310, %v10331_v3   ;;  %v3669_v28 = vadd.f32 %v3653_v19, %v3573_v44  ;;  %v1284_v19 = vmul.f32 %v13935_v41, %v9171_v2  ;;  %v362_v44 = vadd.f32 %v346_v25, %v265_v1  ;;  %v2133_v1 = vmul.f32 %v10426_v31, %v9145_v43  ;;  %v13942_v31 = vld [vmem:[#allocation227_spill] sm:$0xff] }
 0x5c3   :  { %v2037_v41 = vmul.f32 %v10395_v26, %v9155_v62 }
 0x5c4   :  { %7311 = vset.pattern.permute.xlu2 %v13461_v16 }
 0x5c5   :  { %3146 = vperm.xlu2 %7311, %v10488_v17   ;;  %v10534_v33 = vpop.permute.xlu2 %2945 }
 0x5c8   :  { %v10538_v58 = vpop.permute.xlu1 %2101 }
 0x5ca   :  { %7312 = vset.pattern.permute.xlu1 %v13776_v56 }
 0x5cb   :  { %2393 = vperm.xlu1 %7312, %v10448_v42  }
 0x5cd   :  { %7313 = vset.pattern.permute.xlu2 %v13612_v60 }
 0x5ce   :  { %2773 = vperm.xlu2 %7313, %v10331_v3   ;;  %v10553_v61 = vpop.permute.xlu2 %1824  ;;  %v2852_v3 = vmax.f32 %v2836_v48, 0.0 }
 0x5d0   :  { %v2868_v6 = vmax.f32 %v10481_v46, %v2852_v3  ;;  %v1188_v46 = vmul.f32 %v13933_v18, %v9145_v43  ;;  %v13940_v18 = vld [vmem:[#allocation201_spill] sm:$0xff] }
 0x5d1   :  { %v3711_v20 = vpop.permute.xlu1 %3710 }
 0x5d2   :  { %v3749_v10 = vmul.f32 %v10559_v57, %v3711_v20  ;;  %v1204_v8 = vadd.f32 %v1188_v46, %v1092_v35  ;;  %v13939_v35 = vld [vmem:[#allocation50_spill] sm:$0xff]  ;;  %v1476_v46 = vmul.f32 %v13940_v18, %v9230_v23 }
 0x5d3   :  { %7314 = vset.pattern.permute.xlu1 %v13506_v11  ;;  %v540_v51 = vmul.f32 %v9230_v23, %v13939_v35 }
 0x5d4   :  { %v3765_v30 = vadd.f32 %v3749_v10, %v3669_v28  ;;  %3242 = vperm.xlu1 %7314, %v10488_v17   ;;  %v1300_v20 = vadd.f32 %v1284_v19, %v1204_v8  ;;  %v13941_v19 = vld [vmem:[#allocation77_spill] sm:$0xff] }
 0x5d6   :  { %v3781_v9 = vadd.f32 %v10232_v21, %v3765_v30  ;;  %7315 = vset.pattern.permute.xlu2 %v13418_v27  ;;  %v13936_v30 = vld [vmem:[#allocation8_spill] sm:$0xff] }
 0x5d7   :  { %3622 = vperm.xlu2 %7315, %v10392_v52   ;;  %v10567_v24 = vpop.permute.xlu2 %2673  ;;  %v443_v3 = vmul.f32 %v9163_v13, %v13936_v30  ;;  %v13943_v30 = vld [vmem:[#allocation30_spill] sm:$0xff] }
 0x5d8   :  { %v3797_v55 = vmax.f32 %v3781_v9, 0.0  ;;  %v13937_v9 = vld [vmem:[#allocation19_spill] sm:$0xff] }
 0x5da   :  { %v3813_v53 = vmax.f32 %v2868_v6, %v3797_v55  ;;  %v10572_v47 = vpop.permute.xlu1 %2577  ;;  %v1380_v6 = vmul.f32 %v13937_v9, %v9163_v13  ;;  %v459_v55 = vadd.f32 %v443_v3, %v362_v44  ;;  %v637_v44 = vmul.f32 %v9272_v39, %v13941_v19  ;;  %v13944_v9 = vld [vmem:[#allocation103_spill] sm:$0xff] }
 0x5db   :  { %v3270_v3 = vmul.f32 %v13943_v30, %v9163_v13 }
 0x5dc   :  { %3872 = vst.msk [vmem:[#allocation2 + $0xb1] sm:$0xff] %vm3821_vm0, %v3813_v53  ;;  %7316 = vset.pattern.permute.xlu1 %v13809_v4  ;;  %v3078_v53 = vmul.f32 %v10459_v5, %v9145_v43  ;;  %v1396_v34 = vadd.f32 %v1380_v6, %v1300_v20  ;;  %v556_v5 = vadd.f32 %v540_v51, %v459_v55 }
 0x5dd   :  { %2109 = vperm.xlu1 %7316, %v10585_v59   ;;  %v734_v6 = vmul.f32 %v9284_v12, %v13944_v9  ;;  %v1668_v55 = vmul.f32 %v13945_v63, %v9284_v12  ;;  %v2421_v51 = vmul.f32 %v10500_v29, %v9230_v23  ;;  %v13948_v29 = vld [vmem:[#allocation250_spill] sm:$0xff]  ;;  %v2613_v9 = vmul.f32 %v10572_v47, %v9284_v12 }
 0x5de   :  { %v3094_v8 = vadd.f32 %v3078_v53, %v2982_v22  ;;  %v1492_v25 = vadd.f32 %v1476_v46, %v1396_v34  ;;  %v653_v26 = vadd.f32 %v637_v44, %v556_v5  ;;  %v10642_v34 = vld [vmem:[%s13284_s0 + $0x170] sm:$0xff]  ;;  %v1764_v19 = vmul.f32 %v13948_v29, %v9258_v37 }
 0x5df   :  { %7317 = vset.pattern.permute.xlu2 %v13775_v49  ;;  %v2517_v44 = vmul.f32 %v10495_v36, %v9272_v39  ;;  %v10671_v36 = vld [vmem:[%s13284_s0 + $0x1e0] sm:$0xff] }
 0x5e0   :  { %2489 = vperm.xlu2 %7317, %v10448_v42   ;;  %v10592_v0 = vpop.permute.xlu2 %2389  ;;  %v3190_v20 = vadd.f32 %v3174_v50, %v3094_v8  ;;  %v13946_v50 = vld [vmem:[#allocation229_spill] sm:$0xff]  ;;  %v750_v46 = vadd.f32 %v734_v6, %v653_v26  ;;  %v13949_v6 = vld [vmem:[#allocation128_spill] sm:$0xff] }
 0x5e1   :  { %v3366_v18 = vmul.f32 %v13946_v50, %v9230_v23  ;;  %v928_v26 = vmul.f32 %v10559_v57, %v13949_v6 }
 0x5e2   :  { %v3286_v35 = vadd.f32 %v3270_v3, %v3190_v20 }
 0x5e3   :  { %v3427_v48 = vpop.permute.xlu1 %3426  ;;  %v3909_v28 = vld [vmem:[#allocation2 + $0xb1] sm:$0xff] }
 0x5e4   :  { %v4156_v10 = vld [vmem:[#allocation2 + $0xb2] sm:$0xff]  ;;  %6852 = vmatmul.msk.f32.gmra.mxu0 %vm3821_vm0, %v3909_v28  ;;  %v3462_v54 = vmul.f32 %v3427_v48, %v9272_v39  ;;  %v1860_v48 = vmul.f32 %v10559_v57, %v10553_v61 }
 0x5e5   :  { %6888 = vmatmul.msk.f32.gmra.mxu2 %vm3821_vm0, %v4156_v10  ;;  %7318 = vset.pattern.permute.xlu1 %v13776_v56  ;;  %v2149_v10 = vadd.f32 %v2133_v1, %v2037_v41  ;;  %v13950_v61 = vld [vmem:[#allocation94_spill] sm:$0xff] }
 0x5e6   :  { %3338 = vperm.xlu1 %7318, %v10488_v17  }
 0x5e7   :  { %v2245_v22 = vadd.f32 %v2229_v14, %v2149_v10  ;;  %v3382_v14 = vadd.f32 %v3366_v18, %v3286_v35 }
 0x5e8   :  { %7319 = vset.pattern.permute.xlu2 %v13612_v60 }
 0x5e9   :  { %3718 = vperm.xlu2 %7319, %v10392_v52   ;;  %v10618_v15 = vpop.permute.xlu2 %3238  ;;  %v1572_v52 = vmul.f32 %v13942_v31, %v9272_v39  ;;  %v2341_v5 = vadd.f32 %v2325_v32, %v2245_v22  ;;  %v3478_v10 = vadd.f32 %v3462_v54, %v3382_v14 }
 0x5eb   :  { %v1588_v53 = vadd.f32 %v1572_v52, %v1492_v25  ;;  %v13947_v25 = vld [vmem:[#allocation101_spill] sm:$0xff]  ;;  %v2437_v20 = vadd.f32 %v2421_v51, %v2341_v5  ;;  %v2709_v51 = vmul.f32 %v10567_v24, %v9258_v37 }
 0x5ec   :  { %v10626_v28 = vpop.permute.xlu1 %2293  ;;  %v831_v41 = vmul.f32 %v9258_v37, %v13947_v25 }
 0x5ed   :  { %v1684_v8 = vadd.f32 %v1668_v55, %v1588_v53  ;;  %v3654_v55 = vmul.f32 %v13950_v61, %v9258_v37  ;;  %v2533_v22 = vadd.f32 %v2517_v44, %v2437_v20  ;;  %v3715_v53 = vpop.permute.xlu0 %3714 }
 0x5ee   :  { %7320 = vset.pattern.permute.xlu1 %v13809_v4  ;;  %v847_v52 = vadd.f32 %v831_v41, %v750_v46  ;;  %v3750_v35 = vmul.f32 %v10559_v57, %v3715_v53 }
 0x5ef   :  { %2117 = vperm.xlu1 %7320, %v10642_v34   ;;  %v1780_v3 = vadd.f32 %v1764_v19, %v1684_v8  ;;  %v2629_v50 = vadd.f32 %v2613_v9, %v2533_v22 }
 0x5f0   :  { %v944_v47 = vadd.f32 %v928_v26, %v847_v52 }
 0x5f1   :  { %7321 = vset.pattern.permute.xlu2 %v13461_v16  ;;  %v1876_v32 = vadd.f32 %v1860_v48, %v1780_v3  ;;  %v2725_v41 = vadd.f32 %v2709_v51, %v2629_v50  ;;  %v7510_v48 = vld [vmem:[%s13284_s0 + $0xd8] sm:$0xff]  ;;  %v13952_v50 = vld [vmem:[#allocation9_spill] sm:$0xff] }
 0x5f2   :  { %2205 = vperm.xlu2 %7321, %v10585_v59   ;;  %v10652_v1 = vpop.permute.xlu2 %2105  ;;  %v963_v8 = vadd.f32 %v10232_v21, %v944_v47  ;;  %v13951_v47 = vld [vmem:[#allocation36_spill] sm:$0xff] }
 0x5f3   :  { %v1892_v54 = vadd.f32 %v10232_v21, %v1876_v32 }
 0x5f4   :  { %v979_v24 = vmax.f32 %v963_v8, 0.0  ;;  %v2038_v8 = vmul.f32 %v10478_v45, %v9155_v62 }
 0x5f5   :  { %v3523_v31 = vpop.permute.xlu1 %3522  ;;  %v1908_v29 = vmax.f32 %v1892_v54, 0.0  ;;  %v2134_v54 = vmul.f32 %v10538_v58, %v9145_v43 }
 0x5f6   :  { %v3558_v30 = vmul.f32 %v3523_v31, %v9284_v12 }
 0x5f7   :  { %7323 = vset.pattern.permute.xlu1 %v13452_v7  ;;  %v1924_v52 = vmax.f32 %v979_v24, %v1908_v29 }
 0x5f8   :  { %v3574_v63 = vadd.f32 %v3558_v30, %v3478_v10  ;;  %2955 = vperm.xlu1 %7323, %v10671_v36  }
 0x5fa   :  { %7324 = vset.pattern.permute.xlu2 %v13809_v4  ;;  %v3670_v18 = vadd.f32 %v3654_v55, %v3574_v63  ;;  %v10709_v55 = vld [vmem:[%s13284_s0 + $0x1f0] sm:$0xff] }
 0x5fb   :  { %3054 = vperm.xlu2 %7324, %v10671_v36   ;;  %v10681_v46 = vpop.permute.xlu2 %3334 }
 0x5fc   :  { %v3766_v25 = vadd.f32 %v3750_v35, %v3670_v18  ;;  %v250_v35 = vmul.f32 %v9145_v43, %v13951_v47  ;;  %v153_v18 = vmul.f32 %v9155_v62, %v13952_v50  ;;  %v13959_v47 = vld [vmem:[#allocation194_spill] sm:$0xff] }
 0x5fe   :  { %v2770_v5 = vpop.permute.xlu1 %2769  ;;  %v3782_v44 = vadd.f32 %v10232_v21, %v3766_v25  ;;  %v13953_v25 = vld [vmem:[#allocation26_spill] sm:$0xff] }
 0x5ff   :  { %v2805_v14 = vmul.f32 %v10559_v57, %v2770_v5  ;;  %v266_v5 = vadd.f32 %v250_v35, %v153_v18  ;;  %v1381_v35 = vmul.f32 %v13959_v47, %v9163_v13 }
 0x600   :  { %7325 = vset.pattern.permute.xlu1 %v13775_v49  ;;  %v3798_v30 = vmax.f32 %v3782_v44, 0.0  ;;  %v13956_v44 = vld [vmem:[#allocation146_spill] sm:$0xff] }
 0x601   :  { %v2821_v19 = vadd.f32 %v2805_v14, %v2725_v41  ;;  %3434 = vperm.xlu1 %7325, %v10488_v17   ;;  %v347_v41 = vmul.f32 %v9171_v2, %v13953_v25  ;;  %v13954_v14 = vld [vmem:[#allocation44_spill] sm:$0xff]  ;;  %v1093_v58 = vmul.f32 %v13956_v44, %v9155_v62  ;;  %v2983_v25 = vmul.f32 %v10534_v33, %v9155_v62 }
 0x602   :  { %v444_v29 = vmul.f32 %v9163_v13, %v13954_v14  ;;  %v13961_v14 = vld [vmem:[#allocation55_spill] sm:$0xff] }
 0x603   :  { %v2837_v20 = vadd.f32 %v10232_v21, %v2821_v19  ;;  %7326 = vset.pattern.permute.xlu2 %v13612_v60  ;;  %v13955_v19 = vld [vmem:[#allocation43_spill] sm:$0xff] }
 0x604   :  { %1832 = vperm.xlu2 %7326, %v7510_v48   ;;  %v10694_v31 = vpop.permute.xlu2 %2581  ;;  %v1189_v24 = vmul.f32 %v13955_v19, %v9145_v43  ;;  %v363_v48 = vadd.f32 %v347_v41, %v266_v5  ;;  %v13960_v5 = vld [vmem:[#allocation205_spill] sm:$0xff]  ;;  %v13962_v19 = vld [vmem:[#allocation68_spill] sm:$0xff] }
 0x605   :  { %v2853_v10 = vmax.f32 %v2837_v20, 0.0  ;;  %v2150_v20 = vadd.f32 %v2134_v54, %v2038_v8  ;;  %v1477_v8 = vmul.f32 %v13960_v5, %v9230_v23  ;;  %v3271_v5 = vmul.f32 %v10618_v15, %v9163_v13 }
 0x607   :  { %v2869_v3 = vmax.f32 %v1924_v52, %v2853_v10  ;;  %v10696_v9 = vpop.permute.xlu1 %2005  ;;  %v13957_v52 = vld [vmem:[#allocation169_spill] sm:$0xff] }
 0x608   :  { %v1285_v10 = vmul.f32 %v13957_v52, %v9171_v2 }
 0x609   :  { %v3814_v6 = vmax.f32 %v2869_v3, %v3798_v30  ;;  %7327 = vset.pattern.permute.xlu1 %v13506_v11  ;;  %v13958_v30 = vld [vmem:[#allocation195_spill] sm:$0xff] }
 0x60a   :  { %2301 = vperm.xlu1 %7327, %v10585_v59   ;;  %v541_v3 = vmul.f32 %v9230_v23, %v13958_v30  ;;  %v13965_v30 = vld [vmem:[#allocation64_spill] sm:$0xff] }
 0x60b   :  { %3873 = vst.msk [vmem:[#allocation2 + $0xc1] sm:$0xff] %vm3821_vm0, %v3814_v6  ;;  %v2326_v6 = vmul.f32 %v10626_v28, %v9163_v13  ;;  %v2422_v28 = vmul.f32 %v10592_v0, %v9230_v23  ;;  %v13964_v0 = vld [vmem:[#allocation244_spill] sm:$0xff] }
 0x60c   :  { %7328 = vset.pattern.permute.xlu2 %v13418_v27  ;;  %v1669_v52 = vmul.f32 %v13964_v0, %v9284_v12 }
 0x60d   :  { %2681 = vperm.xlu2 %7328, %v10448_v42   ;;  %v10703_v21 = vpop.permute.xlu2 %3050 }
 0x610   :  { %v2486_v26 = vpop.permute.xlu1 %2485 }
 0x611   :  { %v2518_v33 = vmul.f32 %v2486_v26, %v9272_v39 }
 0x612   :  { %7329 = vset.pattern.permute.xlu1 %v13452_v7  ;;  %v3910_v63 = vld [vmem:[#allocation2 + $0xc1] sm:$0xff] }
 0x613   :  { %v4157_v61 = vld [vmem:[#allocation2 + $0xc2] sm:$0xff]  ;;  %2965 = vperm.xlu1 %7329, %v10709_v55   ;;  %6853 = vmatmul.msk.f32.gmra.mxu0 %vm3821_vm0, %v3910_v63  ;;  %v460_v63 = vadd.f32 %v444_v29, %v363_v48  ;;  %v3079_v29 = vmul.f32 %v13961_v14, %v9145_v43 }
 0x614   :  { %6889 = vmatmul.msk.f32.gmra.mxu2 %vm3821_vm0, %v4157_v61  ;;  %v1205_v61 = vadd.f32 %v1189_v24, %v1093_v58  ;;  %v638_v24 = vmul.f32 %v9272_v39, %v13962_v19  ;;  %v13963_v58 = vld [vmem:[#allocation218_spill] sm:$0xff] }
 0x615   :  { %7330 = vset.pattern.permute.xlu2 %v13809_v4  ;;  %v557_v54 = vadd.f32 %v541_v3, %v460_v63  ;;  %v832_v3 = vmul.f32 %v9258_v37, %v13965_v30 }
 0x616   :  { %3062 = vperm.xlu2 %7330, %v10709_v55   ;;  %v10716_v32 = vpop.permute.xlu2 %2297  ;;  %v1301_v18 = vadd.f32 %v1285_v10, %v1205_v61  ;;  %v3095_v10 = vadd.f32 %v3079_v29, %v2983_v25  ;;  %v2039_v25 = vmul.f32 %v10696_v9, %v9155_v62 }
 0x618   :  { %v1397_v44 = vadd.f32 %v1381_v35, %v1301_v18  ;;  %v13967_v35 = vld [vmem:[#allocation95_spill] sm:$0xff] }
 0x619   :  { %v10718_v22 = vpop.permute.xlu1 %2201  ;;  %v735_v26 = vmul.f32 %v9284_v12, %v13967_v35 }
 0x61a   :  { %v1493_v48 = vadd.f32 %v1477_v8, %v1397_v44  ;;  %v2135_v8 = vmul.f32 %v10652_v1, %v9145_v43  ;;  %v3367_v44 = vmul.f32 %v10681_v46, %v9230_v23  ;;  %v2231_v15 = vmul.f32 %v10718_v22, %v9171_v2 }
 0x61b   :  { %7332 = vset.pattern.permute.xlu1 %v13413_v38 }
 0x61c   :  { %3530 = vperm.xlu1 %7332, %v10488_v17   ;;  %v2151_v9 = vadd.f32 %v2135_v8, %v2039_v25  ;;  %v13971_v25 = vld [vmem:[#allocation136_spill] sm:$0xff] }
 0x61e   :  { %7333 = vset.pattern.permute.xlu2 %v13506_v11 }
 0x61f   :  { %2309 = vperm.xlu2 %7333, %v10642_v34   ;;  %v10724_v53 = vpop.permute.xlu2 %3146 }
 0x622   :  { %v10728_v51 = vpop.permute.xlu1 %2950 }
 0x623   :  { %v2984_v8 = vmul.f32 %v10728_v51, %v9155_v62 }
 0x624   :  { %7334 = vset.pattern.permute.xlu1 %v13612_v60 }
 0x625   :  { %2777 = vperm.xlu1 %7334, %v10448_v42   ;;  %v2230_v42 = vmul.f32 %v10511_v40, %v9171_v2 }
 0x627   :  { %7335 = vset.pattern.permute.xlu2 %v13461_v16  ;;  %v2246_v50 = vadd.f32 %v2230_v42, %v2150_v20  ;;  %v1573_v42 = vmul.f32 %v13963_v58, %v9272_v39  ;;  %v654_v20 = vadd.f32 %v638_v24, %v557_v54 }
 0x628   :  { %3158 = vperm.xlu2 %7335, %v10709_v55   ;;  %v2774_v45 = vpop.permute.xlu2 %2773 }
 0x629   :  { %v2342_v41 = vadd.f32 %v2326_v6, %v2246_v50  ;;  %v13966_v6 = vld [vmem:[#allocation76_spill] sm:$0xff]  ;;  %v13968_v50 = vld [vmem:[#allocation181_spill] sm:$0xff]  ;;  %v1589_v54 = vadd.f32 %v1573_v42, %v1493_v48  ;;  %v751_v29 = vadd.f32 %v735_v26, %v654_v20  ;;  %v2806_v30 = vmul.f32 %v10559_v57, %v2774_v45 }
 0x62a   :  { %v1765_v63 = vmul.f32 %v13966_v6, %v9258_v37  ;;  %v3175_v18 = vmul.f32 %v13968_v50, %v9171_v2  ;;  %v13969_v20 = vld [vmem:[#allocation108_spill] sm:$0xff]  ;;  %v3080_v45 = vmul.f32 %v10703_v21, %v9145_v43 }
 0x62b   :  { %v1829_v40 = vpop.permute.xlu1 %1828  ;;  %v2438_v61 = vadd.f32 %v2422_v28, %v2342_v41  ;;  %v2614_v28 = vmul.f32 %v10694_v31, %v9284_v12  ;;  %v1685_v19 = vadd.f32 %v1669_v52, %v1589_v54  ;;  %v10802_v31 = vld [vmem:[%s13284_s0 + $0x168] sm:$0xff]  ;;  %v848_v46 = vadd.f32 %v832_v3, %v751_v29 }
 0x62c   :  { %v3191_v24 = vadd.f32 %v3175_v18, %v3095_v10  ;;  %v1861_v42 = vmul.f32 %v10559_v57, %v1829_v40  ;;  %v3463_v22 = vmul.f32 %v13969_v20, %v9272_v39  ;;  %v2327_v52 = vmul.f32 %v10716_v32, %v9163_v13  ;;  %v13970_v40 = vld [vmem:[#allocation119_spill] sm:$0xff] }
 0x62d   :  { %7336 = vset.pattern.permute.xlu1 %v13506_v11  ;;  %v2534_v41 = vadd.f32 %v2518_v33, %v2438_v61  ;;  %v1781_v0 = vadd.f32 %v1765_v63, %v1685_v19  ;;  %v2247_v10 = vadd.f32 %v2231_v15, %v2151_v9  ;;  %v929_v3 = vmul.f32 %v10559_v57, %v13970_v40 }
 0x62e   :  { %3246 = vperm.xlu1 %7336, %v10671_v36   ;;  %v3287_v1 = vadd.f32 %v3271_v5, %v3191_v24  ;;  %v3176_v15 = vmul.f32 %v10724_v53, %v9171_v2  ;;  %v13972_v53 = vld [vmem:[#allocation163_spill] sm:$0xff] }
 0x62f   :  { %v2630_v33 = vadd.f32 %v2614_v28, %v2534_v41  ;;  %v1877_v35 = vadd.f32 %v1861_v42, %v1781_v0  ;;  %v945_v26 = vadd.f32 %v929_v3, %v848_v46  ;;  %v2343_v5 = vadd.f32 %v2327_v52, %v2247_v10  ;;  %v10827_v41 = vld [vmem:[%s13286_s2] ss:$0 sm:$0xff]  ;;  %v13973_v3 = vld [vmem:[#allocation137_spill] sm:$0xff] }
 0x630   :  { %7337 = vset.pattern.permute.xlu2 %v13418_v27  ;;  %v3383_v48 = vadd.f32 %v3367_v44, %v3287_v1  ;;  %v3559_v28 = vmul.f32 %v13971_v25, %v9284_v12 }
 0x631   :  { %3626 = vperm.xlu2 %7337, %v10488_v17   ;;  %v3623_v47 = vpop.permute.xlu2 %3622  ;;  %v964_v21 = vadd.f32 %v10827_v41, %v945_v26 }
 0x632   :  { %v3479_v50 = vadd.f32 %v3463_v22, %v3383_v48  ;;  %v3655_v29 = vmul.f32 %v3623_v47, %v9258_v37 }
 0x634   :  { %v2678_v14 = vpop.permute.xlu1 %2677  ;;  %v3575_v51 = vadd.f32 %v3559_v28, %v3479_v50 }
 0x635   :  { %v2710_v58 = vmul.f32 %v2678_v14, %v9258_v37  ;;  %v1893_v14 = vadd.f32 %v10827_v41, %v1877_v35  ;;  %v1094_v35 = vmul.f32 %v13973_v3, %v9155_v62 }
 0x636   :  { %7338 = vset.pattern.permute.xlu1 %v13809_v4  ;;  %v3671_v9 = vadd.f32 %v3655_v29, %v3575_v51  ;;  %v13977_v29 = vld [vmem:[#allocation212_spill] sm:$0xff] }
 0x637   :  { %2113 = vperm.xlu1 %7338, %v10802_v31   ;;  %v2726_v6 = vadd.f32 %v2710_v58, %v2630_v33  ;;  %v3096_v58 = vadd.f32 %v3080_v45, %v2984_v8  ;;  %v1909_v47 = vmax.f32 %v1893_v14, 0.0  ;;  %v980_v33 = vmax.f32 %v964_v21, 0.0  ;;  %v13976_v45 = vld [vmem:[#allocation273_spill] sm:$0xff] }
 0x638   :  { %v2040_v8 = vmul.f32 %v13976_v45, %v9155_v62 }
 0x639   :  { %7339 = vset.pattern.permute.xlu2 %v13776_v56  ;;  %v2822_v63 = vadd.f32 %v2806_v30, %v2726_v6  ;;  %v3192_v48 = vadd.f32 %v3176_v15, %v3096_v58  ;;  %v1925_v52 = vmax.f32 %v980_v33, %v1909_v47  ;;  %v1190_v30 = vmul.f32 %v13972_v53, %v9145_v43  ;;  %v13980_v53 = vld [vmem:[#allocation260_spill] sm:$0xff] }
 0x63a   :  { %2405 = vperm.xlu2 %7339, %v10642_v34   ;;  %v2490_v61 = vpop.permute.xlu2 %2489 }
 0x63b   :  { %v2519_v54 = vmul.f32 %v2490_v61, %v9272_v39  ;;  %v2838_v24 = vadd.f32 %v10827_v41, %v2822_v63  ;;  %v13974_v63 = vld [vmem:[#allocation165_spill] sm:$0xff] }
 0x63d   :  { %v2394_v18 = vpop.permute.xlu1 %2393  ;;  %v2854_v46 = vmax.f32 %v2838_v24, 0.0  ;;  %v13978_v24 = vld [vmem:[#allocation308_spill] sm:$0xff] }
 0x63e   :  { %v2423_v32 = vmul.f32 %v2394_v18, %v9230_v23  ;;  %v1206_v18 = vadd.f32 %v1190_v30, %v1094_v35  ;;  %v1574_v15 = vmul.f32 %v13978_v24, %v9272_v39  ;;  %v1766_v30 = vmul.f32 %v13980_v53, %v9258_v37 }
 0x63f   :  { %7340 = vset.pattern.permute.xlu1 %v13775_v49  ;;  %v2870_v61 = vmax.f32 %v1925_v52, %v2854_v46 }
 0x640   :  { %v2439_v19 = vadd.f32 %v2423_v32, %v2343_v5  ;;  %2493 = vperm.xlu1 %7340, %v10585_v59   ;;  %v13975_v5 = vld [vmem:[#allocation185_spill] sm:$0xff] }
 0x642   :  { %v10834_v44 = vadd.f32 %v2519_v54, %v2439_v19  ;;  %7341 = vset.pattern.permute.xlu2 %v13506_v11  ;;  %v1286_v54 = vmul.f32 %v13974_v63, %v9171_v2  ;;  %v1478_v19 = vmul.f32 %v13977_v29, %v9230_v23 }
 0x643   :  { %3254 = vperm.xlu2 %7341, %v10709_v55   ;;  %v3719_v1 = vpop.permute.xlu2 %3718 }
 0x644   :  { %v3751_v42 = vmul.f32 %v10559_v57, %v3719_v1  ;;  %v1302_v14 = vadd.f32 %v1286_v54, %v1206_v18  ;;  %v13982_v18 = vld [vmem:[#allocation277_spill] sm:$0xff] }
 0x645   :  { %v2042_v63 = vmul.f32 %v13982_v18, %v9155_v62 }
 0x646   :  { %v3767_v20 = vadd.f32 %v3751_v42, %v3671_v9  ;;  %v3243_v22 = vpop.permute.xlu1 %3242 }
 0x647   :  { %v3272_v0 = vmul.f32 %v3243_v22, %v9163_v13 }
 0x648   :  { %v3783_v10 = vadd.f32 %v10827_v41, %v3767_v20  ;;  %7343 = vset.pattern.permute.xlu1 %v13612_v60  ;;  %v13979_v20 = vld [vmem:[#allocation236_spill] sm:$0xff] }
 0x649   :  { %v3288_v6 = vadd.f32 %v3272_v0, %v3192_v48  ;;  %3722 = vperm.xlu1 %7343, %v10488_v17   ;;  %v1382_v17 = vmul.f32 %v13975_v5, %v9163_v13  ;;  %v1670_v22 = vmul.f32 %v13979_v20, %v9284_v12 }
 0x64a   :  { %v3799_v40 = vmax.f32 %v3783_v10, 0.0  ;;  %v10879_v10 = vld [vmem:[%s13284_s0 + $0x1e8] sm:$0xff] }
 0x64b   :  { %7344 = vset.pattern.permute.xlu2 %v13461_v16  ;;  %v1398_v51 = vadd.f32 %v1382_v17, %v1302_v14 }
 0x64c   :  { %v3815_v26 = vmax.f32 %v2870_v61, %v3799_v40  ;;  %2209 = vperm.xlu2 %7344, %v10802_v31   ;;  %v2206_v50 = vpop.permute.xlu2 %2205 }
 0x64d   :  { %v2232_v25 = vmul.f32 %v2206_v50, %v9171_v2  ;;  %v1494_v1 = vadd.f32 %v1478_v19, %v1398_v51 }
 0x64e   :  { %3874 = vst.msk [vmem:[#allocation2 + $0xd1] sm:$0xff] %vm3821_vm0, %v3815_v26 }
 0x64f   :  { %v2110_v32 = vpop.permute.xlu1 %2109  ;;  %v1590_v33 = vadd.f32 %v1574_v15, %v1494_v1  ;;  %v13983_v15 = vld [vmem:[#allocation184_spill] sm:$0xff] }
 0x650   :  { %v2136_v28 = vmul.f32 %v2110_v32, %v9145_v43  ;;  %v2234_v1 = vmul.f32 %v13983_v15, %v9171_v2 }
 0x651   :  { %7345 = vset.pattern.permute.xlu1 %v13775_v49  ;;  %v1686_v0 = vadd.f32 %v1670_v22, %v1590_v33 }
 0x652   :  { %v2152_v21 = vadd.f32 %v2136_v28, %v2040_v8  ;;  %2501 = vperm.xlu1 %7345, %v10642_v34  }
 0x653   :  { %v1782_v40 = vadd.f32 %v1766_v30, %v1686_v0 }
 0x654   :  { %7346 = vset.pattern.permute.xlu2 %v13413_v38  ;;  %v2248_v58 = vadd.f32 %v2232_v25, %v2152_v21  ;;  %v7515_v25 = vld [vmem:[%s13284_s0 + $0xf0] sm:$0xff] }
 0x655   :  { %2589 = vperm.xlu2 %7346, %v10585_v59   ;;  %v3055_v47 = vpop.permute.xlu2 %3054  ;;  %v3911_v9 = vld [vmem:[#allocation2 + $0xd1] sm:$0xff] }
 0x656   :  { %v4158_v42 = vld [vmem:[#allocation2 + $0xd2] sm:$0xff]  ;;  %6854 = vmatmul.msk.f32.gmra.mxu0 %vm3821_vm0, %v3911_v9  ;;  %v3081_v14 = vmul.f32 %v3055_v47, %v9145_v43 }
 0x657   :  { %6890 = vmatmul.msk.f32.gmra.mxu2 %vm3821_vm0, %v4158_v42 }
 0x658   :  { %v3339_v46 = vpop.permute.xlu1 %3338 }
 0x659   :  { %v3368_v48 = vmul.f32 %v3339_v46, %v9230_v23 }
 0x65a   :  { %7348 = vset.pattern.permute.xlu1 %v13809_v4 }
 0x65b   :  { %v10874_v52 = vadd.f32 %v3368_v48, %v3288_v6  ;;  %3058 = vperm.xlu1 %7348, %v10879_v10   ;;  %v13981_v6 = vld [vmem:[#allocation126_spill] sm:$0xff] }
 0x65c   :  { %v965_v35 = vadd.f32 %v10827_v41, %v13981_v6  ;;  %v13984_v6 = vld [vmem:[#allocation139_spill] sm:$0xff] }
 0x65d   :  { %7349 = vset.pattern.permute.xlu2 %v13776_v56 }
 0x65e   :  { %3350 = vperm.xlu2 %7349, %v10709_v55   ;;  %v1833_v61 = vpop.permute.xlu2 %1832  ;;  %v981_v32 = vmax.f32 %v965_v35, 0.0  ;;  %v2615_v35 = vmul.f32 %v13984_v6, %v9284_v12 }
 0x65f   :  { %v1862_v3 = vmul.f32 %v10559_v57, %v1833_v61 }
 0x661   :  { %v1878_v26 = vadd.f32 %v1862_v3, %v1782_v40  ;;  %v2118_v50 = vpop.permute.xlu1 %2117 }
 0x662   :  { %v2138_v54 = vmul.f32 %v2118_v50, %v9145_v43 }
 0x663   :  { %v1894_v5 = vadd.f32 %v10827_v41, %v1878_v26  ;;  %7350 = vset.pattern.permute.xlu1 %v13775_v49 }
 0x664   :  { %v2154_v17 = vadd.f32 %v2138_v54, %v2042_v63  ;;  %3438 = vperm.xlu1 %7350, %v10671_v36  }
 0x665   :  { %v1910_v45 = vmax.f32 %v1894_v5, 0.0 }
 0x666   :  { %7351 = vset.pattern.permute.xlu2 %v13418_v27  ;;  %v2250_v9 = vadd.f32 %v2234_v1, %v2154_v17 }
 0x667   :  { %v10896_v8 = vmax.f32 %v981_v32, %v1910_v45  ;;  %1748 = vperm.xlu2 %7351, %v7515_v25   ;;  %v2682_v28 = vpop.permute.xlu2 %2681 }
 0x668   :  { %v2711_v26 = vmul.f32 %v2682_v28, %v9258_v37 }
 0x66a   :  { %v2956_v29 = vpop.permute.xlu1 %2955 }
 0x66b   :  { %v2985_v19 = vmul.f32 %v2956_v29, %v9155_v62 }
 0x66c   :  { %7352 = vset.pattern.permute.xlu1 %v13506_v11 }
 0x66d   :  { %v3097_v21 = vadd.f32 %v3081_v14, %v2985_v19  ;;  %2305 = vperm.xlu1 %7352, %v10802_v31   ;;  %v13985_v14 = vld [vmem:[#allocation186_spill] sm:$0xff] }
 0x66e   :  { %v3177_v29 = vmul.f32 %v13985_v14, %v9171_v2 }
 0x66f   :  { %7353 = vset.pattern.permute.xlu2 %v13413_v38 }
 0x670   :  { %2597 = vperm.xlu2 %7353, %v10642_v34   ;;  %v3063_v51 = vpop.permute.xlu2 %3062  ;;  %v3193_v1 = vadd.f32 %v3177_v29, %v3097_v21 }
 0x671   :  { %v3083_v48 = vmul.f32 %v3063_v51, %v9145_v43 }
 0x673   :  { %v10907_v24 = vpop.permute.xlu1 %3434 }
 0x675   :  { %7354 = vset.pattern.permute.xlu1 %v13418_v27 }
 0x676   :  { %2685 = vperm.xlu1 %7354, %v10585_v59  }
 0x678   :  { %7355 = vset.pattern.permute.xlu2 %v13461_v16 }
 0x679   :  { %3154 = vperm.xlu2 %7355, %v10879_v10   ;;  %v2310_v47 = vpop.permute.xlu2 %2309 }
 0x67a   :  { %v2330_v42 = vmul.f32 %v2310_v47, %v9163_v13 }
 0x67c   :  { %v2346_v33 = vadd.f32 %v2330_v42, %v2250_v9  ;;  %v2302_v46 = vpop.permute.xlu1 %2301  ;;  %v10961_v9 = vld [vmem:[%s13284_s0 + $0x138] sm:$0xff] }
 0x67d   :  { %v2328_v20 = vmul.f32 %v2302_v46, %v9163_v13  ;;  %2089 = vperm.xlu0 %7373, %v10961_v9   ;;  %v13986_v42 = vld [vmem:[#allocation279_spill] sm:$0xff] }
 0x67e   :  { %7357 = vset.pattern.permute.xlu1 %v13413_v38 }
 0x67f   :  { %v10918_v22 = vadd.f32 %v2328_v20, %v2248_v58  ;;  %3534 = vperm.xlu1 %7357, %v10671_v36  }
 0x681   :  { %7358 = vset.pattern.permute.xlu2 %v13612_v60 }
 0x682   :  { %1844 = vperm.xlu2 %7358, %v7515_v25   ;;  %v3159_v59 = vpop.permute.xlu2 %3158 }
 0x683   :  { %v3179_v53 = vmul.f32 %v3159_v59, %v9171_v2 }
 0x685   :  { %v2966_v0 = vpop.permute.xlu1 %2965  ;;  %7377 = vset.pattern.permute.xlu0 %v13461_v16 }
 0x686   :  { %v2987_v30 = vmul.f32 %v2966_v0, %v9155_v62  ;;  %v10979_v0 = vld [vmem:[%s13284_s0 + $0x1b8] sm:$0xff] }
 0x687   :  { %7359 = vset.pattern.permute.xlu1 %v13776_v56  ;;  %3130 = vperm.xlu0 %7377, %v10979_v0  }
 0x688   :  { %v3099_v61 = vadd.f32 %v3083_v48, %v2987_v30  ;;  %2401 = vperm.xlu1 %7359, %v10802_v31  }
 0x68a   :  { %7360 = vset.pattern.permute.xlu2 %v13418_v27  ;;  %v3195_v58 = vadd.f32 %v3179_v53, %v3099_v61  ;;  %v13987_v53 = vld [vmem:[#allocation232_spill] sm:$0xff]  ;;  %v3464_v61 = vmul.f32 %v10907_v24, %v9272_v39 }
 0x68b   :  { %2693 = vperm.xlu2 %7360, %v10642_v34   ;;  %v10929_v40 = vpop.permute.xlu2 %3626  ;;  %v2631_v34 = vadd.f32 %v2615_v35, %v10834_v44  ;;  %v2424_v30 = vmul.f32 %v13987_v53, %v9230_v23  ;;  %v13992_v53 = vld [vmem:[#allocation283_spill] sm:$0xff] }
 0x68d   :  { %v2727_v5 = vadd.f32 %v2711_v26, %v2631_v34  ;;  %v2440_v35 = vadd.f32 %v2424_v30, %v10918_v22  ;;  %v7516_v34 = vld [vmem:[%s13284_s0 + $0xe8] sm:$0xff]  ;;  %v3656_v22 = vmul.f32 %v10929_v40, %v9258_v37  ;;  %v2986_v30 = vmul.f32 %v13992_v53, %v9155_v62 }
 0x68e   :  { %v3531_v3 = vpop.permute.xlu1 %3530 }
 0x68f   :  { %7381 = vset.pattern.permute.xlu0 %v13413_v38 }
 0x690   :  { %7361 = vset.pattern.permute.xlu1 %v13506_v11  ;;  %2569 = vperm.xlu0 %7381, %v10961_v9  }
 0x691   :  { %3250 = vperm.xlu1 %7361, %v10879_v10  }
 0x693   :  { %7362 = vset.pattern.permute.xlu2 %v13413_v38 }
 0x694   :  { %3542 = vperm.xlu2 %7362, %v10709_v55   ;;  %v2406_v50 = vpop.permute.xlu2 %2405 }
 0x695   :  { %v2426_v18 = vmul.f32 %v2406_v50, %v9230_v23  ;;  %v3560_v50 = vmul.f32 %v3531_v3, %v9284_v12 }
 0x697   :  { %v10940_v63 = vadd.f32 %v2426_v18, %v2346_v33  ;;  %v2778_v54 = vpop.permute.xlu1 %2777  ;;  %v2041_v33 = vmul.f32 %v13986_v42, %v9155_v62  ;;  %v13990_v42 = vld [vmem:[#allocation140_spill] sm:$0xff] }
 0x698   :  { %v2807_v17 = vmul.f32 %v10559_v57, %v2778_v54  ;;  %v3480_v54 = vadd.f32 %v3464_v61, %v10874_v52  ;;  %7385 = vset.pattern.permute.xlu0 %v13612_v60 }
 0x699   :  { %7363 = vset.pattern.permute.xlu1 %v13418_v27  ;;  %2761 = vperm.xlu0 %7385, %v10961_v9  }
 0x69a   :  { %v2823_v32 = vadd.f32 %v2807_v17, %v2727_v5  ;;  %3630 = vperm.xlu1 %7363, %v10671_v36   ;;  %v3576_v5 = vadd.f32 %v3560_v50, %v3480_v54  ;;  %v13994_v50 = vld [vmem:[#allocation215_spill] sm:$0xff]  ;;  %v13995_v54 = vld [vmem:[#allocation314_spill] sm:$0xff] }
 0x69c   :  { %v2839_v45 = vadd.f32 %v10827_v41, %v2823_v32  ;;  %7364 = vset.pattern.permute.xlu2 %v13775_v49  ;;  %v13988_v32 = vld [vmem:[#allocation110_spill] sm:$0xff] }
 0x69d   :  { %2497 = vperm.xlu2 %7364, %v10802_v31   ;;  %v3255_v25 = vpop.permute.xlu2 %3254  ;;  %v3467_v52 = vmul.f32 %v13988_v32, %v9272_v39  ;;  %v11040_v32 = vpop.permute.xlu0 %1836 }
 0x69e   :  { %v2855_v28 = vmax.f32 %v2839_v45, 0.0  ;;  %v3275_v44 = vmul.f32 %v3255_v25, %v9163_v13 }
 0x6a0   :  { %v2871_v19 = vmax.f32 %v10896_v8, %v2855_v28  ;;  %v3291_v51 = vadd.f32 %v3275_v44, %v3195_v58  ;;  %v3247_v15 = vpop.permute.xlu1 %3246  ;;  %v3672_v28 = vadd.f32 %v3656_v22, %v3576_v5  ;;  %v1577_v22 = vmul.f32 %v13995_v54, %v9272_v39 }
 0x6a1   :  { %v3273_v36 = vmul.f32 %v3247_v15, %v9163_v13  ;;  %7389 = vset.pattern.permute.xlu0 %v13461_v16 }
 0x6a2   :  { %7365 = vset.pattern.permute.xlu1 %v13776_v56 }
 0x6a3   :  { %v10954_v47 = vadd.f32 %v3273_v36, %v3193_v1  ;;  %3346 = vperm.xlu1 %7365, %v10879_v10  }
 0x6a5   :  { %7366 = vset.pattern.permute.xlu2 %v13418_v27 }
 0x6a6   :  { %3638 = vperm.xlu2 %7366, %v10709_v55   ;;  %v2210_v8 = vpop.permute.xlu2 %2209 }
 0x6a7   :  { %v2233_v46 = vmul.f32 %v2210_v8, %v9171_v2 }
 0x6a9   :  { %v2114_v21 = vpop.permute.xlu1 %2113 }
 0x6aa   :  { %v2137_v20 = vmul.f32 %v2114_v21, %v9145_v43 }
 0x6ab   :  { %7367 = vset.pattern.permute.xlu1 %v13413_v38 }
 0x6ac   :  { %v2153_v59 = vadd.f32 %v2137_v20, %v2041_v33  ;;  %2593 = vperm.xlu1 %7367, %v10802_v31   ;;  %v1097_v33 = vmul.f32 %v13990_v42, %v9155_v62  ;;  %v13997_v42 = vld [vmem:[#allocation152_spill] sm:$0xff] }
 0x6ae   :  { %7368 = vset.pattern.permute.xlu2 %v13775_v49  ;;  %v10973_v55 = vadd.f32 %v2233_v46, %v2153_v59 }
 0x6af   :  { %3442 = vperm.xlu2 %7368, %v10879_v10   ;;  %v2590_v48 = vpop.permute.xlu2 %2589 }
 0x6b0   :  { %v2616_v6 = vmul.f32 %v2590_v48, %v9284_v12 }
 0x6b2   :  { %v2494_v58 = vpop.permute.xlu1 %2493 }
 0x6b3   :  { %v2520_v26 = vmul.f32 %v2494_v58, %v9272_v39  ;;  %v13993_v58 = vld [vmem:[#allocation188_spill] sm:$0xff] }
 0x6b4   :  { %7369 = vset.pattern.permute.xlu1 %v13612_v60 }
 0x6b5   :  { %v2536_v18 = vadd.f32 %v2520_v26, %v2440_v35  ;;  %1840 = vperm.xlu1 %7369, %v7516_v34  }
 0x6b7   :  { %7370 = vset.pattern.permute.xlu2 %v13418_v27  ;;  %v10996_v24 = vadd.f32 %v2616_v6, %v2536_v18  ;;  %v1385_v6 = vmul.f32 %v13993_v58, %v9163_v13  ;;  %v1481_v18 = vmul.f32 %v13994_v50, %v9230_v23 }
 0x6b8   :  { %2689 = vperm.xlu2 %7370, %v10802_v31   ;;  %v3351_v3 = vpop.permute.xlu2 %3350 }
 0x6b9   :  { %v3371_v17 = vmul.f32 %v3351_v3, %v9230_v23 }
 0x6bb   :  { %v3387_v45 = vadd.f32 %v3371_v17, %v3291_v51  ;;  %v3723_v25 = vpop.permute.xlu1 %3722 }
 0x6bc   :  { %v3752_v44 = vmul.f32 %v10559_v57, %v3723_v25 }
 0x6bd   :  { %2785 = vperm.xlu1 %7369, %v10802_v31   ;;  %v11008_v40 = vadd.f32 %v3467_v52, %v3387_v45  ;;  %v13989_v31 = vld [vmem:[#allocation166_spill] sm:$0xff] }
 0x6be   :  { %v3768_v14 = vadd.f32 %v3752_v44, %v3672_v28  ;;  %v1193_v8 = vmul.f32 %v13989_v31, %v9145_v43  ;;  %v13996_v28 = vld [vmem:[#allocation238_spill] sm:$0xff] }
 0x6bf   :  { %v1673_v44 = vmul.f32 %v13996_v28, %v9284_v12  ;;  %v11093_v28 = vld [vmem:[%s13284_s0 + $0x178] sm:$0xff] }
 0x6c0   :  { %v3784_v29 = vadd.f32 %v10827_v41, %v3768_v14  ;;  %3634 = vperm.xlu2 %7370, %v10879_v10   ;;  %v1209_v46 = vadd.f32 %v1193_v8, %v1097_v33  ;;  %v968_v33 = vadd.f32 %v10827_v41, %v13997_v42  ;;  %2217 = vperm.xlu0 %7389, %v11093_v28   ;;  %v14003_v42 = vld [vmem:[#allocation179_spill] sm:$0xff] }
 0x6c1   :  { %v1749_v15 = vpop.permute.xlu2 %1748 }
 0x6c2   :  { %v3800_v1 = vmax.f32 %v3784_v29, 0.0  ;;  %v1769_v14 = vmul.f32 %v1749_v15, %v9258_v37 }
 0x6c4   :  { %v3816_v51 = vmax.f32 %v2871_v19, %v3800_v1  ;;  %v2502_v36 = vpop.permute.xlu1 %2501  ;;  %v13991_v19 = vld [vmem:[#allocation168_spill] sm:$0xff] }
 0x6c5   :  { %3730 = vperm.xlu1 %7369, %v10879_v10   ;;  %v1289_v20 = vmul.f32 %v13991_v19, %v9171_v2  ;;  %v2522_v15 = vmul.f32 %v2502_v36, %v9272_v39 }
 0x6c6   :  { %3875 = vst.msk [vmem:[#allocation2 + $0xe1] sm:$0xff] %vm3821_vm0, %v3816_v51  ;;  %v11053_v51 = vpop.permute.xlu0 %2781 }
 0x6c7   :  { %v1305_v26 = vadd.f32 %v1289_v20, %v1209_v46 }
 0x6c8   :  { %7372 = vset.pattern.permute.xlu2 %v13452_v7  ;;  %7392 = vset.pattern.permute.xlu0 %v13776_v56 }
 0x6c9   :  { %1985 = vperm.xlu2 %7372, %v10961_v9   ;;  %v1401_v34 = vadd.f32 %v1385_v6, %v1305_v26  ;;  %v13998_v26 = vld [vmem:[#allocation249_spill] sm:$0xff]  ;;  %2409 = vperm.xlu0 %7392, %v11093_v28  }
 0x6ca   :  { %v2598_v21 = vpop.permute.xlu2 %2597  ;;  %v155_v50 = vmul.f32 %v9155_v62, %v13998_v26 }
 0x6cb   :  { %v1497_v17 = vadd.f32 %v1481_v18, %v1401_v34  ;;  %v13999_v34 = vld [vmem:[#allocation262_spill] sm:$0xff] }
 0x6cc   :  { %v1095_v54 = vmul.f32 %v13999_v34, %v9155_v62 }
 0x6cd   :  { %7374 = vset.pattern.permute.xlu1 %v13461_v16  ;;  %v3059_v10 = vpop.permute.xlu1 %3058  ;;  %v3912_v59 = vld [vmem:[#allocation2 + $0xe1] sm:$0xff]  ;;  %v1593_v25 = vadd.f32 %v1577_v22, %v1497_v17  ;;  %v14000_v22 = vld [vmem:[#allocation17_spill] sm:$0xff]  ;;  %v14001_v17 = vld [vmem:[#allocation154_spill] sm:$0xff] }
 0x6ce   :  { %v4159_v48 = vld [vmem:[#allocation2 + $0xe2] sm:$0xff]  ;;  %v3082_v61 = vmul.f32 %v3059_v10, %v9145_v43  ;;  %2185 = vperm.xlu1 %7374, %v10961_v9   ;;  %6855 = vmatmul.msk.f32.gmra.mxu0 %vm3821_vm0, %v3912_v59  ;;  %v2618_v59 = vmul.f32 %v2598_v21, %v9284_v12 }
 0x6cf   :  { %6891 = vmatmul.msk.f32.gmra.mxu2 %vm3821_vm0, %v4159_v48  ;;  %v1689_v29 = vadd.f32 %v1673_v44, %v1593_v25  ;;  %v1191_v25 = vmul.f32 %v14001_v17, %v9145_v43  ;;  %v14008_v17 = vld [vmem:[#allocation80_spill] sm:$0xff] }
 0x6d0   :  { %v3098_v35 = vadd.f32 %v3082_v61, %v2986_v30  ;;  %v2538_v30 = vadd.f32 %v2522_v15, %v10940_v63 }
 0x6d1   :  { %2930 = vperm.xlu2 %7372, %v10979_v0   ;;  %v1785_v31 = vadd.f32 %v1769_v14, %v1689_v29  ;;  %v1207_v29 = vadd.f32 %v1191_v25, %v1095_v54  ;;  %v3898_v54 = vld [vmem:[%s13287_s3 + $0x10] sm:$0xff]  ;;  %v640_v25 = vmul.f32 %v9272_v39, %v14008_v17  ;;  %7396 = vset.pattern.permute.xlu0 %v13413_v38 }
 0x6d2   :  { %v2634_v36 = vadd.f32 %v2618_v59, %v2538_v30  ;;  %v14004_v59 = vld [vmem:[#allocation10_spill] sm:$0xff]  ;;  %2601 = vperm.xlu0 %7396, %v11093_v28  }
 0x6d3   :  { %v3155_v5 = vpop.permute.xlu2 %3154 }
 0x6d4   :  { %v3178_v3 = vmul.f32 %v3155_v5, %v9171_v2  ;;  %v252_v5 = vmul.f32 %v9145_v43, %v14000_v22 }
 0x6d6   :  { %v11042_v52 = vadd.f32 %v3178_v3, %v3098_v35  ;;  %7375 = vset.pattern.permute.xlu1 %v13809_v4  ;;  %v11045_v45 = vpop.permute.xlu1 %3438  ;;  %v2790_v35 = vpop.permute.xlu0 %2789  ;;  %v268_v44 = vadd.f32 %v252_v5, %v155_v50 }
 0x6d7   :  { %3034 = vperm.xlu1 %7375, %v10979_v0  }
 0x6d9   :  { %7376 = vset.pattern.permute.xlu2 %v13506_v11 }
 0x6da   :  { %2281 = vperm.xlu2 %7376, %v10961_v9   ;;  %7401 = vset.pattern.permute.xlu0 %v13612_v60 }
 0x6db   :  { %2793 = vperm.xlu0 %7401, %v11093_v28  }
 0x6dc   :  { %v1845_v1 = vpop.permute.xlu2 %1844 }
 0x6dd   :  { %v1865_v8 = vmul.f32 %v10559_v57, %v1845_v1  ;;  %v984_v57 = vmax.f32 %v968_v33, 0.0  ;;  %v14002_v1 = vld [vmem:[#allocation35_spill] sm:$0xff]  ;;  %v1287_v33 = vmul.f32 %v14003_v42, %v9171_v2 }
 0x6de   :  { %v11121_v50 = vpop.permute.xlu0 %3726 }
 0x6df   :  { %v1881_v46 = vadd.f32 %v1865_v8, %v1785_v31  ;;  %7378 = vset.pattern.permute.xlu1 %v13776_v56  ;;  %v2306_v19 = vpop.permute.xlu1 %2305  ;;  %v349_v31 = vmul.f32 %v9171_v2, %v14002_v1  ;;  %v3896_v1 = vld [vmem:[%s13287_s3] sm:$0xff] }
 0x6e0   :  { %v2329_v20 = vmul.f32 %v2306_v19, %v9163_v13  ;;  %2377 = vperm.xlu1 %7378, %v10961_v9  }
 0x6e1   :  { %v1897_v10 = vadd.f32 %v10827_v41, %v1881_v46  ;;  %v365_v19 = vadd.f32 %v349_v31, %v268_v44  ;;  %v14010_v31 = vld [vmem:[#allocation106_spill] sm:$0xff] }
 0x6e2   :  { %v11065_v48 = vadd.f32 %v2329_v20, %v10973_v55  ;;  %3226 = vperm.xlu2 %7376, %v10979_v0   ;;  %v11075_v55 = vld [vmem:[%s13285_s1 + $0x8] ss:$0 sm:$0xff]  ;;  %v1303_v20 = vadd.f32 %v1287_v33, %v1207_v29  ;;  %v14011_v33 = vld [vmem:[#allocation121_spill] sm:$0xff] }
 0x6e3   :  { %v1913_v53 = vmax.f32 %v1897_v10, 0.0  ;;  %v2810_v21 = vmul.f32 %v11075_v55, %v2790_v35  ;;  %v14006_v35 = vld [vmem:[#allocation53_spill] sm:$0xff] }
 0x6e4   :  { %v543_v26 = vmul.f32 %v9230_v23, %v14006_v35 }
 0x6e5   :  { %v1929_v61 = vmax.f32 %v984_v57, %v1913_v53  ;;  %v2694_v58 = vpop.permute.xlu2 %2693  ;;  %v446_v57 = vmul.f32 %v9163_v13, %v14004_v59  ;;  %v14005_v53 = vld [vmem:[#allocation21_spill] sm:$0xff]  ;;  %v6918_v59 = vld [vmem:[%s13287_s3 + $0x98] sm:$0xff] }
 0x6e6   :  { %v2714_v6 = vmul.f32 %v2694_v58, %v9258_v37  ;;  %v1383_v30 = vmul.f32 %v14005_v53, %v9163_v13  ;;  %4528 = vmatpush.msrb.mxu0 %v6918_v59  ;;  %v3735_v53 = vpop.permute.xlu0 %3734 }
 0x6e7   :  { %v462_v58 = vadd.f32 %v446_v57, %v365_v19 }
 0x6e8   :  { %v2730_v18 = vadd.f32 %v2714_v6, %v2634_v36  ;;  %7379 = vset.pattern.permute.xlu1 %v13775_v49  ;;  %v11079_v63 = vpop.permute.xlu1 %2685  ;;  %v7518_v36 = vld [vmem:[%s13284_s0 + $0xb8] sm:$0xff] }
 0x6e9   :  { %2473 = vperm.xlu1 %7379, %v10961_v9   ;;  %v3899_v6 = vld [vmem:[%s13287_s3 + $0x18] sm:$0xff]  ;;  %v559_v22 = vadd.f32 %v543_v26, %v462_v58 }
 0x6ea   :  { %v2826_v3 = vadd.f32 %v2810_v21, %v2730_v18  ;;  %7380 = vset.pattern.permute.xlu2 %v13776_v56  ;;  %4094 = vmatpush.msrb.mxu1 %v3899_v6  ;;  %v14007_v21 = vld [vmem:[#allocation203_spill] sm:$0xff]  ;;  %v14012_v6 = vld [vmem:[#allocation104_spill] sm:$0xff]  ;;  %v14013_v26 = vld [vmem:[#allocation254_spill] sm:$0xff] }
 0x6eb   :  { %3322 = vperm.xlu2 %7380, %v10979_v0   ;;  %v1479_v18 = vmul.f32 %v14007_v21, %v9230_v23  ;;  %v656_v42 = vadd.f32 %v640_v25, %v559_v22  ;;  %v834_v35 = vmul.f32 %v9258_v37, %v14012_v6  ;;  %v1767_v21 = vmul.f32 %v14013_v26, %v9258_v37  ;;  %v14014_v25 = vld [vmem:[#allocation131_spill] sm:$0xff] }
 0x6ec   :  { %v2842_v14 = vadd.f32 %v10827_v41, %v2826_v3  ;;  %4095 = vmatpush.msrb.mxu1 %v3898_v54  ;;  %v3897_v3 = vld [vmem:[%s13287_s3 + $0x8] sm:$0xff]  ;;  %v3755_v54 = vmul.f32 %v11075_v55, %v3735_v53 }
 0x6ee   :  { %v2858_v8 = vmax.f32 %v2842_v14, 0.0  ;;  %v3543_v46 = vpop.permute.xlu2 %3542  ;;  %4096 = vmatpush.msrb.mxu1 %v3897_v3  ;;  %v14009_v14 = vld [vmem:[#allocation230_spill] sm:$0xff] }
 0x6ef   :  { %v1575_v29 = vmul.f32 %v14009_v14, %v9272_v39  ;;  %v931_v14 = vmul.f32 %v11075_v55, %v14014_v25 }
 0x6f0   :  { %v11101_v15 = vmax.f32 %v1929_v61, %v2858_v8  ;;  %v1399_v61 = vadd.f32 %v1383_v30, %v1303_v20  ;;  %v737_v8 = vmul.f32 %v9284_v12, %v14010_v31  ;;  %4097 = vmatpush.msrb.mxu1 %v3896_v1  ;;  %v3563_v20 = vmul.f32 %v3543_v46, %v9284_v12 }
 0x6f1   :  { %3418 = vperm.xlu1 %7379, %v10979_v0   ;;  %v11104_v10 = vpop.permute.xlu1 %3534  ;;  %v2808_v31 = vmul.f32 %v11075_v55, %v11053_v51 }
 0x6f2   :  { %v1495_v5 = vadd.f32 %v1479_v18, %v1399_v61  ;;  %v753_v57 = vadd.f32 %v737_v8, %v656_v42  ;;  %v3579_v46 = vadd.f32 %v3563_v20, %v11008_v40  ;;  %v1863_v18 = vmul.f32 %v11075_v55, %v11040_v32 }
 0x6f3   :  { %7382 = vset.pattern.permute.xlu2 %v13612_v60 }
 0x6f4   :  { %1816 = vperm.xlu2 %7382, %v7518_v36   ;;  %v1591_v19 = vadd.f32 %v1575_v29, %v1495_v5  ;;  %v2712_v36 = vmul.f32 %v11079_v63, %v9258_v37  ;;  %v850_v63 = vadd.f32 %v834_v35, %v753_v57  ;;  %v14015_v29 = vld [vmem:[#allocation235_spill] sm:$0xff] }
 0x6f5   :  { %v3369_v1 = vmul.f32 %v14015_v29, %v9230_v23  ;;  %v14018_v29 = vld [vmem:[#allocation28_spill] sm:$0xff] }
 0x6f6   :  { %v2728_v3 = vadd.f32 %v2712_v36, %v10996_v24  ;;  %v3465_v24 = vmul.f32 %v11045_v45, %v9272_v39  ;;  %v947_v42 = vadd.f32 %v931_v14, %v850_v63  ;;  %v3880_v14 = vld [vmem:[#allocation2] sm:$0xff] }
 0x6f7   :  { %v11125_v34 = vpop.permute.xlu2 %2497 }
 0x6f8   :  { %v966_v53 = vadd.f32 %v10827_v41, %v947_v42  ;;  %v14021_v42 = vld [vmem:[#allocation149_spill] sm:$0xff] }
 0x6f9   :  { %7383 = vset.pattern.permute.xlu1 %v13418_v27 }
 0x6fa   :  { %2665 = vperm.xlu1 %7383, %v10961_v9   ;;  %v11137_v44 = vpop.permute.xlu1 %2401  ;;  %v1671_v9 = vmul.f32 %v14011_v33, %v9284_v12  ;;  %v3385_v33 = vadd.f32 %v3369_v1, %v10954_v47  ;;  %v350_v1 = vmul.f32 %v9171_v2, %v14018_v29 }
 0x6fc   :  { %7384 = vset.pattern.permute.xlu2 %v13413_v38  ;;  %v1687_v58 = vadd.f32 %v1671_v9, %v1591_v19  ;;  %v2824_v9 = vadd.f32 %v2808_v31, %v2728_v3  ;;  %v3481_v59 = vadd.f32 %v3465_v24, %v3385_v33  ;;  %v14020_v24 = vld [vmem:[#allocation46_spill] sm:$0xff]  ;;  %v1096_v33 = vmul.f32 %v14021_v42, %v9155_v62 }
 0x6fd   :  { %3514 = vperm.xlu2 %7384, %v10979_v0  }
 0x6fe   :  { %v1783_v40 = vadd.f32 %v1767_v21, %v1687_v58  ;;  %v2840_v47 = vadd.f32 %v10827_v41, %v2824_v9  ;;  %v3753_v58 = vmul.f32 %v11075_v55, %v11121_v50  ;;  %v14016_v50 = vld [vmem:[#allocation38_spill] sm:$0xff] }
 0x700   :  { %v3639_v30 = vpop.permute.xlu2 %3638  ;;  %v1879_v32 = vadd.f32 %v1863_v18, %v1783_v40  ;;  %v253_v18 = vmul.f32 %v9145_v43, %v14016_v50  ;;  %v14017_v40 = vld [vmem:[#allocation12_spill] sm:$0xff] }
 0x701   :  { %v3659_v61 = vmul.f32 %v3639_v30, %v9258_v37  ;;  %v156_v3 = vmul.f32 %v9155_v62, %v14017_v40 }
 0x702   :  { %3610 = vperm.xlu1 %7383, %v10979_v0   ;;  %v1895_v51 = vadd.f32 %v10827_v41, %v1879_v32  ;;  %v14019_v32 = vld [vmem:[#allocation47_spill] sm:$0xff] }
 0x703   :  { %v3675_v22 = vadd.f32 %v3659_v61, %v3579_v46  ;;  %v11168_v5 = vpop.permute.xlu1 %3250  ;;  %v982_v46 = vmax.f32 %v966_v53, 0.0  ;;  %v2856_v61 = vmax.f32 %v2840_v47, 0.0  ;;  %v269_v25 = vadd.f32 %v253_v18, %v156_v3  ;;  %v14027_v18 = vld [vmem:[#allocation221_spill] sm:$0xff] }
 0x704   :  { %v447_v31 = vmul.f32 %v9163_v13, %v14019_v32  ;;  %v3274_v29 = vmul.f32 %v11168_v5, %v9163_v13 }
 0x705   :  { %v3771_v17 = vadd.f32 %v3755_v54, %v3675_v22  ;;  %7386 = vset.pattern.permute.xlu2 %v13612_v60  ;;  %v366_v9 = vadd.f32 %v350_v1, %v269_v25  ;;  %v2521_v25 = vmul.f32 %v11125_v34, %v9272_v39 }
 0x706   :  { %3706 = vperm.xlu2 %7386, %v10979_v0   ;;  %v3561_v0 = vmul.f32 %v11104_v10, %v9284_v12 }
 0x707   :  { %v3787_v8 = vadd.f32 %v10827_v41, %v3771_v17  ;;  %v463_v53 = vadd.f32 %v447_v31, %v366_v9  ;;  %v14029_v31 = vld [vmem:[#allocation98_spill] sm:$0xff]  ;;  %v14030_v9 = vld [vmem:[#allocation67_spill] sm:$0xff] }
 0x708   :  { %v3577_v30 = vadd.f32 %v3561_v0, %v3481_v59  ;;  %v14022_v0 = vld [vmem:[#allocation171_spill] sm:$0xff]  ;;  %v835_v34 = vmul.f32 %v9258_v37, %v14030_v9 }
 0x709   :  { %v3803_v19 = vmax.f32 %v3787_v8, 0.0  ;;  %v11188_v20 = vpop.permute.xlu2 %3442  ;;  %v1192_v8 = vmul.f32 %v14020_v24, %v9145_v43  ;;  %v738_v24 = vmul.f32 %v9284_v12, %v14029_v31 }
 0x70a   :  { %7387 = vset.pattern.permute.xlu1 %v13452_v7  ;;  %v1911_v7 = vmax.f32 %v1895_v51, 0.0  ;;  %v14023_v51 = vld [vmem:[#allocation198_spill] sm:$0xff] }
 0x70b   :  { %v3819_v45 = vmax.f32 %v11101_v15, %v3803_v19  ;;  %2025 = vperm.xlu1 %7387, %v11093_v28   ;;  %v11204_v15 = vld [vmem:[%s13284_s0 + $0x1f8] sm:$0xff]  ;;  %v1288_v19 = vmul.f32 %v14022_v0, %v9171_v2  ;;  %v544_v59 = vmul.f32 %v9230_v23, %v14023_v51  ;;  %v1208_v47 = vadd.f32 %v1192_v8, %v1096_v33 }
 0x70c   :  { %v3631_v57 = vpop.permute.xlu1 %3630  ;;  %v1927_v35 = vmax.f32 %v982_v46, %v1911_v7  ;;  %v14025_v46 = vld [vmem:[#allocation208_spill] sm:$0xff]  ;;  %v3290_v51 = vadd.f32 %v3274_v29, %v11042_v52  ;;  %v6957_v29 = vld [vmem:[%s13287_s3 + $0xd0] sm:$0xff] }
 0x70d   :  { %3878 = vst.msk [vmem:[#allocation2 + $0x111] sm:$0xff] %vm3821_vm0, %v3819_v45  ;;  %v3657_v10 = vmul.f32 %v3631_v57, %v9258_v37 }
 0x70e   :  { %7388 = vset.pattern.permute.xlu2 %v13809_v4  ;;  %v2872_v54 = vmax.f32 %v1927_v35, %v2856_v61  ;;  %v1480_v61 = vmul.f32 %v14025_v46, %v9230_v23  ;;  %v14026_v35 = vld [vmem:[#allocation71_spill] sm:$0xff] }
 0x70f   :  { %v3673_v36 = vadd.f32 %v3657_v10, %v3577_v30  ;;  %2121 = vperm.xlu2 %7388, %v11093_v28   ;;  %v14024_v30 = vld [vmem:[#allocation197_spill] sm:$0xff] }
 0x710   :  { %v1384_v10 = vmul.f32 %v14024_v30, %v9163_v13 }
 0x711   :  { %v3769_v6 = vadd.f32 %v3753_v58, %v3673_v36  ;;  %v1304_v58 = vadd.f32 %v1288_v19, %v1208_v47  ;;  %v560_v36 = vadd.f32 %v544_v59, %v463_v53  ;;  %v3539_v47 = vpop.permute.xlu0 %3538 }
 0x712   :  { %v11208_v4 = vpop.permute.xlu2 %2689 }
 0x713   :  { %v3785_v26 = vadd.f32 %v10827_v41, %v3769_v6  ;;  %2970 = vperm.xlu1 %7387, %v11204_v15   ;;  %v6917_v6 = vld [vmem:[%s13287_s3 + $0x90] sm:$0xff]  ;;  %v1400_v50 = vadd.f32 %v1384_v10, %v1304_v58  ;;  %v11288_v58 = vld [vmem:[#allocation2 + $0x20] sm:$0xff] }
 0x714   :  { %v11210_v21 = vld [vmem:[#allocation2 + $0x111] sm:$0xff]  ;;  %4529 = vmatpush.msrb.mxu0 %v6917_v6 }
 0x715   :  { %v3801_v22 = vmax.f32 %v3785_v26, 0.0  ;;  %6858 = vmatmul.msk.f32.vlgmr.msra.gmra.mxu1 %vm3821_vm0, %v11210_v21  ;;  %v3347_v63 = vpop.permute.xlu1 %3346  ;;  %v641_v26 = vmul.f32 %v9272_v39, %v14026_v35  ;;  %v1496_v3 = vadd.f32 %v1480_v61, %v1400_v50 }
 0x716   :  { %v3370_v42 = vmul.f32 %v3347_v63, %v9230_v23  ;;  %v3466_v63 = vmul.f32 %v11188_v20, %v9272_v39  ;;  %v14032_v20 = vld [vmem:[#allocation122_spill] sm:$0xff] }
 0x717   :  { %v3817_v17 = vmax.f32 %v2872_v54, %v3801_v22  ;;  %3066 = vperm.xlu2 %7388, %v11204_v15   ;;  %v1576_v54 = vmul.f32 %v14027_v18, %v9272_v39  ;;  %v3881_v22 = vld [vmem:[#allocation2 + $0x10] sm:$0xff]  ;;  %v657_v40 = vadd.f32 %v641_v26, %v560_v36  ;;  %v932_v46 = vmul.f32 %v11075_v55, %v14032_v20  ;;  %v6915_v18 = vld [vmem:[%s13287_s3 + $0x80] sm:$0xff] }
 0x718   :  { %v3386_v53 = vadd.f32 %v3370_v42, %v3290_v51  ;;  %v11342_v51 = vld [vmem:[#allocation2 + $0x40] sm:$0xff]  ;;  %v11376_v20 = vld [vmem:[#allocation2 + $0x112] sm:$0xff] }
 0x719   :  { %3876 = vst.msk [vmem:[#allocation2 + $0xf1] sm:$0xff] %vm3821_vm0, %v3817_v17  ;;  %v1592_v8 = vadd.f32 %v1576_v54, %v1496_v3  ;;  %v754_v5 = vadd.f32 %v738_v24, %v657_v40  ;;  %v7519_v40 = vld [vmem:[%s13284_s0 + $0xf8] sm:$0xff]  ;;  %v6956_v24 = vld [vmem:[%s13287_s3 + $0xc8] sm:$0xff] }
 0x71a   :  { %v11235_v45 = vpop.permute.xlu2 %3634  ;;  %v6958_v3 = vld [vmem:[%s13287_s3 + $0xd8] sm:$0xff] }
 0x71b   :  { %7390 = vset.pattern.permute.xlu1 %v13506_v11  ;;  %v851_v52 = vadd.f32 %v835_v34, %v754_v5  ;;  %4829 = vmatpush.msrb.mxu2 %v6958_v3  ;;  %v11339_v5 = vld [vmem:[%s13286_s2] ss:$0 sm:$0xff] }
 0x71c   :  { %2313 = vperm.xlu1 %7390, %v11093_v28  }
 0x71d   :  { %6859 = vmatmul.msk.f32.vlgmr.msrb.gmra.mxu1 %vm3821_vm0, %v3880_v14  ;;  %v948_v54 = vadd.f32 %v932_v46, %v851_v52  ;;  %4830 = vmatpush.msrb.mxu2 %v6957_v29  ;;  %v4447_v46 = vld [vmem:[#allocation2 + $0x11] sm:$0xff] }
 0x71e   :  { %v2594_v57 = vpop.permute.xlu1 %2593 }
 0x71f   :  { %7391 = vset.pattern.permute.xlu2 %v13461_v16  ;;  %v2425_v16 = vmul.f32 %v11137_v44, %v9230_v23  ;;  %v14028_v44 = vld [vmem:[#allocation247_spill] sm:$0xff]  ;;  %v2617_v33 = vmul.f32 %v2594_v57, %v9284_v12  ;;  %v2713_v57 = vmul.f32 %v11208_v4, %v9258_v37  ;;  %v3562_v4 = vmul.f32 %v3539_v47, %v9284_v12 }
 0x720   :  { %3162 = vperm.xlu2 %7391, %v11204_v15   ;;  %v11241_v11 = vld [vmem:[#allocation2 + $0xf1] sm:$0xff]  ;;  %v1672_v17 = vmul.f32 %v14028_v44, %v9284_v12  ;;  %4831 = vmatpush.msrb.mxu2 %v6956_v24 }
 0x721   :  { %v11243_v7 = vld [vmem:[#allocation2 + $0xf2] sm:$0xff]  ;;  %6856 = vmatmul.msk.f32.gmra.mxu0 %vm3821_vm0, %v11241_v11  ;;  %v2441_v14 = vadd.f32 %v2425_v16, %v11065_v48  ;;  %v6916_v16 = vld [vmem:[%s13287_s3 + $0x88] sm:$0xff] }
 0x722   :  { %6892 = vmatmul.msk.f32.gmra.mxu2 %vm3821_vm0, %v11243_v7  ;;  %v14031_v48 = vld [vmem:[#allocation79_spill] sm:$0xff]  ;;  %v1688_v19 = vadd.f32 %v1672_v17, %v1592_v8  ;;  %4530 = vmatpush.msrb.mxu0 %v6916_v16  ;;  %v3658_v17 = vmul.f32 %v11235_v45, %v9258_v37 }
 0x723   :  { %v11269_v1 = vpop.permute.xlu2 %1985  ;;  %v1768_v0 = vmul.f32 %v14031_v48, %v9258_v37  ;;  %v2537_v59 = vadd.f32 %v2521_v25, %v2441_v14  ;;  %v11315_v14 = vld [vmem:[#allocation2 + $0x30] sm:$0xff] }
 0x724   :  { %3258 = vperm.xlu1 %7390, %v11204_v15   ;;  %4531 = vmatpush.msrb.mxu0 %v6915_v18  ;;  %v14035_v18 = vld [vmem:[#allocation24_spill] sm:$0xff]  ;;  %v2035_v24 = vmul.f32 %v11269_v1, %v9155_v62 }
 0x725   :  { %6860 = vmatmul.msk.f32.gmra.mxu1 %vm3821_vm0, %v3881_v22  ;;  %v2633_v30 = vadd.f32 %v2617_v33, %v2537_v59  ;;  %v1784_v36 = vadd.f32 %v1768_v0, %v1688_v19 }
 0x727   :  { %v1841_v32 = vpop.permute.xlu1 %1840  ;;  %v2729_v26 = vadd.f32 %v2713_v57, %v2633_v30  ;;  %v11352_v30 = vld [vmem:[#allocation2 + $0x50] sm:$0xff] }
 0x728   :  { %7393 = vset.pattern.permute.xlu2 %v13775_v49  ;;  %v1864_v10 = vmul.f32 %v11075_v55, %v1841_v32  ;;  %v967_v32 = vadd.f32 %v10827_v41, %v948_v54  ;;  %v344_v54 = vmul.f32 %v9171_v2, %v14035_v18  ;;  %v11425_v18 = vld [vmem:[#allocation2 + $0x31] sm:$0xff] }
 0x729   :  { %2505 = vperm.xlu2 %7393, %v11093_v28  }
 0x72a   :  { %v1880_v6 = vadd.f32 %v1864_v10, %v1784_v36  ;;  %v983_v9 = vmax.f32 %v967_v32, 0.0  ;;  %v11374_v36 = vpop.f32.mrf.mxu0 }
 0x72b   :  { %v11299_v35 = vpop.permute.xlu2 %2930 }
 0x72c   :  { %7394 = vset.pattern.permute.xlu1 %v13776_v56  ;;  %v3482_v56 = vadd.f32 %v3466_v63, %v3386_v53  ;;  %v1896_v25 = vadd.f32 %v10827_v41, %v1880_v6 }
 0x72d   :  { %6861 = vmatmul.msk.f32.gmra.mxu1 %vm3821_vm0, %v11288_v58  ;;  %3354 = vperm.xlu1 %7394, %v11204_v15  }
 0x72e   :  { %v3578_v44 = vadd.f32 %v3562_v4, %v3482_v56  ;;  %v1912_v42 = vmax.f32 %v1896_v25, 0.0  ;;  %v2090_v4 = vpop.permute.xlu0 %2089  ;;  %v11383_v56 = vld [vmem:[#allocation2 + $0x70] sm:$0xff]  ;;  %v14038_v25 = vld [vmem:[#allocation143_spill] sm:$0xff] }
 0x72f   :  { %v2786_v61 = vpop.permute.xlu1 %2785  ;;  %v1090_v29 = vmul.f32 %v14038_v25, %v9155_v62 }
 0x730   :  { %v2809_v50 = vmul.f32 %v11075_v55, %v2786_v61  ;;  %v3674_v8 = vadd.f32 %v3658_v17, %v3578_v44  ;;  %v1928_v0 = vmax.f32 %v983_v9, %v1912_v42  ;;  %v14037_v44 = vld [vmem:[#allocation40_spill] sm:$0xff] }
 0x731   :  { %7395 = vset.pattern.permute.xlu2 %v13418_v27  ;;  %v1186_v17 = vmul.f32 %v14037_v44, %v9145_v43 }
 0x732   :  { %v2825_v22 = vadd.f32 %v2809_v50, %v2729_v26  ;;  %1752 = vperm.xlu2 %7395, %v7519_v40  }
 0x734   :  { %v2841_v31 = vadd.f32 %v10827_v41, %v2825_v22  ;;  %v11333_v41 = vpop.permute.xlu2 %2281  ;;  %v11393_v22 = vld [vmem:[#allocation2 + $0x21] sm:$0xff] }
 0x735   :  { %6862 = vmatmul.msk.f32.gmra.mxu1 %vm3821_vm0, %v11315_v14  ;;  %7397 = vset.pattern.permute.xlu1 %v13775_v49  ;;  %v6955_v49 = vld [vmem:[%s13287_s3 + $0xc0] sm:$0xff] }
 0x736   :  { %3450 = vperm.xlu1 %7397, %v11204_v15   ;;  %v2857_v34 = vmax.f32 %v2841_v31, 0.0  ;;  %4832 = vmatpush.msrb.mxu2 %v6955_v49  ;;  %v3131_v32 = vpop.permute.xlu0 %3130  ;;  %v3888_v31 = vld [vmem:[#allocation2 + $0xa0] sm:$0xff]  ;;  %v2131_v49 = vmul.f32 %v2090_v4, %v9145_v43 }
 0x737   :  { %v3731_v45 = vpop.permute.xlu1 %3730  ;;  %v3172_v25 = vmul.f32 %v3131_v32, %v9171_v2 }
 0x738   :  { %v3754_v33 = vmul.f32 %v11075_v55, %v3731_v45  ;;  %v2873_v59 = vmax.f32 %v1928_v0, %v2857_v34  ;;  %v11405_v45 = vpop.f32.mrf.mxu0  ;;  %v14041_v34 = vld [vmem:[#allocation192_spill] sm:$0xff]  ;;  %v2147_v1 = vadd.f32 %v2131_v49, %v2035_v24 }
 0x739   :  { %14039 = vst [vmem:[#allocation142_spill] sm:$0xff] %v11405_v45 }
 0x73a   :  { %v3770_v48 = vadd.f32 %v3754_v33, %v3674_v8  ;;  %7398 = vset.pattern.permute.xlu2 %v13612_v60  ;;  %v14040_v33 = vld [vmem:[#allocation167_spill] sm:$0xff] }
 0x73b   :  { %1848 = vperm.xlu2 %7398, %v7519_v40   ;;  %v14036_v40 = vld [vmem:[#allocation41_spill] sm:$0xff]  ;;  %v1282_v9 = vmul.f32 %v14040_v33, %v9171_v2 }
 0x73c   :  { %v3786_v19 = vadd.f32 %v11339_v5, %v3770_v48  ;;  %v11350_v47 = vpop.permute.xlu2 %3226  ;;  %v441_v3 = vmul.f32 %v9163_v13, %v14036_v40  ;;  %v538_v48 = vmul.f32 %v9230_v23, %v14041_v34 }
 0x73d   :  { %6863 = vmatmul.msk.f32.gmra.mxu1 %vm3821_vm0, %v11342_v51 }
 0x73e   :  { %v3802_v63 = vmax.f32 %v3786_v19, 0.0  ;;  %7399 = vset.pattern.permute.xlu1 %v13418_v27  ;;  %v1202_v19 = vadd.f32 %v1186_v17, %v1090_v29  ;;  %v2570_v17 = vpop.permute.xlu0 %2569 }
 0x73f   :  { %2697 = vperm.xlu1 %7399, %v11093_v28  }
 0x740   :  { %v3818_v57 = vmax.f32 %v2873_v59, %v3802_v63  ;;  %v2186_v53 = vpop.permute.xlu1 %2185  ;;  %v14042_v59 = vld [vmem:[#allocation191_spill] sm:$0xff] }
 0x741   :  { %v2227_v0 = vmul.f32 %v2186_v53, %v9171_v2  ;;  %v1378_v63 = vmul.f32 %v14042_v59, %v9163_v13  ;;  %v2323_v53 = vmul.f32 %v11333_v41, %v9163_v13 }
 0x742   :  { %3877 = vst.msk [vmem:[#allocation2 + $0x101] sm:$0xff] %vm3821_vm0, %v3818_v57 }
 0x743   :  { %7400 = vset.pattern.permute.xlu2 %v13413_v38  ;;  %v11366_v38 = vld [vmem:[#allocation2 + $0x60] sm:$0xff] }
 0x744   :  { %3546 = vperm.xlu2 %7400, %v11204_v15  }
 0x745   :  { %6864 = vmatmul.msk.f32.gmra.mxu1 %vm3821_vm0, %v11352_v30  ;;  %v11372_v52 = vpop.permute.xlu2 %3322 }
 0x747   :  { %3642 = vperm.xlu1 %7399, %v11204_v15  }
 0x749   :  { %v3035_v27 = vpop.permute.xlu1 %3034  ;;  %v11358_v10 = vld [vmem:[#allocation2 + $0x101] sm:$0xff] }
 0x74a   :  { %v11360_v28 = vld [vmem:[#allocation2 + $0x102] sm:$0xff]  ;;  %6857 = vmatmul.msk.f32.gmra.mxu0 %vm3821_vm0, %v11358_v10  ;;  %v3076_v57 = vmul.f32 %v3035_v27, %v9145_v43 }
 0x74b   :  { %6893 = vmatmul.msk.f32.gmra.mxu2 %vm3821_vm0, %v11360_v28  ;;  %v14045_v27 = vld [vmem:[#allocation216_spill] sm:$0xff] }
 0x74c   :  { %7402 = vset.pattern.permute.xlu2 %v13612_v60  ;;  %v14033_v60 = vld [vmem:[#allocation34_spill] sm:$0xff]  ;;  %v1570_v44 = vmul.f32 %v14045_v27, %v9272_v39  ;;  %v11465_v27 = vld [vmem:[#allocation2 + $0xc0] sm:$0xff] }
 0x74d   :  { %6865 = vmatmul.msk.f32.gmra.mxu1 %vm3821_vm0, %v11366_v38  ;;  %3738 = vperm.xlu2 %7402, %v11204_v15   ;;  %v247_v16 = vmul.f32 %v9145_v43, %v14033_v60  ;;  %v14034_v15 = vld [vmem:[#allocation7_spill] sm:$0xff]  ;;  %v14043_v60 = vld [vmem:[#allocation202_spill] sm:$0xff] }
 0x74e   :  { %v150_v6 = vmul.f32 %v9155_v62, %v14034_v15  ;;  %v11389_v50 = vpop.permute.xlu2 %1816 }
 0x750   :  { %v263_v26 = vadd.f32 %v247_v16, %v150_v6  ;;  %v1474_v16 = vmul.f32 %v14043_v60, %v9230_v23  ;;  %v2980_v6 = vmul.f32 %v11299_v35, %v9155_v62  ;;  %v11435_v35 = vpop.f32.mrf.mxu0  ;;  %v2611_v60 = vmul.f32 %v2570_v17, %v9284_v12 }
 0x751   :  { %14046 = vst [vmem:[#allocation156_spill] sm:$0xff] %v11435_v35 }
 0x752   :  { %6919 = vmatmul.msk.f32.vlgmr.msrb.gmra.mxu0 %vm3821_vm0, %v4447_v46  ;;  %v2378_v61 = vpop.permute.xlu1 %2377  ;;  %v360_v42 = vadd.f32 %v344_v54, %v263_v26  ;;  %v1298_v46 = vadd.f32 %v1282_v9, %v1202_v19  ;;  %v2243_v26 = vadd.f32 %v2227_v0, %v2147_v1  ;;  %v14044_v54 = vld [vmem:[#allocation66_spill] sm:$0xff]  ;;  %v3092_v41 = vadd.f32 %v3076_v57, %v2980_v6  ;;  %v14049_v19 = vld [vmem:[#allocation61_spill] sm:$0xff] }
 0x753   :  { %6894 = vmatmul.msk.f32.gmra.mxu2 %vm3821_vm0, %v11376_v20  ;;  %v635_v40 = vmul.f32 %v9272_v39, %v14044_v54  ;;  %v2419_v29 = vmul.f32 %v2378_v61, %v9230_v23  ;;  %v11441_v9 = vld [vmem:[#allocation2 + $0xb0] sm:$0xff]  ;;  %v829_v59 = vmul.f32 %v9258_v37, %v14049_v19 }
 0x754   :  { %v2339_v34 = vadd.f32 %v2323_v53, %v2243_v26  ;;  %v2762_v53 = vpop.permute.xlu0 %2761  ;;  %v3364_v26 = vmul.f32 %v11372_v52, %v9230_v23  ;;  %v11492_v19 = vld [vmem:[#allocation2 + $0xd0] sm:$0xff] }
 0x755   :  { %6866 = vmatmul.msk.f32.gmra.mxu1 %vm3821_vm0, %v11383_v56  ;;  %v2803_v52 = vmul.f32 %v11075_v55, %v2762_v53 }
 0x756   :  { %v2435_v61 = vadd.f32 %v2419_v29, %v2339_v34  ;;  %v14052_v29 = vld [vmem:[#allocation117_spill] sm:$0xff] }
 0x757   :  { %v3515_v15 = vpop.permute.xlu2 %3514 }
 0x758   :  { %v11467_v17 = vpop.f32.mrf.mxu0 }
 0x759   :  { %14051 = vst [vmem:[#allocation144_spill] sm:$0xff] %v11467_v17 }
 0x75a   :  { %6920 = vmatmul.msk.f32.gmra.mxu0 %vm3821_vm0, %v11393_v22 }
 0x75b   :  { %6959 = vmatmul.msk.f32.vlgmr.msrb.gmra.mxu2 %vm3821_vm0, %v11288_v58  ;;  %v2474_v8 = vpop.permute.xlu1 %2473  ;;  %v457_v58 = vadd.f32 %v441_v3, %v360_v42  ;;  %v1394_v3 = vadd.f32 %v1378_v63, %v1298_v46  ;;  %v14047_v42 = vld [vmem:[#allocation241_spill] sm:$0xff] }
 0x75c   :  { %v1666_v33 = vmul.f32 %v14047_v42, %v9284_v12  ;;  %v14050_v63 = vld [vmem:[#allocation73_spill] sm:$0xff] }
 0x75d   :  { %6867 = vmatmul.msk.f32.gmra.mxu1 %vm3821_vm0, %v3888_v31  ;;  %v554_v4 = vadd.f32 %v538_v48, %v457_v58  ;;  %v1490_v49 = vadd.f32 %v1474_v16, %v1394_v3  ;;  %v2515_v48 = vmul.f32 %v2474_v8, %v9272_v39  ;;  %v3188_v58 = vadd.f32 %v3172_v25, %v3092_v41  ;;  %v11455_v16 = vld [vmem:[#allocation2 + $0x41] sm:$0xff] }
 0x75e   :  { %v1762_v1 = vmul.f32 %v14050_v63, %v9258_v37  ;;  %v3268_v8 = vmul.f32 %v11350_v47, %v9163_v13  ;;  %v1858_v47 = vmul.f32 %v11075_v55, %v11389_v50  ;;  %v926_v50 = vmul.f32 %v11075_v55, %v14052_v29 }
 0x75f   :  { %v651_v24 = vadd.f32 %v635_v40, %v554_v4  ;;  %v1586_v32 = vadd.f32 %v1570_v44, %v1490_v49  ;;  %v2531_v4 = vadd.f32 %v2515_v48, %v2435_v61 }
 0x760   :  { %v3707_v6 = vpop.permute.xlu2 %3706  ;;  %v3284_v54 = vadd.f32 %v3268_v8, %v3188_v58  ;;  %v6938_v58 = vld [vmem:[%s13287_s3 + $0xb8] sm:$0xff] }
 0x761   :  { %v1682_v46 = vadd.f32 %v1666_v33, %v1586_v32  ;;  %v2627_v41 = vadd.f32 %v2611_v60, %v2531_v4  ;;  %v6978_v33 = vld [vmem:[%s13287_s3 + $0xf8] sm:$0xff]  ;;  %4678 = vmatpush.msra.mxu1 %v6938_v58  ;;  %v3748_v8 = vmul.f32 %v11075_v55, %v3707_v6  ;;  %v6937_v60 = vld [vmem:[%s13287_s3 + $0xb0] sm:$0xff] }
 0x762   :  { %6921 = vmatmul.msk.f32.gmra.mxu0 %vm3821_vm0, %v11425_v18  ;;  %v3380_v49 = vadd.f32 %v3364_v26, %v3284_v54  ;;  %4979 = vmatpush.msrb.mxu3 %v6978_v33  ;;  %v6977_v58 = vld [vmem:[%s13287_s3 + $0xf0] sm:$0xff] }
 0x763   :  { %6960 = vmatmul.msk.f32.gmra.mxu2 %vm3821_vm0, %v11315_v14  ;;  %v3419_v31 = vpop.permute.xlu1 %3418  ;;  %v14048_v14 = vld [vmem:[#allocation92_spill] sm:$0xff]  ;;  %v1778_v3 = vadd.f32 %v1762_v1, %v1682_v46  ;;  %4679 = vmatpush.msra.mxu1 %v6937_v60 }
 0x764   :  { %v732_v0 = vmul.f32 %v9284_v12, %v14048_v14  ;;  %v3460_v25 = vmul.f32 %v3419_v31, %v9272_v39  ;;  %v3556_v31 = vmul.f32 %v3515_v15, %v9284_v12  ;;  %4980 = vmatpush.msrb.mxu3 %v6977_v58  ;;  %v14055_v60 = vld [vmem:[#allocation252_spill] sm:$0xff]  ;;  %v14061_v58 = vld [vmem:[#allocation37_spill] sm:$0xff] }
 0x765   :  { %6868 = vmatmul.msk.f32.gmra.mxu1 %vm3821_vm0, %v11441_v9 }
 0x766   :  { %v748_v57 = vadd.f32 %v732_v0, %v651_v24  ;;  %v1874_v24 = vadd.f32 %v1858_v47, %v1778_v3  ;;  %v3476_v48 = vadd.f32 %v3460_v25, %v3380_v49  ;;  %v11480_v0 = vld [vmem:[#allocation2 + $0x51] sm:$0xff]  ;;  %v11505_v47 = vld [vmem:[#allocation2 + $0x61] sm:$0xff]  ;;  %v11536_v49 = vpop.f32.mrf.mxu2 }
 0x767   :  { %v6935_v3 = vld [vmem:[%s13287_s3 + $0xa0] sm:$0xff] }
 0x768   :  { %v845_v40 = vadd.f32 %v829_v59, %v748_v57  ;;  %v1890_v32 = vadd.f32 %v11339_v5, %v1874_v24  ;;  %v11494_v59 = vpop.f32.mrf.mxu0  ;;  %v11530_v24 = vld [vmem:[#allocation2 + $0x71] sm:$0xff] }
 0x769   :  { %v11490_v61 = vpop.permute.xlu2 %2121 }
 0x76a   :  { %6922 = vmatmul.msk.f32.gmra.mxu0 %vm3821_vm0, %v11455_v16  ;;  %v942_v34 = vadd.f32 %v926_v50, %v845_v40  ;;  %v1906_v46 = vmax.f32 %v1890_v32, 0.0  ;;  %v6936_v40 = vld [vmem:[%s13287_s3 + $0xa8] sm:$0xff] }
 0x76b   :  { %6961 = vmatmul.msk.f32.gmra.mxu2 %vm3821_vm0, %v11342_v51  ;;  %4680 = vmatpush.msra.mxu1 %v6936_v40  ;;  %v14058_v40 = vld [vmem:[#allocation20_spill] sm:$0xff] }
 0x76c   :  { %v2666_v44 = vpop.permute.xlu1 %2665  ;;  %v961_v63 = vadd.f32 %v11339_v5, %v942_v34 }
 0x76d   :  { %6869 = vmatmul.msk.f32.gmra.mxu1 %vm3821_vm0, %v11465_v27  ;;  %v2707_v51 = vmul.f32 %v2666_v44, %v9258_v37  ;;  %v11518_v44 = vld [vmem:[#allocation2 + $0xe0] sm:$0xff] }
 0x76e   :  { %v977_v53 = vmax.f32 %v961_v63, 0.0  ;;  %4681 = vmatpush.msra.mxu1 %v6935_v3 }
 0x76f   :  { %v2723_v42 = vadd.f32 %v2707_v51, %v2627_v41 }
 0x770   :  { %v1922_v55 = vmax.f32 %v977_v53, %v1906_v46  ;;  %v11520_v41 = vpop.f32.mrf.mxu0  ;;  %v158_v53 = vmul.f32 %v9155_v62, %v14055_v60  ;;  %v2139_v60 = vmul.f32 %v11490_v61, %v9145_v43 }
 0x771   :  { %v2819_v14 = vadd.f32 %v2803_v52, %v2723_v42  ;;  %v11524_v29 = vpop.permute.xlu2 %3066  ;;  %v11538_v42 = vld [vmem:[#allocation2 + $0xf0] sm:$0xff] }
 0x772   :  { %6923 = vmatmul.msk.f32.gmra.mxu0 %vm3821_vm0, %v11480_v0 }
 0x773   :  { %6962 = vmatmul.msk.f32.gmra.mxu2 %vm3821_vm0, %v11352_v30  ;;  %v2835_v1 = vadd.f32 %v11339_v5, %v2819_v14  ;;  %v3572_v30 = vadd.f32 %v3556_v31, %v3476_v48 }
 0x774   :  { %v3611_v15 = vpop.permute.xlu1 %3610 }
 0x775   :  { %6870 = vmatmul.msk.f32.gmra.mxu1 %vm3821_vm0, %v11492_v19  ;;  %v3652_v57 = vmul.f32 %v3611_v15, %v9258_v37  ;;  %v2851_v26 = vmax.f32 %v2835_v1, 0.0  ;;  %v11563_v15 = vpop.f32.mrf.mxu2  ;;  %v4755_v1 = vld [vmem:[#allocation2 + $0x90] sm:$0xff] }
 0x776   :  { %14053 = vst [vmem:[#allocation153_spill] sm:$0xff] %v11563_v15  ;;  %v14066_v15 = vld [vmem:[#allocation22_spill] sm:$0xff] }
 0x777   :  { %v3668_v4 = vadd.f32 %v3652_v57, %v3572_v30  ;;  %v2867_v25 = vmax.f32 %v1922_v55, %v2851_v26  ;;  %v4455_v30 = vld [vmem:[#allocation2 + $0xb1] sm:$0xff]  ;;  %v255_v55 = vmul.f32 %v9145_v43, %v14058_v40  ;;  %v1386_v45 = vmul.f32 %v14066_v15, %v9163_v13 }
 0x778   :  { %v11540_v33 = vpop.f32.mrf.mxu0 }
 0x779   :  { %v3764_v54 = vadd.f32 %v3748_v8, %v3668_v4  ;;  %v2218_v8 = vpop.permute.xlu0 %2217  ;;  %v11573_v4 = vld [vmem:[#allocation2 + $0x110] sm:$0xff] }
 0x77a   :  { %6924 = vmatmul.msk.f32.gmra.mxu0 %vm3821_vm0, %v11505_v47  ;;  %v11546_v31 = vpop.permute.xlu2 %3162  ;;  %v2235_v17 = vmul.f32 %v2218_v8, %v9171_v2  ;;  %v14067_v8 = vld [vmem:[#allocation56_spill] sm:$0xff] }
 0x77b   :  { %6963 = vmatmul.msk.f32.gmra.mxu2 %vm3821_vm0, %v11366_v38  ;;  %v3780_v6 = vadd.f32 %v11339_v5, %v3764_v54  ;;  %v6998_v38 = vld [vmem:[%s13287_s3 + $0x118] sm:$0xff] }
 0x77c   :  { %5129 = vmatpush.msra.mxu0 %v6998_v38  ;;  %v271_v38 = vadd.f32 %v255_v55, %v158_v53 }
 0x77d   :  { %v3796_v51 = vmax.f32 %v3780_v6, 0.0  ;;  %6871 = vmatmul.msk.f32.gmra.mxu1 %vm3821_vm0, %v11518_v44  ;;  %v2026_v52 = vpop.permute.xlu1 %2025  ;;  %v14059_v6 = vld [vmem:[#allocation264_spill] sm:$0xff] }
 0x77e   :  { %v1098_v3 = vmul.f32 %v14059_v6, %v9155_v62  ;;  %v2043_v53 = vmul.f32 %v2026_v52, %v9155_v62  ;;  %v4597_v6 = vld [vmem:[#allocation2 + $0x12] sm:$0xff] }
 0x77f   :  { %v3812_v50 = vmax.f32 %v2867_v25, %v3796_v51  ;;  %v14060_v25 = vld [vmem:[#allocation157_spill] sm:$0xff] }
 0x780   :  { %v11556_v32 = vpop.f32.mrf.mxu0  ;;  %v1194_v51 = vmul.f32 %v14060_v25, %v9145_v43  ;;  %v6997_v25 = vld [vmem:[%s13287_s3 + $0x110] sm:$0xff]  ;;  %v2155_v52 = vadd.f32 %v2139_v60, %v2043_v53  ;;  %v11634_v53 = vld [vmem:[#allocation2 + $0x22] sm:$0xff] }
 0x781   :  { %3871 = vst.msk [vmem:[#allocation2 + $0x81] sm:$0xff] %vm3821_vm0, %v3812_v50  ;;  %v11593_v50 = vld [vmem:[#allocation2 + $0xc1] sm:$0xff]  ;;  %v2410_v55 = vpop.permute.xlu0 %2409  ;;  %5130 = vmatpush.msra.mxu0 %v6997_v25 }
 0x782   :  { %6925 = vmatmul.msk.f32.gmra.mxu0 %vm3821_vm0, %v11530_v24  ;;  %v2251_v60 = vadd.f32 %v2235_v17, %v2155_v52  ;;  %v14071_v17 = vld [vmem:[#allocation109_spill] sm:$0xff] }
 0x783   :  { %6964 = vmatmul.msk.f32.gmra.mxu2 %vm3821_vm0, %v11383_v56  ;;  %v11554_v56 = vld [vmem:[#allocation2 + $0x100] sm:$0xff]  ;;  %v11567_v57 = vpop.permute.xlu2 %2505 }
 0x785   :  { %6872 = vmatmul.msk.f32.gmra.mxu1 %vm3821_vm0, %v11538_v42  ;;  %v11544_v34 = vpop.permute.xlu1 %2970 }
 0x788   :  { %v4304_v48 = vld [vmem:[#allocation2 + $0x80] sm:$0xff]  ;;  %v11577_v26 = vpop.f32.mrf.mxu0 }
 0x789   :  { %v11548_v14 = vld [vmem:[#allocation2 + $0x81] sm:$0xff]  ;;  %6906 = vmatmul.msk.f32.gmra.mxu3 %vm3821_vm0, %v4304_v48  ;;  %14056 = vst [vmem:[#allocation190_spill] sm:$0xff] %v11577_v26 }
 0x78a   :  { %6926 = vmatmul.msk.f32.gmra.mxu0 %vm3821_vm0, %v11548_v14 }
 0x78b   :  { %6965 = vmatmul.msk.f32.gmra.mxu2 %vm3821_vm0, %v4304_v48 }
 0x78c   :  { %v1753_v40 = vpop.permute.xlu2 %1752 }
 0x78d   :  { %6873 = vmatmul.msk.f32.gmra.mxu1 %vm3821_vm0, %v11554_v56 }
 0x78e   :  { %v2314_v63 = vpop.permute.xlu1 %2313 }
 0x791   :  { %6907 = vmatmul.msk.f32.gmra.mxu3 %vm3821_vm0, %v11441_v9  ;;  %v11581_v9 = vpop.f32.mrf.mxu2 }
 0x792   :  { %v11569_v46 = vpop.f32.mrf.mxu1  ;;  %6927 = vmatmul.msk.f32.gmra.mxu0 %vm3821_vm0, %v4455_v30  ;;  %14057 = vst [vmem:[#allocation261_spill] sm:$0xff] %v11581_v9  ;;  %v1210_v30 = vadd.f32 %v1194_v51, %v1098_v3  ;;  %v14063_v3 = vld [vmem:[#allocation13_spill] sm:$0xff] }
 0x793   :  { %14054 = vst [vmem:[#allocation211_spill] sm:$0xff] %v11569_v46  ;;  %6966 = vmatmul.msk.f32.gmra.mxu2 %vm3821_vm0, %v4755_v1  ;;  %v352_v1 = vmul.f32 %v9171_v2, %v14061_v58  ;;  %v14062_v46 = vld [vmem:[#allocation182_spill] sm:$0xff]  ;;  %v449_v51 = vmul.f32 %v9163_v13, %v14063_v3  ;;  %v11614_v58 = vpop.f32.mrf.mxu0 }
 0x794   :  { %v1290_v26 = vmul.f32 %v14062_v46, %v9171_v2  ;;  %14064 = vst [vmem:[#allocation161_spill] sm:$0xff] %v11614_v58 }
 0x795   :  { %6874 = vmatmul.msk.f32.gmra.mxu1 %vm3821_vm0, %v11573_v4  ;;  %v1849_v58 = vpop.permute.xlu2 %1848 }
 0x796   :  { %v11583_v54 = vpop.permute.xlu1 %3258  ;;  %v1306_v61 = vadd.f32 %v1290_v26, %v1210_v30  ;;  %v546_v30 = vmul.f32 %v9230_v23, %v14067_v8 }
 0x798   :  { %v1402_v15 = vadd.f32 %v1386_v45, %v1306_v61  ;;  %v740_v61 = vmul.f32 %v9284_v12, %v14071_v17  ;;  %v7521_v17 = vld [vmem:[#allocation2 + $0xe1] sm:$0xff] }
 0x799   :  { %6908 = vmatmul.msk.f32.gmra.mxu3 %vm3821_vm0, %v11465_v27  ;;  %v11617_v35 = vpop.f32.mrf.mxu2 }
 0x79a   :  { %v11595_v48 = vpop.f32.mrf.mxu1  ;;  %6928 = vmatmul.msk.f32.gmra.mxu0 %vm3821_vm0, %v11593_v50  ;;  %14065 = vst [vmem:[#allocation187_spill] sm:$0xff] %v11617_v35 }
 0x79b   :  { %6967 = vmatmul.msk.f32.gmra.mxu2 %vm3821_vm0, %v11465_v27  ;;  %v368_v27 = vadd.f32 %v352_v1, %v271_v38  ;;  %v2331_v38 = vmul.f32 %v2314_v63, %v9163_v13  ;;  %v11624_v1 = vld [vmem:[#allocation2 + $0xd1] sm:$0xff]  ;;  %v11643_v8 = vpop.f32.mrf.mxu0 }
 0x79c   :  { %v14068_v63 = vld [vmem:[#allocation206_spill] sm:$0xff]  ;;  %14070 = vst [vmem:[#allocation214_spill] sm:$0xff] %v11643_v8 }
 0x79d   :  { %6939 = vmatmul.msk.f32.vlgmr.msra.gmra.mxu1 %vm3821_vm0, %v4597_v6  ;;  %v465_v46 = vadd.f32 %v449_v51, %v368_v27  ;;  %v1482_v6 = vmul.f32 %v14068_v63, %v9230_v23  ;;  %v2427_v27 = vmul.f32 %v2410_v55, %v9230_v23  ;;  %v2347_v3 = vadd.f32 %v2331_v38, %v2251_v60  ;;  %v2602_v51 = vpop.permute.xlu0 %2601  ;;  %v14072_v38 = vld [vmem:[#allocation233_spill] sm:$0xff] }
 0x79e   :  { %v2988_v55 = vmul.f32 %v11544_v34, %v9155_v62  ;;  %v2523_v63 = vmul.f32 %v11567_v57, %v9272_v39  ;;  %v14073_v62 = vld [vmem:[#allocation124_spill] sm:$0xff]  ;;  %v3180_v57 = vmul.f32 %v11546_v31, %v9171_v2  ;;  %v3547_v2 = vpop.permute.xlu2 %3546 }
 0x79f   :  { %v3355_v9 = vpop.permute.xlu1 %3354  ;;  %v562_v25 = vadd.f32 %v546_v30, %v465_v46  ;;  %v1498_v45 = vadd.f32 %v1482_v6, %v1402_v15  ;;  %v1578_v30 = vmul.f32 %v14072_v38, %v9272_v39  ;;  %v3084_v15 = vmul.f32 %v11524_v29, %v9145_v43 }
 0x7a0   :  { %v1770_v43 = vmul.f32 %v1753_v40, %v9258_v37  ;;  %v2619_v38 = vmul.f32 %v2602_v51, %v9284_v12 }
 0x7a1   :  { %6909 = vmatmul.msk.f32.gmra.mxu3 %vm3821_vm0, %v11492_v19  ;;  %v11647_v52 = vpop.f32.mrf.mxu2  ;;  %v1594_v34 = vadd.f32 %v1578_v30, %v1498_v45  ;;  %v3276_v45 = vmul.f32 %v11583_v54, %v9163_v13 }
 0x7a2   :  { %v11626_v26 = vpop.f32.mrf.mxu1  ;;  %6929 = vmatmul.msk.f32.gmra.mxu0 %vm3821_vm0, %v11624_v1 }
 0x7a3   :  { %6968 = vmatmul.msk.f32.gmra.mxu2 %vm3821_vm0, %v11492_v19  ;;  %v14069_v19 = vld [vmem:[#allocation83_spill] sm:$0xff]  ;;  %v11681_v40 = vpop.f32.mrf.mxu0 }
 0x7a4   :  { %v643_v35 = vmul.f32 %v9272_v39, %v14069_v19  ;;  %v2443_v19 = vadd.f32 %v2427_v27, %v2347_v3  ;;  %v11668_v27 = vld [vmem:[#allocation2 + $0x32] sm:$0xff]  ;;  %14075 = vst [vmem:[#allocation225_spill] sm:$0xff] %v11681_v40 }
 0x7a5   :  { %6940 = vmatmul.msk.f32.gmra.mxu1 %vm3821_vm0, %v11634_v53  ;;  %v2794_v31 = vpop.permute.xlu0 %2793 }
 0x7a6   :  { %v659_v60 = vadd.f32 %v643_v35, %v562_v25  ;;  %v1674_v35 = vmul.f32 %v14073_v62, %v9284_v12  ;;  %v3100_v25 = vadd.f32 %v3084_v15, %v2988_v55  ;;  %v2539_v29 = vadd.f32 %v2523_v63, %v2443_v19  ;;  %v14074_v55 = vld [vmem:[#allocation107_spill] sm:$0xff] }
 0x7a7   :  { %v3372_v15 = vmul.f32 %v3355_v9, %v9230_v23  ;;  %v14076_v23 = vld [vmem:[#allocation134_spill] sm:$0xff] }
 0x7a8   :  { %v3451_v46 = vpop.permute.xlu1 %3450  ;;  %v756_v3 = vadd.f32 %v740_v61, %v659_v60  ;;  %v837_v61 = vmul.f32 %v9258_v37, %v14074_v55  ;;  %v1690_v30 = vadd.f32 %v1674_v35, %v1594_v34  ;;  %v7522_v60 = vld [vmem:[%s13285_s1 + $0x8] ss:$0 sm:$0xff]  ;;  %v3196_v19 = vadd.f32 %v3180_v57, %v3100_v25 }
 0x7a9   :  { %6910 = vmatmul.msk.f32.gmra.mxu3 %vm3821_vm0, %v11518_v44  ;;  %v11683_v51 = vpop.f32.mrf.mxu2  ;;  %v1866_v63 = vmul.f32 %v7522_v60, %v1849_v58  ;;  %v2635_v54 = vadd.f32 %v2619_v38, %v2539_v29  ;;  %v3468_v35 = vmul.f32 %v3451_v46, %v9272_v39  ;;  %v934_v9 = vmul.f32 %v7522_v60, %v14076_v23  ;;  %v6996_v58 = vld [vmem:[%s13287_s3 + $0x108] sm:$0xff] }
 0x7aa   :  { %v11659_v6 = vpop.f32.mrf.mxu1  ;;  %6930 = vmatmul.msk.f32.gmra.mxu0 %vm3821_vm0, %v7521_v17  ;;  %v1786_v13 = vadd.f32 %v1770_v43, %v1690_v30  ;;  %v853_v17 = vadd.f32 %v837_v61, %v756_v3  ;;  %v3292_v55 = vadd.f32 %v3276_v45, %v3196_v19  ;;  %v11703_v39 = vld [vmem:[#allocation2 + $0x42] sm:$0xff]  ;;  %v3564_v29 = vmul.f32 %v3547_v2, %v9284_v12  ;;  %v3739_v45 = vpop.permute.xlu2 %3738 }
 0x7ab   :  { %6969 = vmatmul.msk.f32.gmra.mxu2 %vm3821_vm0, %v11518_v44  ;;  %v6976_v44 = vld [vmem:[%s13287_s3 + $0xe8] sm:$0xff]  ;;  %5131 = vmatpush.msra.mxu0 %v6996_v58  ;;  %v3756_v19 = vmul.f32 %v7522_v60, %v3739_v45 }
 0x7ac   :  { %4981 = vmatpush.msrb.mxu3 %v6976_v44  ;;  %v2811_v44 = vmul.f32 %v7522_v60, %v2794_v31  ;;  %v1882_v57 = vadd.f32 %v1866_v63, %v1786_v13  ;;  %v3388_v25 = vadd.f32 %v3372_v15, %v3292_v55  ;;  %v950_v46 = vadd.f32 %v934_v9, %v853_v17  ;;  %v11714_v31 = vpop.f32.mrf.mxu0 }
 0x7ad   :  { %6941 = vmatmul.msk.f32.gmra.mxu1 %vm3821_vm0, %v11668_v27  ;;  %14077 = vst [vmem:[#allocation200_spill] sm:$0xff] %v11714_v31 }
 0x7ae   :  { %v3484_v43 = vadd.f32 %v3468_v35, %v3388_v25  ;;  %v969_v30 = vadd.f32 %v11339_v5, %v950_v46 }
 0x7b0   :  { %v3580_v15 = vadd.f32 %v3564_v29, %v3484_v43  ;;  %v11761_v29 = vpop.f32.mrf.mxu3 }
 0x7b1   :  { %6911 = vmatmul.msk.f32.gmra.mxu3 %vm3821_vm0, %v11538_v42  ;;  %v2698_v62 = vpop.permute.xlu1 %2697  ;;  %v11716_v61 = vpop.f32.mrf.mxu2 }
 0x7b2   :  { %v11692_v34 = vpop.f32.mrf.mxu1  ;;  %v2715_v40 = vmul.f32 %v2698_v62, %v9258_v37  ;;  %6931 = vmatmul.msk.f32.gmra.mxu0 %vm3821_vm0, %v11241_v11  ;;  %v6975_v11 = vld [vmem:[%s13287_s3 + $0xe0] sm:$0xff]  ;;  %v4601_v62 = vld [vmem:[#allocation2 + $0x52] sm:$0xff] }
 0x7b3   :  { %6970 = vmatmul.msk.f32.gmra.mxu2 %vm3821_vm0, %v11538_v42  ;;  %v6995_v42 = vld [vmem:[%s13287_s3 + $0x100] sm:$0xff]  ;;  %4982 = vmatpush.msrb.mxu3 %v6975_v11 }
 0x7b4   :  { %v2731_v3 = vadd.f32 %v2715_v40, %v2635_v54  ;;  %5132 = vmatpush.msra.mxu0 %v6995_v42  ;;  %v1898_v40 = vadd.f32 %v11339_v5, %v1882_v57  ;;  %v11731_v35 = vpop.f32.mrf.mxu0  ;;  %v4603_v42 = vld [vmem:[#allocation2 + $0x72] sm:$0xff] }
 0x7b5   :  { %6942 = vmatmul.msk.f32.gmra.mxu1 %vm3821_vm0, %v11703_v39 }
 0x7b6   :  { %v2827_v38 = vadd.f32 %v2811_v44, %v2731_v3  ;;  %v1914_v54 = vmax.f32 %v1898_v40, 0.0  ;;  %v985_v44 = vmax.f32 %v969_v30, 0.0  ;;  %v4602_v3 = vld [vmem:[#allocation2 + $0x62] sm:$0xff] }
 0x7b7   :  { %v4604_v40 = vld [vmem:[#allocation2 + $0x82] sm:$0xff] }
 0x7b8   :  { %v2843_v12 = vadd.f32 %v11339_v5, %v2827_v38  ;;  %v1930_v9 = vmax.f32 %v985_v44, %v1914_v54 }
 0x7b9   :  { %6912 = vmatmul.msk.f32.gmra.mxu3 %vm3821_vm0, %v11554_v56  ;;  %v3643_v63 = vpop.permute.xlu1 %3642  ;;  %v11733_v23 = vpop.f32.mrf.mxu2 }
 0x7ba   :  { %v11723_v2 = vpop.f32.mrf.mxu1  ;;  %v3660_v13 = vmul.f32 %v3643_v63, %v9258_v37  ;;  %6932 = vmatmul.msk.f32.gmra.mxu0 %vm3821_vm0, %v11358_v10  ;;  %v2859_v60 = vmax.f32 %v2843_v12, 0.0  ;;  %v11774_v63 = vpop.f32.mrf.mxu3  ;;  %v4605_v12 = vld [vmem:[#allocation2 + $0xb2] sm:$0xff] }
 0x7bb   :  { %6971 = vmatmul.msk.f32.gmra.mxu2 %vm3821_vm0, %v11554_v56 }
 0x7bc   :  { %v3676_v17 = vadd.f32 %v3660_v13, %v3580_v15  ;;  %v2875_v58 = vmax.f32 %v1930_v9, %v2859_v60  ;;  %v4763_v9 = vld [vmem:[#allocation2 + $0x130] sm:$0xff] }
 0x7bd   :  { %6943 = vmatmul.msk.f32.gmra.mxu1 %vm3821_vm0, %v4601_v62 }
 0x7be   :  { %v3772_v55 = vadd.f32 %v3756_v19, %v3676_v17  ;;  %v4606_v17 = vld [vmem:[#allocation2 + $0xc2] sm:$0xff] }
 0x7c0   :  { %v3788_v37 = vadd.f32 %v11339_v5, %v3772_v55  ;;  %v4607_v55 = vld [vmem:[#allocation2 + $0xd2] sm:$0xff] }
 0x7c1   :  { %6913 = vmatmul.msk.f32.gmra.mxu3 %vm3821_vm0, %v11573_v4  ;;  %v11748_v46 = vpop.f32.mrf.mxu2 }
 0x7c2   :  { %v3804_v56 = vmax.f32 %v3788_v37, 0.0  ;;  %v11738_v57 = vpop.f32.mrf.mxu1  ;;  %6933 = vmatmul.msk.f32.gmra.mxu0 %vm3821_vm0, %v11210_v21  ;;  %14078 = vst [vmem:[#allocation268_spill] sm:$0xff] %v11748_v46  ;;  %v11791_v54 = vpop.f32.mrf.mxu3  ;;  %v4911_v46 = vld [vmem:[#allocation2 + $0x111] sm:$0xff] }
 0x7c3   :  { %6972 = vmatmul.msk.f32.gmra.mxu2 %vm3821_vm0, %v11573_v4 }
 0x7c4   :  { %v3820_v25 = vmax.f32 %v2875_v58, %v3804_v56  ;;  %v4608_v56 = vld [vmem:[#allocation2 + $0xe2] sm:$0xff] }
 0x7c5   :  { %6944 = vmatmul.msk.f32.gmra.mxu1 %vm3821_vm0, %v4602_v3 }
 0x7c6   :  { %3879 = vst.msk [vmem:[#allocation2 + $0x121] sm:$0xff] %vm3821_vm0, %v3820_v25 }
 0x7c7   :  { %v11746_v5 = vpop.f32.mrf.mxu0 }
 0x7c9   :  { %v11763_v38 = vpop.f32.mrf.mxu2 }
 0x7ca   :  { %v11750_v11 = vpop.f32.mrf.mxu1  ;;  %14079 = vst [vmem:[#allocation275_spill] sm:$0xff] %v11763_v38  ;;  %v11804_v60 = vpop.f32.mrf.mxu3 }
 0x7cd   :  { %6945 = vmatmul.msk.f32.gmra.mxu1 %vm3821_vm0, %v4603_v42  ;;  %v4312_v43 = vld [vmem:[#allocation2 + $0x120] sm:$0xff] }
 0x7ce   :  { %v11753_v21 = vld [vmem:[#allocation2 + $0x121] sm:$0xff]  ;;  %6914 = vmatmul.msk.f32.gmra.mxu3 %vm3821_vm0, %v4312_v43  ;;  %6973 = vmatmul.msk.f32.gmra.mxu2 %vm3821_vm0, %v4312_v43 }
 0x7cf   :  { %6934 = vmatmul.msk.f32.gmra.mxu0 %vm3821_vm0, %v11753_v21  ;;  %v11759_v4 = vpop.f32.mrf.mxu0 }
 0x7d1   :  { %v11776_v19 = vpop.f32.mrf.mxu2 }
 0x7d2   :  { %v11765_v45 = vpop.f32.mrf.mxu1  ;;  %14080 = vst [vmem:[#allocation251_spill] sm:$0xff] %v11776_v19  ;;  %v11817_v58 = vpop.f32.mrf.mxu3 }
 0x7d5   :  { %6946 = vmatmul.msk.f32.gmra.mxu1 %vm3821_vm0, %v4604_v40 }
 0x7d6   :  { %6979 = vmatmul.msk.f32.vlgmr.msrb.gmra.mxu3 %vm3821_vm0, %v11393_v22  ;;  %6974 = vmatmul.msk.f32.gmra.mxu2 %vm3821_vm0, %v4763_v9 }
 0x7d7   :  { %6999 = vmatmul.msk.f32.vlgmr.msra.gmra.mxu0 %vm3821_vm0, %v11634_v53  ;;  %v11772_v30 = vpop.f32.mrf.mxu0 }
 0x7d9   :  { %v11787_v53 = vpop.f32.mrf.mxu2 }
 0x7da   :  { %v11778_v15 = vpop.f32.mrf.mxu1  ;;  %14081 = vst [vmem:[#allocation170_spill] sm:$0xff] %v11787_v53  ;;  %v11829_v43 = vpop.f32.mrf.mxu3  ;;  %v11863_v53 = vld [vmem:[#allocation2 + $0x122] sm:$0xff] }
 0x7dd   :  { %6947 = vmatmul.msk.f32.gmra.mxu1 %vm3821_vm0, %v4605_v12 }
 0x7de   :  { %6980 = vmatmul.msk.f32.gmra.mxu3 %vm3821_vm0, %v11425_v18 }
 0x7df   :  { %7000 = vmatmul.msk.f32.gmra.mxu0 %vm3821_vm0, %v11668_v27  ;;  %v11785_v22 = vpop.f32.mrf.mxu0 }
 0x7e1   :  { %v11800_v27 = vpop.f32.mrf.mxu2 }
 0x7e2   :  { %v11789_v13 = vpop.f32.mrf.mxu1  ;;  %14083 = vst [vmem:[#allocation274_spill] sm:$0xff] %v11800_v27  ;;  %v4905_v27 = vld [vmem:[#allocation2 + $0x91] sm:$0xff] }
 0x7e3   :  { %14082 = vst [vmem:[#allocation240_spill] sm:$0xff] %v11789_v13 }
 0x7e5   :  { %6948 = vmatmul.msk.f32.gmra.mxu1 %vm3821_vm0, %v4606_v17 }
 0x7e6   :  { %6981 = vmatmul.msk.f32.gmra.mxu3 %vm3821_vm0, %v11455_v16 }
 0x7e7   :  { %7001 = vmatmul.msk.f32.gmra.mxu0 %vm3821_vm0, %v11703_v39  ;;  %v11798_v18 = vpop.f32.mrf.mxu0 }
 0x7e9   :  { %v11813_v39 = vpop.f32.mrf.mxu2 }
 0x7ea   :  { %v11802_v44 = vpop.f32.mrf.mxu1 }
 0x7eb   :  { %14084 = vst [vmem:[#allocation278_spill] sm:$0xff] %v11802_v44 }
 0x7ed   :  { %6949 = vmatmul.msk.f32.gmra.mxu1 %vm3821_vm0, %v4607_v55 }
 0x7ee   :  { %6982 = vmatmul.msk.f32.gmra.mxu3 %vm3821_vm0, %v11480_v0 }
 0x7ef   :  { %7002 = vmatmul.msk.f32.gmra.mxu0 %vm3821_vm0, %v4601_v62  ;;  %v11810_v16 = vpop.f32.mrf.mxu0 }
 0x7f1   :  { %v11825_v62 = vpop.f32.mrf.mxu2 }
 0x7f2   :  { %v11815_v37 = vpop.f32.mrf.mxu1 }
 0x7f3   :  { %14085 = vst [vmem:[#allocation210_spill] sm:$0xff] %v11815_v37 }
 0x7f5   :  { %6950 = vmatmul.msk.f32.gmra.mxu1 %vm3821_vm0, %v4608_v56 }
 0x7f6   :  { %6983 = vmatmul.msk.f32.gmra.mxu3 %vm3821_vm0, %v11505_v47 }
 0x7f7   :  { %7003 = vmatmul.msk.f32.gmra.mxu0 %vm3821_vm0, %v4602_v3  ;;  %v11823_v0 = vpop.f32.mrf.mxu0  ;;  %v11838_v3 = vpop.f32.mrf.mxu3 }
 0x7f9   :  { %v11840_v9 = vpop.f32.mrf.mxu2 }
 0x7fa   :  { %v11827_v25 = vpop.f32.mrf.mxu1  ;;  %14087 = vst [vmem:[#allocation289_spill] sm:$0xff] %v11840_v9 }
 0x7fb   :  { %14086 = vst [vmem:[#allocation288_spill] sm:$0xff] %v11827_v25 }
 0x7fd   :  { %6951 = vmatmul.msk.f32.gmra.mxu1 %vm3821_vm0, %v11243_v7 }
 0x7fe   :  { %6984 = vmatmul.msk.f32.gmra.mxu3 %vm3821_vm0, %v11530_v24 }
 0x7ff   :  { %7004 = vmatmul.msk.f32.gmra.mxu0 %vm3821_vm0, %v4603_v42  ;;  %v11836_v12 = vpop.f32.mrf.mxu0  ;;  %v5055_v42 = vld [vmem:[#allocation2 + $0x92] sm:$0xff] }
 0x801   :  { %v11853_v31 = vpop.f32.mrf.mxu2 }
 0x802   :  { %v4138_v47 = vpop.f32.mrf.mxu1 }
 0x805   :  { %6952 = vmatmul.msk.f32.gmra.mxu1 %vm3821_vm0, %v11360_v28 }
 0x806   :  { %6985 = vmatmul.msk.f32.gmra.mxu3 %vm3821_vm0, %v11548_v14 }
 0x807   :  { %7005 = vmatmul.msk.f32.gmra.mxu0 %vm3821_vm0, %v4604_v40  ;;  %v11847_v7 = vpop.f32.mrf.mxu0 }
 0x80a   :  { %v4141_v24 = vpop.f32.mrf.mxu1 }
 0x80c   :  { %v11849_v25 = vpop.f32.mrf.mxu3 }
 0x80d   :  { %6953 = vmatmul.msk.f32.gmra.mxu1 %vm3821_vm0, %v11376_v20 }
 0x80e   :  { %6986 = vmatmul.msk.f32.gmra.mxu3 %vm3821_vm0, %v4905_v27  ;;  %v11872_v27 = vpop.f32.mrf.mxu2 }
 0x80f   :  { %7006 = vmatmul.msk.f32.gmra.mxu0 %vm3821_vm0, %v5055_v42  ;;  %v11857_v9 = vpop.f32.mrf.mxu0 }
 0x810   :  { %14088 = vst [vmem:[#allocation65_spill] sm:$0xff] %v11857_v9  ;;  %v5059_v9 = vld [vmem:[#allocation2 + $0xf2] sm:$0xff] }
 0x812   :  { %v11859_v14 = vpop.f32.mrf.mxu1 }
 0x813   :  { %14089 = vst [vmem:[#allocation280_spill] sm:$0xff] %v11859_v14 }
 0x814   :  { %v11861_v40 = vpop.f32.mrf.mxu3 }
 0x815   :  { %14090 = vst [vmem:[#allocation60_spill] sm:$0xff] %v11861_v40  ;;  %6954 = vmatmul.msk.f32.gmra.mxu1 %vm3821_vm0, %v11863_v53 }
 0x816   :  { %6987 = vmatmul.msk.f32.gmra.mxu3 %vm3821_vm0, %v11593_v50  ;;  %v11883_v44 = vpop.f32.mrf.mxu2 }
 0x817   :  { %7007 = vmatmul.msk.f32.gmra.mxu0 %vm3821_vm0, %v4606_v17  ;;  %v11870_v19 = vpop.f32.mrf.mxu0 }
 0x818   :  { %14091 = vst [vmem:[#allocation292_spill] sm:$0xff] %v11870_v19  ;;  %v4908_v19 = vld [vmem:[#allocation2 + $0xe1] sm:$0xff] }
 0x81a   :  { %v11874_v42 = vpop.f32.mrf.mxu1 }
 0x81c   :  { %v11876_v37 = vpop.f32.mrf.mxu3 }
 0x81d   :  { %14092 = vst [vmem:[#allocation312_spill] sm:$0xff] %v11876_v37 }
 0x81e   :  { %6988 = vmatmul.msk.f32.gmra.mxu3 %vm3821_vm0, %v11624_v1  ;;  %v11895_v1 = vpop.f32.mrf.mxu2 }
 0x81f   :  { %7008 = vmatmul.msk.f32.gmra.mxu0 %vm3821_vm0, %v4607_v55  ;;  %v11881_v14 = vpop.f32.mrf.mxu0 }
 0x820   :  { %14093 = vst [vmem:[#allocation255_spill] sm:$0xff] %v11881_v14  ;;  %v4909_v14 = vld [vmem:[#allocation2 + $0xf1] sm:$0xff] }
 0x822   :  { %v11885_v50 = vpop.f32.mrf.mxu1 }
 0x824   :  { %v11887_v17 = vpop.f32.mrf.mxu3 }
 0x825   :  { %14094 = vst [vmem:[#allocation295_spill] sm:$0xff] %v11887_v17  ;;  %v4112_v17 = vadd.f32 %v11723_v2, %v11494_v59  ;;  %v4139_v2 = vadd.f32 %v4138_v47, %v11731_v35 }
 0x826   :  { %6989 = vmatmul.msk.f32.gmra.mxu3 %vm3821_vm0, %v4908_v19  ;;  %v4846_v40 = vpop.f32.mrf.mxu2 }
 0x827   :  { %7009 = vmatmul.msk.f32.gmra.mxu0 %vm3821_vm0, %v4608_v56  ;;  %v11891_v8 = vpop.f32.mrf.mxu0 }
 0x828   :  { %14095 = vst [vmem:[#allocation237_spill] sm:$0xff] %v11891_v8  ;;  %v4285_v8 = vadd.f32 %v11647_v52, %v4112_v17 }
 0x82a   :  { %v11893_v37 = vpop.f32.mrf.mxu1  ;;  %v4435_v59 = vadd.f32 %v11817_v58, %v4285_v8 }
 0x82c   :  { %v11897_v55 = vpop.f32.mrf.mxu3 }
 0x82d   :  { %14096 = vst [vmem:[#allocation282_spill] sm:$0xff] %v11897_v55  ;;  %v4294_v55 = vadd.f32 %v11813_v39, %v4139_v2 }
 0x82e   :  { %6990 = vmatmul.msk.f32.gmra.mxu3 %vm3821_vm0, %v4909_v14  ;;  %v4585_v14 = vadd.f32 %v11810_v16, %v4435_v59 }
 0x82f   :  { %7010 = vmatmul.msk.f32.gmra.mxu0 %vm3821_vm0, %v5059_v9  ;;  %v11903_v19 = vpop.f32.mrf.mxu0  ;;  %v4115_v9 = vadd.f32 %v11738_v57, %v11520_v41  ;;  %v4118_v41 = vadd.f32 %v11750_v11, %v11540_v33  ;;  %v4849_v57 = vpop.f32.mrf.mxu2  ;;  %v4121_v33 = vadd.f32 %v11765_v45, %v11556_v32 }
 0x830   :  { %14097 = vst [vmem:[#allocation287_spill] sm:$0xff] %v11903_v19 }
 0x831   :  { %v4286_v17 = vadd.f32 %v11683_v51, %v4115_v9  ;;  %v4142_v51 = vadd.f32 %v4141_v24, %v11746_v5 }
 0x832   :  { %v11905_v56 = vpop.f32.mrf.mxu1 }
 0x833   :  { %v4436_v8 = vadd.f32 %v11829_v43, %v4286_v17  ;;  %v4295_v47 = vadd.f32 %v11825_v62, %v4142_v51  ;;  %v4288_v43 = vadd.f32 %v11733_v23, %v4121_v33  ;;  %v14101_v51 = vld [vmem:[#allocation156_spill] sm:$0xff]  ;;  %v14104_v33 = vld [vmem:[#allocation187_spill] sm:$0xff] }
 0x834   :  { %v11908_v38 = vpop.f32.mrf.mxu3 }
 0x835   :  { %14098 = vst [vmem:[#allocation299_spill] sm:$0xff] %v11908_v38  ;;  %v4586_v16 = vadd.f32 %v11823_v0, %v4436_v8  ;;  %v4438_v32 = vadd.f32 %v11849_v25, %v4288_v43 }
 0x836   :  { %6991 = vmatmul.msk.f32.gmra.mxu3 %vm3821_vm0, %v11358_v10 }
 0x837   :  { %7011 = vmatmul.msk.f32.gmra.mxu0 %vm3821_vm0, %v11360_v28  ;;  %v4572_v19 = vpop.f32.mrf.mxu0  ;;  %v4852_v0 = vpop.f32.mrf.mxu2  ;;  %v4588_v23 = vadd.f32 %v11847_v7, %v4438_v32  ;;  %v4106_v7 = vadd.f32 %v11659_v6, %v14101_v51  ;;  %v14103_v6 = vld [vmem:[#allocation144_spill] sm:$0xff] }
 0x838   :  { %v12038_v51 = vld [vmem:[%s13289_s5 + $0x68] sm:$0xff] }
 0x83a   :  { %v4695_v52 = vpop.f32.mrf.mxu1 }
 0x83b   :  { %v4735_v38 = vadd.f32 %v4695_v52, %v4585_v14  ;;  %v14100_v14 = vld [vmem:[#allocation153_spill] sm:$0xff] }
 0x83c   :  { %v4422_v10 = vpop.f32.mrf.mxu3 }
 0x83d   :  { %v4444_v13 = vadd.f32 %v4422_v10, %v4294_v55  ;;  %v11921_v28 = vadd.f32 %v4846_v40, %v4735_v38  ;;  %v4287_v38 = vadd.f32 %v11716_v61, %v4118_v41 }
 0x83e   :  { %6992 = vmatmul.msk.f32.gmra.mxu3 %vm3821_vm0, %v4911_v46 }
 0x83f   :  { %7012 = vmatmul.msk.f32.gmra.mxu0 %vm3821_vm0, %v11376_v20  ;;  %v11930_v35 = vadd.f32 %v4572_v19, %v4444_v13  ;;  %v4575_v58 = vpop.f32.mrf.mxu0  ;;  %v4437_v5 = vadd.f32 %v11838_v3, %v4287_v38  ;;  %v4100_v13 = vadd.f32 %v11595_v48, %v11374_v36  ;;  %v5063_v19 = vld [vmem:[#allocation2 + $0x132] sm:$0xff]  ;;  %v4855_v17 = vpop.f32.mrf.mxu2 }
 0x840   :  { %v14099_v36 = vld [vmem:[#allocation142_spill] sm:$0xff] }
 0x841   :  { %v4587_v11 = vadd.f32 %v11836_v12, %v4437_v5  ;;  %v4281_v3 = vadd.f32 %v11536_v49, %v4100_v13  ;;  %v4103_v48 = vadd.f32 %v11626_v26, %v14099_v36 }
 0x842   :  { %v4698_v39 = vpop.f32.mrf.mxu1 }
 0x843   :  { %v4736_v46 = vadd.f32 %v4698_v39, %v4586_v16  ;;  %v4431_v9 = vadd.f32 %v11761_v29, %v4281_v3  ;;  %v4282_v52 = vadd.f32 %v14100_v14, %v4103_v48 }
 0x844   :  { %v4425_v20 = vpop.f32.mrf.mxu3 }
 0x845   :  { %v4445_v40 = vadd.f32 %v4425_v20, %v4295_v47  ;;  %v11935_v55 = vadd.f32 %v4849_v57, %v4736_v46  ;;  %v4581_v49 = vadd.f32 %v11759_v4, %v4431_v9  ;;  %v4432_v26 = vadd.f32 %v11774_v63, %v4282_v52  ;;  %v11978_v4 = vld [vmem:[%s13289_s5 + $0x70] sm:$0xff] }
 0x846   :  { %6993 = vmatmul.msk.f32.gmra.mxu3 %vm3821_vm0, %v11753_v21  ;;  %5288 = vmatpush.msrb.mxu1 %v11978_v4 }
 0x847   :  { %7013 = vmatmul.msk.f32.gmra.mxu0 %vm3821_vm0, %v11863_v53  ;;  %v11944_v61 = vadd.f32 %v4575_v58, %v4445_v40  ;;  %v4913_v53 = vld [vmem:[#allocation2 + $0x131] sm:$0xff]  ;;  %v4731_v41 = vadd.f32 %v11874_v42, %v4581_v49  ;;  %v4582_v29 = vadd.f32 %v11772_v30, %v4432_v26  ;;  %v14102_v42 = vld [vmem:[#allocation261_spill] sm:$0xff]  ;;  %v4109_v30 = vadd.f32 %v11692_v34, %v14103_v6  ;;  %v12069_v6 = vld [vmem:[%s13289_s5 + $0x40] sm:$0xff] }
 0x848   :  { %v4283_v58 = vadd.f32 %v14102_v42, %v4106_v7  ;;  %6080 = vmatpush.msrb.mxu0 %v11978_v4  ;;  %v12026_v26 = vld [vmem:[%s13289_s5 + $0xf0] sm:$0xff]  ;;  %v12043_v7 = vld [vmem:[%s13289_s5 + $0xe0] sm:$0xff] }
 0x849   :  { %v4882_v57 = vadd.f32 %v11853_v31, %v4731_v41  ;;  %v4732_v39 = vadd.f32 %v11885_v50, %v4582_v29  ;;  %v11988_v31 = vld [vmem:[%s13288_s4] ss:$0 sm:$0xff]  ;;  %v4284_v5 = vadd.f32 %v14104_v33, %v4109_v30  ;;  %v12021_v41 = vld [vmem:[%s13289_s5 + $0x78] sm:$0xff]  ;;  %5367 = vmatpush.msra.mxu3 %v12026_v26  ;;  %v12047_v29 = vpop.f32.mrf.mxu2  ;;  %v12074_v30 = vld [vmem:[%s13289_s5 + $0x48] sm:$0xff] }
 0x84a   :  { %v4701_v62 = vpop.f32.mrf.mxu1  ;;  %v4433_v47 = vadd.f32 %v11791_v54, %v4283_v58  ;;  %5308 = vmatpush.msra.mxu2 %v12021_v41  ;;  %14106 = vst [vmem:[#allocation316_spill] sm:$0xff] %v12074_v30  ;;  %v12108_v33 = vld [vmem:[%s13289_s5 + $0x20] sm:$0xff] }
 0x84b   :  { %v4737_v21 = vadd.f32 %v4701_v62, %v4587_v11  ;;  %v4883_v50 = vadd.f32 %v11872_v27, %v4732_v39  ;;  %v4434_v43 = vadd.f32 %v11804_v60, %v4284_v5  ;;  %5368 = vmatpush.msra.mxu3 %v12043_v7  ;;  %v12058_v39 = vld [vmem:[%s13289_s5 + $0xd0] sm:$0xff]  ;;  %v12113_v5 = vld [vmem:[%s13289_s5 + $0x28] sm:$0xff] }
 0x84c   :  { %v11950_v24 = vpop.f32.mrf.mxu0  ;;  %v4583_v11 = vadd.f32 %v11785_v22, %v4433_v47  ;;  %5309 = vmatpush.msra.mxu2 %v12038_v51  ;;  %14105 = vst [vmem:[#allocation87_spill] sm:$0xff] %v12058_v39  ;;  %v12093_v47 = vld [vmem:[%s13289_s5 + $0x38] sm:$0xff] }
 0x84d   :  { %v11953_v45 = vadd.f32 %v4852_v0, %v4737_v21  ;;  %v4584_v54 = vadd.f32 %v11798_v18, %v4434_v43  ;;  %5369 = vmatpush.msra.mxu3 %v12058_v39  ;;  %14108 = vst [vmem:[#allocation304_spill] sm:$0xff] %v12093_v47 }
 0x84e   :  { %6994 = vmatmul.msk.f32.gmra.mxu3 %vm3821_vm0, %v4913_v53  ;;  %v4733_v0 = vadd.f32 %v11893_v37, %v4583_v11  ;;  %v12006_v37 = vld [vmem:[%s13289_s5 + $0x60] sm:$0xff]  ;;  %14110 = vst [vmem:[#allocation62_spill] sm:$0xff] %v12113_v5 }
 0x84f   :  { %7014 = vmatmul.msk.f32.gmra.mxu0 %vm3821_vm0, %v5063_v19  ;;  %v4734_v22 = vadd.f32 %v11905_v56, %v4584_v54  ;;  %5289 = vmatpush.msrb.mxu1 %v12006_v37  ;;  %v12118_v11 = vld [vmem:[%s13289_s5 + $0xa0] sm:$0xff] }
 0x850   :  { %v4884_v32 = vadd.f32 %v11883_v44, %v4733_v0  ;;  %6081 = vmatpush.msrb.mxu0 %v12006_v37  ;;  %14111 = vst [vmem:[#allocation291_spill] sm:$0xff] %v12118_v11  ;;  %v14112_v0 = vld [vmem:[#allocation190_spill] sm:$0xff] }
 0x851   :  { %v11960_v12 = vpop.f32.mrf.mxu3  ;;  %v4885_v60 = vadd.f32 %v11895_v1, %v4734_v22  ;;  %v12153_v22 = vld [vmem:[%s13289_s5] sm:$0xff] }
 0x852   :  { %v4704_v59 = vpop.f32.mrf.mxu1 }
 0x853   :  { %v4738_v2 = vadd.f32 %v4704_v59, %v4588_v23 }
 0x854   :  { %v5134_v25 = vpop.f32.mrf.mxu0 }
 0x855   :  { %v11966_v10 = vadd.f32 %v4855_v17, %v4738_v2 }
 0x859   :  { %v4984_v8 = vpop.f32.mrf.mxu3 }
 0x85a   :  { %v5032_v38 = vadd.f32 %v4984_v8, %v4882_v57  ;;  %v12013_v14 = vpop.f32.mrf.mxu1 }
 0x85c   :  { %v5137_v16 = vpop.f32.mrf.mxu0  ;;  %v5182_v63 = vadd.f32 %v5134_v25, %v5032_v38 }
 0x85e   :  { %v5202_v13 = vadd.f32 %v11988_v31, %v5182_v63 }
 0x860   :  { %v5218_v21 = vmax.f32 %v5202_v13, 0.0 }
 0x861   :  { %v4987_v46 = vpop.f32.mrf.mxu3 }
 0x862   :  { %v5033_v20 = vadd.f32 %v4987_v46, %v4883_v50  ;;  %v12063_v42 = vpop.f32.mrf.mxu1  ;;  %v12088_v46 = vld [vmem:[%s13289_s5 + $0x30] sm:$0xff] }
 0x864   :  { %v5140_v40 = vpop.f32.mrf.mxu0  ;;  %v5183_v34 = vadd.f32 %v5137_v16, %v5033_v20  ;;  %v12053_v16 = vld [vmem:[%s13289_s5 + $0x58] sm:$0xff]  ;;  %v12098_v20 = vld [vmem:[%s13289_s5 + $0xb0] sm:$0xff] }
 0x865   :  { %5310 = vmatpush.msra.mxu2 %v12053_v16  ;;  %14109 = vst [vmem:[#allocation173_spill] sm:$0xff] %v12098_v20 }
 0x866   :  { %v5203_v62 = vadd.f32 %v11988_v31, %v5183_v34 }
 0x867   :  { %5311 = vmatpush.msra.mxu2 %v12074_v30 }
 0x868   :  { %v5219_v27 = vmax.f32 %v5203_v62, 0.0  ;;  %v4124_v62 = vadd.f32 %v11778_v15, %v14112_v0  ;;  %v12244_v0 = vld [vmem:[%s13289_s5 + $0x148] sm:$0xff] }
 0x869   :  { %v4990_v53 = vpop.f32.mrf.mxu3  ;;  %5312 = vmatpush.msra.mxu2 %v12093_v47  ;;  %14130 = vst [vmem:[#allocation42_spill] sm:$0xff] %v12244_v0  ;;  %v14154_v47 = vld [vmem:[#allocation288_spill] sm:$0xff] }
 0x86a   :  { %v11999_v19 = vmax.f32 %v5218_v21, %v5219_v27  ;;  %v5034_v36 = vadd.f32 %v4990_v53, %v4884_v32  ;;  %v12129_v21 = vld [vmem:[%s13289_s5 + $0x10] sm:$0xff]  ;;  %v12134_v27 = vld [vmem:[%s13289_s5 + $0x18] sm:$0xff]  ;;  %v12147_v32 = vpop.f32.mrf.mxu2 }
 0x86b   :  { %5313 = vmatpush.msra.mxu2 %v12113_v5  ;;  %14113 = vst [vmem:[#allocation51_spill] sm:$0xff] %v12134_v27  ;;  %v12139_v53 = vld [vmem:[%s13289_s5 + $0x90] sm:$0xff] }
 0x86c   :  { %v5143_v3 = vpop.f32.mrf.mxu0  ;;  %v5184_v48 = vadd.f32 %v5140_v40, %v5034_v36  ;;  %14114 = vst [vmem:[#allocation311_spill] sm:$0xff] %v12139_v53  ;;  %v12158_v36 = vld [vmem:[%s13289_s5 + $0x8] sm:$0xff] }
 0x86d   :  { %5314 = vmatpush.msra.mxu2 %v12134_v27  ;;  %14115 = vst [vmem:[#allocation269_spill] sm:$0xff] %v12158_v36 }
 0x86e   :  { %v5204_v44 = vadd.f32 %v11988_v31, %v5184_v48  ;;  %v12171_v48 = vld [vmem:[%s13289_s5 + $0xf8] sm:$0xff] }
 0x86f   :  { %5315 = vmatpush.msra.mxu2 %v12158_v36 }
 0x870   :  { %v5220_v2 = vmax.f32 %v5204_v44, 0.0  ;;  %v12186_v44 = vld [vmem:[%s13289_s5 + $0x178] sm:$0xff] }
 0x871   :  { %v4993_v18 = vpop.f32.mrf.mxu3  ;;  %14119 = vst [vmem:[#allocation89_spill] sm:$0xff] %v12186_v44 }
 0x872   :  { %v5035_v23 = vadd.f32 %v4993_v18, %v4885_v60  ;;  %v12176_v60 = vld [vmem:[%s13289_s5 + $0x170] sm:$0xff]  ;;  %v14118_v18 = vld [vmem:[#allocation268_spill] sm:$0xff] }
 0x873   :  { %14117 = vst [vmem:[#allocation290_spill] sm:$0xff] %v12176_v60  ;;  %5446 = vmatpush.msrb.mxu2 %v12176_v60 }
 0x874   :  { %v5146_v9 = vpop.f32.mrf.mxu0  ;;  %v5185_v59 = vadd.f32 %v5143_v3, %v5035_v23  ;;  %v4289_v23 = vadd.f32 %v14118_v18, %v4124_v62 }
 0x876   :  { %v5205_v56 = vadd.f32 %v11988_v31, %v5185_v59 }
 0x878   :  { %v5221_v25 = vmax.f32 %v5205_v56, 0.0  ;;  %v12193_v56 = vld [vmem:[%s13289_s5 + $0xe8] sm:$0xff] }
 0x879   :  { %v4996_v52 = vpop.f32.mrf.mxu3 }
 0x87a   :  { %v12015_v49 = vmax.f32 %v5220_v2, %v5221_v25  ;;  %v5036_v1 = vadd.f32 %v4996_v52, %v11921_v28  ;;  %v12033_v28 = vld [vmem:[%s13289_s5 + $0x50] sm:$0xff]  ;;  %v12198_v2 = vld [vmem:[%s13289_s5 + $0x160] sm:$0xff]  ;;  %v12203_v25 = vld [vmem:[%s13289_s5 + $0x168] sm:$0xff] }
 0x87b   :  { %5290 = vmatpush.msrb.mxu1 %v12033_v28  ;;  %6082 = vmatpush.msrb.mxu0 %v12033_v28  ;;  %14120 = vst [vmem:[#allocation313_spill] sm:$0xff] %v12198_v2  ;;  %v14122_v52 = vld [vmem:[#allocation161_spill] sm:$0xff] }
 0x87c   :  { %v5149_v17 = vpop.f32.mrf.mxu0  ;;  %v5186_v8 = vadd.f32 %v5146_v9, %v5036_v1  ;;  %v12179_v9 = vpop.f32.mrf.mxu1  ;;  %14121 = vst [vmem:[#allocation263_spill] sm:$0xff] %v12203_v25  ;;  %v14123_v1 = vld [vmem:[#allocation240_spill] sm:$0xff]  ;;  %5447 = vmatpush.msrb.mxu2 %v12198_v2 }
 0x87d   :  { %5291 = vmatpush.msrb.mxu1 %v12069_v6  ;;  %6083 = vmatpush.msrb.mxu0 %v12069_v6 }
 0x87e   :  { %v5206_v63 = vadd.f32 %v11988_v31, %v5186_v8  ;;  %v14124_v8 = vld [vmem:[#allocation60_spill] sm:$0xff] }
 0x87f   :  { %5292 = vmatpush.msrb.mxu1 %v12088_v46  ;;  %6084 = vmatpush.msrb.mxu0 %v12088_v46 }
 0x880   :  { %v5222_v13 = vmax.f32 %v5206_v63, 0.0  ;;  %v12224_v63 = vld [vmem:[%s13289_s5 + $0x158] sm:$0xff] }
 0x881   :  { %v4999_v57 = vpop.f32.mrf.mxu3  ;;  %5293 = vmatpush.msrb.mxu1 %v12108_v33  ;;  %6085 = vmatpush.msrb.mxu0 %v12108_v33  ;;  %14127 = vst [vmem:[#allocation49_spill] sm:$0xff] %v12224_v63 }
 0x882   :  { %v5037_v38 = vadd.f32 %v4999_v57, %v11935_v55  ;;  %v12079_v55 = vld [vmem:[%s13289_s5 + $0xc0] sm:$0xff]  ;;  %v4439_v57 = vadd.f32 %v14124_v8, %v4289_v23  ;;  %v12268_v8 = vld [vmem:[%s13289_s5 + $0x138] sm:$0xff] }
 0x883   :  { %14107 = vst [vmem:[#allocation281_spill] sm:$0xff] %v12079_v55  ;;  %5370 = vmatpush.msra.mxu3 %v12079_v55  ;;  %5294 = vmatpush.msrb.mxu1 %v12129_v21 }
 0x884   :  { %v5152_v58 = vpop.f32.mrf.mxu0  ;;  %v5187_v50 = vadd.f32 %v5149_v17, %v5037_v38  ;;  %6086 = vmatpush.msrb.mxu0 %v12129_v21  ;;  %v4127_v17 = vadd.f32 %v14123_v1, %v14122_v52  ;;  %v12214_v38 = vld [vmem:[%s13289_s5 + $0xd8] sm:$0xff]  ;;  %14135 = vst [vmem:[#allocation145_spill] sm:$0xff] %v12268_v8 }
 0x885   :  { %5371 = vmatpush.msra.mxu3 %v12098_v20  ;;  %5295 = vmatpush.msrb.mxu1 %v12153_v22  ;;  %14125 = vst [vmem:[#allocation272_spill] sm:$0xff] %v12214_v38  ;;  %v12258_v1 = vld [vmem:[%s13289_s5 + $0xb8] sm:$0xff] }
 0x886   :  { %v5207_v40 = vadd.f32 %v11988_v31, %v5187_v50  ;;  %6087 = vmatpush.msrb.mxu0 %v12153_v22  ;;  %14133 = vst [vmem:[#allocation293_spill] sm:$0xff] %v12258_v1 }
 0x887   :  { %5372 = vmatpush.msra.mxu3 %v12118_v11  ;;  %5387 = vmatpush.msra.mxu1 %v12171_v48  ;;  %v5481_v11 = vsel %vm5480_vm5, %v11999_v19, -inf }
 0x888   :  { %v5223_v34 = vmax.f32 %v5207_v40, 0.0  ;;  %6202 = vmatpush.msra.mxu0 %v12176_v60  ;;  %v12316_v60 = vld [vmem:[%s13289_s5 + $0x110] sm:$0xff] }
 0x889   :  { %v5002_v43 = vpop.f32.mrf.mxu3  ;;  %5373 = vmatpush.msra.mxu3 %v12139_v53  ;;  %5388 = vmatpush.msra.mxu1 %v12193_v56  ;;  %14143 = vst [vmem:[#allocation310_spill] sm:$0xff] %v12316_v60 }
 0x88a   :  { %v12142_v15 = vmax.f32 %v5222_v13, %v5223_v34  ;;  %v5038_v54 = vadd.f32 %v5002_v43, %v11953_v45  ;;  %v12163_v45 = vld [vmem:[%s13289_s5 + $0x80] sm:$0xff]  ;;  %v12234_v13 = vld [vmem:[%s13289_s5 + $0xc8] sm:$0xff]  ;;  %6203 = vmatpush.msra.mxu0 %v12198_v2 }
 0x88b   :  { %14116 = vst [vmem:[#allocation300_spill] sm:$0xff] %v12163_v45  ;;  %5374 = vmatpush.msra.mxu3 %v12163_v45  ;;  %5389 = vmatpush.msra.mxu1 %v12214_v38  ;;  %v12239_v34 = vld [vmem:[%s13289_s5 + $0x140] sm:$0xff]  ;;  %v14132_v43 = vld [vmem:[#allocation65_spill] sm:$0xff] }
 0x88c   :  { %v5155_v3 = vpop.f32.mrf.mxu0  ;;  %v5188_v59 = vadd.f32 %v5152_v58, %v5038_v54  ;;  %v12219_v58 = vld [vmem:[%s13289_s5 + $0x150] sm:$0xff]  ;;  %14128 = vst [vmem:[#allocation70_spill] sm:$0xff] %v12234_v13  ;;  %v4589_v54 = vadd.f32 %v14132_v43, %v4439_v57  ;;  %v12271_v57 = vpop.f32.mrf.mxu2  ;;  %v12294_v43 = vld [vmem:[%s13289_s5 + $0x128] sm:$0xff] }
 0x88d   :  { %5466 = vmatpush.msrb.mxu3 %v12186_v44  ;;  %14126 = vst [vmem:[#allocation193_spill] sm:$0xff] %v12219_v58  ;;  %5448 = vmatpush.msrb.mxu2 %v12219_v58  ;;  %v12311_v44 = vld [vmem:[%s13289_s5 + $0x98] sm:$0xff] }
 0x88e   :  { %14129 = vst [vmem:[#allocation57_spill] sm:$0xff] %v12239_v34  ;;  %5390 = vmatpush.msra.mxu1 %v12234_v13  ;;  %v5208_v23 = vadd.f32 %v11988_v31, %v5188_v59  ;;  %6204 = vmatpush.msra.mxu0 %v12219_v58  ;;  %v14147_v58 = vld [vmem:[#allocation292_spill] sm:$0xff]  ;;  %v14155_v13 = vld [vmem:[#allocation295_spill] sm:$0xff] }
 0x88f   :  { %5467 = vmatpush.msrb.mxu3 %v12203_v25  ;;  %5449 = vmatpush.msrb.mxu2 %v12239_v34  ;;  %14139 = vst [vmem:[#allocation276_spill] sm:$0xff] %v12294_v43 }
 0x890   :  { %5391 = vmatpush.msra.mxu1 %v12258_v1  ;;  %v5224_v25 = vmax.f32 %v5208_v23, 0.0  ;;  %14142 = vst [vmem:[#allocation148_spill] sm:$0xff] %v12311_v44  ;;  %v14145_v23 = vld [vmem:[#allocation225_spill] sm:$0xff]  ;;  %6205 = vmatpush.msra.mxu0 %v12239_v34  ;;  %v14152_v34 = vld [vmem:[#allocation170_spill] sm:$0xff] }
 0x891   :  { %v5005_v50 = vpop.f32.mrf.mxu3  ;;  %5468 = vmatpush.msrb.mxu3 %v12224_v63 }
 0x892   :  { %v5039_v40 = vadd.f32 %v5005_v50, %v11966_v10  ;;  %v14131_v10 = vld [vmem:[#allocation275_spill] sm:$0xff]  ;;  %v4739_v50 = vadd.f32 %v12013_v14, %v4589_v54  ;;  %v5323_v54 = vsel %vm5322_vm3, %v11999_v19, -inf }
 0x893   :  { %v4290_v62 = vadd.f32 %v14131_v10, %v4127_v17  ;;  %5469 = vmatpush.msrb.mxu3 %v12244_v0  ;;  %v12263_v17 = vld [vmem:[%s13289_s5 + $0x130] sm:$0xff]  ;;  %v12289_v14 = vld [vmem:[%s13289_s5 + $0x120] sm:$0xff]  ;;  %v5324_v27 = vrot.slane %v5323_v54, 4 }
 0x894   :  { %v12248_v18 = vpop.f32.mrf.mxu0  ;;  %v5189_v52 = vadd.f32 %v5155_v3, %v5039_v40  ;;  %14134 = vst [vmem:[#allocation303_spill] sm:$0xff] %v12263_v17  ;;  %v14136_v3 = vld [vmem:[#allocation312_spill] sm:$0xff]  ;;  %v5243_v40 = vsel %vm5242_vm2, %v11999_v19, -inf  ;;  %5450 = vmatpush.msrb.mxu2 %v12263_v17  ;;  %v14141_v0 = vld [vmem:[#allocation278_spill] sm:$0xff]  ;;  %v4890_v36 = vadd.f32 %v12047_v29, %v4739_v50  ;;  %6206 = vmatpush.msra.mxu0 %v12263_v17  ;;  %v14151_v50 = vld [vmem:[#allocation251_spill] sm:$0xff] }
 0x895   :  { %v4440_v59 = vadd.f32 %v14136_v3, %v4290_v62  ;;  %5470 = vmatpush.msrb.mxu3 %v12268_v8  ;;  %v12284_v62 = vld [vmem:[%s13289_s5 + $0xa8] sm:$0xff]  ;;  %14138 = vst [vmem:[#allocation271_spill] sm:$0xff] %v12289_v14  ;;  %v12300_v3 = vpop.f32.mrf.mxu1  ;;  %v14140_v8 = vld [vmem:[#allocation214_spill] sm:$0xff]  ;;  %v5244_v45 = vrot.slane %v5243_v40, 4  ;;  %v5325_v1 = vmax.f32 %v5323_v54, %v5324_v27 }
 0x896   :  { %v5209_v10 = vadd.f32 %v11988_v31, %v5189_v52  ;;  %14137 = vst [vmem:[#allocation265_spill] sm:$0xff] %v12284_v62  ;;  %v5402_v52 = vsel %vm5401_vm4, %v11999_v19, -inf  ;;  %5392 = vmatpush.msra.mxu1 %v12284_v62  ;;  %v4130_v63 = vadd.f32 %v14141_v0, %v14140_v8  ;;  %5451 = vmatpush.msrb.mxu2 %v12289_v14  ;;  %v12321_v0 = vld [vmem:[%s13289_s5 + $0x118] sm:$0xff]  ;;  %v12338_v29 = vld [vmem:[%s13289_s5 + $0x88] sm:$0xff] }
 0x897   :  { %5471 = vmatpush.msrb.mxu3 %v12294_v43  ;;  %14144 = vst [vmem:[#allocation69_spill] sm:$0xff] %v12321_v0  ;;  %v14146_v8 = vld [vmem:[#allocation210_spill] sm:$0xff]  ;;  %v4590_v43 = vadd.f32 %v14147_v58, %v4440_v59  ;;  %v5403_v62 = vrot.slane %v5402_v52, 4  ;;  %v12343_v58 = vld [vmem:[%s13289_s5 + $0x100] sm:$0xff]  ;;  %v12348_v19 = vld [vmem:[%s13289_s5 + $0x108] sm:$0xff]  ;;  %6207 = vmatpush.msra.mxu0 %v12289_v14 }
 0x898   :  { %v5225_v2 = vmax.f32 %v5209_v10, 0.0  ;;  %v4133_v10 = vadd.f32 %v14146_v8, %v14145_v23  ;;  %5393 = vmatpush.msra.mxu1 %v12311_v44  ;;  %5452 = vmatpush.msrb.mxu2 %v12316_v60  ;;  %14148 = vst [vmem:[#allocation284_spill] sm:$0xff] %v12338_v29  ;;  %v4291_v23 = vadd.f32 %v14151_v50, %v4130_v63  ;;  %v5482_v8 = vrot.slane %v5481_v11, 4  ;;  %v14158_v63 = vld [vmem:[#allocation282_spill] sm:$0xff] }
 0x899   :  { %v5008_v53 = vpop.f32.mrf.mxu3  ;;  %5472 = vmatpush.msrb.mxu3 %v12321_v0  ;;  %14149 = vst [vmem:[#allocation286_spill] sm:$0xff] %v12343_v58  ;;  %v5245_v0 = vmax.f32 %v5243_v40, %v5244_v45  ;;  %v5404_v20 = vmax.f32 %v5402_v52, %v5403_v62  ;;  %6208 = vmatpush.msra.mxu0 %v12316_v60 }
 0x89a   :  { %v12331_v5 = vmax.f32 %v5224_v25, %v5225_v2  ;;  %14150 = vst [vmem:[#allocation58_spill] sm:$0xff] %v12348_v19  ;;  %5394 = vmatpush.msra.mxu1 %v12338_v29  ;;  %v4740_v25 = vadd.f32 %v12063_v42, %v4590_v43  ;;  %v5040_v59 = vadd.f32 %v5008_v53, %v4890_v36  ;;  %v14153_v29 = vld [vmem:[#allocation200_spill] sm:$0xff]  ;;  %v4867_v53 = vpop.f32.mrf.mxu2  ;;  %v14156_v36 = vld [vmem:[#allocation211_spill] sm:$0xff] }
 0x89b   :  { %5453 = vmatpush.msrb.mxu2 %v12343_v58  ;;  %5473 = vmatpush.msrb.mxu3 %v12348_v19  ;;  %v4292_v44 = vadd.f32 %v14152_v34, %v4133_v10  ;;  %v4136_v17 = vadd.f32 %v14154_v47, %v14153_v29  ;;  %v4441_v42 = vadd.f32 %v14155_v13, %v4291_v23  ;;  %v14157_v43 = vld [vmem:[#allocation280_spill] sm:$0xff]  ;;  %v5246_v62 = vrot.slane %v5245_v0, 2  ;;  %v14159_v10 = vld [vmem:[#allocation274_spill] sm:$0xff]  ;;  %v14160_v23 = vld [vmem:[#allocation255_spill] sm:$0xff] }
 0x89c   :  { %v5161_v2 = vpop.f32.mrf.mxu0  ;;  %v4145_v19 = vadd.f32 %v14157_v43, %v14156_v36  ;;  %v5190_v45 = vadd.f32 %v12248_v18, %v5040_v59  ;;  %v4891_v40 = vadd.f32 %v12147_v32, %v4740_v25  ;;  %v5483_v54 = vmax.f32 %v5481_v11, %v5482_v8  ;;  %6209 = vmatpush.msra.mxu0 %v12343_v58  ;;  %v14161_v43 = vld [vmem:[#allocation289_spill] sm:$0xff]  ;;  %v14163_v59 = vld [vmem:[#allocation299_spill] sm:$0xff] }
 0x89d   :  { %v4442_v50 = vadd.f32 %v14158_v63, %v4292_v44  ;;  %v4719_v34 = vpop.f32.mrf.mxu1  ;;  %v5326_v13 = vrot.slane %v5325_v1, 2  ;;  %v5405_v52 = vrot.slane %v5404_v20, 2  ;;  %v4293_v29 = vadd.f32 %v14159_v10, %v4136_v17  ;;  %v14162_v63 = vld [vmem:[#allocation237_spill] sm:$0xff] }
 0x89e   :  { %v4591_v60 = vadd.f32 %v14160_v23, %v4441_v42  ;;  %v4296_v44 = vadd.f32 %v14161_v43, %v4145_v19  ;;  %v5210_v32 = vadd.f32 %v11988_v31, %v5190_v45  ;;  %v5247_v8 = vmax.f32 %v5245_v0, %v5246_v62  ;;  %v14164_v45 = vld [vmem:[#allocation287_spill] sm:$0xff] }
 0x89f   :  { %v4592_v18 = vadd.f32 %v14162_v63, %v4442_v50  ;;  %v4443_v14 = vadd.f32 %v14163_v59, %v4293_v29  ;;  %v5327_v58 = vmax.f32 %v5325_v1, %v5326_v13  ;;  %v5406_v17 = vmax.f32 %v5404_v20, %v5405_v52 }
 0x8a0   :  { %v4741_v11 = vadd.f32 %v12179_v9, %v4591_v60  ;;  %v4446_v42 = vadd.f32 %v11960_v12, %v4296_v44  ;;  %v5226_v19 = vmax.f32 %v5210_v32, 0.0  ;;  %v5248_v60 = vrot.slane %v5247_v8, 1 }
 0x8a1   :  { %v5011_v27 = vpop.f32.mrf.mxu3  ;;  %v4742_v10 = vadd.f32 %v12300_v3, %v4592_v18  ;;  %v5561_v1 = vsel %vm5242_vm2, %v12015_v49, -inf  ;;  %v5328_v0 = vrot.slane %v5327_v58, 1  ;;  %v5407_v12 = vrot.slane %v5406_v17, 1 }
 0x8a2   :  { %v5041_v47 = vadd.f32 %v5011_v27, %v4891_v40  ;;  %v5484_v40 = vrot.slane %v5483_v54, 2  ;;  %v12378_v50 = vpop.f32.mrf.mxu2  ;;  %v5622_v3 = vsel %vm5322_vm3, %v12015_v49, -inf  ;;  %v12390_v62 = vsel %vm5401_vm4, %v12015_v49, -inf }
 0x8a3   :  { %v4893_v13 = vadd.f32 %v4867_v53, %v4742_v10  ;;  %v5562_v18 = vrot.slane %v5561_v1, 4 }
 0x8a4   :  { %v5164_v36 = vpop.f32.mrf.mxu0  ;;  %v5191_v25 = vadd.f32 %v5161_v2, %v5041_v47  ;;  %v4593_v2 = vadd.f32 %v14164_v45, %v4443_v14  ;;  %v4892_v47 = vadd.f32 %v12271_v57, %v4741_v11  ;;  %v12382_v9 = vmax.f32 %v5483_v54, %v5484_v40 }
 0x8a5   :  { %v12392_v14 = vpop.f32.mrf.mxu1  ;;  %v12395_v57 = vadd.f32 %v11950_v24, %v4446_v42  ;;  %v5249_v11 = vmax.f32 %v5247_v8, %v5248_v60  ;;  %v5329_v40 = vmax.f32 %v5327_v58, %v5328_v0  ;;  %v5623_v42 = vrot.slane %v5622_v3, 4  ;;  %v12428_v24 = vld [vmem:[%s13289_s5 + $0x1f0] sm:$0xff] }
 0x8a6   :  { %v5211_v27 = vadd.f32 %v11988_v31, %v5191_v25  ;;  %v4743_v45 = vadd.f32 %v4719_v34, %v4593_v2  ;;  %v5868_v60 = vsel %vm5322_vm3, %v12142_v15, -inf  ;;  %v5929_v0 = vsel %vm5401_vm4, %v12142_v15, -inf }
 0x8a8   :  { %v5227_v23 = vmax.f32 %v5211_v27, 0.0  ;;  %v12400_v27 = vmax.f32 %v5406_v17, %v5407_v12  ;;  %v5563_v17 = vmax.f32 %v5561_v1, %v5562_v18 }
 0x8a9   :  { %v5014_v29 = vpop.f32.mrf.mxu3 }
 0x8aa   :  { %v5241_v20 = vmax.f32 %v5226_v19, %v5227_v23  ;;  %v5042_v63 = vadd.f32 %v5014_v29, %v4892_v47  ;;  %v5807_v29 = vsel %vm5242_vm2, %v12142_v15, -inf }
 0x8ac   :  { %v5167_v54 = vpop.f32.mrf.mxu0  ;;  %v5250_v52 = vsel %vm5242_vm2, %v5241_v20, -inf  ;;  %v5330_v43 = vsel %vm5322_vm3, %v5241_v20, -inf  ;;  %v5409_v44 = vsel %vm5401_vm4, %v5241_v20, -inf  ;;  %v5488_v55 = vsel %vm5480_vm5, %v5241_v20, -inf }
 0x8ad   :  { %v5251_v32 = vrot.slane %v5250_v52, 4  ;;  %v5331_v25 = vrot.slane %v5330_v43, 4  ;;  %v5410_v59 = vrot.slane %v5409_v44, 4  ;;  %v5192_v47 = vadd.f32 %v5164_v36, %v5042_v63 }
 0x8ae   :  { %v5489_v34 = vrot.slane %v5488_v55, 4  ;;  %v12413_v20 = vmax.f32 %v5622_v3, %v5623_v42  ;;  %v5990_v63 = vsel %vm5480_vm5, %v12142_v15, -inf  ;;  %v5564_v42 = vrot.slane %v5563_v17, 2 }
 0x8af   :  { %v5252_v19 = vmax.f32 %v5250_v52, %v5251_v32  ;;  %v5332_v53 = vmax.f32 %v5330_v43, %v5331_v25  ;;  %v5411_v10 = vmax.f32 %v5409_v44, %v5410_v59  ;;  %v12411_v43 = vpop.f32.mrf.mxu2  ;;  %v5808_v44 = vrot.slane %v5807_v29, 4  ;;  %v12418_v59 = vpop.f32.mrf.mxu1 }
 0x8b0   :  { %v5212_v1 = vadd.f32 %v11988_v31, %v5192_v47  ;;  %v5869_v32 = vrot.slane %v5868_v60, 4  ;;  %v5930_v25 = vrot.slane %v5929_v0, 4 }
 0x8b1   :  { %v5017_v30 = vpop.f32.mrf.mxu3  ;;  %v5253_v8 = vrot.slane %v5252_v19, 2  ;;  %v5333_v58 = vrot.slane %v5332_v53, 2  ;;  %v5412_v52 = vrot.slane %v5411_v10, 2 }
 0x8b2   :  { %v5043_v12 = vadd.f32 %v5017_v30, %v4893_v13  ;;  %v5228_v47 = vmax.f32 %v5212_v1, 0.0  ;;  %v5870_v38 = vmax.f32 %v5868_v60, %v5869_v32  ;;  %v5931_v39 = vmax.f32 %v5929_v0, %v5930_v25 }
 0x8b3   :  { %v5254_v2 = vmax.f32 %v5252_v19, %v5253_v8  ;;  %v5334_v36 = vmax.f32 %v5332_v53, %v5333_v58  ;;  %v5413_v3 = vmax.f32 %v5411_v10, %v5412_v52  ;;  %v5490_v53 = vmax.f32 %v5488_v55, %v5489_v34 }
 0x8b4   :  { %v5193_v18 = vadd.f32 %v5167_v54, %v5043_v12  ;;  %v12420_v30 = vpop.f32.mrf.mxu0  ;;  %v12423_v58 = vmax.f32 %v5807_v29, %v5808_v44  ;;  %v5991_v54 = vrot.slane %v5990_v63, 4  ;;  %v4894_v52 = vadd.f32 %v12378_v50, %v4743_v45  ;;  %v12460_v50 = vld [vmem:[%s13289_s5 + $0x1e8] sm:$0xff] }
 0x8b5   :  { %v5255_v13 = vrot.slane %v5254_v2, 1  ;;  %v5335_v23 = vrot.slane %v5334_v36, 1  ;;  %v5625_v60 = vrot.slane %v12413_v20, 2  ;;  %v5744_v34 = vsel %vm5480_vm5, %v12015_v49, -inf }
 0x8b6   :  { %v5213_v19 = vadd.f32 %v11988_v31, %v5193_v18  ;;  %v14165_v45 = vrot.slane %v12382_v9, 1  ;;  %v5565_v44 = vmax.f32 %v5563_v17, %v5564_v42  ;;  %v4744_v49 = vadd.f32 %v12392_v14, %v11930_v35  ;;  %v12482_v35 = vld [vmem:[%s13289_s5 + $0x1d8] sm:$0xff] }
 0x8b7   :  { %v5256_v8 = vmax.f32 %v5254_v2, %v5255_v13  ;;  %v5336_v15 = vmax.f32 %v5334_v36, %v5335_v23  ;;  %v12437_v23 = vld [vmem:[%s13289_s5 + $0x1f8] sm:$0xff]  ;;  %v12450_v0 = vpop.f32.mrf.mxu2  ;;  %v5491_v36 = vrot.slane %v5490_v53, 2  ;;  %v5992_v1 = vmax.f32 %v5990_v63, %v5991_v54  ;;  %v12476_v13 = vld [vmem:[%s13289_s5 + $0x1d0] sm:$0xff] }
 0x8b8   :  { %v5229_v12 = vmax.f32 %v5213_v19, 0.0  ;;  %v12465_v2 = vmax.f32 %v12382_v9, %v14165_v45  ;;  %v5810_v14 = vrot.slane %v12423_v58, 2  ;;  %v5871_v17 = vrot.slane %v5870_v38, 2 }
 0x8b9   :  { %v5020_v18 = vpop.f32.mrf.mxu3  ;;  %v5276_v10 = vsel %vm5275_vm6, %v5256_v8, %v5249_v11  ;;  %v12432_v55 = vsel %vm5275_vm6, %v5336_v15, %v5329_v40  ;;  %v12447_v11 = vld [vmem:[%s13289_s5 + $0x1e0] sm:$0xff]  ;;  %v5414_v40 = vrot.slane %v5413_v3, 1  ;;  %v5932_v63 = vrot.slane %v5931_v39, 2 }
 0x8ba   :  { %v12439_v29 = vmax.f32 %v5228_v47, %v5229_v12  ;;  %7015 = vmatmul.msk.f32.vlgmr.msrb.gmra.mxu1 %vm5277_vm7, %v5276_v10  ;;  %7016 = vmatmul.msk.f32.vlgmr.msra.gmra.mxu2 %vm5277_vm7, %v5276_v10  ;;  %v5044_v25 = vadd.f32 %v5020_v18, %v4894_v52  ;;  %v5745_v19 = vrot.slane %v5744_v34, 4  ;;  %v12493_v8 = vmax.f32 %v12413_v20, %v5625_v60  ;;  %v4728_v47 = vpop.f32.mrf.mxu1 }
 0x8bb   :  { %7033 = vmatmul.msk.f32.vlgmr.msra.gmra.mxu3 %vm5277_vm7, %v12432_v55  ;;  %5525 = vmatpush.msrb.mxu1 %v12428_v24  ;;  %v5415_v42 = vmax.f32 %v5413_v3, %v5414_v40  ;;  %v14166_v15 = vrot.slane %v12390_v62, 4  ;;  %v12506_v3 = vld [vmem:[%s13289_s5 + $0x1c8] sm:$0xff]  ;;  %v5492_v20 = vmax.f32 %v5490_v53, %v5491_v36  ;;  %v5566_v10 = vrot.slane %v5565_v44, 1  ;;  %v12518_v53 = vld [vmem:[%s13289_s5 + $0x1b0] sm:$0xff] }
 0x8bc   :  { %v5568_v32 = vsel %vm5242_vm2, %v12439_v29, -inf  ;;  %5545 = vmatpush.msra.mxu2 %v12437_v23  ;;  %5588 = vmatpush.msra.mxu3 %v11978_v4  ;;  %v12490_v4 = vld [vmem:[%s13289_s5 + $0x1c0] sm:$0xff]  ;;  %v5629_v18 = vsel %vm5322_vm3, %v12439_v29, -inf  ;;  %v4745_v52 = vadd.f32 %v12418_v59, %v11944_v61  ;;  %v4895_v40 = vadd.f32 %v12411_v43, %v4744_v49  ;;  %v12529_v49 = vld [vmem:[%s13289_s5 + $0x1b8] sm:$0xff] }
 0x8bd   :  { %v5569_v9 = vrot.slane %v5568_v32, 4  ;;  %5526 = vmatpush.msrb.mxu1 %v12447_v11  ;;  %v12498_v54 = vmax.f32 %v12390_v62, %v14166_v15  ;;  %v5194_v62 = vadd.f32 %v12420_v30, %v5044_v25  ;;  %v5993_v60 = vrot.slane %v5992_v1, 2 }
 0x8be   :  { %5546 = vmatpush.msra.mxu2 %v12460_v50  ;;  %5589 = vmatpush.msra.mxu3 %v12006_v37  ;;  %v5173_v37 = vpop.f32.mrf.mxu0  ;;  %v5811_v61 = vmax.f32 %v12423_v58, %v5810_v14  ;;  %v5872_v59 = vmax.f32 %v5870_v38, %v5871_v17  ;;  %v5933_v30 = vmax.f32 %v5931_v39, %v5932_v63  ;;  %v5630_v25 = vrot.slane %v5629_v18, 4  ;;  %v12537_v39 = vld [vmem:[%s13289_s5 + $0x1a0] sm:$0xff] }
 0x8bf   :  { %v5570_v12 = vmax.f32 %v5568_v32, %v5569_v9  ;;  %5527 = vmatpush.msrb.mxu1 %v12476_v13  ;;  %v4746_v32 = vadd.f32 %v4728_v47, %v12395_v57  ;;  %v5435_v43 = vsel %vm5275_vm6, %v5415_v42, %v12400_v27  ;;  %v4879_v9 = vpop.f32.mrf.mxu2  ;;  %v5567_v38 = vmax.f32 %v5565_v44, %v5566_v10 }
 0x8c0   :  { %5547 = vmatpush.msra.mxu2 %v12482_v35  ;;  %5590 = vmatpush.msra.mxu3 %v12033_v28  ;;  %v12539_v27 = vmax.f32 %v5744_v34, %v5745_v19  ;;  %v5214_v58 = vadd.f32 %v11988_v31, %v5194_v62  ;;  %v5627_v17 = vrot.slane %v12493_v8, 1  ;;  %v12550_v63 = vmax.f32 %v5992_v1, %v5993_v60  ;;  %v12557_v34 = vld [vmem:[%s13289_s5 + $0x190] sm:$0xff] }
 0x8c1   :  { %5528 = vmatpush.msrb.mxu1 %v12490_v4  ;;  %v5023_v45 = vpop.f32.mrf.mxu3  ;;  %v5571_v36 = vrot.slane %v5570_v12, 2  ;;  %v5812_v19 = vrot.slane %v5811_v61, 1  ;;  %v5873_v42 = vrot.slane %v5872_v59, 1  ;;  %v5934_v15 = vrot.slane %v5933_v30, 1 }
 0x8c2   :  { %5548 = vmatpush.msra.mxu2 %v12506_v3  ;;  %5591 = vmatpush.msra.mxu3 %v12069_v6  ;;  %v5045_v28 = vadd.f32 %v5023_v45, %v4895_v40  ;;  %v5493_v6 = vrot.slane %v5492_v20, 1  ;;  %v12559_v47 = vadd.f32 %v4879_v9, %v4746_v32  ;;  %v4896_v1 = vadd.f32 %v12450_v0, %v4745_v52 }
 0x8c3   :  { %7034 = vmatmul.msk.f32.vlgmr.msra.gmra.mxu1 %vm5277_vm7, %v12432_v55  ;;  %7051 = vmatmul.msk.f32.vlgmr.msrb.gmra.mxu2 %vm5277_vm7, %v5435_v43  ;;  %v5572_v57 = vmax.f32 %v5570_v12, %v5571_v36  ;;  %v12547_v55 = vld [vmem:[%s13289_s5 + $0x1a8] sm:$0xff]  ;;  %v5631_v12 = vmax.f32 %v5629_v18, %v5630_v25  ;;  %v6053_v10 = vsel %vm5242_vm2, %v12331_v5, -inf  ;;  %v6114_v62 = vsel %vm5322_vm3, %v12331_v5, -inf  ;;  %v12578_v18 = vld [vmem:[%s13289_s5 + $0x180] sm:$0xff] }
 0x8c4   :  { %v5195_v14 = vadd.f32 %v5173_v37, %v5045_v28  ;;  %7052 = vmatmul.msk.f32.vlgmr.msrb.gmra.mxu3 %vm5277_vm7, %v5435_v43  ;;  %5529 = vmatpush.msrb.mxu1 %v12518_v53  ;;  %v5494_v40 = vmax.f32 %v5492_v20, %v5493_v6  ;;  %v6175_v0 = vsel %vm5401_vm4, %v12331_v5, -inf  ;;  %v5230_v52 = vmax.f32 %v5214_v58, 0.0  ;;  %v12586_v36 = vld [vmem:[%s13289_s5 + $0x188] sm:$0xff] }
 0x8c5   :  { %5549 = vmatpush.msra.mxu2 %v12529_v49  ;;  %5592 = vmatpush.msra.mxu3 %v12088_v46  ;;  %v5573_v44 = vrot.slane %v5572_v57, 1  ;;  %v12566_v46 = vld [vmem:[%s13289_s5 + $0x198] sm:$0xff]  ;;  %v12591_v32 = vsel %vm5480_vm5, %v12331_v5, -inf  ;;  %v12595_v28 = vmax.f32 %v5811_v61, %v5812_v19  ;;  %v12597_v43 = vmax.f32 %v5872_v59, %v5873_v42 }
 0x8c6   :  { %v5215_v37 = vadd.f32 %v11988_v31, %v5195_v14  ;;  %5530 = vmatpush.msrb.mxu1 %v12537_v39  ;;  %v5176_v20 = vpop.f32.mrf.mxu0  ;;  %v12599_v9 = vmax.f32 %v5933_v30, %v5934_v15  ;;  %v6054_v6 = vrot.slane %v6053_v10, 4  ;;  %v5632_v14 = vrot.slane %v5631_v12, 2 }
 0x8c7   :  { %5550 = vmatpush.msra.mxu2 %v12547_v55  ;;  %5593 = vmatpush.msra.mxu3 %v12108_v33  ;;  %v5574_v60 = vmax.f32 %v5572_v57, %v5573_v44  ;;  %v5995_v33 = vrot.slane %v12550_v63, 1  ;;  %v6115_v57 = vrot.slane %v6114_v62, 4  ;;  %v6176_v5 = vrot.slane %v6175_v0, 4 }
 0x8c8   :  { %v5231_v45 = vmax.f32 %v5215_v37, 0.0  ;;  %5531 = vmatpush.msrb.mxu1 %v12557_v34 }
 0x8c9   :  { %5551 = vmatpush.msra.mxu2 %v12566_v46  ;;  %5594 = vmatpush.msra.mxu3 %v12129_v21  ;;  %v5026_v25 = vpop.f32.mrf.mxu3  ;;  %v5514_v21 = vsel %vm5275_vm6, %v5494_v40, %v12465_v2  ;;  %v12607_v61 = vsel %vm5275_vm6, %v5574_v60, %v5567_v38  ;;  %v12617_v2 = vmax.f32 %v6053_v10, %v6054_v6  ;;  %v5690_v38 = vsel %vm5401_vm4, %v12439_v29, -inf }
 0x8ca   :  { %v5806_v58 = vmax.f32 %v5230_v52, %v5231_v45  ;;  %5532 = vmatpush.msrb.mxu1 %v12578_v18  ;;  %v5046_v44 = vadd.f32 %v5026_v25, %v4896_v1  ;;  %v12628_v10 = vmax.f32 %v6114_v62, %v6115_v57  ;;  %v12630_v45 = vmax.f32 %v6175_v0, %v6176_v5  ;;  %v14167_v0 = vld [vmem:[#allocation87_spill] sm:$0xff]  ;;  %v14168_v57 = vld [vmem:[#allocation272_spill] sm:$0xff] }
 0x8cb   :  { %5552 = vmatpush.msra.mxu2 %v12586_v36  ;;  %5595 = vmatpush.msra.mxu3 %v12153_v22  ;;  %v6237_v25 = vrot.slane %v12591_v32, 4  ;;  %v5751_v62 = vsel %vm5480_vm5, %v12439_v29, -inf  ;;  %v14171_v29 = vld [vmem:[#allocation70_spill] sm:$0xff] }
 0x8cc   :  { %v5814_v59 = vsel %vm5242_vm2, %v5806_v58, -inf  ;;  %v5875_v30 = vsel %vm5322_vm3, %v5806_v58, -inf  ;;  %v5936_v19 = vsel %vm5401_vm4, %v5806_v58, -inf  ;;  %v5997_v42 = vsel %vm5480_vm5, %v5806_v58, -inf  ;;  %5608 = vmatpush.msra.mxu1 %v12021_v41  ;;  %7070 = vmatmul.msk.f32.vlgmr.msra.gmra.mxu2 %vm5277_vm7, %v5514_v21 }
 0x8cd   :  { %5649 = vmatpush.msrb.mxu2 %v12026_v26  ;;  %v5815_v22 = vrot.slane %v5814_v59, 4  ;;  %v5876_v15 = vrot.slane %v5875_v30, 4  ;;  %v5937_v37 = vrot.slane %v5936_v19, 4  ;;  %v5998_v1 = vrot.slane %v5997_v42, 4  ;;  %5669 = vmatpush.msrb.mxu3 %v12171_v48 }
 0x8ce   :  { %7069 = vmatmul.msk.f32.vlgmr.msrb.gmra.mxu1 %vm5277_vm7, %v5514_v21  ;;  %7071 = vmatmul.msk.f32.vlgmr.msra.gmra.mxu3 %vm5277_vm7, %v12607_v61  ;;  %v5633_v41 = vmax.f32 %v5631_v12, %v5632_v14  ;;  %v12625_v26 = vmax.f32 %v12550_v63, %v5995_v33  ;;  %v5196_v6 = vadd.f32 %v5176_v20, %v5046_v44  ;;  %v5179_v12 = vpop.f32.mrf.mxu0 }
 0x8cf   :  { %v5816_v40 = vmax.f32 %v5814_v59, %v5815_v22  ;;  %v5877_v60 = vmax.f32 %v5875_v30, %v5876_v15  ;;  %v5938_v52 = vmax.f32 %v5936_v19, %v5937_v37  ;;  %v5999_v48 = vmax.f32 %v5997_v42, %v5998_v1  ;;  %5609 = vmatpush.msra.mxu1 %v12038_v51  ;;  %v14170_v42 = vld [vmem:[#allocation281_spill] sm:$0xff]  ;;  %v14172_v37 = vld [vmem:[#allocation304_spill] sm:$0xff] }
 0x8d0   :  { %5650 = vmatpush.msrb.mxu2 %v12043_v7  ;;  %5670 = vmatpush.msrb.mxu3 %v12193_v56  ;;  %v5691_v51 = vrot.slane %v5690_v38, 4  ;;  %v5634_v20 = vrot.slane %v5633_v41, 1  ;;  %v14169_v56 = vld [vmem:[#allocation316_spill] sm:$0xff]  ;;  %v6238_v30 = vmax.f32 %v12591_v32, %v6237_v25  ;;  %v5216_v19 = vadd.f32 %v11988_v31, %v5196_v6  ;;  %v14174_v32 = vld [vmem:[#allocation293_spill] sm:$0xff] }
 0x8d1   :  { %5610 = vmatpush.msra.mxu1 %v12053_v16  ;;  %v5029_v63 = vpop.f32.mrf.mxu3  ;;  %v5817_v33 = vrot.slane %v5816_v40, 2  ;;  %v5878_v58 = vrot.slane %v5877_v60, 2  ;;  %v5939_v14 = vrot.slane %v5938_v52, 2  ;;  %v6000_v21 = vrot.slane %v5999_v48, 2 }
 0x8d2   :  { %5651 = vmatpush.msrb.mxu2 %v14167_v0  ;;  %5671 = vmatpush.msrb.mxu3 %v14168_v57  ;;  %v5047_v7 = vadd.f32 %v5029_v63, %v12559_v47  ;;  %v6056_v15 = vrot.slane %v12617_v2, 2  ;;  %v5635_v6 = vmax.f32 %v5633_v41, %v5634_v20  ;;  %v5232_v0 = vmax.f32 %v5216_v19, 0.0 }
 0x8d3   :  { %5611 = vmatpush.msra.mxu1 %v14169_v56  ;;  %v5818_v16 = vmax.f32 %v5816_v40, %v5817_v33  ;;  %v5879_v5 = vmax.f32 %v5877_v60, %v5878_v58  ;;  %v5940_v44 = vmax.f32 %v5938_v52, %v5939_v14  ;;  %v6001_v59 = vmax.f32 %v5999_v48, %v6000_v21  ;;  %v14173_v48 = vld [vmem:[#allocation173_spill] sm:$0xff]  ;;  %v14175_v33 = vld [vmem:[#allocation62_spill] sm:$0xff] }
 0x8d4   :  { %5652 = vmatpush.msrb.mxu2 %v14170_v42  ;;  %5672 = vmatpush.msrb.mxu3 %v14171_v29  ;;  %v5197_v22 = vadd.f32 %v5179_v12, %v5047_v7  ;;  %v5692_v60 = vmax.f32 %v5690_v38, %v5691_v51  ;;  %v5752_v52 = vrot.slane %v5751_v62, 4  ;;  %v14176_v7 = vld [vmem:[#allocation291_spill] sm:$0xff]  ;;  %v14177_v56 = vld [vmem:[#allocation265_spill] sm:$0xff]  ;;  %v5628_v38 = vmax.f32 %v12493_v8, %v5627_v17 }
 0x8d5   :  { %5612 = vmatpush.msra.mxu1 %v14172_v37  ;;  %v5819_v47 = vrot.slane %v5818_v16, 1  ;;  %v5880_v1 = vrot.slane %v5879_v5, 1  ;;  %v5941_v63 = vrot.slane %v5940_v44, 1  ;;  %v6002_v40 = vrot.slane %v6001_v59, 1  ;;  %v14181_v42 = vld [vmem:[#allocation269_spill] sm:$0xff] }
 0x8d6   :  { %5653 = vmatpush.msrb.mxu2 %v14173_v48  ;;  %5673 = vmatpush.msrb.mxu3 %v14174_v32  ;;  %v5217_v25 = vadd.f32 %v11988_v31, %v5197_v22  ;;  %v6178_v51 = vrot.slane %v12630_v45, 2  ;;  %v14178_v31 = vld [vmem:[#allocation51_spill] sm:$0xff]  ;;  %v5753_v8 = vmax.f32 %v5751_v62, %v5752_v52  ;;  %v6239_v19 = vrot.slane %v6238_v30, 2 }
 0x8d7   :  { %5613 = vmatpush.msra.mxu1 %v14175_v33  ;;  %v5820_v12 = vmax.f32 %v5818_v16, %v5819_v47  ;;  %v5881_v58 = vmax.f32 %v5879_v5, %v5880_v1  ;;  %v5942_v14 = vmax.f32 %v5940_v44, %v5941_v63  ;;  %v6003_v21 = vmax.f32 %v6001_v59, %v6002_v40  ;;  %v14179_v44 = vld [vmem:[#allocation311_spill] sm:$0xff]  ;;  %v14180_v59 = vld [vmem:[#allocation148_spill] sm:$0xff] }
 0x8d8   :  { %v5233_v57 = vmax.f32 %v5217_v25, 0.0  ;;  %5654 = vmatpush.msrb.mxu2 %v14176_v7  ;;  %5674 = vmatpush.msrb.mxu3 %v14177_v56  ;;  %v5693_v29 = vrot.slane %v5692_v60, 2  ;;  %v6057_v22 = vmax.f32 %v12617_v2, %v6056_v15  ;;  %v14182_v1 = vld [vmem:[#allocation300_spill] sm:$0xff]  ;;  %v14184_v2 = vld [vmem:[#allocation290_spill] sm:$0xff]  ;;  %v5754_v15 = vrot.slane %v5753_v8, 2 }
 0x8d9   :  { %5614 = vmatpush.msra.mxu1 %v14178_v31  ;;  %v12661_v41 = vsel %vm5275_vm6, %v5820_v12, %v12595_v28  ;;  %v12665_v20 = vsel %vm5275_vm6, %v5881_v58, %v12597_v43  ;;  %v12669_v16 = vsel %vm5275_vm6, %v5942_v14, %v12599_v9  ;;  %v12673_v5 = vsel %vm5275_vm6, %v6003_v21, %v12625_v26  ;;  %v14183_v63 = vld [vmem:[#allocation284_spill] sm:$0xff]  ;;  %v14187_v31 = vld [vmem:[#allocation263_spill] sm:$0xff] }
 0x8da   :  { %v6052_v17 = vmax.f32 %v5232_v0, %v5233_v57  ;;  %5655 = vmatpush.msrb.mxu2 %v14179_v44  ;;  %5675 = vmatpush.msrb.mxu3 %v14180_v59  ;;  %v6117_v28 = vrot.slane %v12628_v10, 2  ;;  %v5638_v43 = vsel %vm5275_vm6, %v5635_v6, %v5628_v38  ;;  %v5686_v9 = vrot.slane %v12498_v54, 2  ;;  %v14185_v0 = vld [vmem:[#allocation89_spill] sm:$0xff] }
 0x8db   :  { %5615 = vmatpush.msra.mxu1 %v14181_v42  ;;  %v6179_v25 = vmax.f32 %v12630_v45, %v6178_v51  ;;  %v6240_v33 = vmax.f32 %v6238_v30, %v6239_v19  ;;  %v5694_v7 = vmax.f32 %v5692_v60, %v5693_v29  ;;  %v5747_v56 = vrot.slane %v12539_v27, 2  ;;  %v14189_v42 = vld [vmem:[#allocation49_spill] sm:$0xff] }
 0x8dc   :  { %v6060_v26 = vsel %vm5242_vm2, %v6052_v17, -inf  ;;  %v6121_v62 = vsel %vm5322_vm3, %v6052_v17, -inf  ;;  %v6182_v37 = vsel %vm5401_vm4, %v6052_v17, -inf  ;;  %v6243_v47 = vsel %vm5480_vm5, %v6052_v17, -inf  ;;  %5656 = vmatpush.msrb.mxu2 %v14182_v1  ;;  %5676 = vmatpush.msrb.mxu3 %v14183_v63  ;;  %v14188_v17 = vld [vmem:[#allocation193_spill] sm:$0xff]  ;;  %v14191_v1 = vld [vmem:[#allocation42_spill] sm:$0xff] }
 0x8dd   :  { %v6061_v40 = vrot.slane %v6060_v26, 4  ;;  %v6122_v52 = vrot.slane %v6121_v62, 4  ;;  %v6183_v48 = vrot.slane %v6182_v37, 4  ;;  %v6244_v32 = vrot.slane %v6243_v47, 4  ;;  %7072 = vmatmul.msk.f32.vlgmr.msra.gmra.mxu1 %vm5277_vm7, %v12607_v61  ;;  %7073 = vmatmul.msk.f32.vlgmr.msrb.gmra.mxu2 %vm5277_vm7, %v5638_v43  ;;  %v14186_v61 = vld [vmem:[#allocation313_spill] sm:$0xff] }
 0x8de   :  { %7074 = vmatmul.msk.f32.vlgmr.msrb.gmra.mxu3 %vm5277_vm7, %v5638_v43  ;;  %5710 = vmatpush.msrb.mxu1 %v14184_v2  ;;  %v6118_v6 = vmax.f32 %v12628_v10, %v6117_v28  ;;  %v5687_v57 = vmax.f32 %v12498_v54, %v5686_v9  ;;  %v6058_v38 = vrot.slane %v6057_v22, 1  ;;  %v5755_v44 = vmax.f32 %v5753_v8, %v5754_v15  ;;  %v14190_v29 = vld [vmem:[#allocation57_spill] sm:$0xff] }
 0x8df   :  { %v6062_v12 = vmax.f32 %v6060_v26, %v6061_v40  ;;  %v6123_v58 = vmax.f32 %v6121_v62, %v6122_v52  ;;  %v6184_v14 = vmax.f32 %v6182_v37, %v6183_v48  ;;  %v6245_v21 = vmax.f32 %v6243_v47, %v6244_v32  ;;  %5730 = vmatpush.msra.mxu2 %v14185_v0  ;;  %v14192_v32 = vld [vmem:[#allocation303_spill] sm:$0xff] }
 0x8e0   :  { %5771 = vmatpush.msra.mxu3 %v12428_v24  ;;  %5711 = vmatpush.msrb.mxu1 %v14186_v61  ;;  %v6180_v59 = vrot.slane %v6179_v25, 1  ;;  %v6119_v28 = vrot.slane %v6118_v6, 1  ;;  %v6241_v19 = vrot.slane %v6240_v33, 1  ;;  %v5688_v26 = vrot.slane %v5687_v57, 1  ;;  %v14194_v61 = vld [vmem:[#allocation271_spill] sm:$0xff] }
 0x8e1   :  { %v6063_v45 = vrot.slane %v6062_v12, 2  ;;  %v6124_v51 = vrot.slane %v6123_v58, 2  ;;  %v6185_v10 = vrot.slane %v6184_v14, 2  ;;  %v6246_v30 = vrot.slane %v6245_v21, 2  ;;  %5731 = vmatpush.msra.mxu2 %v14187_v31  ;;  %v14197_v31 = vld [vmem:[#allocation69_spill] sm:$0xff] }
 0x8e2   :  { %5772 = vmatpush.msra.mxu3 %v12447_v11  ;;  %5712 = vmatpush.msrb.mxu1 %v14188_v17  ;;  %v5695_v62 = vrot.slane %v5694_v7, 1  ;;  %v5748_v37 = vmax.f32 %v12539_v27, %v5747_v56  ;;  %v6059_v47 = vmax.f32 %v6057_v22, %v6058_v38  ;;  %v5756_v2 = vrot.slane %v5755_v44, 1  ;;  %v14198_v17 = vld [vmem:[#allocation286_spill] sm:$0xff] }
 0x8e3   :  { %5732 = vmatpush.msra.mxu2 %v14189_v42  ;;  %v6064_v54 = vmax.f32 %v6062_v12, %v6063_v45  ;;  %v6186_v60 = vmax.f32 %v6184_v14, %v6185_v10  ;;  %v6125_v43 = vmax.f32 %v6123_v58, %v6124_v51  ;;  %v6247_v9 = vmax.f32 %v6245_v21, %v6246_v30  ;;  %v14193_v14 = vld [vmem:[#allocation145_spill] sm:$0xff]  ;;  %v14195_v45 = vld [vmem:[#allocation276_spill] sm:$0xff]  ;;  %v14196_v10 = vld [vmem:[#allocation310_spill] sm:$0xff] }
 0x8e4   :  { %5773 = vmatpush.msra.mxu3 %v12476_v13  ;;  %5713 = vmatpush.msrb.mxu1 %v14190_v29  ;;  %v6181_v15 = vmax.f32 %v6179_v25, %v6180_v59  ;;  %v6120_v12 = vmax.f32 %v6118_v6, %v6119_v28  ;;  %v6242_v58 = vmax.f32 %v6240_v33, %v6241_v19  ;;  %v5749_v38 = vrot.slane %v5748_v37, 1  ;;  %v14199_v19 = vld [vmem:[#allocation58_spill] sm:$0xff] }
 0x8e5   :  { %5733 = vmatpush.msra.mxu2 %v14191_v1  ;;  %v6065_v8 = vrot.slane %v6064_v54, 1  ;;  %v6187_v40 = vrot.slane %v6186_v60, 1  ;;  %v6126_v52 = vrot.slane %v6125_v43, 1  ;;  %v6248_v48 = vrot.slane %v6247_v9, 1  ;;  %v7523_v42 = vld [vmem:[%s13289_s5 + $0x70] sm:$0xff]  ;;  %v12800_v1 = vld [vmem:[%s13289_s5 + $0x48] sm:$0xff] }
 0x8e6   :  { %5774 = vmatpush.msra.mxu3 %v12490_v4  ;;  %5714 = vmatpush.msrb.mxu1 %v14192_v32  ;;  %v5696_v56 = vmax.f32 %v5694_v7, %v5695_v62  ;;  %v5689_v7 = vmax.f32 %v5687_v57, %v5688_v26  ;;  %v5757_v30 = vmax.f32 %v5755_v44, %v5756_v2  ;;  %v12742_v44 = vld [vmem:[%s13290_s6 + $0x70] sm:$0xff]  ;;  %v12784_v62 = vld [vmem:[%s13289_s5 + $0x58] sm:$0xff]  ;;  %v12828_v32 = vld [vmem:[%s13289_s5 + $0x28] sm:$0xff] }
 0x8e7   :  { %5734 = vmatpush.msra.mxu2 %v14193_v14  ;;  %v6066_v21 = vmax.f32 %v6064_v54, %v6065_v8  ;;  %v6188_v0 = vmax.f32 %v6186_v60, %v6187_v40  ;;  %v6127_v27 = vmax.f32 %v6125_v43, %v6126_v52  ;;  %v6249_v22 = vmax.f32 %v6247_v9, %v6248_v48  ;;  %v12752_v54 = vld [vmem:[%s13289_s5 + $0x78] sm:$0xff]  ;;  %v12758_v60 = vld [vmem:[%s13290_s6 + $0x60] sm:$0xff]  ;;  %v12768_v9 = vld [vmem:[%s13289_s5 + $0x68] sm:$0xff] }
 0x8e8   :  { %5775 = vmatpush.msra.mxu3 %v12518_v53  ;;  %5715 = vmatpush.msrb.mxu1 %v14194_v61  ;;  %v5699_v59 = vsel %vm5275_vm6, %v5696_v56, %v5689_v7  ;;  %v5750_v28 = vmax.f32 %v5748_v37, %v5749_v38  ;;  %v7525_v43 = vld [vmem:[%s13289_s5 + $0x60] sm:$0xff]  ;;  %v12774_v29 = vld [vmem:[%s13290_s6 + $0x50] sm:$0xff]  ;;  %v12811_v40 = vld [vmem:[%s13289_s5 + $0x38] sm:$0xff] }
 0x8e9   :  { %5735 = vmatpush.msra.mxu2 %v14195_v45  ;;  %v12715_v51 = vsel %vm5275_vm6, %v6066_v21, %v6059_v47  ;;  %v12718_v25 = vsel %vm5275_vm6, %v6188_v0, %v6181_v15  ;;  %v12721_v6 = vsel %vm5275_vm6, %v6127_v27, %v6120_v12  ;;  %v12724_v33 = vsel %vm5275_vm6, %v6249_v22, %v6242_v58  ;;  %v7527_v26 = vld [vmem:[%s13289_s5 + $0x50] sm:$0xff]  ;;  %v12790_v37 = vld [vmem:[%s13290_s6 + $0x40] sm:$0xff]  ;;  %v12844_v12 = vld [vmem:[%s13289_s5 + $0x18] sm:$0xff] }
 0x8ea   :  { %5776 = vmatpush.msra.mxu3 %v12537_v39  ;;  %5716 = vmatpush.msrb.mxu1 %v14196_v10  ;;  %v5760_v57 = vsel %vm5275_vm6, %v5757_v30, %v5750_v28  ;;  %v7529_v47 = vld [vmem:[%s13289_s5 + $0x40] sm:$0xff]  ;;  %v7531_v8 = vld [vmem:[%s13289_s5 + $0x30] sm:$0xff]  ;;  %v12855_v14 = vld [vmem:[%s13289_s5 + $0x8] sm:$0xff]  ;;  %v14200_v30 = vmov 0.0  }
 0x8eb   :  { %5736 = vmatpush.msra.mxu2 %v14197_v31  ;;  %7087 = vmatmul.msk.f32.vlgmr.msrb.gmra.mxu0 %vm5277_vm7, %v12715_v51  ;;  %v12817_v52 = vld [vmem:[%s13290_s6 + $0x30] sm:$0xff]  ;;  %v7533_v48 = vld [vmem:[%s13289_s5 + $0x20] sm:$0xff]  ;;  %v12877_v27 = vld [vmem:[%s13289_s5 + $0xf8] sm:$0xff] }
 0x8ec   :  { %5777 = vmatpush.msra.mxu3 %v12557_v34  ;;  %5717 = vmatpush.msrb.mxu1 %v14198_v17  ;;  %v12834_v2 = vld [vmem:[%s13290_s6 + $0x20] sm:$0xff]  ;;  %v7535_v15 = vld [vmem:[%s13289_s5 + $0x10] sm:$0xff]  ;;  %v12898_v56 = vld [vmem:[%s13289_s5 + $0xe8] sm:$0xff] }
 0x8ed   :  { %5737 = vmatpush.msra.mxu2 %v14199_v19  ;;  %7075 = vmatmul.msk.f32.vlgmr.msrb.gmra.mxu1 %vm5277_vm7, %v5699_v59  ;;  %v7537_v58 = vld [vmem:[%s13289_s5] sm:$0xff]  ;;  %v12864_v21 = vld [vmem:[%s13290_s6 + $0x10] sm:$0xff]  ;;  %v12914_v10 = vld [vmem:[%s13289_s5 + $0xd8] sm:$0xff] }
 0x8ee   :  { %5778 = vmatpush.msra.mxu3 %v12578_v18  ;;  %7076 = vmatmul.msk.f32.vlgmr.msra.gmra.mxu2 %vm5277_vm7, %v5699_v59  ;;  %v12871_v0 = vld [vmem:[%s13289_s5 + $0xf0] sm:$0xff]  ;;  %v12892_v61 = vld [vmem:[%s13289_s5 + $0xe0] sm:$0xff]  ;;  %v12930_v59 = vld [vmem:[%s13289_s5 + $0xc8] sm:$0xff] }
 0x8ef   :  { %7077 = vmatmul.msk.f32.vlgmr.msra.gmra.mxu3 %vm5277_vm7, %v5760_v57  ;;  %5791 = vmatpush.msra.mxu1 %v12437_v23  ;;  %v7541_v22 = vld [vmem:[%s13289_s5 + $0x170] sm:$0xff]  ;;  %v7544_v38 = vld [vmem:[%s13289_s5 + $0x160] sm:$0xff] }
 0x8f0   :  { %5834 = vmatpush.msrb.mxu2 %v7523_v42  ;;  %5854 = vmatpush.msrb.mxu3 %v12752_v54  ;;  %v12908_v45 = vld [vmem:[%s13289_s5 + $0xd0] sm:$0xff]  ;;  %v12924_v31 = vld [vmem:[%s13289_s5 + $0xc0] sm:$0xff] }
 0x8f1   :  { %5792 = vmatpush.msra.mxu1 %v12460_v50  ;;  %6324 = vmatpush.msrb.mxu0 %v12742_v44  ;;  %v7547_v7 = vld [vmem:[%s13289_s5 + $0x150] sm:$0xff]  ;;  %v7550_v28 = vld [vmem:[%s13289_s5 + $0x140] sm:$0xff] }
 0x8f2   :  { %5835 = vmatpush.msrb.mxu2 %v7525_v43  ;;  %5855 = vmatpush.msrb.mxu3 %v12768_v9  ;;  %v12939_v19 = vld [vmem:[%s13289_s5 + $0xb0] sm:$0xff]  ;;  %v12955_v43 = vld [vmem:[%s13289_s5 + $0xa0] sm:$0xff] }
 0x8f3   :  { %5793 = vmatpush.msra.mxu1 %v12482_v35  ;;  %6325 = vmatpush.msrb.mxu0 %v12758_v60  ;;  %v7553_v42 = vld [vmem:[%s13289_s5 + $0x130] sm:$0xff] }
 0x8f4   :  { %5836 = vmatpush.msrb.mxu2 %v7527_v26  ;;  %5856 = vmatpush.msrb.mxu3 %v12784_v62  ;;  %v12962_v26 = vld [vmem:[%s13289_s5 + $0xa8] sm:$0xff] }
 0x8f5   :  { %5794 = vmatpush.msra.mxu1 %v12506_v3  ;;  %6326 = vmatpush.msrb.mxu0 %v12774_v29 }
 0x8f6   :  { %5837 = vmatpush.msrb.mxu2 %v7529_v47  ;;  %5857 = vmatpush.msrb.mxu3 %v12800_v1  ;;  %v7556_v47 = vld [vmem:[%s13289_s5 + $0x120] sm:$0xff] }
 0x8f7   :  { %5795 = vmatpush.msra.mxu1 %v12529_v49  ;;  %6327 = vmatpush.msrb.mxu0 %v12790_v37 }
 0x8f8   :  { %5838 = vmatpush.msrb.mxu2 %v7531_v8  ;;  %5858 = vmatpush.msrb.mxu3 %v12811_v40  ;;  %v12971_v8 = vld [vmem:[%s13289_s5 + $0x90] sm:$0xff] }
 0x8f9   :  { %5796 = vmatpush.msra.mxu1 %v12547_v55  ;;  %7091 = vmatmul.msk.f32.vlgmr.msra.gmra.mxu0 %vm5277_vm7, %v12718_v25 }
 0x8fa   :  { %5839 = vmatpush.msrb.mxu2 %v7533_v48  ;;  %5859 = vmatpush.msrb.mxu3 %v12828_v32  ;;  %v12978_v48 = vld [vmem:[%s13289_s5 + $0x98] sm:$0xff] }
 0x8fb   :  { %5797 = vmatpush.msra.mxu1 %v12566_v46  ;;  %6328 = vmatpush.msrb.mxu0 %v12817_v52 }
 0x8fc   :  { %5840 = vmatpush.msrb.mxu2 %v7535_v15  ;;  %5860 = vmatpush.msrb.mxu3 %v12844_v12  ;;  %v7559_v15 = vld [vmem:[%s13289_s5 + $0x110] sm:$0xff] }
 0x8fd   :  { %5798 = vmatpush.msra.mxu1 %v12586_v36  ;;  %6329 = vmatpush.msrb.mxu0 %v12834_v2 }
 0x8fe   :  { %5841 = vmatpush.msrb.mxu2 %v7537_v58  ;;  %5861 = vmatpush.msrb.mxu3 %v12855_v14  ;;  %v12987_v58 = vld [vmem:[%s13289_s5 + $0x80] sm:$0xff] }
 0x8ff   :  { %7078 = vmatmul.msk.f32.vlgmr.msra.gmra.mxu1 %vm5277_vm7, %v5760_v57  ;;  %7079 = vmatmul.msk.f32.vlgmr.msrb.gmra.mxu2 %vm5277_vm7, %v12661_v41  ;;  %v12946_v57 = vld [vmem:[%s13289_s5 + $0xb8] sm:$0xff] }
 0x900   :  { %7080 = vmatmul.msk.f32.vlgmr.msrb.gmra.mxu3 %vm5277_vm7, %v12661_v41  ;;  %5895 = vmatpush.msrb.mxu1 %v12871_v0  ;;  %v12886_v41 = vld [vmem:[%s13290_s6] sm:$0xff] }
 0x901   :  { %5915 = vmatpush.msra.mxu2 %v12877_v27  ;;  %5956 = vmatpush.msra.mxu3 %v7541_v22  ;;  %v13002_v22 = vld [vmem:[%s13289_s5 + $0x178] sm:$0xff] }
 0x902   :  { %6330 = vmatpush.msrb.mxu0 %v12864_v21  ;;  %5896 = vmatpush.msrb.mxu1 %v12892_v61 }
 0x903   :  { %5916 = vmatpush.msra.mxu2 %v12898_v56  ;;  %5957 = vmatpush.msra.mxu3 %v7544_v38  ;;  %v13037_v38 = vld [vmem:[%s13289_s5 + $0x138] sm:$0xff] }
 0x904   :  { %6331 = vmatpush.msrb.mxu0 %v12886_v41  ;;  %5897 = vmatpush.msrb.mxu1 %v12908_v45 }
 0x905   :  { %5917 = vmatpush.msra.mxu2 %v12914_v10  ;;  %5958 = vmatpush.msra.mxu3 %v7547_v7  ;;  %v7566_v7 = vld [vmem:[%s13289_s5 + $0x128] sm:$0xff] }
 0x906   :  { %6332 = vmatmul.f32.vlgmr.msrb.gmra.mxu0 %v14200_v30  ;;  %5898 = vmatpush.msrb.mxu1 %v12924_v31 }
 0x907   :  { %5918 = vmatpush.msra.mxu2 %v12930_v59  ;;  %5959 = vmatpush.msra.mxu3 %v7550_v28  ;;  %v13051_v28 = vld [vmem:[%s13289_s5 + $0x118] sm:$0xff] }
 0x908   :  { %5899 = vmatpush.msrb.mxu1 %v12939_v19  ;;  %6526 = vmatpush.msra.mxu0 %v12742_v44 }
 0x909   :  { %5919 = vmatpush.msra.mxu2 %v12946_v57  ;;  %5960 = vmatpush.msra.mxu3 %v7553_v42  ;;  %v13059_v42 = vld [vmem:[%s13289_s5 + $0x108] sm:$0xff] }
 0x90a   :  { %5900 = vmatpush.msrb.mxu1 %v12955_v43  ;;  %6527 = vmatpush.msra.mxu0 %v12758_v60 }
 0x90b   :  { %5920 = vmatpush.msra.mxu2 %v12962_v26  ;;  %5961 = vmatpush.msra.mxu3 %v7556_v47 }
 0x90c   :  { %5901 = vmatpush.msrb.mxu1 %v12971_v8  ;;  %6528 = vmatpush.msra.mxu0 %v12774_v29 }
 0x90d   :  { %5921 = vmatpush.msra.mxu2 %v12978_v48  ;;  %5962 = vmatpush.msra.mxu3 %v7559_v15 }
 0x90e   :  { %5902 = vmatpush.msrb.mxu1 %v12987_v58  ;;  %6529 = vmatpush.msra.mxu0 %v12790_v37 }
 0x90f   :  { %5922 = vmatpush.msra.mxu2 %v14183_v63  ;;  %5963 = vmatpush.msra.mxu3 %v14198_v17  ;;  %v13010_v63 = vld [vmem:[%s13289_s5 + $0x168] sm:$0xff] }
 0x910   :  { %7081 = vmatmul.msk.f32.vlgmr.msrb.gmra.mxu1 %vm5277_vm7, %v12665_v20  ;;  %7082 = vmatmul.msk.f32.vlgmr.msra.gmra.mxu2 %vm5277_vm7, %v12665_v20  ;;  %v13019_v20 = vld [vmem:[%s13289_s5 + $0x158] sm:$0xff]  ;;  %v13028_v17 = vld [vmem:[%s13289_s5 + $0x148] sm:$0xff] }
 0x911   :  { %7083 = vmatmul.msk.f32.vlgmr.msra.gmra.mxu3 %vm5277_vm7, %v12669_v16  ;;  %5976 = vmatpush.msra.mxu1 %v13002_v22 }
 0x912   :  { %6017 = vmatpush.msrb.mxu2 %v12428_v24  ;;  %6037 = vmatpush.msrb.mxu3 %v12437_v23 }
 0x913   :  { %5977 = vmatpush.msra.mxu1 %v13010_v63  ;;  %6530 = vmatpush.msra.mxu0 %v12817_v52 }
 0x914   :  { %6018 = vmatpush.msrb.mxu2 %v12447_v11  ;;  %6038 = vmatpush.msrb.mxu3 %v12460_v50 }
 0x915   :  { %5978 = vmatpush.msra.mxu1 %v13019_v20  ;;  %6531 = vmatpush.msra.mxu0 %v12834_v2 }
 0x916   :  { %6019 = vmatpush.msrb.mxu2 %v12476_v13  ;;  %6039 = vmatpush.msrb.mxu3 %v12482_v35 }
 0x917   :  { %5979 = vmatpush.msra.mxu1 %v13028_v17  ;;  %6532 = vmatpush.msra.mxu0 %v12864_v21 }
 0x918   :  { %6020 = vmatpush.msrb.mxu2 %v12490_v4  ;;  %6040 = vmatpush.msrb.mxu3 %v12506_v3 }
 0x919   :  { %5980 = vmatpush.msra.mxu1 %v13037_v38  ;;  %6533 = vmatpush.msra.mxu0 %v12886_v41 }
 0x91a   :  { %6021 = vmatpush.msrb.mxu2 %v12518_v53  ;;  %6041 = vmatpush.msrb.mxu3 %v12529_v49 }
 0x91b   :  { %5981 = vmatpush.msra.mxu1 %v7566_v7 }
 0x91c   :  { %6022 = vmatpush.msrb.mxu2 %v12537_v39  ;;  %6042 = vmatpush.msrb.mxu3 %v12547_v55 }
 0x91d   :  { %5982 = vmatpush.msra.mxu1 %v13051_v28 }
 0x91e   :  { %6023 = vmatpush.msrb.mxu2 %v12557_v34  ;;  %6043 = vmatpush.msrb.mxu3 %v12566_v46 }
 0x91f   :  { %5983 = vmatpush.msra.mxu1 %v13059_v42 }
 0x920   :  { %6024 = vmatpush.msrb.mxu2 %v12578_v18  ;;  %6044 = vmatpush.msrb.mxu3 %v12586_v36 }
 0x921   :  { %7084 = vmatmul.msk.f32.vlgmr.msra.gmra.mxu1 %vm5277_vm7, %v12669_v16  ;;  %7085 = vmatmul.msk.f32.vlgmr.msrb.gmra.mxu2 %vm5277_vm7, %v12673_v5  ;;  %v7569_v16 = vld [vmem:[%s13289_s5 + $0x88] sm:$0xff] }
 0x922   :  { %7086 = vmatmul.msk.f32.vlgmr.msrb.gmra.mxu3 %vm5277_vm7, %v12673_v5  ;;  %6100 = vmatpush.msrb.mxu1 %v12752_v54  ;;  %v13111_v5 = vld [vmem:[%s13291_s7] sm:$0x3] }
 0x923   :  { %6141 = vmatpush.msra.mxu2 %v12871_v0  ;;  %6161 = vmatpush.msra.mxu3 %v12877_v27 }
 0x924   :  { %6101 = vmatpush.msrb.mxu1 %v12768_v9 }
 0x925   :  { %6142 = vmatpush.msra.mxu2 %v12892_v61  ;;  %6162 = vmatpush.msra.mxu3 %v12898_v56 }
 0x926   :  { %6102 = vmatpush.msrb.mxu1 %v12784_v62 }
 0x927   :  { %6143 = vmatpush.msra.mxu2 %v12908_v45  ;;  %6163 = vmatpush.msra.mxu3 %v12914_v10 }
 0x928   :  { %6103 = vmatpush.msrb.mxu1 %v12800_v1 }
 0x929   :  { %6144 = vmatpush.msra.mxu2 %v12924_v31  ;;  %6164 = vmatpush.msra.mxu3 %v12930_v59 }
 0x92a   :  { %6104 = vmatpush.msrb.mxu1 %v12811_v40 }
 0x92b   :  { %6145 = vmatpush.msra.mxu2 %v12939_v19  ;;  %6165 = vmatpush.msra.mxu3 %v12946_v57 }
 0x92c   :  { %6105 = vmatpush.msrb.mxu1 %v12828_v32 }
 0x92d   :  { %6146 = vmatpush.msra.mxu2 %v12955_v43  ;;  %6166 = vmatpush.msra.mxu3 %v12962_v26 }
 0x92e   :  { %6106 = vmatpush.msrb.mxu1 %v12844_v12 }
 0x92f   :  { %6147 = vmatpush.msra.mxu2 %v12971_v8  ;;  %6167 = vmatpush.msra.mxu3 %v12978_v48 }
 0x930   :  { %6107 = vmatpush.msrb.mxu1 %v12855_v14 }
 0x931   :  { %6148 = vmatpush.msra.mxu2 %v12987_v58  ;;  %6168 = vmatpush.msra.mxu3 %v7569_v16 }
 0x932   :  { %7088 = vmatmul.msk.f32.vlgmr.msrb.gmra.mxu1 %vm5277_vm7, %v12715_v51  ;;  %7089 = vmatmul.msk.f32.vlgmr.msra.gmra.mxu2 %vm5277_vm7, %v12721_v6 }
 0x933   :  { %7090 = vmatmul.msk.f32.vlgmr.msra.gmra.mxu3 %vm5277_vm7, %v12721_v6  ;;  %6222 = vmatpush.msra.mxu1 %v13002_v22  ;;  %v6298_v6 = vld [vmem:[%s13290_s6 + $0x8] sm:$0xff] }
 0x934   :  { %6263 = vmatpush.msrb.mxu2 %v12428_v24  ;;  %6283 = vmatpush.msrb.mxu3 %v12437_v23  ;;  %v13118_v24 = vperm.slane %v13111_v5, 0 }
 0x935   :  { %6223 = vmatpush.msra.mxu1 %v13010_v63 }
 0x936   :  { %6264 = vmatpush.msrb.mxu2 %v12447_v11  ;;  %6284 = vmatpush.msrb.mxu3 %v12460_v50 }
 0x937   :  { %6224 = vmatpush.msra.mxu1 %v13019_v20  ;;  %v5297_v51 = vpop.f32.mrf.mxu1 }
 0x938   :  { %6265 = vmatpush.msrb.mxu2 %v12476_v13  ;;  %6285 = vmatpush.msrb.mxu3 %v12482_v35  ;;  %v5320_v23 = vadd.f32 %v5297_v51, %v13118_v24 }
 0x939   :  { %6225 = vmatpush.msra.mxu1 %v13028_v17 }
 0x93a   :  { %6266 = vmatpush.msrb.mxu2 %v12490_v4  ;;  %6286 = vmatpush.msrb.mxu3 %v12506_v3  ;;  %v6312_v4 = vld [vmem:[%s13290_s6 + $0x78] sm:$0xff]  ;;  %v6310_v3 = vld [vmem:[%s13290_s6 + $0x68] sm:$0xff] }
 0x93b   :  { %6226 = vmatpush.msra.mxu1 %v13037_v38 }
 0x93c   :  { %6267 = vmatpush.msrb.mxu2 %v12518_v53  ;;  %6287 = vmatpush.msrb.mxu3 %v12529_v49  ;;  %v6308_v53 = vld [vmem:[%s13290_s6 + $0x58] sm:$0xff] }
 0x93d   :  { %6227 = vmatpush.msra.mxu1 %v7566_v7  ;;  %v13126_v11 = vpop.f32.mrf.mxu2 }
 0x93e   :  { %6268 = vmatpush.msrb.mxu2 %v12537_v39  ;;  %6288 = vmatpush.msrb.mxu3 %v12547_v55  ;;  %v5376_v50 = vpop.f32.mrf.mxu3  ;;  %v6306_v39 = vld [vmem:[%s13290_s6 + $0x48] sm:$0xff] }
 0x93f   :  { %6228 = vmatpush.msra.mxu1 %v13051_v28  ;;  %v5399_v13 = vadd.f32 %v5376_v50, %v5320_v23 }
 0x940   :  { %6269 = vmatpush.msrb.mxu2 %v12557_v34  ;;  %6289 = vmatpush.msrb.mxu3 %v12566_v46  ;;  %v13133_v35 = vpop.f32.mrf.mxu1  ;;  %v6304_v34 = vld [vmem:[%s13290_s6 + $0x38] sm:$0xff] }
 0x941   :  { %6229 = vmatpush.msra.mxu1 %v13059_v42 }
 0x942   :  { %6270 = vmatpush.msrb.mxu2 %v12578_v18  ;;  %6290 = vmatpush.msrb.mxu3 %v12586_v36  ;;  %v6302_v18 = vld [vmem:[%s13290_s6 + $0x28] sm:$0xff] }
 0x943   :  { %7092 = vmatmul.msk.f32.vlgmr.msra.gmra.mxu1 %vm5277_vm7, %v12718_v25  ;;  %7093 = vmatmul.msk.f32.vlgmr.msrb.gmra.mxu2 %vm5277_vm7, %v12724_v33  ;;  %v6300_v25 = vld [vmem:[%s13290_s6 + $0x18] sm:$0xff]  ;;  %s7580_s6 = smov 64  }
 0x944   :  { %7094 = vmatmul.msk.f32.vlgmr.msrb.gmra.mxu3 %vm5277_vm7, %v12724_v33  ;;  %6344 = vmatpush.msrb.mxu1 %v6312_v4 }
 0x945   :  { %6425 = vmatpush.msra.mxu2 %v12742_v44  ;;  %6445 = vmatpush.msra.mxu3 %v6312_v4 }
 0x946   :  { %6345 = vmatpush.msrb.mxu1 %v6310_v3  ;;  %v5455_v49 = vpop.f32.mrf.mxu2 }
 0x947   :  { %v5478_v55 = vadd.f32 %v5455_v49, %v5399_v13  ;;  %6426 = vmatpush.msra.mxu2 %v12758_v60  ;;  %6446 = vmatpush.msra.mxu3 %v6310_v3  ;;  %v13177_v33 = vpop.f32.mrf.mxu3 }
 0x948   :  { %6346 = vmatpush.msrb.mxu1 %v6308_v53 }
 0x949   :  { %6427 = vmatpush.msra.mxu2 %v12774_v29  ;;  %6447 = vmatpush.msra.mxu3 %v6308_v53 }
 0x94a   :  { %6347 = vmatpush.msrb.mxu1 %v6306_v39 }
 0x94b   :  { %v5534_v46 = vpop.f32.mrf.mxu1  ;;  %6428 = vmatpush.msra.mxu2 %v12790_v37  ;;  %6448 = vmatpush.msra.mxu3 %v6306_v39 }
 0x94c   :  { %v13165_v36 = vadd.f32 %v5534_v46, %v5478_v55  ;;  %6348 = vmatpush.msrb.mxu1 %v6304_v34 }
 0x94d   :  { %6429 = vmatpush.msra.mxu2 %v12817_v52  ;;  %6449 = vmatpush.msra.mxu3 %v6304_v34 }
 0x94e   :  { %6349 = vmatpush.msrb.mxu1 %v6302_v18 }
 0x94f   :  { %6430 = vmatpush.msra.mxu2 %v12834_v2  ;;  %6450 = vmatpush.msra.mxu3 %v6302_v18  ;;  %v13183_v54 = vpop.f32.mrf.mxu2 }
 0x950   :  { %6350 = vmatpush.msrb.mxu1 %v6300_v25 }
 0x951   :  { %6431 = vmatpush.msra.mxu2 %v12864_v21  ;;  %6451 = vmatpush.msra.mxu3 %v6300_v25  ;;  %v5597_v9 = vpop.f32.mrf.mxu3 }
 0x952   :  { %6351 = vmatpush.msrb.mxu1 %v6298_v6 }
 0x953   :  { %6352 = vmatmul.f32.vlgmr.msrb.gmra.mxu1 %v14200_v30  ;;  %6432 = vmatpush.msra.mxu2 %v12886_v41 }
 0x954   :  { %6452 = vmatpush.msra.mxu3 %v6298_v6  ;;  %6546 = vmatpush.msra.mxu1 %v6312_v4 }
 0x955   :  { %6627 = vmatpush.msrb.mxu2 %v12742_v44  ;;  %v5620_v44 = vadd.f32 %v5597_v9, %v13118_v24 }
 0x956   :  { %6647 = vmatpush.msrb.mxu3 %v6312_v4  ;;  %6547 = vmatpush.msra.mxu1 %v6310_v3 }
 0x957   :  { %6628 = vmatpush.msrb.mxu2 %v12758_v60 }
 0x958   :  { %6648 = vmatpush.msrb.mxu3 %v6310_v3  ;;  %6548 = vmatpush.msra.mxu1 %v6308_v53 }
 0x959   :  { %6629 = vmatpush.msrb.mxu2 %v12774_v29 }
 0x95a   :  { %6649 = vmatpush.msrb.mxu3 %v6308_v53  ;;  %6549 = vmatpush.msra.mxu1 %v6306_v39  ;;  %v5617_v29 = vpop.f32.mrf.mxu1 }
 0x95b   :  { %6630 = vmatpush.msrb.mxu2 %v12790_v37 }
 0x95c   :  { %6650 = vmatpush.msrb.mxu3 %v6306_v39  ;;  %6550 = vmatpush.msra.mxu1 %v6304_v34 }
 0x95d   :  { %6631 = vmatpush.msrb.mxu2 %v12817_v52 }
 0x95e   :  { %6651 = vmatpush.msrb.mxu3 %v6304_v34  ;;  %6551 = vmatpush.msra.mxu1 %v6302_v18 }
 0x95f   :  { %6632 = vmatpush.msrb.mxu2 %v12834_v2  ;;  %v5237_v2 = vperm.slane %v13111_v5, 1 }
 0x960   :  { %6652 = vmatpush.msrb.mxu3 %v6302_v18  ;;  %v5658_v60 = vpop.f32.mrf.mxu2  ;;  %6552 = vmatpush.msra.mxu1 %v6300_v25 }
 0x961   :  { %v5681_v62 = vadd.f32 %v5658_v60, %v5620_v44  ;;  %6633 = vmatpush.msrb.mxu2 %v12864_v21  ;;  %v5678_v37 = vpop.f32.mrf.mxu3  ;;  %v5621_v12 = vadd.f32 %v5617_v29, %v5237_v2  ;;  %v5321_v50 = vadd.f32 %v13126_v11, %v5237_v2 }
 0x962   :  { %6653 = vmatpush.msrb.mxu3 %v6300_v25  ;;  %6553 = vmatpush.msra.mxu1 %v6298_v6 }
 0x963   :  { %6634 = vmatpush.msrb.mxu2 %v12886_v41  ;;  %v5682_v0 = vadd.f32 %v5678_v37, %v5621_v12  ;;  %v5400_v13 = vadd.f32 %v13133_v35, %v5321_v50 }
 0x964   :  { %6654 = vmatpush.msrb.mxu3 %v6298_v6 }
 0x965   :  { %v5479_v4 = vadd.f32 %v13177_v33, %v5400_v13 }
 0x967   :  { %v5558_v3 = vadd.f32 %v13183_v54, %v5479_v4 }
 0x968   :  { %v6089_v22 = vpop.f32.mrf.mxu0 }
 0x969   :  { %v6112_v20 = vadd.f32 %v6089_v22, %v13118_v24 }
 0x96a   :  { %v5719_v1 = vpop.f32.mrf.mxu1 }
 0x96b   :  { %v5742_v40 = vadd.f32 %v5719_v1, %v5681_v62 }
 0x971   :  { %v5739_v14 = vpop.f32.mrf.mxu2 }
 0x972   :  { %v5780_v52 = vpop.f32.mrf.mxu3  ;;  %v5743_v27 = vadd.f32 %v5739_v14, %v5682_v0 }
 0x973   :  { %v13192_v32 = vadd.f32 %v5780_v52, %v5742_v40 }
 0x976   :  { %v6211_v42 = vpop.f32.mrf.mxu0 }
 0x97c   :  { %v5800_v61 = vpop.f32.mrf.mxu1 }
 0x97d   :  { %v13195_v21 = vadd.f32 %v5800_v61, %v5743_v27 }
 0x982   :  { %v5843_v56 = vpop.f32.mrf.mxu2 }
 0x983   :  { %v5866_v45 = vadd.f32 %v5843_v56, %v13118_v24  ;;  %v5863_v41 = vpop.f32.mrf.mxu3  ;;  %v6333_v39 = vpop.f32.mrf.mxu0 }
 0x984   :  { %v5867_v31 = vadd.f32 %v5863_v41, %v5237_v2  ;;  %v6356_v55 = vadd.f32 %v6333_v39, %v13165_v36 }
 0x986   :  { %v7095_v34 = vmul.f32 -1.442695, %v6356_v55 }
 0x98d   :  { %v5904_v10 = vpop.f32.mrf.mxu1 }
 0x98e   :  { %v5927_v30 = vadd.f32 %v5904_v10, %v5866_v45 }
 0x993   :  { %v5924_v59 = vpop.f32.mrf.mxu2 }
 0x994   :  { %v5928_v19 = vadd.f32 %v5924_v59, %v5867_v31  ;;  %v5965_v57 = vpop.f32.mrf.mxu3 }
 0x995   :  { %v5988_v43 = vadd.f32 %v5965_v57, %v5927_v30 }
 0x99e   :  { %v5985_v26 = vpop.f32.mrf.mxu1 }
 0x99f   :  { %v5989_v47 = vadd.f32 %v5985_v26, %v5928_v19 }
 0x9a4   :  { %v6026_v8 = vpop.f32.mrf.mxu2 }
 0x9a5   :  { %v13198_v48 = vadd.f32 %v6026_v8, %v5988_v43  ;;  %v6046_v15 = vpop.f32.mrf.mxu3 }
 0x9a6   :  { %v13200_v58 = vadd.f32 %v6046_v15, %v5989_v47 }
 0x9af   :  { %v6109_v63 = vpop.f32.mrf.mxu1 }
 0x9b0   :  { %v6113_v17 = vadd.f32 %v6109_v63, %v5237_v2 }
 0x9b5   :  { %v6150_v38 = vpop.f32.mrf.mxu2 }
 0x9b6   :  { %v6173_v7 = vadd.f32 %v6150_v38, %v6112_v20  ;;  %v6170_v28 = vpop.f32.mrf.mxu3 }
 0x9b7   :  { %v6174_v16 = vadd.f32 %v6170_v28, %v6113_v17 }
 0x9b8   :  { %v13203_v5 = vadd.f32 %v6211_v42, %v6173_v7 }
 0x9c0   :  { %v6231_v51 = vpop.f32.mrf.mxu1 }
 0x9c1   :  { %v13205_v23 = vadd.f32 %v6231_v51, %v6174_v16 }
 0x9c6   :  { %v13221_v15 = vpop.f32.mrf.mxu2 }
 0x9c7   :  { %v13217_v43 = vpop.f32.mrf.mxu3 }
 0x9d0   :  { %v6353_v24 = vpop.f32.mrf.mxu1 }
 0x9d1   :  { %v6357_v53 = vadd.f32 %v6353_v24, %v5558_v3 }
 0x9d3   :  { %7409 = vtanh.f32 %v6357_v53  ;;  %v7096_v2 = vmul.f32 -1.442695, %v6357_v53 }
 0x9d4   :  { %7411 = vpow2.f32 %v7095_v34 }
 0x9d9   :  { %v7410_v49 = vpop.eup %7409 }
 0x9da   :  { %6399 = vrot.lane.b32.xlu1 %v7410_v49, %s7580_s6  ;;  %v7412_v46 = vpop.eup %7411 }
 0x9db   :  { %v6364_v11 = vadd.f32 1.0, %v7412_v46 }
 0x9dd   :  { %7413 = vrcp.f32 %v6364_v11  ;;  %v6377_v54 = vand.u32 2147483648, %v6364_v11  ;;  %vm6371_vm9 = vweird.f32 %v6364_v11  ;;  %v6375_v9 = vand.u32 2147483647, %v6364_v11 }
 0x9df   :  { %v6378_v60 = vor.u32 1.1754944e-38, %v6377_v54  ;;  %vm6376_vm11 = vcmp.eq.f32.partialorder %v6375_v9, 8.507059e+37 }
 0x9e3   :  { %v7414_v35 = vpop.eup %7413 }
 0x9e4   :  { %v6367_v18 = vmul.f32 %v7414_v35, %v6364_v11  ;;  %vm6372_vm8 = vweird.f32 %v7414_v35 }
 0x9e5   :  { %vm6373_vm10 = vmor %vm6371_vm9, %vm6372_vm8 }
 0x9e6   :  { %v6368_v25 = vsub.f32 1.0, %v6367_v18 }
 0x9e8   :  { %v6369_v6 = vmul.f32 %v7414_v35, %v6368_v25 }
 0x9ea   :  { %v6370_v33 = vadd.f32 %v7414_v35, %v6369_v6 }
 0x9ec   :  { %v6374_v44 = vsel %vm6373_vm10, %v7414_v35, %v6370_v33 }
 0x9ed   :  { %v6379_v36 = vsel %vm6376_vm11, %v6378_v60, %v6374_v44 }
 0x9ee   :  { %v6397_v37 = vmul.f32 0.0, %v6379_v36 }
 0xa4c   :  { %v6400_v62 = vpop.permute.xlu1 %6399 }
 0xa4d   :  { %v6402_v29 = vmul.f32 %v6400_v62, %v6379_v36 }
 0xa4f   :  { %6404 = vrot.lane.b32.xlu2 %v6402_v29, %s7580_s6 }
 0xaa9   :  { %v6405_v1 = vpop.permute.xlu2 %6404 }
 0xaaa   :  { %v6407_v40 = vadd.f32 %v6405_v1, %v6397_v37 }
 0xaac   :  { %7415 = vtanh.f32 %v6407_v40 }
 0xaad   :  { %7417 = vpow2.f32 %v7096_v2 }
 0xab2   :  { %v7416_v52 = vpop.eup %7415 }
 0xab3   :  { %6410 = vrot.lane.b32.xlu0 %v7416_v52, %s7580_s6  ;;  %v7418_v12 = vpop.eup %7417 }
 0xab4   :  { %v6365_v14 = vadd.f32 1.0, %v7418_v12 }
 0xab6   :  { %7419 = vrcp.f32 %v6365_v14  ;;  %v6392_v41 = vand.u32 2147483648, %v6365_v14  ;;  %vm6386_vm13 = vweird.f32 %v6365_v14  ;;  %v6390_v10 = vand.u32 2147483647, %v6365_v14 }
 0xab8   :  { %v6393_v31 = vor.u32 1.1754944e-38, %v6392_v41  ;;  %vm6391_vm15 = vcmp.eq.f32.partialorder %v6390_v10, 8.507059e+37 }
 0xabc   :  { %v7420_v0 = vpop.eup %7419 }
 0xabd   :  { %v6382_v27 = vmul.f32 %v7420_v0, %v6365_v14  ;;  %vm6387_vm12 = vweird.f32 %v7420_v0 }
 0xabe   :  { %vm6388_vm14 = vmor %vm6386_vm13, %vm6387_vm12 }
 0xabf   :  { %v6383_v61 = vsub.f32 1.0, %v6382_v27 }
 0xac1   :  { %v6384_v56 = vmul.f32 %v7420_v0, %v6383_v61 }
 0xac3   :  { %v6385_v45 = vadd.f32 %v7420_v0, %v6384_v56 }
 0xac5   :  { %v6389_v30 = vsel %vm6388_vm14, %v7420_v0, %v6385_v45 }
 0xac6   :  { %v6394_v59 = vsel %vm6391_vm15, %v6393_v31, %v6389_v30 }
 0xb25   :  { %v6411_v19 = vpop.permute.xlu0 %6410 }
 0xb26   :  { %v6413_v57 = vmul.f32 %v6411_v19, %v6394_v59 }
 0xb28   :  { %7097 = vmatmul.msk.f32.vlgmr.msra.gmra.mxu2 %vm5277_vm7, %v6413_v57  ;;  %7098 = vmatmul.msk.f32.vlgmr.msra.gmra.mxu3 %vm5277_vm7, %v6413_v57 }
 0xbab   :  { %v6454_v26 = vpop.f32.mrf.mxu3  ;;  %v6434_v22 = vpop.f32.mrf.mxu2 }
 0xbac   :  { %v6458_v47 = vadd.f32 %v6454_v26, %v13195_v21  ;;  %v6457_v63 = vadd.f32 %v6434_v22, %v13192_v32 }
 0xbae   :  { %7421 = vtanh.f32 %v6458_v47  ;;  %v7099_v20 = vmul.f32 -1.442695, %v6457_v63  ;;  %v7100_v34 = vmul.f32 -1.442695, %v6458_v47 }
 0xbb0   :  { %7423 = vpow2.f32 %v7099_v20 }
 0xbb4   :  { %v7422_v8 = vpop.eup %7421 }
 0xbb5   :  { %6500 = vrot.lane.b32.xlu1 %v7422_v8, %s7580_s6 }
 0xbb6   :  { %v7424_v17 = vpop.eup %7423 }
 0xbb7   :  { %v6465_v38 = vadd.f32 1.0, %v7424_v17 }
 0xbb9   :  { %7425 = vrcp.f32 %v6465_v38  ;;  %v6478_v21 = vand.u32 2147483648, %v6465_v38  ;;  %vm6472_vm1 = vweird.f32 %v6465_v38  ;;  %v6476_v50 = vand.u32 2147483647, %v6465_v38 }
 0xbbb   :  { %v6479_v4 = vor.u32 1.1754944e-38, %v6478_v21  ;;  %vm6477_vm4 = vcmp.eq.f32.partialorder %v6476_v50, 8.507059e+37 }
 0xbbf   :  { %v7426_v7 = vpop.eup %7425 }
 0xbc0   :  { %v6468_v28 = vmul.f32 %v7426_v7, %v6465_v38  ;;  %vm6473_vm0 = vweird.f32 %v7426_v7 }
 0xbc1   :  { %vm6474_vm3 = vmor %vm6472_vm1, %vm6473_vm0 }
 0xbc2   :  { %v6469_v42 = vsub.f32 1.0, %v6468_v28 }
 0xbc4   :  { %v6470_v16 = vmul.f32 %v7426_v7, %v6469_v42 }
 0xbc6   :  { %v6471_v51 = vadd.f32 %v7426_v7, %v6470_v16 }
 0xbc8   :  { %v6475_v13 = vsel %vm6474_vm3, %v7426_v7, %v6471_v51 }
 0xbc9   :  { %v6480_v32 = vsel %vm6477_vm4, %v6479_v4, %v6475_v13 }
 0xbca   :  { %v6498_v53 = vmul.f32 %v6480_v32, %v6407_v40 }
 0xc27   :  { %v6501_v3 = vpop.permute.xlu1 %6500 }
 0xc28   :  { %v6503_v24 = vmul.f32 %v6501_v3, %v6480_v32  ;;  %v6296_v32 = vadd.f32 %v13217_v43, %v13205_v23 }
 0xc2a   :  { %6505 = vrot.lane.b32.xlu2 %v6503_v24, %s7580_s6 }
 0xc84   :  { %v6506_v49 = vpop.permute.xlu2 %6505 }
 0xc85   :  { %v6508_v39 = vadd.f32 %v6506_v49, %v6498_v53 }
 0xc87   :  { %7427 = vtanh.f32 %v6508_v39 }
 0xc88   :  { %7429 = vpow2.f32 %v7100_v34 }
 0xc8d   :  { %v7428_v55 = vpop.eup %7427 }
 0xc8e   :  { %6511 = vrot.lane.b32.xlu0 %v7428_v55, %s7580_s6  ;;  %v7430_v46 = vpop.eup %7429  ;;  %v6295_v55 = vadd.f32 %v13221_v15, %v13203_v5 }
 0xc8f   :  { %v6466_v11 = vadd.f32 1.0, %v7430_v46 }
 0xc91   :  { %7431 = vrcp.f32 %v6466_v11  ;;  %v6493_v54 = vand.u32 2147483648, %v6466_v11  ;;  %vm6487_vm6 = vweird.f32 %v6466_v11  ;;  %v6491_v9 = vand.u32 2147483647, %v6466_v11 }
 0xc93   :  { %v6494_v60 = vor.u32 1.1754944e-38, %v6493_v54  ;;  %vm6492_vm9 = vcmp.eq.f32.partialorder %v6491_v9, 8.507059e+37 }
 0xc97   :  { %v7432_v35 = vpop.eup %7431 }
 0xc98   :  { %v6483_v18 = vmul.f32 %v7432_v35, %v6466_v11  ;;  %vm6488_vm5 = vweird.f32 %v7432_v35 }
 0xc99   :  { %vm6489_vm8 = vmor %vm6487_vm6, %vm6488_vm5 }
 0xc9a   :  { %v6484_v25 = vsub.f32 1.0, %v6483_v18 }
 0xc9c   :  { %v6485_v6 = vmul.f32 %v7432_v35, %v6484_v25 }
 0xc9e   :  { %v6486_v33 = vadd.f32 %v7432_v35, %v6485_v6 }
 0xca0   :  { %v6490_v44 = vsel %vm6489_vm8, %v7432_v35, %v6486_v33 }
 0xca1   :  { %v6495_v62 = vsel %vm6492_vm9, %v6494_v60, %v6490_v44 }
 0xd00   :  { %v6512_v36 = vpop.permute.xlu0 %6511 }
 0xd01   :  { %v6514_v29 = vmul.f32 %v6512_v36, %v6495_v62  ;;  %v6724_v62 = vld [vmem:[%s13292_s8 + $0x38] sm:$0xff]  ;;  %v6723_v36 = vld [vmem:[%s13292_s8 + $0x30] sm:$0xff] }
 0xd02   :  { %6740 = vmatpush.msrb.mxu0 %v6724_v62 }
 0xd03   :  { %7101 = vmatmul.msk.f32.vlgmr.msra.gmra.mxu0 %vm5277_vm7, %v6514_v29  ;;  %7102 = vmatmul.msk.f32.vlgmr.msra.gmra.mxu1 %vm5277_vm7, %v6514_v29  ;;  %v6722_v29 = vld [vmem:[%s13292_s8 + $0x28] sm:$0xff] }
 0xd04   :  { %6741 = vmatpush.msrb.mxu0 %v6723_v36 }
 0xd06   :  { %6742 = vmatpush.msrb.mxu0 %v6722_v29 }
 0xd80   :  { %v6555_v37 = vpop.f32.mrf.mxu1  ;;  %v6535_v52 = vpop.f32.mrf.mxu0 }
 0xd81   :  { %v6559_v1 = vadd.f32 %v6555_v37, %v13200_v58  ;;  %v6558_v2 = vadd.f32 %v6535_v52, %v13198_v48  ;;  %v6721_v37 = vld [vmem:[%s13292_s8 + $0x20] sm:$0xff]  ;;  %v6718_v52 = vld [vmem:[%s13292_s8 + $0x8] sm:$0xff] }
 0xd82   :  { %6743 = vmatpush.msrb.mxu0 %v6721_v37 }
 0xd83   :  { %7433 = vtanh.f32 %v6559_v1  ;;  %v7103_v12 = vmul.f32 -1.442695, %v6558_v2  ;;  %v7104_v22 = vmul.f32 -1.442695, %v6559_v1  ;;  %v6720_v1 = vld [vmem:[%s13292_s8 + $0x18] sm:$0xff] }
 0xd84   :  { %6744 = vmatpush.msrb.mxu0 %v6720_v1 }
 0xd85   :  { %7435 = vpow2.f32 %v7103_v12 }
 0xd89   :  { %v7434_v40 = vpop.eup %7433 }
 0xd8a   :  { %6601 = vrot.lane.b32.xlu1 %v7434_v40, %s7580_s6  ;;  %v6719_v40 = vld [vmem:[%s13292_s8 + $0x10] sm:$0xff] }
 0xd8b   :  { %v7436_v14 = vpop.eup %7435  ;;  %6745 = vmatpush.msrb.mxu0 %v6719_v40 }
 0xd8c   :  { %v6566_v0 = vadd.f32 1.0, %v7436_v14 }
 0xd8d   :  { %6746 = vmatpush.msrb.mxu0 %v6718_v52 }
 0xd8e   :  { %7437 = vrcp.f32 %v6566_v0  ;;  %v6579_v10 = vand.u32 2147483648, %v6566_v0  ;;  %vm6573_vm11 = vweird.f32 %v6566_v0  ;;  %v6577_v58 = vand.u32 2147483647, %v6566_v0 }
 0xd90   :  { %v6580_v31 = vor.u32 1.1754944e-38, %v6579_v10  ;;  %vm6578_vm13 = vcmp.eq.f32.partialorder %v6577_v58, 8.507059e+37 }
 0xd94   :  { %v7438_v27 = vpop.eup %7437 }
 0xd95   :  { %v6569_v61 = vmul.f32 %v7438_v27, %v6566_v0  ;;  %vm6574_vm10 = vweird.f32 %v7438_v27 }
 0xd96   :  { %vm6575_vm12 = vmor %vm6573_vm11, %vm6574_vm10 }
 0xd97   :  { %v6570_v56 = vsub.f32 1.0, %v6569_v61 }
 0xd99   :  { %v6571_v45 = vmul.f32 %v7438_v27, %v6570_v56 }
 0xd9b   :  { %v6572_v41 = vadd.f32 %v7438_v27, %v6571_v45  ;;  %v6717_v45 = vld [vmem:[%s13292_s8] sm:$0xff] }
 0xd9c   :  { %6747 = vmatpush.msrb.mxu0 %v6717_v45 }
 0xd9d   :  { %v6576_v30 = vsel %vm6575_vm12, %v7438_v27, %v6572_v41 }
 0xd9e   :  { %v6581_v48 = vsel %vm6578_vm13, %v6580_v31, %v6576_v30  ;;  %vm6785_vm13 = vcmask 1024  }
 0xd9f   :  { %v6599_v57 = vmul.f32 %v6581_v48, %v6508_v39 }
 0xdfc   :  { %v6602_v59 = vpop.permute.xlu1 %6601 }
 0xdfd   :  { %v6604_v19 = vmul.f32 %v6602_v59, %v6581_v48 }
 0xdff   :  { %6606 = vrot.lane.b32.xlu2 %v6604_v19, %s7580_s6 }
 0xe59   :  { %v6607_v26 = vpop.permute.xlu2 %6606 }
 0xe5a   :  { %v13232_v47 = vadd.f32 %v6607_v26, %v6599_v57 }
 0xe5c   :  { %7439 = vtanh.f32 %v13232_v47 }
 0xe5d   :  { %7441 = vpow2.f32 %v7104_v22  ;;  %v17_v22 = vstv %s13295_s11 }
 0xe5e   :  { %18 = vst [vmem:[#allocation3] sm:$0x1] %v17_v22 }
 0xe62   :  { %v7440_v8 = vpop.eup %7439 }
 0xe63   :  { %6612 = vrot.lane.b32.xlu0 %v7440_v8, %s7580_s6  ;;  %v7442_v63 = vpop.eup %7441 }
 0xe64   :  { %v6567_v20 = vadd.f32 1.0, %v7442_v63  ;;  %v7406_v63 = vld [vmem:[%s13293_s9] ss:$0 sm:$0xff] }
 0xe66   :  { %7443 = vrcp.f32 %v6567_v20  ;;  %v6594_v16 = vand.u32 2147483648, %v6567_v20  ;;  %vm6588_vm15 = vweird.f32 %v6567_v20  ;;  %v6592_v51 = vand.u32 2147483647, %v6567_v20 }
 0xe68   :  { %v6595_v50 = vor.u32 1.1754944e-38, %v6594_v16  ;;  %vm6593_vm1 = vcmp.eq.f32.partialorder %v6592_v51, 8.507059e+37  ;;  %v7408_v16 = vld [vmem:[#allocation3] ss:$0 sm:$0xff] }
 0xe6c   :  { %v7444_v17 = vpop.eup %7443 }
 0xe6d   :  { %v6584_v38 = vmul.f32 %v7444_v17, %v6567_v20  ;;  %vm6589_vm14 = vweird.f32 %v7444_v17 }
 0xe6e   :  { %vm6590_vm0 = vmor %vm6588_vm15, %vm6589_vm14 }
 0xe6f   :  { %v6585_v7 = vsub.f32 1.0, %v6584_v38  ;;  %v7407_v38 = vld [vmem:[%s13294_s10] ss:$0 sm:$0xff] }
 0xe71   :  { %v6586_v28 = vmul.f32 %v7444_v17, %v6585_v7 }
 0xe73   :  { %v6587_v42 = vadd.f32 %v7444_v17, %v6586_v28 }
 0xe75   :  { %v6591_v21 = vsel %vm6590_vm0, %v7444_v17, %v6587_v42 }
 0xe76   :  { %v6596_v13 = vsel %vm6593_vm1, %v6595_v50, %v6591_v21 }
 0xed5   :  { %v6613_v4 = vpop.permute.xlu0 %6612 }
 0xed6   :  { %v6615_v3 = vmul.f32 %v6613_v4, %v6596_v13 }
 0xed8   :  { %7105 = vmatmul.msk.f32.vlgmr.msrb.gmra.mxu2 %vm5277_vm7, %v6615_v3  ;;  %7106 = vmatmul.msk.f32.vlgmr.msrb.gmra.mxu3 %vm5277_vm7, %v6615_v3 }
 0xf5b   :  { %v6656_v24 = vpop.f32.mrf.mxu3  ;;  %v6636_v39 = vpop.f32.mrf.mxu2 }
 0xf5c   :  { %v6660_v53 = vadd.f32 %v6656_v24, %v6296_v32  ;;  %v6659_v34 = vadd.f32 %v6636_v39, %v6295_v55 }
 0xf5e   :  { %7445 = vtanh.f32 %v6660_v53  ;;  %v7107_v46 = vmul.f32 -1.442695, %v6659_v34  ;;  %v7108_v27 = vmul.f32 -1.442695, %v6660_v53 }
 0xf60   :  { %7447 = vpow2.f32 %v7107_v46 }
 0xf64   :  { %v7446_v49 = vpop.eup %7445 }
 0xf65   :  { %6702 = vrot.lane.b32.xlu1 %v7446_v49, %s7580_s6 }
 0xf66   :  { %v7448_v11 = vpop.eup %7447 }
 0xf67   :  { %v6667_v35 = vadd.f32 1.0, %v7448_v11 }
 0xf69   :  { %7449 = vrcp.f32 %v6667_v35  ;;  %v6680_v33 = vand.u32 2147483648, %v6667_v35  ;;  %vm6674_vm4 = vweird.f32 %v6667_v35  ;;  %v6678_v54 = vand.u32 2147483647, %v6667_v35 }
 0xf6b   :  { %v6681_v44 = vor.u32 1.1754944e-38, %v6680_v33  ;;  %vm6679_vm6 = vcmp.eq.f32.partialorder %v6678_v54, 8.507059e+37 }
 0xf6f   :  { %v7450_v18 = vpop.eup %7449 }
 0xf70   :  { %v6670_v25 = vmul.f32 %v7450_v18, %v6667_v35  ;;  %vm6675_vm3 = vweird.f32 %v7450_v18 }
 0xf71   :  { %vm6676_vm5 = vmor %vm6674_vm4, %vm6675_vm3 }
 0xf72   :  { %v6671_v6 = vsub.f32 1.0, %v6670_v25 }
 0xf74   :  { %v6672_v23 = vmul.f32 %v7450_v18, %v6671_v6 }
 0xf76   :  { %v6673_v43 = vadd.f32 %v7450_v18, %v6672_v23 }
 0xf78   :  { %v6677_v9 = vsel %vm6676_vm5, %v7450_v18, %v6673_v43 }
 0xf79   :  { %v6682_v15 = vsel %vm6679_vm6, %v6681_v44, %v6677_v9 }
 0xf7a   :  { %v6700_v2 = vmul.f32 %v6682_v15, %v13232_v47 }
 0xfd7   :  { %v6703_v5 = vpop.permute.xlu1 %6702 }
 0xfd8   :  { %v6705_v60 = vmul.f32 %v6703_v5, %v6682_v15 }
 0xfda   :  { %6707 = vrot.lane.b32.xlu2 %v6705_v60, %s7580_s6 }
0x1034   :  { %v6708_v12 = vpop.permute.xlu2 %6707 }
0x1035   :  { %v6710_v14 = vadd.f32 %v6708_v12, %v6700_v2 }
0x1037   :  { %7451 = vtanh.f32 %v6710_v14 }
0x1038   :  { %7453 = vpow2.f32 %v7108_v27 }
0x103d   :  { %v7452_v0 = vpop.eup %7451 }
0x103e   :  { %6713 = vrot.lane.b32.xlu0 %v7452_v0, %s7580_s6  ;;  %v7454_v61 = vpop.eup %7453 }
0x103f   :  { %v6668_v56 = vadd.f32 1.0, %v7454_v61 }
0x1041   :  { %7455 = vrcp.f32 %v6668_v56  ;;  %v6695_v59 = vand.u32 2147483648, %v6668_v56  ;;  %vm6689_vm9 = vweird.f32 %v6668_v56  ;;  %v6693_v48 = vand.u32 2147483647, %v6668_v56 }
0x1043   :  { %v6696_v57 = vor.u32 1.1754944e-38, %v6695_v59  ;;  %vm6694_vm11 = vcmp.eq.f32.partialorder %v6693_v48, 8.507059e+37 }
0x1047   :  { %v7456_v41 = vpop.eup %7455 }
0x1048   :  { %v6685_v10 = vmul.f32 %v7456_v41, %v6668_v56  ;;  %vm6690_vm8 = vweird.f32 %v7456_v41 }
0x1049   :  { %vm6691_vm10 = vmor %vm6689_vm9, %vm6690_vm8 }
0x104a   :  { %v6686_v58 = vsub.f32 1.0, %v6685_v10 }
0x104c   :  { %v6687_v30 = vmul.f32 %v7456_v41, %v6686_v58 }
0x104e   :  { %v6688_v31 = vadd.f32 %v7456_v41, %v6687_v30 }
0x1050   :  { %v6692_v19 = vsel %vm6691_vm10, %v7456_v41, %v6688_v31 }
0x1051   :  { %v6697_v26 = vsel %vm6694_vm11, %v6696_v57, %v6692_v19 }
0x10b0   :  { %v6714_v47 = vpop.permute.xlu0 %6713 }
0x10b1   :  { %v6716_v8 = vmul.f32 %v6714_v47, %v6697_v26 }
0x10b3   :  { %7109 = vmatmul.msk.f32.vlgmr.msrb.gmra.mxu0 %vm5277_vm7, %v6716_v8 }
0x1130   :  { %v6749_v20 = vpop.f32.mrf.mxu0 }
0x1131   :  { %v6750_v17 = vadd.f32 %v7406_v63, %v6749_v20 }
0x1133   :  { %v6752_v7 = vmax.f32 %v6750_v17, 0.0 }
0x1135   :  { %v6757_v28 = vmul.f32 %v7407_v38, %v6752_v7 }
0x1137   :  { %v6758_v42 = vsel %vm5242_vm2, %v6757_v28, 0.0 }
0x1138   :  { %6759 = vadd.xlane.f32.xlu1 %v6758_v42 }
0x11ab   :  { %v6760_v51 = vpop.xlane.xlu1 %6759 }
0x11ac   :  { %v6765_v21 = vadd.f32 %v7408_v16, %v6760_v51 }
0x11ae   :  { %v7110_v50 = vmul.f32 -1.442695, %v6765_v21 }
0x11b0   :  { %7457 = vpow2.f32 %v7110_v50 }
0x11b6   :  { %v7458_v13 = vpop.eup %7457 }
0x11b7   :  { %v6769_v4 = vadd.f32 1.0, %v7458_v13 }
0x11b9   :  { %7459 = vrcp.f32 %v6769_v4  ;;  %v6781_v53 = vand.u32 2147483648, %v6769_v4  ;;  %v6779_v39 = vand.u32 2147483647, %v6769_v4  ;;  %vm6775_vm12 = vweird.f32 %v6769_v4 }
0x11bb   :  { %v6782_v34 = vor.u32 1.1754944e-38, %v6781_v53  ;;  %vm6780_vm14 = vcmp.eq.f32.partialorder %v6779_v39, 8.507059e+37 }
0x11bf   :  { %v7460_v3 = vpop.eup %7459 }
0x11c0   :  { %v6771_v32 = vmul.f32 %v7460_v3, %v6769_v4  ;;  %vm6776_vm7 = vweird.f32 %v7460_v3 }
0x11c1   :  { %vm6777_vm2 = vmor %vm6775_vm12, %vm6776_vm7 }
0x11c2   :  { %v6772_v24 = vsub.f32 1.0, %v6771_v32 }
0x11c4   :  { %v6773_v49 = vmul.f32 %v7460_v3, %v6772_v24 }
0x11c6   :  { %v6774_v55 = vadd.f32 %v7460_v3, %v6773_v49 }
0x11c8   :  { %v6778_v46 = vsel %vm6777_vm2, %v7460_v3, %v6774_v55 }
0x11c9   :  { %v6783_v11 = vsel %vm6780_vm14, %v6782_v34, %v6778_v46 }
0x11ca   :  { %6786 = vst.msk [vmem:[%s13296_s12] sm:$0x3] %vm6785_vm13, %v6783_v11 }

</bundles_post_ra>
